<compile_context>
chip_gen: v5e
topology: v5e:2x2
jax: 0.10.0
libtpu: 0.0.40
codegen_flags: <defaults>
</compile_context>

<pallas_src>
import numpy as np

import jax
import jax.numpy as jnp
from jax.experimental import pallas as pl
from jax.experimental.pallas import tpu as pltpu

DOT_DTYPE = jnp.bfloat16   # MXU input precision (accumulation is always f32).
EPS = 1e-5


def _vmem():
    return pl.BlockSpec(memory_space=pltpu.MemorySpace.VMEM)


# ---------------------------------------------------------------------------
# Fused whole-network kernel
# ---------------------------------------------------------------------------
def make_stnorm_kernel(*, B, N, C, k, dils, Ts):
    """Builds the fused kernel body.

    Ref order (all inputs, then the single output):
      x0, w_start, b_start,
      tn_g, tn_b, sn_g, sn_b, w_fg, b_fg, w_sr, b_sr,   (stacked over layers)
      w_e1, b_e1, w_e2, b_e2,
      out
    """
    L = len(dils)
    BN = B * N
    f32 = jnp.float32
    inv_n = 1.0 / N
    unbias = float(N) / float(max(N - 1, 1))   # SNorm unbiased var; guard N == 1

    def mxu(a, w):
        # Activation cast to bf16 at the dot; weights arrive pre-cast bf16.
        return jnp.dot(a.astype(DOT_DTYPE), w, preferred_element_type=f32)

    def kernel(x0_ref, w_start_ref, b_start_ref,
               tn_g_ref, tn_b_ref, sn_g_ref, sn_b_ref,
               w_fg_ref, b_fg_ref, w_sr_ref, b_sr_ref,
               w_e1_ref, b_e1_ref, w_e2_ref, b_e2_ref,
               out_ref):
        # start_conv (1x1): (M0, F) @ (F, C)
        x = mxu(x0_ref[...], w_start_ref[...]) + b_start_ref[...]     # (M0, C) f32

        skip = None
        for l in range(L):                     # Python-unrolled (shapes shrink)
            d, T, T_out = dils[l], Ts[l], Ts[l + 1]
            G = B * T                          # number of (time, batch) groups
            inv_g = 1.0 / G

            # --- group statistics: plain f32 reductions, no one-hot matmuls ---
            x3 = x.reshape(G, N, C)            # rows r = g*N + n  (g = t*B + b)
            xsq3 = x3 * x3
            # TNorm: per (node, channel), biased var over (batch, time)
            mu_t = jnp.sum(x3, axis=0) * inv_g                       # (N, C)
            var_t = jnp.maximum(jnp.sum(xsq3, axis=0) * inv_g - mu_t * mu_t, 0.0)
            scale_t = jax.lax.rsqrt(var_t + EPS) * tn_g_ref[l]       # (N, C)
            shift_t = tn_b_ref[l] - mu_t * scale_t
            # SNorm: per (batch, time, channel), unbiased var over nodes
            mu_s = jnp.sum(x3, axis=1, keepdims=True) * inv_n        # (G, 1, C)
            var_s = jnp.maximum(
                (jnp.sum(xsq3, axis=1, keepdims=True) * inv_n - mu_s * mu_s)
                * unbias, 0.0)
            scale_s = jax.lax.rsqrt(var_s + EPS) * sn_g_ref[l]       # (G, 1, C)
            shift_s = sn_b_ref[l] - mu_s * scale_s

            # apply both norms via layout broadcasting and form [x | tn(x) | sn(x)]
            xc = jnp.concatenate(
                [x3, x3 * scale_t + shift_t, x3 * scale_s + shift_s], axis=-1)
            xc = xc.reshape(G * N, 3 * C)                            # (M_in, 3C)

            # --- dilated gated conv: k accumulated dots (no materialized taps) ---
            fg = b_fg_ref[l]                                         # (1, 2C)
            for j in range(k):
                tap = xc[j * d * BN:(j * d + T_out) * BN, :]         # contiguous rows
                fg = fg + mxu(tap, w_fg_ref[l, j])                   # (M_out, 2C)
            g = jnp.tanh(fg[:, :C]) * jax.nn.sigmoid(fg[:, C:])      # f32 (v5e-safe)
            sr = mxu(g, w_sr_ref[l]) + b_sr_ref[l]                   # (M_out, 2C)

            off = (k - 1) * d * BN
            new_x = sr[:, C:] + x[off:, :]                           # residual path
            if skip is None:
                skip = sr[:, :C]                                     # first layer
            else:
                skip = sr[:, :C] + skip[off:, :]
            x = new_x

        # --- head: relu -> end_conv_1 -> relu -> end_conv_2 ---------------
        xr = jnp.maximum(skip, 0.0)
        rep = jnp.maximum(mxu(xr, w_e1_ref[...]) + b_e1_ref[...], 0.0)
        out_ref[...] = mxu(rep, w_e2_ref[...]) + b_e2_ref[...]

    return kernel


# ---------------------------------------------------------------------------
# Wrapper (all reshapes / weight packing / bf16 casts happen once in XLA)
# ---------------------------------------------------------------------------
def _layer_schedule(cfg):
    dils = []
    for _ in range(cfg['blocks']):
        d = 1
        for _ in range(cfg['n_layers']):
            dils.append(d)
            d *= 2
    return dils


def stnorm_forward(inp, params, cfg):
    """inp: (B, T_in, N, in_dim).  Returns (B, horizon, N, T_final)."""
    k = cfg['kernel_size']
    rf = cfg['receptive_field']
    B, T_in, N, F = inp.shape
    C = cfg['hidden_channels']
    H = cfg['horizon']
    BN = B * N

    # (B,T,N,F) -> time-major (T,B,N,F), left-pad time to the receptive field
    x = jnp.transpose(inp, (1, 0, 2, 3)).astype(jnp.float32)
    if T_in < rf:
        x = jnp.pad(x, ((rf - T_in, 0), (0, 0), (0, 0), (0, 0)))
    T0 = x.shape[0]
    x0 = x.reshape(T0 * BN, F)

    dils = _layer_schedule(cfg)
    Ts = [T0]
    for d in dils:
        Ts.append(Ts[-1] - (k - 1) * d)
    L = len(dils)
    Tf = Ts[-1]
    Mf = Tf * BN

    bf16 = DOT_DTYPE
    lys = params['layers']
    # norm affine params (f32)
    tn_g = jnp.stack([p['tn_g'] for p in lys])                      # (L, N, C)
    tn_b = jnp.stack([p['tn_b'] for p in lys])
    sn_g = jnp.stack([p['sn_g'] for p in lys])                      # (L, 1, C)
    sn_b = jnp.stack([p['sn_b'] for p in lys])
    # per-tap filter|gate weights, pre-cast bf16: (L, k, 3C, 2C)
    w_fg = jnp.stack([jnp.concatenate([p['wf'], p['wg']], axis=-1) for p in lys]
                     ).astype(bf16)
    b_fg = jnp.stack([jnp.concatenate([p['bf'], p['bg']], axis=-1) for p in lys])
    # skip|residual 1x1 weights, pre-cast bf16: (L, C, 2C)
    w_sr = jnp.stack([jnp.concatenate([p['ws'], p['wr']], axis=-1) for p in lys]
                     ).astype(bf16)
    b_sr = jnp.stack([jnp.concatenate([p['bs'], p['br']], axis=-1) for p in lys])

    args = [x0,
            params['w_start'].astype(bf16), params['b_start'],
            tn_g, tn_b, sn_g, sn_b, w_fg, b_fg, w_sr, b_sr,
            params['w_e1'].astype(bf16), params['b_e1'],
            params['w_e2'].astype(bf16), params['b_e2']]

    kernel = make_stnorm_kernel(B=B, N=N, C=C, k=k, dils=dils, Ts=Ts)

    # advisory cost estimate for XLA scheduling around the fused call
    flops = 2 * T0 * BN * F * C
    trans = 0
    for li in range(L):
        M_in, M_out = Ts[li] * BN, Ts[li + 1] * BN
        flops += 14 * M_in * C                         # stats + norm apply (VPU)
        flops += 2 * M_out * (k * 3 * C) * (2 * C)     # filter|gate conv
        flops += 2 * M_out * C * (2 * C)               # skip|residual conv
        trans += 2 * M_out * C + (N + B * Ts[li]) * C  # tanh, sigmoid, rsqrt
    flops += 2 * Mf * C * C + 2 * Mf * C * H           # head
    bytes_accessed = sum(int(np.prod(a.shape)) * a.dtype.itemsize for a in args)
    bytes_accessed += Mf * H * 4
    cost = pl.CostEstimate(flops=int(flops), transcendentals=int(trans),
                           bytes_accessed=int(bytes_accessed))

    out2d = pl.pallas_call(
        kernel,
        out_shape=jax.ShapeDtypeStruct((Mf, H), jnp.float32),
        in_specs=[_vmem() for _ in args],
        out_specs=_vmem(),
        cost_estimate=cost,
    )(*args)

    out = out2d.reshape(Tf, B, N, H)
    return jnp.transpose(out, (1, 3, 2, 0))      # (B, horizon, N, T_final)


# ---------------------------------------------------------------------------
# Pure-JAX reference (direct 4-D port of the PyTorch math; mirrors the kernel's
# bf16 MXU-input precision so the comparison is tight).
# ---------------------------------------------------------------------------
def _mm(a, b):
    return jnp.einsum('...i,io->...o', a.astype(DOT_DTYPE), b.astype(DOT_DTYPE),
                      preferred_element_type=jnp.float32)


def reference_forward(inp, params, cfg):
    k = cfg['kernel_size']
    rf = cfg['receptive_field']
    x = jnp.transpose(inp, (0, 2, 1, 3)).astype(jnp.float32)     # (B, N, T, F)
    if x.shape[2] < rf:
        x = jnp.pad(x, ((0, 0), (0, 0), (rf - x.shape[2], 0), (0, 0)))
    x = _mm(x, params['w_start']) + params['b_start']
    skip = None
    idx = 0
    for _ in range(cfg['blocks']):
        d = 1
        for _ in range(cfg['n_layers']):
            p = params['layers'][idx]
            B, N, T, C = x.shape
            T_out = T - (k - 1) * d
            mu_t = x.mean(axis=(0, 2), keepdims=True)
            var_t = ((x - mu_t) ** 2).mean(axis=(0, 2), keepdims=True)
            x_tn = ((x - mu_t) / jnp.sqrt(var_t + EPS)
                    * p['tn_g'][None, :, None, :] + p['tn_b'][None, :, None, :])
            mu_s = x.mean(axis=1, keepdims=True)
            var_s = ((x - mu_s) ** 2).sum(axis=1, keepdims=True) / (N - 1)
            x_sn = (x - mu_s) / jnp.sqrt(var_s + EPS) * p['sn_g'] + p['sn_b']
            xc = jnp.concatenate([x, x_tn, x_sn], axis=-1)
            filt = sum(_mm(xc[:, :, j * d: j * d + T_out, :], p['wf'][j])
                       for j in range(k)) + p['bf']
            gate = sum(_mm(xc[:, :, j * d: j * d + T_out, :], p['wg'][j])
                       for j in range(k)) + p['bg']
            g = jnp.tanh(filt) * jax.nn.sigmoid(gate)
            s = _mm(g, p['ws']) + p['bs']
            skip = s if skip is None else s + skip[:, :, skip.shape[2] - T_out:, :]
            r = _mm(g, p['wr']) + p['br']
            x = r + x[:, :, T - T_out:, :]
            d *= 2
            idx += 1
    xr = jax.nn.relu(skip)
    rep = jax.nn.relu(_mm(xr, params['w_e1']) + params['b_e1'])
    out = _mm(rep, params['w_e2']) + params['b_e2']
    return jnp.transpose(out, (0, 3, 1, 2))


# ---------------------------------------------------------------------------
# Deterministic parameter init (shapes follow STNorm.__init__)
# ---------------------------------------------------------------------------
def compute_receptive_field(cfg):
    rf = 1
    for _ in range(cfg['blocks']):
        add = cfg['kernel_size'] - 1
        for _ in range(cfg['n_layers']):
            rf += add
            add *= 2
    return rf


def init_params(key, cfg):
    C = cfg['hidden_channels']
    F = cfg['in_dim']
    N = cfg['num_nodes']
    k = cfg['kernel_size']
    H = cfg['horizon']
    num = 3  # [x, tnorm(x), snorm(x)] concatenated along channels
    n_layers_total = cfg['blocks'] * cfg['n_layers']
    keys = jax.random.split(key, 8 + 8 * n_layers_total)
    it = iter(keys)

    def nrm(shape, scale):
        return jax.random.normal(next(it), shape, jnp.float32) * scale

    params = {
        'w_start': nrm((F, C), 1.0 / jnp.sqrt(F)),
        'b_start': nrm((1, C), 0.05),
        'w_e1': nrm((C, C), 1.0 / jnp.sqrt(C)),
        'b_e1': nrm((1, C), 0.05),
        'w_e2': nrm((C, H), 1.0 / jnp.sqrt(C)),
        'b_e2': nrm((1, H), 0.05),
        'layers': [],
    }
    for _ in range(n_layers_total):
        params['layers'].append({
            'tn_g': jnp.ones((N, C), jnp.float32),    # TNorm gamma (1,C,N,1)
            'tn_b': jnp.zeros((N, C), jnp.float32),   # TNorm beta
            'sn_g': jnp.ones((1, C), jnp.float32),    # SNorm gamma (C,)
            'sn_b': jnp.zeros((1, C), jnp.float32),   # SNorm beta
            'wf': nrm((k, num * C, C), 1.0 / jnp.sqrt(k * num * C)),
            'bf': nrm((1, C), 0.05),
            'wg': nrm((k, num * C, C), 1.0 / jnp.sqrt(k * num * C)),
            'bg': nrm((1, C), 0.05),
            'ws': nrm((C, C), 1.0 / jnp.sqrt(C)),
            'bs': nrm((1, C), 0.05),
            'wr': nrm((C, C), 1.0 / jnp.sqrt(C)),
            'br': nrm((1, C), 0.05),
        })
    return params


if __name__ == "__main__":
    cfg = dict(blocks=2, n_layers=2, kernel_size=2, in_dim=2,
               hidden_channels=32, num_nodes=16, horizon=4,
               snorm=True, tnorm=True)
    cfg['receptive_field'] = compute_receptive_field(cfg)   # = 7

    key = jax.random.PRNGKey(0)
    pkey, xkey = jax.random.split(key)
    params = init_params(pkey, cfg)

    B, T_in = 2, 8
    x = jax.random.normal(xkey, (B, T_in, cfg['num_nodes'], cfg['in_dim']),
                          jnp.float32)

    fwd = jax.jit(lambda inp, p: stnorm_forward(inp, p, cfg))
    out = jax.block_until_ready(fwd(x, params))
    ref = jax.block_until_ready(reference_forward(x, params, cfg))

    T_final = T_in - (cfg['receptive_field'] - 1)
    assert out.shape == (B, cfg['horizon'], cfg['num_nodes'], T_final), out.shape
    assert not bool(jnp.any(jnp.isnan(out)))
    max_err = float(jnp.max(jnp.abs(out - ref)))
    assert max_err < 2e-2, f"mismatch vs reference: {max_err}"
    print("KERNEL_OK")
</pallas_src>

<mosaic_0001>
module attributes {stable_mosaic.version = 11 : i64} {
  func.func @kernel(%arg0: memref<256x2xf32, #tpu.memory_space<vmem>>, %arg1: memref<2x32xbf16, #tpu.memory_space<vmem>>, %arg2: memref<1x32xf32, #tpu.memory_space<vmem>>, %arg3: memref<4x16x32xf32, #tpu.memory_space<vmem>>, %arg4: memref<4x16x32xf32, #tpu.memory_space<vmem>>, %arg5: memref<4x1x32xf32, #tpu.memory_space<vmem>>, %arg6: memref<4x1x32xf32, #tpu.memory_space<vmem>>, %arg7: memref<4x2x96x64xbf16, #tpu.memory_space<vmem>>, %arg8: memref<4x1x64xf32, #tpu.memory_space<vmem>>, %arg9: memref<4x32x64xbf16, #tpu.memory_space<vmem>>, %arg10: memref<4x1x64xf32, #tpu.memory_space<vmem>>, %arg11: memref<32x32xbf16, #tpu.memory_space<vmem>>, %arg12: memref<1x32xf32, #tpu.memory_space<vmem>>, %arg13: memref<32x4xbf16, #tpu.memory_space<vmem>>, %arg14: memref<1x4xf32, #tpu.memory_space<vmem>>, %arg15: memref<64x4xf32, #tpu.memory_space<vmem>>) attributes {dimension_semantics = [], scalar_prefetch = 0 : i64, scratch_operands = 0 : i64, tpu.core_type = #tpu.core_type<tc>} {
    %c0 = arith.constant 0 : index
    %c0_0 = arith.constant 0 : index
    %0 = vector.load %arg0[%c0, %c0_0] : memref<256x2xf32, #tpu.memory_space<vmem>>, vector<256x2xf32>
    %c0_1 = arith.constant 0 : index
    %c0_2 = arith.constant 0 : index
    %1 = vector.load %arg1[%c0_1, %c0_2] : memref<2x32xbf16, #tpu.memory_space<vmem>>, vector<2x32xbf16>
    %2 = arith.truncf %0 : vector<256x2xf32> to vector<256x2xbf16>
    %cst = arith.constant dense<0.000000e+00> : vector<256x32xf32>
    %3 = tpu.matmul %2, %1, %cst {dimension_numbers = #tpu.dot_dimension_numbers<[1], [0], [0], [1], [0, 0, 1, 1], [], []>} : vector<256x2xbf16>, vector<2x32xbf16>, vector<256x32xf32> -> vector<256x32xf32>
    %c0_3 = arith.constant 0 : index
    %c0_4 = arith.constant 0 : index
    %4 = vector.load %arg2[%c0_3, %c0_4] : memref<1x32xf32, #tpu.memory_space<vmem>>, vector<1x32xf32>
    %5 = vector.broadcast %4 : vector<1x32xf32> to vector<256x32xf32>
    %6 = arith.addf %3, %5 : vector<256x32xf32>
    %7 = vector.shape_cast %6 : vector<256x32xf32> to vector<16x16x32xf32>
    %8 = arith.mulf %7, %7 : vector<16x16x32xf32>
    %cst_5 = arith.constant dense<0.000000e+00> : vector<16x32xf32>
    %9 = vector.multi_reduction <add>, %7, %cst_5 [0] : vector<16x16x32xf32> to vector<16x32xf32>
    %cst_6 = arith.constant 6.250000e-02 : f32
    %10 = vector.broadcast %cst_6 : f32 to vector<16x32xf32>
    %11 = arith.mulf %9, %10 : vector<16x32xf32>
    %cst_7 = arith.constant dense<0.000000e+00> : vector<16x32xf32>
    %12 = vector.multi_reduction <add>, %8, %cst_7 [0] : vector<16x16x32xf32> to vector<16x32xf32>
    %cst_8 = arith.constant 6.250000e-02 : f32
    %13 = vector.broadcast %cst_8 : f32 to vector<16x32xf32>
    %14 = arith.mulf %12, %13 : vector<16x32xf32>
    %15 = arith.mulf %11, %11 : vector<16x32xf32>
    %16 = arith.subf %14, %15 : vector<16x32xf32>
    %cst_9 = arith.constant 0.000000e+00 : f32
    %17 = vector.broadcast %cst_9 : f32 to vector<16x32xf32>
    %18 = arith.maximumf %16, %17 : vector<16x32xf32>
    %cst_10 = arith.constant 9.99999974E-6 : f32
    %19 = vector.broadcast %cst_10 : f32 to vector<16x32xf32>
    %20 = arith.addf %18, %19 : vector<16x32xf32>
    %21 = math.rsqrt %20 : vector<16x32xf32>
    %c0_11 = arith.constant 0 : index
    %c0_12 = arith.constant 0 : index
    %c0_13 = arith.constant 0 : index
    %22 = vector.load %arg3[%c0_11, %c0_12, %c0_13] : memref<4x16x32xf32, #tpu.memory_space<vmem>>, vector<1x16x32xf32>
    %23 = vector.shape_cast %22 : vector<1x16x32xf32> to vector<16x32xf32>
    %24 = arith.mulf %21, %23 : vector<16x32xf32>
    %c0_14 = arith.constant 0 : index
    %c0_15 = arith.constant 0 : index
    %c0_16 = arith.constant 0 : index
    %25 = vector.load %arg4[%c0_14, %c0_15, %c0_16] : memref<4x16x32xf32, #tpu.memory_space<vmem>>, vector<1x16x32xf32>
    %26 = vector.shape_cast %25 : vector<1x16x32xf32> to vector<16x32xf32>
    %27 = arith.mulf %11, %24 : vector<16x32xf32>
    %28 = arith.subf %26, %27 : vector<16x32xf32>
    %cst_17 = arith.constant dense<0.000000e+00> : vector<16x32xf32>
    %29 = vector.multi_reduction <add>, %7, %cst_17 [1] : vector<16x16x32xf32> to vector<16x32xf32>
    %30 = vector.shape_cast %29 : vector<16x32xf32> to vector<16x1x32xf32>
    %cst_18 = arith.constant 6.250000e-02 : f32
    %31 = vector.broadcast %cst_18 : f32 to vector<16x1x32xf32>
    %32 = arith.mulf %30, %31 : vector<16x1x32xf32>
    %cst_19 = arith.constant dense<0.000000e+00> : vector<16x32xf32>
    %33 = vector.multi_reduction <add>, %8, %cst_19 [1] : vector<16x16x32xf32> to vector<16x32xf32>
    %34 = vector.shape_cast %33 : vector<16x32xf32> to vector<16x1x32xf32>
    %cst_20 = arith.constant 6.250000e-02 : f32
    %35 = vector.broadcast %cst_20 : f32 to vector<16x1x32xf32>
    %36 = arith.mulf %34, %35 : vector<16x1x32xf32>
    %37 = arith.mulf %32, %32 : vector<16x1x32xf32>
    %38 = arith.subf %36, %37 : vector<16x1x32xf32>
    %cst_21 = arith.constant 1.06666672 : f32
    %39 = vector.broadcast %cst_21 : f32 to vector<16x1x32xf32>
    %40 = arith.mulf %38, %39 : vector<16x1x32xf32>
    %cst_22 = arith.constant 0.000000e+00 : f32
    %41 = vector.broadcast %cst_22 : f32 to vector<16x1x32xf32>
    %42 = arith.maximumf %40, %41 : vector<16x1x32xf32>
    %cst_23 = arith.constant 9.99999974E-6 : f32
    %43 = vector.broadcast %cst_23 : f32 to vector<16x1x32xf32>
    %44 = arith.addf %42, %43 : vector<16x1x32xf32>
    %45 = math.rsqrt %44 : vector<16x1x32xf32>
    %c0_24 = arith.constant 0 : index
    %c0_25 = arith.constant 0 : index
    %c0_26 = arith.constant 0 : index
    %46 = vector.load %arg5[%c0_24, %c0_25, %c0_26] : memref<4x1x32xf32, #tpu.memory_space<vmem>>, vector<1x1x32xf32>
    %47 = vector.shape_cast %46 : vector<1x1x32xf32> to vector<1x32xf32>
    %48 = vector.shape_cast %47 : vector<1x32xf32> to vector<1x1x32xf32>
    %49 = vector.broadcast %48 : vector<1x1x32xf32> to vector<16x1x32xf32>
    %50 = arith.mulf %45, %49 : vector<16x1x32xf32>
    %c0_27 = arith.constant 0 : index
    %c0_28 = arith.constant 0 : index
    %c0_29 = arith.constant 0 : index
    %51 = vector.load %arg6[%c0_27, %c0_28, %c0_29] : memref<4x1x32xf32, #tpu.memory_space<vmem>>, vector<1x1x32xf32>
    %52 = vector.shape_cast %51 : vector<1x1x32xf32> to vector<1x32xf32>
    %53 = arith.mulf %32, %50 : vector<16x1x32xf32>
    %54 = vector.shape_cast %52 : vector<1x32xf32> to vector<1x1x32xf32>
    %55 = vector.broadcast %54 : vector<1x1x32xf32> to vector<16x1x32xf32>
    %56 = arith.subf %55, %53 : vector<16x1x32xf32>
    %57 = vector.shape_cast %24 : vector<16x32xf32> to vector<1x16x32xf32>
    %58 = vector.broadcast %57 : vector<1x16x32xf32> to vector<16x16x32xf32>
    %59 = arith.mulf %7, %58 : vector<16x16x32xf32>
    %60 = vector.shape_cast %28 : vector<16x32xf32> to vector<1x16x32xf32>
    %61 = vector.broadcast %60 : vector<1x16x32xf32> to vector<16x16x32xf32>
    %62 = arith.addf %59, %61 : vector<16x16x32xf32>
    %63 = vector.broadcast %50 : vector<16x1x32xf32> to vector<16x16x32xf32>
    %64 = arith.mulf %7, %63 : vector<16x16x32xf32>
    %65 = vector.broadcast %56 : vector<16x1x32xf32> to vector<16x16x32xf32>
    %66 = arith.addf %64, %65 : vector<16x16x32xf32>
    %67 = tpu.concatenate %7, %62, %66 in 2 : vector<16x16x32xf32>, vector<16x16x32xf32>, vector<16x16x32xf32> -> vector<16x16x96xf32>
    %68 = vector.shape_cast %67 : vector<16x16x96xf32> to vector<256x96xf32>
    %c0_30 = arith.constant 0 : index
    %c0_31 = arith.constant 0 : index
    %c0_32 = arith.constant 0 : index
    %69 = vector.load %arg8[%c0_30, %c0_31, %c0_32] : memref<4x1x64xf32, #tpu.memory_space<vmem>>, vector<1x1x64xf32>
    %70 = vector.shape_cast %69 : vector<1x1x64xf32> to vector<1x64xf32>
    %71 = vector.extract_strided_slice %68 {offsets = [0, 0], sizes = [224, 96], strides = [1, 1]} : vector<256x96xf32> to vector<224x96xf32>
    %c0_33 = arith.constant 0 : index
    %c0_34 = arith.constant 0 : index
    %c0_35 = arith.constant 0 : index
    %c0_36 = arith.constant 0 : index
    %72 = vector.load %arg7[%c0_33, %c0_34, %c0_35, %c0_36] : memref<4x2x96x64xbf16, #tpu.memory_space<vmem>>, vector<1x1x96x64xbf16>
    %73 = vector.shape_cast %72 : vector<1x1x96x64xbf16> to vector<96x64xbf16>
    %74 = arith.truncf %71 : vector<224x96xf32> to vector<224x96xbf16>
    %cst_37 = arith.constant dense<0.000000e+00> : vector<224x64xf32>
    %75 = tpu.matmul %74, %73, %cst_37 {dimension_numbers = #tpu.dot_dimension_numbers<[1], [0], [0], [1], [0, 0, 1, 1], [], []>} : vector<224x96xbf16>, vector<96x64xbf16>, vector<224x64xf32> -> vector<224x64xf32>
    %76 = vector.broadcast %70 : vector<1x64xf32> to vector<224x64xf32>
    %77 = arith.addf %76, %75 : vector<224x64xf32>
    %78 = vector.extract_strided_slice %68 {offsets = [32, 0], sizes = [224, 96], strides = [1, 1]} : vector<256x96xf32> to vector<224x96xf32>
    %c0_38 = arith.constant 0 : index
    %c1 = arith.constant 1 : index
    %c0_39 = arith.constant 0 : index
    %c0_40 = arith.constant 0 : index
    %79 = vector.load %arg7[%c0_38, %c1, %c0_39, %c0_40] : memref<4x2x96x64xbf16, #tpu.memory_space<vmem>>, vector<1x1x96x64xbf16>
    %80 = vector.shape_cast %79 : vector<1x1x96x64xbf16> to vector<96x64xbf16>
    %81 = arith.truncf %78 : vector<224x96xf32> to vector<224x96xbf16>
    %cst_41 = arith.constant dense<0.000000e+00> : vector<224x64xf32>
    %82 = tpu.matmul %81, %80, %cst_41 {dimension_numbers = #tpu.dot_dimension_numbers<[1], [0], [0], [1], [0, 0, 1, 1], [], []>} : vector<224x96xbf16>, vector<96x64xbf16>, vector<224x64xf32> -> vector<224x64xf32>
    %83 = arith.addf %77, %82 : vector<224x64xf32>
    %84 = vector.extract_strided_slice %83 {offsets = [0, 0], sizes = [224, 32], strides = [1, 1]} : vector<224x64xf32> to vector<224x32xf32>
    %85 = math.tanh %84 : vector<224x32xf32>
    %86 = vector.extract_strided_slice %83 {offsets = [0, 32], sizes = [224, 32], strides = [1, 1]} : vector<224x64xf32> to vector<224x32xf32>
    %87 = arith.negf %86 : vector<224x32xf32>
    %88 = math.exp %87 : vector<224x32xf32>
    %cst_42 = arith.constant 1.000000e+00 : f32
    %89 = vector.broadcast %cst_42 : f32 to vector<224x32xf32>
    %90 = arith.addf %89, %88 : vector<224x32xf32>
    %91 = arith.divf %89, %90 : vector<224x32xf32>
    %92 = arith.mulf %85, %91 : vector<224x32xf32>
    %c0_43 = arith.constant 0 : index
    %c0_44 = arith.constant 0 : index
    %c0_45 = arith.constant 0 : index
    %93 = vector.load %arg9[%c0_43, %c0_44, %c0_45] : memref<4x32x64xbf16, #tpu.memory_space<vmem>>, vector<1x32x64xbf16>
    %94 = vector.shape_cast %93 : vector<1x32x64xbf16> to vector<32x64xbf16>
    %95 = arith.truncf %92 : vector<224x32xf32> to vector<224x32xbf16>
    %cst_46 = arith.constant dense<0.000000e+00> : vector<224x64xf32>
    %96 = tpu.matmul %95, %94, %cst_46 {dimension_numbers = #tpu.dot_dimension_numbers<[1], [0], [0], [1], [0, 0, 1, 1], [], []>} : vector<224x32xbf16>, vector<32x64xbf16>, vector<224x64xf32> -> vector<224x64xf32>
    %c0_47 = arith.constant 0 : index
    %c0_48 = arith.constant 0 : index
    %c0_49 = arith.constant 0 : index
    %97 = vector.load %arg10[%c0_47, %c0_48, %c0_49] : memref<4x1x64xf32, #tpu.memory_space<vmem>>, vector<1x1x64xf32>
    %98 = vector.shape_cast %97 : vector<1x1x64xf32> to vector<1x64xf32>
    %99 = vector.broadcast %98 : vector<1x64xf32> to vector<224x64xf32>
    %100 = arith.addf %96, %99 : vector<224x64xf32>
    %101 = vector.extract_strided_slice %100 {offsets = [0, 32], sizes = [224, 32], strides = [1, 1]} : vector<224x64xf32> to vector<224x32xf32>
    %102 = vector.extract_strided_slice %6 {offsets = [32, 0], sizes = [224, 32], strides = [1, 1]} : vector<256x32xf32> to vector<224x32xf32>
    %103 = arith.addf %101, %102 : vector<224x32xf32>
    %104 = vector.extract_strided_slice %100 {offsets = [0, 0], sizes = [224, 32], strides = [1, 1]} : vector<224x64xf32> to vector<224x32xf32>
    %105 = vector.shape_cast %103 : vector<224x32xf32> to vector<14x16x32xf32>
    %106 = arith.mulf %105, %105 : vector<14x16x32xf32>
    %cst_50 = arith.constant dense<0.000000e+00> : vector<16x32xf32>
    %107 = vector.multi_reduction <add>, %105, %cst_50 [0] : vector<14x16x32xf32> to vector<16x32xf32>
    %cst_51 = arith.constant 0.0714285746 : f32
    %108 = vector.broadcast %cst_51 : f32 to vector<16x32xf32>
    %109 = arith.mulf %107, %108 : vector<16x32xf32>
    %cst_52 = arith.constant dense<0.000000e+00> : vector<16x32xf32>
    %110 = vector.multi_reduction <add>, %106, %cst_52 [0] : vector<14x16x32xf32> to vector<16x32xf32>
    %cst_53 = arith.constant 0.0714285746 : f32
    %111 = vector.broadcast %cst_53 : f32 to vector<16x32xf32>
    %112 = arith.mulf %110, %111 : vector<16x32xf32>
    %113 = arith.mulf %109, %109 : vector<16x32xf32>
    %114 = arith.subf %112, %113 : vector<16x32xf32>
    %cst_54 = arith.constant 0.000000e+00 : f32
    %115 = vector.broadcast %cst_54 : f32 to vector<16x32xf32>
    %116 = arith.maximumf %114, %115 : vector<16x32xf32>
    %cst_55 = arith.constant 9.99999974E-6 : f32
    %117 = vector.broadcast %cst_55 : f32 to vector<16x32xf32>
    %118 = arith.addf %116, %117 : vector<16x32xf32>
    %119 = math.rsqrt %118 : vector<16x32xf32>
    %c1_56 = arith.constant 1 : index
    %c0_57 = arith.constant 0 : index
    %c0_58 = arith.constant 0 : index
    %120 = vector.load %arg3[%c1_56, %c0_57, %c0_58] : memref<4x16x32xf32, #tpu.memory_space<vmem>>, vector<1x16x32xf32>
    %121 = vector.shape_cast %120 : vector<1x16x32xf32> to vector<16x32xf32>
    %122 = arith.mulf %119, %121 : vector<16x32xf32>
    %c1_59 = arith.constant 1 : index
    %c0_60 = arith.constant 0 : index
    %c0_61 = arith.constant 0 : index
    %123 = vector.load %arg4[%c1_59, %c0_60, %c0_61] : memref<4x16x32xf32, #tpu.memory_space<vmem>>, vector<1x16x32xf32>
    %124 = vector.shape_cast %123 : vector<1x16x32xf32> to vector<16x32xf32>
    %125 = arith.mulf %109, %122 : vector<16x32xf32>
    %126 = arith.subf %124, %125 : vector<16x32xf32>
    %cst_62 = arith.constant dense<0.000000e+00> : vector<14x32xf32>
    %127 = vector.multi_reduction <add>, %105, %cst_62 [1] : vector<14x16x32xf32> to vector<14x32xf32>
    %128 = vector.shape_cast %127 : vector<14x32xf32> to vector<14x1x32xf32>
    %cst_63 = arith.constant 6.250000e-02 : f32
    %129 = vector.broadcast %cst_63 : f32 to vector<14x1x32xf32>
    %130 = arith.mulf %128, %129 : vector<14x1x32xf32>
    %cst_64 = arith.constant dense<0.000000e+00> : vector<14x32xf32>
    %131 = vector.multi_reduction <add>, %106, %cst_64 [1] : vector<14x16x32xf32> to vector<14x32xf32>
    %132 = vector.shape_cast %131 : vector<14x32xf32> to vector<14x1x32xf32>
    %cst_65 = arith.constant 6.250000e-02 : f32
    %133 = vector.broadcast %cst_65 : f32 to vector<14x1x32xf32>
    %134 = arith.mulf %132, %133 : vector<14x1x32xf32>
    %135 = arith.mulf %130, %130 : vector<14x1x32xf32>
    %136 = arith.subf %134, %135 : vector<14x1x32xf32>
    %cst_66 = arith.constant 1.06666672 : f32
    %137 = vector.broadcast %cst_66 : f32 to vector<14x1x32xf32>
    %138 = arith.mulf %136, %137 : vector<14x1x32xf32>
    %cst_67 = arith.constant 0.000000e+00 : f32
    %139 = vector.broadcast %cst_67 : f32 to vector<14x1x32xf32>
    %140 = arith.maximumf %138, %139 : vector<14x1x32xf32>
    %cst_68 = arith.constant 9.99999974E-6 : f32
    %141 = vector.broadcast %cst_68 : f32 to vector<14x1x32xf32>
    %142 = arith.addf %140, %141 : vector<14x1x32xf32>
    %143 = math.rsqrt %142 : vector<14x1x32xf32>
    %c1_69 = arith.constant 1 : index
    %c0_70 = arith.constant 0 : index
    %c0_71 = arith.constant 0 : index
    %144 = vector.load %arg5[%c1_69, %c0_70, %c0_71] : memref<4x1x32xf32, #tpu.memory_space<vmem>>, vector<1x1x32xf32>
    %145 = vector.shape_cast %144 : vector<1x1x32xf32> to vector<1x32xf32>
    %146 = vector.shape_cast %145 : vector<1x32xf32> to vector<1x1x32xf32>
    %147 = vector.broadcast %146 : vector<1x1x32xf32> to vector<14x1x32xf32>
    %148 = arith.mulf %143, %147 : vector<14x1x32xf32>
    %c1_72 = arith.constant 1 : index
    %c0_73 = arith.constant 0 : index
    %c0_74 = arith.constant 0 : index
    %149 = vector.load %arg6[%c1_72, %c0_73, %c0_74] : memref<4x1x32xf32, #tpu.memory_space<vmem>>, vector<1x1x32xf32>
    %150 = vector.shape_cast %149 : vector<1x1x32xf32> to vector<1x32xf32>
    %151 = arith.mulf %130, %148 : vector<14x1x32xf32>
    %152 = vector.shape_cast %150 : vector<1x32xf32> to vector<1x1x32xf32>
    %153 = vector.broadcast %152 : vector<1x1x32xf32> to vector<14x1x32xf32>
    %154 = arith.subf %153, %151 : vector<14x1x32xf32>
    %155 = vector.shape_cast %122 : vector<16x32xf32> to vector<1x16x32xf32>
    %156 = vector.broadcast %155 : vector<1x16x32xf32> to vector<14x16x32xf32>
    %157 = arith.mulf %105, %156 : vector<14x16x32xf32>
    %158 = vector.shape_cast %126 : vector<16x32xf32> to vector<1x16x32xf32>
    %159 = vector.broadcast %158 : vector<1x16x32xf32> to vector<14x16x32xf32>
    %160 = arith.addf %157, %159 : vector<14x16x32xf32>
    %161 = vector.broadcast %148 : vector<14x1x32xf32> to vector<14x16x32xf32>
    %162 = arith.mulf %105, %161 : vector<14x16x32xf32>
    %163 = vector.broadcast %154 : vector<14x1x32xf32> to vector<14x16x32xf32>
    %164 = arith.addf %162, %163 : vector<14x16x32xf32>
    %165 = tpu.concatenate %105, %160, %164 in 2 : vector<14x16x32xf32>, vector<14x16x32xf32>, vector<14x16x32xf32> -> vector<14x16x96xf32>
    %166 = vector.shape_cast %165 : vector<14x16x96xf32> to vector<224x96xf32>
    %c1_75 = arith.constant 1 : index
    %c0_76 = arith.constant 0 : index
    %c0_77 = arith.constant 0 : index
    %167 = vector.load %arg8[%c1_75, %c0_76, %c0_77] : memref<4x1x64xf32, #tpu.memory_space<vmem>>, vector<1x1x64xf32>
    %168 = vector.shape_cast %167 : vector<1x1x64xf32> to vector<1x64xf32>
    %169 = vector.extract_strided_slice %166 {offsets = [0, 0], sizes = [160, 96], strides = [1, 1]} : vector<224x96xf32> to vector<160x96xf32>
    %c1_78 = arith.constant 1 : index
    %c0_79 = arith.constant 0 : index
    %c0_80 = arith.constant 0 : index
    %c0_81 = arith.constant 0 : index
    %170 = vector.load %arg7[%c1_78, %c0_79, %c0_80, %c0_81] : memref<4x2x96x64xbf16, #tpu.memory_space<vmem>>, vector<1x1x96x64xbf16>
    %171 = vector.shape_cast %170 : vector<1x1x96x64xbf16> to vector<96x64xbf16>
    %172 = arith.truncf %169 : vector<160x96xf32> to vector<160x96xbf16>
    %cst_82 = arith.constant dense<0.000000e+00> : vector<160x64xf32>
    %173 = tpu.matmul %172, %171, %cst_82 {dimension_numbers = #tpu.dot_dimension_numbers<[1], [0], [0], [1], [0, 0, 1, 1], [], []>} : vector<160x96xbf16>, vector<96x64xbf16>, vector<160x64xf32> -> vector<160x64xf32>
    %174 = vector.broadcast %168 : vector<1x64xf32> to vector<160x64xf32>
    %175 = arith.addf %174, %173 : vector<160x64xf32>
    %176 = vector.extract_strided_slice %166 {offsets = [64, 0], sizes = [160, 96], strides = [1, 1]} : vector<224x96xf32> to vector<160x96xf32>
    %c1_83 = arith.constant 1 : index
    %c1_84 = arith.constant 1 : index
    %c0_85 = arith.constant 0 : index
    %c0_86 = arith.constant 0 : index
    %177 = vector.load %arg7[%c1_83, %c1_84, %c0_85, %c0_86] : memref<4x2x96x64xbf16, #tpu.memory_space<vmem>>, vector<1x1x96x64xbf16>
    %178 = vector.shape_cast %177 : vector<1x1x96x64xbf16> to vector<96x64xbf16>
    %179 = arith.truncf %176 : vector<160x96xf32> to vector<160x96xbf16>
    %cst_87 = arith.constant dense<0.000000e+00> : vector<160x64xf32>
    %180 = tpu.matmul %179, %178, %cst_87 {dimension_numbers = #tpu.dot_dimension_numbers<[1], [0], [0], [1], [0, 0, 1, 1], [], []>} : vector<160x96xbf16>, vector<96x64xbf16>, vector<160x64xf32> -> vector<160x64xf32>
    %181 = arith.addf %175, %180 : vector<160x64xf32>
    %182 = vector.extract_strided_slice %181 {offsets = [0, 0], sizes = [160, 32], strides = [1, 1]} : vector<160x64xf32> to vector<160x32xf32>
    %183 = math.tanh %182 : vector<160x32xf32>
    %184 = vector.extract_strided_slice %181 {offsets = [0, 32], sizes = [160, 32], strides = [1, 1]} : vector<160x64xf32> to vector<160x32xf32>
    %185 = arith.negf %184 : vector<160x32xf32>
    %186 = math.exp %185 : vector<160x32xf32>
    %cst_88 = arith.constant 1.000000e+00 : f32
    %187 = vector.broadcast %cst_88 : f32 to vector<160x32xf32>
    %188 = arith.addf %187, %186 : vector<160x32xf32>
    %189 = arith.divf %187, %188 : vector<160x32xf32>
    %190 = arith.mulf %183, %189 : vector<160x32xf32>
    %c1_89 = arith.constant 1 : index
    %c0_90 = arith.constant 0 : index
    %c0_91 = arith.constant 0 : index
    %191 = vector.load %arg9[%c1_89, %c0_90, %c0_91] : memref<4x32x64xbf16, #tpu.memory_space<vmem>>, vector<1x32x64xbf16>
    %192 = vector.shape_cast %191 : vector<1x32x64xbf16> to vector<32x64xbf16>
    %193 = arith.truncf %190 : vector<160x32xf32> to vector<160x32xbf16>
    %cst_92 = arith.constant dense<0.000000e+00> : vector<160x64xf32>
    %194 = tpu.matmul %193, %192, %cst_92 {dimension_numbers = #tpu.dot_dimension_numbers<[1], [0], [0], [1], [0, 0, 1, 1], [], []>} : vector<160x32xbf16>, vector<32x64xbf16>, vector<160x64xf32> -> vector<160x64xf32>
    %c1_93 = arith.constant 1 : index
    %c0_94 = arith.constant 0 : index
    %c0_95 = arith.constant 0 : index
    %195 = vector.load %arg10[%c1_93, %c0_94, %c0_95] : memref<4x1x64xf32, #tpu.memory_space<vmem>>, vector<1x1x64xf32>
    %196 = vector.shape_cast %195 : vector<1x1x64xf32> to vector<1x64xf32>
    %197 = vector.broadcast %196 : vector<1x64xf32> to vector<160x64xf32>
    %198 = arith.addf %194, %197 : vector<160x64xf32>
    %199 = vector.extract_strided_slice %198 {offsets = [0, 32], sizes = [160, 32], strides = [1, 1]} : vector<160x64xf32> to vector<160x32xf32>
    %200 = vector.extract_strided_slice %103 {offsets = [64, 0], sizes = [160, 32], strides = [1, 1]} : vector<224x32xf32> to vector<160x32xf32>
    %201 = arith.addf %199, %200 : vector<160x32xf32>
    %202 = vector.extract_strided_slice %198 {offsets = [0, 0], sizes = [160, 32], strides = [1, 1]} : vector<160x64xf32> to vector<160x32xf32>
    %203 = vector.extract_strided_slice %104 {offsets = [64, 0], sizes = [160, 32], strides = [1, 1]} : vector<224x32xf32> to vector<160x32xf32>
    %204 = arith.addf %202, %203 : vector<160x32xf32>
    %205 = vector.shape_cast %201 : vector<160x32xf32> to vector<10x16x32xf32>
    %206 = arith.mulf %205, %205 : vector<10x16x32xf32>
    %cst_96 = arith.constant dense<0.000000e+00> : vector<16x32xf32>
    %207 = vector.multi_reduction <add>, %205, %cst_96 [0] : vector<10x16x32xf32> to vector<16x32xf32>
    %cst_97 = arith.constant 1.000000e-01 : f32
    %208 = vector.broadcast %cst_97 : f32 to vector<16x32xf32>
    %209 = arith.mulf %207, %208 : vector<16x32xf32>
    %cst_98 = arith.constant dense<0.000000e+00> : vector<16x32xf32>
    %210 = vector.multi_reduction <add>, %206, %cst_98 [0] : vector<10x16x32xf32> to vector<16x32xf32>
    %cst_99 = arith.constant 1.000000e-01 : f32
    %211 = vector.broadcast %cst_99 : f32 to vector<16x32xf32>
    %212 = arith.mulf %210, %211 : vector<16x32xf32>
    %213 = arith.mulf %209, %209 : vector<16x32xf32>
    %214 = arith.subf %212, %213 : vector<16x32xf32>
    %cst_100 = arith.constant 0.000000e+00 : f32
    %215 = vector.broadcast %cst_100 : f32 to vector<16x32xf32>
    %216 = arith.maximumf %214, %215 : vector<16x32xf32>
    %cst_101 = arith.constant 9.99999974E-6 : f32
    %217 = vector.broadcast %cst_101 : f32 to vector<16x32xf32>
    %218 = arith.addf %216, %217 : vector<16x32xf32>
    %219 = math.rsqrt %218 : vector<16x32xf32>
    %c2 = arith.constant 2 : index
    %c0_102 = arith.constant 0 : index
    %c0_103 = arith.constant 0 : index
    %220 = vector.load %arg3[%c2, %c0_102, %c0_103] : memref<4x16x32xf32, #tpu.memory_space<vmem>>, vector<1x16x32xf32>
    %221 = vector.shape_cast %220 : vector<1x16x32xf32> to vector<16x32xf32>
    %222 = arith.mulf %219, %221 : vector<16x32xf32>
    %c2_104 = arith.constant 2 : index
    %c0_105 = arith.constant 0 : index
    %c0_106 = arith.constant 0 : index
    %223 = vector.load %arg4[%c2_104, %c0_105, %c0_106] : memref<4x16x32xf32, #tpu.memory_space<vmem>>, vector<1x16x32xf32>
    %224 = vector.shape_cast %223 : vector<1x16x32xf32> to vector<16x32xf32>
    %225 = arith.mulf %209, %222 : vector<16x32xf32>
    %226 = arith.subf %224, %225 : vector<16x32xf32>
    %cst_107 = arith.constant dense<0.000000e+00> : vector<10x32xf32>
    %227 = vector.multi_reduction <add>, %205, %cst_107 [1] : vector<10x16x32xf32> to vector<10x32xf32>
    %228 = vector.shape_cast %227 : vector<10x32xf32> to vector<10x1x32xf32>
    %cst_108 = arith.constant 6.250000e-02 : f32
    %229 = vector.broadcast %cst_108 : f32 to vector<10x1x32xf32>
    %230 = arith.mulf %228, %229 : vector<10x1x32xf32>
    %cst_109 = arith.constant dense<0.000000e+00> : vector<10x32xf32>
    %231 = vector.multi_reduction <add>, %206, %cst_109 [1] : vector<10x16x32xf32> to vector<10x32xf32>
    %232 = vector.shape_cast %231 : vector<10x32xf32> to vector<10x1x32xf32>
    %cst_110 = arith.constant 6.250000e-02 : f32
    %233 = vector.broadcast %cst_110 : f32 to vector<10x1x32xf32>
    %234 = arith.mulf %232, %233 : vector<10x1x32xf32>
    %235 = arith.mulf %230, %230 : vector<10x1x32xf32>
    %236 = arith.subf %234, %235 : vector<10x1x32xf32>
    %cst_111 = arith.constant 1.06666672 : f32
    %237 = vector.broadcast %cst_111 : f32 to vector<10x1x32xf32>
    %238 = arith.mulf %236, %237 : vector<10x1x32xf32>
    %cst_112 = arith.constant 0.000000e+00 : f32
    %239 = vector.broadcast %cst_112 : f32 to vector<10x1x32xf32>
    %240 = arith.maximumf %238, %239 : vector<10x1x32xf32>
    %cst_113 = arith.constant 9.99999974E-6 : f32
    %241 = vector.broadcast %cst_113 : f32 to vector<10x1x32xf32>
    %242 = arith.addf %240, %241 : vector<10x1x32xf32>
    %243 = math.rsqrt %242 : vector<10x1x32xf32>
    %c2_114 = arith.constant 2 : index
    %c0_115 = arith.constant 0 : index
    %c0_116 = arith.constant 0 : index
    %244 = vector.load %arg5[%c2_114, %c0_115, %c0_116] : memref<4x1x32xf32, #tpu.memory_space<vmem>>, vector<1x1x32xf32>
    %245 = vector.shape_cast %244 : vector<1x1x32xf32> to vector<1x32xf32>
    %246 = vector.shape_cast %245 : vector<1x32xf32> to vector<1x1x32xf32>
    %247 = vector.broadcast %246 : vector<1x1x32xf32> to vector<10x1x32xf32>
    %248 = arith.mulf %243, %247 : vector<10x1x32xf32>
    %c2_117 = arith.constant 2 : index
    %c0_118 = arith.constant 0 : index
    %c0_119 = arith.constant 0 : index
    %249 = vector.load %arg6[%c2_117, %c0_118, %c0_119] : memref<4x1x32xf32, #tpu.memory_space<vmem>>, vector<1x1x32xf32>
    %250 = vector.shape_cast %249 : vector<1x1x32xf32> to vector<1x32xf32>
    %251 = arith.mulf %230, %248 : vector<10x1x32xf32>
    %252 = vector.shape_cast %250 : vector<1x32xf32> to vector<1x1x32xf32>
    %253 = vector.broadcast %252 : vector<1x1x32xf32> to vector<10x1x32xf32>
    %254 = arith.subf %253, %251 : vector<10x1x32xf32>
    %255 = vector.shape_cast %222 : vector<16x32xf32> to vector<1x16x32xf32>
    %256 = vector.broadcast %255 : vector<1x16x32xf32> to vector<10x16x32xf32>
    %257 = arith.mulf %205, %256 : vector<10x16x32xf32>
    %258 = vector.shape_cast %226 : vector<16x32xf32> to vector<1x16x32xf32>
    %259 = vector.broadcast %258 : vector<1x16x32xf32> to vector<10x16x32xf32>
    %260 = arith.addf %257, %259 : vector<10x16x32xf32>
    %261 = vector.broadcast %248 : vector<10x1x32xf32> to vector<10x16x32xf32>
    %262 = arith.mulf %205, %261 : vector<10x16x32xf32>
    %263 = vector.broadcast %254 : vector<10x1x32xf32> to vector<10x16x32xf32>
    %264 = arith.addf %262, %263 : vector<10x16x32xf32>
    %265 = tpu.concatenate %205, %260, %264 in 2 : vector<10x16x32xf32>, vector<10x16x32xf32>, vector<10x16x32xf32> -> vector<10x16x96xf32>
    %266 = vector.shape_cast %265 : vector<10x16x96xf32> to vector<160x96xf32>
    %c2_120 = arith.constant 2 : index
    %c0_121 = arith.constant 0 : index
    %c0_122 = arith.constant 0 : index
    %267 = vector.load %arg8[%c2_120, %c0_121, %c0_122] : memref<4x1x64xf32, #tpu.memory_space<vmem>>, vector<1x1x64xf32>
    %268 = vector.shape_cast %267 : vector<1x1x64xf32> to vector<1x64xf32>
    %269 = vector.extract_strided_slice %266 {offsets = [0, 0], sizes = [128, 96], strides = [1, 1]} : vector<160x96xf32> to vector<128x96xf32>
    %c2_123 = arith.constant 2 : index
    %c0_124 = arith.constant 0 : index
    %c0_125 = arith.constant 0 : index
    %c0_126 = arith.constant 0 : index
    %270 = vector.load %arg7[%c2_123, %c0_124, %c0_125, %c0_126] : memref<4x2x96x64xbf16, #tpu.memory_space<vmem>>, vector<1x1x96x64xbf16>
    %271 = vector.shape_cast %270 : vector<1x1x96x64xbf16> to vector<96x64xbf16>
    %272 = arith.truncf %269 : vector<128x96xf32> to vector<128x96xbf16>
    %cst_127 = arith.constant dense<0.000000e+00> : vector<128x64xf32>
    %273 = tpu.matmul %272, %271, %cst_127 {dimension_numbers = #tpu.dot_dimension_numbers<[1], [0], [0], [1], [0, 0, 1, 1], [], []>} : vector<128x96xbf16>, vector<96x64xbf16>, vector<128x64xf32> -> vector<128x64xf32>
    %274 = vector.broadcast %268 : vector<1x64xf32> to vector<128x64xf32>
    %275 = arith.addf %274, %273 : vector<128x64xf32>
    %276 = vector.extract_strided_slice %266 {offsets = [32, 0], sizes = [128, 96], strides = [1, 1]} : vector<160x96xf32> to vector<128x96xf32>
    %c2_128 = arith.constant 2 : index
    %c1_129 = arith.constant 1 : index
    %c0_130 = arith.constant 0 : index
    %c0_131 = arith.constant 0 : index
    %277 = vector.load %arg7[%c2_128, %c1_129, %c0_130, %c0_131] : memref<4x2x96x64xbf16, #tpu.memory_space<vmem>>, vector<1x1x96x64xbf16>
    %278 = vector.shape_cast %277 : vector<1x1x96x64xbf16> to vector<96x64xbf16>
    %279 = arith.truncf %276 : vector<128x96xf32> to vector<128x96xbf16>
    %cst_132 = arith.constant dense<0.000000e+00> : vector<128x64xf32>
    %280 = tpu.matmul %279, %278, %cst_132 {dimension_numbers = #tpu.dot_dimension_numbers<[1], [0], [0], [1], [0, 0, 1, 1], [], []>} : vector<128x96xbf16>, vector<96x64xbf16>, vector<128x64xf32> -> vector<128x64xf32>
    %281 = arith.addf %275, %280 : vector<128x64xf32>
    %282 = vector.extract_strided_slice %281 {offsets = [0, 0], sizes = [128, 32], strides = [1, 1]} : vector<128x64xf32> to vector<128x32xf32>
    %283 = math.tanh %282 : vector<128x32xf32>
    %284 = vector.extract_strided_slice %281 {offsets = [0, 32], sizes = [128, 32], strides = [1, 1]} : vector<128x64xf32> to vector<128x32xf32>
    %285 = arith.negf %284 : vector<128x32xf32>
    %286 = math.exp %285 : vector<128x32xf32>
    %cst_133 = arith.constant 1.000000e+00 : f32
    %287 = vector.broadcast %cst_133 : f32 to vector<128x32xf32>
    %288 = arith.addf %287, %286 : vector<128x32xf32>
    %289 = arith.divf %287, %288 : vector<128x32xf32>
    %290 = arith.mulf %283, %289 : vector<128x32xf32>
    %c2_134 = arith.constant 2 : index
    %c0_135 = arith.constant 0 : index
    %c0_136 = arith.constant 0 : index
    %291 = vector.load %arg9[%c2_134, %c0_135, %c0_136] : memref<4x32x64xbf16, #tpu.memory_space<vmem>>, vector<1x32x64xbf16>
    %292 = vector.shape_cast %291 : vector<1x32x64xbf16> to vector<32x64xbf16>
    %293 = arith.truncf %290 : vector<128x32xf32> to vector<128x32xbf16>
    %cst_137 = arith.constant dense<0.000000e+00> : vector<128x64xf32>
    %294 = tpu.matmul %293, %292, %cst_137 {dimension_numbers = #tpu.dot_dimension_numbers<[1], [0], [0], [1], [0, 0, 1, 1], [], []>} : vector<128x32xbf16>, vector<32x64xbf16>, vector<128x64xf32> -> vector<128x64xf32>
    %c2_138 = arith.constant 2 : index
    %c0_139 = arith.constant 0 : index
    %c0_140 = arith.constant 0 : index
    %295 = vector.load %arg10[%c2_138, %c0_139, %c0_140] : memref<4x1x64xf32, #tpu.memory_space<vmem>>, vector<1x1x64xf32>
    %296 = vector.shape_cast %295 : vector<1x1x64xf32> to vector<1x64xf32>
    %297 = vector.broadcast %296 : vector<1x64xf32> to vector<128x64xf32>
    %298 = arith.addf %294, %297 : vector<128x64xf32>
    %299 = vector.extract_strided_slice %298 {offsets = [0, 32], sizes = [128, 32], strides = [1, 1]} : vector<128x64xf32> to vector<128x32xf32>
    %300 = vector.extract_strided_slice %201 {offsets = [32, 0], sizes = [128, 32], strides = [1, 1]} : vector<160x32xf32> to vector<128x32xf32>
    %301 = arith.addf %299, %300 : vector<128x32xf32>
    %302 = vector.extract_strided_slice %298 {offsets = [0, 0], sizes = [128, 32], strides = [1, 1]} : vector<128x64xf32> to vector<128x32xf32>
    %303 = vector.extract_strided_slice %204 {offsets = [32, 0], sizes = [128, 32], strides = [1, 1]} : vector<160x32xf32> to vector<128x32xf32>
    %304 = arith.addf %302, %303 : vector<128x32xf32>
    %305 = vector.shape_cast %301 : vector<128x32xf32> to vector<8x16x32xf32>
    %306 = arith.mulf %305, %305 : vector<8x16x32xf32>
    %cst_141 = arith.constant dense<0.000000e+00> : vector<16x32xf32>
    %307 = vector.multi_reduction <add>, %305, %cst_141 [0] : vector<8x16x32xf32> to vector<16x32xf32>
    %cst_142 = arith.constant 1.250000e-01 : f32
    %308 = vector.broadcast %cst_142 : f32 to vector<16x32xf32>
    %309 = arith.mulf %307, %308 : vector<16x32xf32>
    %cst_143 = arith.constant dense<0.000000e+00> : vector<16x32xf32>
    %310 = vector.multi_reduction <add>, %306, %cst_143 [0] : vector<8x16x32xf32> to vector<16x32xf32>
    %cst_144 = arith.constant 1.250000e-01 : f32
    %311 = vector.broadcast %cst_144 : f32 to vector<16x32xf32>
    %312 = arith.mulf %310, %311 : vector<16x32xf32>
    %313 = arith.mulf %309, %309 : vector<16x32xf32>
    %314 = arith.subf %312, %313 : vector<16x32xf32>
    %cst_145 = arith.constant 0.000000e+00 : f32
    %315 = vector.broadcast %cst_145 : f32 to vector<16x32xf32>
    %316 = arith.maximumf %314, %315 : vector<16x32xf32>
    %cst_146 = arith.constant 9.99999974E-6 : f32
    %317 = vector.broadcast %cst_146 : f32 to vector<16x32xf32>
    %318 = arith.addf %316, %317 : vector<16x32xf32>
    %319 = math.rsqrt %318 : vector<16x32xf32>
    %c3 = arith.constant 3 : index
    %c0_147 = arith.constant 0 : index
    %c0_148 = arith.constant 0 : index
    %320 = vector.load %arg3[%c3, %c0_147, %c0_148] : memref<4x16x32xf32, #tpu.memory_space<vmem>>, vector<1x16x32xf32>
    %321 = vector.shape_cast %320 : vector<1x16x32xf32> to vector<16x32xf32>
    %322 = arith.mulf %319, %321 : vector<16x32xf32>
    %c3_149 = arith.constant 3 : index
    %c0_150 = arith.constant 0 : index
    %c0_151 = arith.constant 0 : index
    %323 = vector.load %arg4[%c3_149, %c0_150, %c0_151] : memref<4x16x32xf32, #tpu.memory_space<vmem>>, vector<1x16x32xf32>
    %324 = vector.shape_cast %323 : vector<1x16x32xf32> to vector<16x32xf32>
    %325 = arith.mulf %309, %322 : vector<16x32xf32>
    %326 = arith.subf %324, %325 : vector<16x32xf32>
    %cst_152 = arith.constant dense<0.000000e+00> : vector<8x32xf32>
    %327 = vector.multi_reduction <add>, %305, %cst_152 [1] : vector<8x16x32xf32> to vector<8x32xf32>
    %328 = vector.shape_cast %327 : vector<8x32xf32> to vector<8x1x32xf32>
    %cst_153 = arith.constant 6.250000e-02 : f32
    %329 = vector.broadcast %cst_153 : f32 to vector<8x1x32xf32>
    %330 = arith.mulf %328, %329 : vector<8x1x32xf32>
    %cst_154 = arith.constant dense<0.000000e+00> : vector<8x32xf32>
    %331 = vector.multi_reduction <add>, %306, %cst_154 [1] : vector<8x16x32xf32> to vector<8x32xf32>
    %332 = vector.shape_cast %331 : vector<8x32xf32> to vector<8x1x32xf32>
    %cst_155 = arith.constant 6.250000e-02 : f32
    %333 = vector.broadcast %cst_155 : f32 to vector<8x1x32xf32>
    %334 = arith.mulf %332, %333 : vector<8x1x32xf32>
    %335 = arith.mulf %330, %330 : vector<8x1x32xf32>
    %336 = arith.subf %334, %335 : vector<8x1x32xf32>
    %cst_156 = arith.constant 1.06666672 : f32
    %337 = vector.broadcast %cst_156 : f32 to vector<8x1x32xf32>
    %338 = arith.mulf %336, %337 : vector<8x1x32xf32>
    %cst_157 = arith.constant 0.000000e+00 : f32
    %339 = vector.broadcast %cst_157 : f32 to vector<8x1x32xf32>
    %340 = arith.maximumf %338, %339 : vector<8x1x32xf32>
    %cst_158 = arith.constant 9.99999974E-6 : f32
    %341 = vector.broadcast %cst_158 : f32 to vector<8x1x32xf32>
    %342 = arith.addf %340, %341 : vector<8x1x32xf32>
    %343 = math.rsqrt %342 : vector<8x1x32xf32>
    %c3_159 = arith.constant 3 : index
    %c0_160 = arith.constant 0 : index
    %c0_161 = arith.constant 0 : index
    %344 = vector.load %arg5[%c3_159, %c0_160, %c0_161] : memref<4x1x32xf32, #tpu.memory_space<vmem>>, vector<1x1x32xf32>
    %345 = vector.shape_cast %344 : vector<1x1x32xf32> to vector<1x32xf32>
    %346 = vector.shape_cast %345 : vector<1x32xf32> to vector<1x1x32xf32>
    %347 = vector.broadcast %346 : vector<1x1x32xf32> to vector<8x1x32xf32>
    %348 = arith.mulf %343, %347 : vector<8x1x32xf32>
    %c3_162 = arith.constant 3 : index
    %c0_163 = arith.constant 0 : index
    %c0_164 = arith.constant 0 : index
    %349 = vector.load %arg6[%c3_162, %c0_163, %c0_164] : memref<4x1x32xf32, #tpu.memory_space<vmem>>, vector<1x1x32xf32>
    %350 = vector.shape_cast %349 : vector<1x1x32xf32> to vector<1x32xf32>
    %351 = arith.mulf %330, %348 : vector<8x1x32xf32>
    %352 = vector.shape_cast %350 : vector<1x32xf32> to vector<1x1x32xf32>
    %353 = vector.broadcast %352 : vector<1x1x32xf32> to vector<8x1x32xf32>
    %354 = arith.subf %353, %351 : vector<8x1x32xf32>
    %355 = vector.shape_cast %322 : vector<16x32xf32> to vector<1x16x32xf32>
    %356 = vector.broadcast %355 : vector<1x16x32xf32> to vector<8x16x32xf32>
    %357 = arith.mulf %305, %356 : vector<8x16x32xf32>
    %358 = vector.shape_cast %326 : vector<16x32xf32> to vector<1x16x32xf32>
    %359 = vector.broadcast %358 : vector<1x16x32xf32> to vector<8x16x32xf32>
    %360 = arith.addf %357, %359 : vector<8x16x32xf32>
    %361 = vector.broadcast %348 : vector<8x1x32xf32> to vector<8x16x32xf32>
    %362 = arith.mulf %305, %361 : vector<8x16x32xf32>
    %363 = vector.broadcast %354 : vector<8x1x32xf32> to vector<8x16x32xf32>
    %364 = arith.addf %362, %363 : vector<8x16x32xf32>
    %365 = tpu.concatenate %305, %360, %364 in 2 : vector<8x16x32xf32>, vector<8x16x32xf32>, vector<8x16x32xf32> -> vector<8x16x96xf32>
    %366 = vector.shape_cast %365 : vector<8x16x96xf32> to vector<128x96xf32>
    %c3_165 = arith.constant 3 : index
    %c0_166 = arith.constant 0 : index
    %c0_167 = arith.constant 0 : index
    %367 = vector.load %arg8[%c3_165, %c0_166, %c0_167] : memref<4x1x64xf32, #tpu.memory_space<vmem>>, vector<1x1x64xf32>
    %368 = vector.shape_cast %367 : vector<1x1x64xf32> to vector<1x64xf32>
    %369 = vector.extract_strided_slice %366 {offsets = [0, 0], sizes = [64, 96], strides = [1, 1]} : vector<128x96xf32> to vector<64x96xf32>
    %c3_168 = arith.constant 3 : index
    %c0_169 = arith.constant 0 : index
    %c0_170 = arith.constant 0 : index
    %c0_171 = arith.constant 0 : index
    %370 = vector.load %arg7[%c3_168, %c0_169, %c0_170, %c0_171] : memref<4x2x96x64xbf16, #tpu.memory_space<vmem>>, vector<1x1x96x64xbf16>
    %371 = vector.shape_cast %370 : vector<1x1x96x64xbf16> to vector<96x64xbf16>
    %372 = arith.truncf %369 : vector<64x96xf32> to vector<64x96xbf16>
    %cst_172 = arith.constant dense<0.000000e+00> : vector<64x64xf32>
    %373 = tpu.matmul %372, %371, %cst_172 {dimension_numbers = #tpu.dot_dimension_numbers<[1], [0], [0], [1], [0, 0, 1, 1], [], []>} : vector<64x96xbf16>, vector<96x64xbf16>, vector<64x64xf32> -> vector<64x64xf32>
    %374 = vector.broadcast %368 : vector<1x64xf32> to vector<64x64xf32>
    %375 = arith.addf %374, %373 : vector<64x64xf32>
    %376 = vector.extract_strided_slice %366 {offsets = [64, 0], sizes = [64, 96], strides = [1, 1]} : vector<128x96xf32> to vector<64x96xf32>
    %c3_173 = arith.constant 3 : index
    %c1_174 = arith.constant 1 : index
    %c0_175 = arith.constant 0 : index
    %c0_176 = arith.constant 0 : index
    %377 = vector.load %arg7[%c3_173, %c1_174, %c0_175, %c0_176] : memref<4x2x96x64xbf16, #tpu.memory_space<vmem>>, vector<1x1x96x64xbf16>
    %378 = vector.shape_cast %377 : vector<1x1x96x64xbf16> to vector<96x64xbf16>
    %379 = arith.truncf %376 : vector<64x96xf32> to vector<64x96xbf16>
    %cst_177 = arith.constant dense<0.000000e+00> : vector<64x64xf32>
    %380 = tpu.matmul %379, %378, %cst_177 {dimension_numbers = #tpu.dot_dimension_numbers<[1], [0], [0], [1], [0, 0, 1, 1], [], []>} : vector<64x96xbf16>, vector<96x64xbf16>, vector<64x64xf32> -> vector<64x64xf32>
    %381 = arith.addf %375, %380 : vector<64x64xf32>
    %382 = vector.extract_strided_slice %381 {offsets = [0, 0], sizes = [64, 32], strides = [1, 1]} : vector<64x64xf32> to vector<64x32xf32>
    %383 = math.tanh %382 : vector<64x32xf32>
    %384 = vector.extract_strided_slice %381 {offsets = [0, 32], sizes = [64, 32], strides = [1, 1]} : vector<64x64xf32> to vector<64x32xf32>
    %385 = arith.negf %384 : vector<64x32xf32>
    %386 = math.exp %385 : vector<64x32xf32>
    %cst_178 = arith.constant 1.000000e+00 : f32
    %387 = vector.broadcast %cst_178 : f32 to vector<64x32xf32>
    %388 = arith.addf %387, %386 : vector<64x32xf32>
    %389 = arith.divf %387, %388 : vector<64x32xf32>
    %390 = arith.mulf %383, %389 : vector<64x32xf32>
    %c3_179 = arith.constant 3 : index
    %c0_180 = arith.constant 0 : index
    %c0_181 = arith.constant 0 : index
    %391 = vector.load %arg9[%c3_179, %c0_180, %c0_181] : memref<4x32x64xbf16, #tpu.memory_space<vmem>>, vector<1x32x64xbf16>
    %392 = vector.shape_cast %391 : vector<1x32x64xbf16> to vector<32x64xbf16>
    %393 = arith.truncf %390 : vector<64x32xf32> to vector<64x32xbf16>
    %cst_182 = arith.constant dense<0.000000e+00> : vector<64x64xf32>
    %394 = tpu.matmul %393, %392, %cst_182 {dimension_numbers = #tpu.dot_dimension_numbers<[1], [0], [0], [1], [0, 0, 1, 1], [], []>} : vector<64x32xbf16>, vector<32x64xbf16>, vector<64x64xf32> -> vector<64x64xf32>
    %c3_183 = arith.constant 3 : index
    %c0_184 = arith.constant 0 : index
    %c0_185 = arith.constant 0 : index
    %395 = vector.load %arg10[%c3_183, %c0_184, %c0_185] : memref<4x1x64xf32, #tpu.memory_space<vmem>>, vector<1x1x64xf32>
    %396 = vector.shape_cast %395 : vector<1x1x64xf32> to vector<1x64xf32>
    %397 = vector.broadcast %396 : vector<1x64xf32> to vector<64x64xf32>
    %398 = arith.addf %394, %397 : vector<64x64xf32>
    %399 = vector.extract_strided_slice %398 {offsets = [0, 0], sizes = [64, 32], strides = [1, 1]} : vector<64x64xf32> to vector<64x32xf32>
    %400 = vector.extract_strided_slice %304 {offsets = [64, 0], sizes = [64, 32], strides = [1, 1]} : vector<128x32xf32> to vector<64x32xf32>
    %401 = arith.addf %399, %400 : vector<64x32xf32>
    %cst_186 = arith.constant 0.000000e+00 : f32
    %402 = vector.broadcast %cst_186 : f32 to vector<64x32xf32>
    %403 = arith.maximumf %401, %402 : vector<64x32xf32>
    %c0_187 = arith.constant 0 : index
    %c0_188 = arith.constant 0 : index
    %404 = vector.load %arg11[%c0_187, %c0_188] : memref<32x32xbf16, #tpu.memory_space<vmem>>, vector<32x32xbf16>
    %405 = arith.truncf %403 : vector<64x32xf32> to vector<64x32xbf16>
    %cst_189 = arith.constant dense<0.000000e+00> : vector<64x32xf32>
    %406 = tpu.matmul %405, %404, %cst_189 {dimension_numbers = #tpu.dot_dimension_numbers<[1], [0], [0], [1], [0, 0, 1, 1], [], []>} : vector<64x32xbf16>, vector<32x32xbf16>, vector<64x32xf32> -> vector<64x32xf32>
    %c0_190 = arith.constant 0 : index
    %c0_191 = arith.constant 0 : index
    %407 = vector.load %arg12[%c0_190, %c0_191] : memref<1x32xf32, #tpu.memory_space<vmem>>, vector<1x32xf32>
    %408 = vector.broadcast %407 : vector<1x32xf32> to vector<64x32xf32>
    %409 = arith.addf %406, %408 : vector<64x32xf32>
    %cst_192 = arith.constant 0.000000e+00 : f32
    %410 = vector.broadcast %cst_192 : f32 to vector<64x32xf32>
    %411 = arith.maximumf %409, %410 : vector<64x32xf32>
    %c0_193 = arith.constant 0 : index
    %c0_194 = arith.constant 0 : index
    %412 = vector.load %arg13[%c0_193, %c0_194] : memref<32x4xbf16, #tpu.memory_space<vmem>>, vector<32x4xbf16>
    %413 = arith.truncf %411 : vector<64x32xf32> to vector<64x32xbf16>
    %cst_195 = arith.constant dense<0.000000e+00> : vector<64x4xf32>
    %414 = tpu.matmul %413, %412, %cst_195 {dimension_numbers = #tpu.dot_dimension_numbers<[1], [0], [0], [1], [0, 0, 1, 1], [], []>} : vector<64x32xbf16>, vector<32x4xbf16>, vector<64x4xf32> -> vector<64x4xf32>
    %c0_196 = arith.constant 0 : index
    %c0_197 = arith.constant 0 : index
    %415 = vector.load %arg14[%c0_196, %c0_197] : memref<1x4xf32, #tpu.memory_space<vmem>>, vector<1x4xf32>
    %416 = vector.broadcast %415 : vector<1x4xf32> to vector<64x4xf32>
    %417 = arith.addf %414, %416 : vector<64x4xf32>
    %c0_198 = arith.constant 0 : index
    %c0_199 = arith.constant 0 : index
    %418 = vector.load %arg15[%c0_198, %c0_199] : memref<64x4xf32, #tpu.memory_space<vmem>>, vector<64x4xf32>
    tpu.vector_store %arg15[%c0_198, %c0_199], %417 {strides = array<i32>} : memref<64x4xf32, #tpu.memory_space<vmem>>, vector<64x4xf32>,
    return
  }
}

</mosaic_0001>

<bundles_post_ra>
// kernel: _lambda_.1
= control target key start
LH: loop header
LB: loop body
LE: loop exit
PB: predicated region body
PF: predicated region fallthrough
CT: control target
= control target key end

     0   :  { %vm153_vm0 = vcmask 1040384   ;;  %vm104_vm1 = vcmask 15360   ;;  %vm278_vm2 = vcmask 261120   ;;  %s9806_s20 = smov 32   ;;  %s9807_s21 = smov 64   ;;  %s14858_s1 = inlined_call_operand.vmem [shape: bf16[2,32], index: 1, kind: input, shape index: {}]   ;;  %s14859_s0 = inlined_call_operand.vmem [shape: f32[256,2], index: 0, kind: input, shape index: {}]   ;;  %s14860_s2 = inlined_call_operand.vmem [shape: f32[1,32], index: 2, kind: input, shape index: {}]   ;;  %s14861_s5 = inlined_call_operand.vmem [shape: f32[4,1,32], index: 5, kind: input, shape index: {}]   ;;  %s14862_s6 = inlined_call_operand.vmem [shape: f32[4,1,32], index: 6, kind: input, shape index: {}]   ;;  %s14863_s3 = inlined_call_operand.vmem [shape: f32[4,16,32], index: 3, kind: input, shape index: {}]   ;;  %s14864_s4 = inlined_call_operand.vmem [shape: f32[4,16,32], index: 4, kind: input, shape index: {}]   ;;  %s14865_s7 = inlined_call_operand.vmem [shape: bf16[4,2,96,64], index: 7, kind: input, shape index: {}]   ;;  %s14866_s8 = inlined_call_operand.vmem [shape: f32[4,1,64], index: 8, kind: input, shape index: {}]   ;;  %s14867_s9 = inlined_call_operand.vmem [shape: bf16[4,32,64], index: 9, kind: input, shape index: {}]   ;;  %s14868_s10 = inlined_call_operand.vmem [shape: f32[4,1,64], index: 10, kind: input, shape index: {}]   ;;  %s14869_s11 = inlined_call_operand.vmem [shape: bf16[32,32], index: 11, kind: input, shape index: {}]   ;;  %s14870_s13 = inlined_call_operand.vmem [shape: bf16[32,4], index: 13, kind: input, shape index: {}]   ;;  %s14871_s12 = inlined_call_operand.vmem [shape: f32[1,32], index: 12, kind: input, shape index: {}]   ;;  %s14872_s14 = inlined_call_operand.vmem [shape: f32[1,4], index: 14, kind: input, shape index: {}]   ;;  %s14873_s15 = inlined_call_operand.vmem [shape: f32[64,4], index: 15, kind: output, shape index: {}]  }
   0x1   :  { %v83_v0 = vld [vmem:[%s14858_s1] sm:$0x1]  ;;  %v52_v2 = vld [vmem:[%s14859_s0 + $0x8] sm:$0xff]  ;;  %v53_v5 = vld [vmem:[%s14859_s0 + $0x10] sm:$0xff]  ;;  %s9808_s30 = smov 96  }
   0x2   :  { %v51_v1 = vld [vmem:[%s14859_s0] sm:$0xff]  ;;  %v155_v3 = vsel %vm153_vm0, %v83_v0, 0  ;;  %v54_v6 = vld [vmem:[%s14859_s0 + $0x18] sm:$0xff]  ;;  %v56_v9 = vld [vmem:[%s14859_s0 + $0x28] sm:$0xff] }
   0x3   :  { %v84_v4 = vpack.c.bf16 %v52_v2, %v51_v1  ;;  %164 = vmatpush.bf16.msra.mxu0 %v155_v3  ;;  %8756 = vmatpush.bf16.msra.mxu3 %v155_v3  ;;  %v85_v7 = vpack.c.bf16 %v54_v6, %v53_v5  ;;  %v55_v8 = vld [vmem:[%s14859_s0 + $0x20] sm:$0xff]  ;;  %v57_v11 = vld [vmem:[%s14859_s0 + $0x30] sm:$0xff]  ;;  %v58_v12 = vld [vmem:[%s14859_s0 + $0x38] sm:$0xff] }
   0x4   :  { %v86_v10 = vpack.c.bf16 %v56_v9, %v55_v8  ;;  %v87_v13 = vpack.c.bf16 %v58_v12, %v57_v11  ;;  %v59_v14 = vld [vmem:[%s14859_s0 + $0x40] sm:$0xff]  ;;  %v60_v15 = vld [vmem:[%s14859_s0 + $0x48] sm:$0xff]  ;;  %v61_v17 = vld [vmem:[%s14859_s0 + $0x50] sm:$0xff] }
   0x5   :  { %v88_v16 = vpack.c.bf16 %v60_v15, %v59_v14  ;;  %v62_v18 = vld [vmem:[%s14859_s0 + $0x58] sm:$0xff]  ;;  %v63_v20 = vld [vmem:[%s14859_s0 + $0x60] sm:$0xff]  ;;  %v64_v21 = vld [vmem:[%s14859_s0 + $0x68] sm:$0xff] }
   0x6   :  { %8132 = vmatmul.msk.bf16.vlgmr.msra.gmra.mxu0 %vm104_vm1, %v84_v4  ;;  %v89_v19 = vpack.c.bf16 %v62_v18, %v61_v17  ;;  %v90_v22 = vpack.c.bf16 %v64_v21, %v63_v20  ;;  %v79_v23 = vld [vmem:[%s14859_s0 + $0xe0] sm:$0xff]  ;;  %v80_v24 = vld [vmem:[%s14859_s0 + $0xe8] sm:$0xff]  ;;  %v65_v26 = vld [vmem:[%s14859_s0 + $0x70] sm:$0xff] }
   0x7   :  { %v98_v25 = vpack.c.bf16 %v80_v24, %v79_v23  ;;  %v66_v27 = vld [vmem:[%s14859_s0 + $0x78] sm:$0xff]  ;;  %v81_v29 = vld [vmem:[%s14859_s0 + $0xf0] sm:$0xff]  ;;  %v67_v32 = vld [vmem:[%s14859_s0 + $0x80] sm:$0xff] }
   0x8   :  { %v91_v28 = vpack.c.bf16 %v66_v27, %v65_v26  ;;  %v82_v30 = vld [vmem:[%s14859_s0 + $0xf8] sm:$0xff]  ;;  %v68_v33 = vld [vmem:[%s14859_s0 + $0x88] sm:$0xff]  ;;  %v69_v37 = vld [vmem:[%s14859_s0 + $0x90] sm:$0xff] }
   0x9   :  { %8146 = vmatmul.msk.bf16.vlgmr.msra.gmra.mxu3 %vm104_vm1, %v98_v25  ;;  %v99_v31 = vpack.c.bf16 %v82_v30, %v81_v29  ;;  %v92_v34 = vpack.c.bf16 %v68_v33, %v67_v32  ;;  %v70_v38 = vld [vmem:[%s14859_s0 + $0x98] sm:$0xff]  ;;  %v71_v42 = vld [vmem:[%s14859_s0 + $0xa0] sm:$0xff]  ;;  %v72_v43 = vld [vmem:[%s14859_s0 + $0xa8] sm:$0xff] }
   0xa   :  { %v93_v39 = vpack.c.bf16 %v70_v38, %v69_v37  ;;  %v94_v44 = vpack.c.bf16 %v72_v43, %v71_v42  ;;  %v9986_v46 = vld [vmem:[%s14860_s2] ss:$0 sm:$0xff]  ;;  %v73_v52 = vld [vmem:[%s14859_s0 + $0xb0] sm:$0xff]  ;;  %v74_v53 = vld [vmem:[%s14859_s0 + $0xb8] sm:$0xff] }
   0xb   :  { %v95_v57 = vpack.c.bf16 %v74_v53, %v73_v52  ;;  %v75_v17 = vld [vmem:[%s14859_s0 + $0xc0] sm:$0xff]  ;;  %v76_v18 = vld [vmem:[%s14859_s0 + $0xc8] sm:$0xff] }
  0x16   :  { %8133 = vmatmul.msk.bf16.gmra.mxu0 %vm104_vm1, %v85_v7 }
  0x19   :  { %8147 = vmatmul.msk.bf16.gmra.mxu3 %vm104_vm1, %v99_v31 }
  0x26   :  { %8134 = vmatmul.msk.bf16.gmra.mxu0 %vm104_vm1, %v86_v10 }
  0x36   :  { %8135 = vmatmul.msk.bf16.gmra.mxu0 %vm104_vm1, %v87_v13 }
  0x46   :  { %8136 = vmatmul.msk.bf16.gmra.mxu0 %vm104_vm1, %v88_v16 }
  0x56   :  { %8137 = vmatmul.msk.bf16.gmra.mxu0 %vm104_vm1, %v89_v19 }
  0x66   :  { %8138 = vmatmul.msk.bf16.gmra.mxu0 %vm104_vm1, %v90_v22  ;;  %v96_v22 = vpack.c.bf16 %v76_v18, %v75_v17 }
  0x76   :  { %8139 = vmatmul.msk.bf16.gmra.mxu0 %vm104_vm1, %v91_v28 }
  0x83   :  { %v166_v35 = vpop.f32.mrf.mxu0 }
  0x84   :  { %v9992_v49 = vadd.f32 %v9986_v46, %v166_v35 }
  0x86   :  { %8140 = vmatmul.msk.bf16.gmra.mxu0 %vm104_vm1, %v92_v34  ;;  %15032 = vst [vmem:[#allocation3_spill] sm:$0xff] %v9992_v49  ;;  %v246_v54 = vmul.f32 %v9992_v49, %v9992_v49  ;;  %v10010_v55 = vsel %vm278_vm2, %v9992_v49, 0.0 }
  0x88   :  { %v10021_v61 = vsel %vm278_vm2, %v246_v54, 0.0 }
  0x8b   :  { %v168_v36 = vpop.f32.mrf.mxu0 }
  0x8c   :  { %v9989_v47 = vadd.f32 %v9986_v46, %v168_v36 }
  0x8e   :  { %15031 = vst [vmem:[#allocation2_spill] sm:$0xff] %v9989_v47  ;;  %v247_v50 = vmul.f32 %v9989_v47, %v9989_v47  ;;  %v9998_v51 = vsel %vm278_vm2, %v9989_v47, 0.0 }
  0x8f   :  { %v445_v56 = vadd.f32 %v9998_v51, %v10010_v55 }
  0x90   :  { %v10015_v58 = vsel %vm278_vm2, %v247_v50, 0.0 }
  0x91   :  { %v446_v62 = vrot.slane %v445_v56, 4  ;;  %v573_v63 = vadd.f32 %v10015_v58, %v10021_v61 }
  0x93   :  { %v171_v40 = vpop.f32.mrf.mxu0  ;;  %v574_v3 = vrot.slane %v573_v63, 4  ;;  %v447_v6 = vadd.f32 %v446_v62, %v445_v56  ;;  %v78_v62 = vld [vmem:[%s14859_s0 + $0xd8] sm:$0xff] }
  0x94   :  { %v10026_v0 = vadd.f32 %v9986_v46, %v171_v40 }
  0x95   :  { %v575_v11 = vadd.f32 %v574_v3, %v573_v63  ;;  %v448_v13 = vrot.slane %v447_v6, 2 }
  0x96   :  { %8141 = vmatmul.msk.bf16.gmra.mxu0 %vm104_vm1, %v93_v39  ;;  %15034 = vst [vmem:[#allocation5_spill] sm:$0xff] %v10026_v0  ;;  %v248_v4 = vmul.f32 %v10026_v0, %v10026_v0  ;;  %v10039_v5 = vsel %vm278_vm2, %v10026_v0, 0.0 }
  0x97   :  { %v576_v21 = vrot.slane %v575_v11, 2  ;;  %v449_v23 = vadd.f32 %v448_v13, %v447_v6 }
  0x98   :  { %v10050_v12 = vsel %vm278_vm2, %v248_v4, 0.0 }
  0x99   :  { %v450_v32 = vrot.slane %v449_v23, 1  ;;  %v577_v35 = vadd.f32 %v576_v21, %v575_v11 }
  0x9b   :  { %v173_v41 = vpop.f32.mrf.mxu0 }
  0x9c   :  { %v10018_v60 = vadd.f32 %v9986_v46, %v173_v41 }
  0x9e   :  { %15033 = vst [vmem:[#allocation4_spill] sm:$0xff] %v10018_v60  ;;  %v249_v1 = vmul.f32 %v10018_v60, %v10018_v60  ;;  %v10033_v2 = vsel %vm278_vm2, %v10018_v60, 0.0 }
  0x9f   :  { %v452_v7 = vadd.f32 %v10033_v2, %v10039_v5 }
  0xa0   :  { %v10044_v9 = vsel %vm278_vm2, %v249_v1, 0.0 }
  0xa1   :  { %v453_v14 = vrot.slane %v452_v7, 4  ;;  %v580_v15 = vadd.f32 %v10044_v9, %v10050_v12 }
  0xa3   :  { %v176_v45 = vpop.f32.mrf.mxu0  ;;  %v581_v24 = vrot.slane %v580_v15, 4  ;;  %v454_v28 = vadd.f32 %v453_v14, %v452_v7 }
  0xa4   :  { %v10055_v16 = vadd.f32 %v9986_v46, %v176_v45  ;;  %v578_v45 = vrot.slane %v577_v35, 1 }
  0xa5   :  { %v582_v33 = vadd.f32 %v581_v24, %v580_v15  ;;  %v455_v36 = vrot.slane %v454_v28, 2 }
  0xa6   :  { %8142 = vmatmul.msk.bf16.gmra.mxu0 %vm104_vm1, %v94_v44  ;;  %15036 = vst [vmem:[#allocation7_spill] sm:$0xff] %v10055_v16  ;;  %v250_v25 = vmul.f32 %v10055_v16, %v10055_v16  ;;  %v10073_v26 = vsel %vm278_vm2, %v10055_v16, 0.0  ;;  %v451_v44 = vadd.f32 %v450_v32, %v449_v23  ;;  %v579_v1 = vadd.f32 %v578_v45, %v577_v35 }
  0xa7   :  { %v583_v42 = vrot.slane %v582_v33, 2 }
  0xa8   :  { %v10085_v34 = vsel %vm278_vm2, %v250_v25, 0.0  ;;  %v10115_v63 = vmul.f32 0.0625, %v451_v44  ;;  %v685_v17 = vmul.f32 0.0625, %v579_v1 }
  0xa9   :  { %v584_v4 = vadd.f32 %v583_v42, %v582_v33 }
  0xaa   :  { %v701_v18 = vmul.f32 %v10115_v63, %v10115_v63 }
  0xab   :  { %v178_v48 = vpop.f32.mrf.mxu0  ;;  %v585_v21 = vrot.slane %v584_v4, 1 }
  0xac   :  { %v10047_v10 = vadd.f32 %v9986_v46, %v178_v48  ;;  %v456_v48 = vadd.f32 %v455_v36, %v454_v28 }
  0xad   :  { %v586_v33 = vadd.f32 %v585_v21, %v584_v4 }
  0xae   :  { %15035 = vst [vmem:[#allocation6_spill] sm:$0xff] %v10047_v10  ;;  %v251_v19 = vmul.f32 %v10047_v10, %v10047_v10  ;;  %v10067_v20 = vsel %vm278_vm2, %v10047_v10, 0.0  ;;  %v457_v3 = vrot.slane %v456_v48, 1 }
  0xaf   :  { %v459_v29 = vadd.f32 %v10067_v20, %v10073_v26 }
  0xb0   :  { %v10078_v30 = vsel %vm278_vm2, %v251_v19, 0.0  ;;  %v458_v19 = vadd.f32 %v457_v3, %v456_v48  ;;  %v686_v48 = vmul.f32 0.0625, %v586_v33 }
  0xb1   :  { %v587_v37 = vadd.f32 %v10078_v30, %v10085_v34  ;;  %v460_v39 = vrot.slane %v459_v29, 4 }
  0xb2   :  { %v10128_v32 = vmul.f32 0.0625, %v458_v19 }
  0xb3   :  { %v181_v59 = vpop.f32.mrf.mxu0  ;;  %v588_v50 = vrot.slane %v587_v37, 4  ;;  %v461_v54 = vadd.f32 %v460_v39, %v459_v29  ;;  %v717_v29 = vsub.f32 %v685_v17, %v701_v18 }
  0xb4   :  { %v10090_v38 = vadd.f32 %v9986_v46, %v181_v59  ;;  %v77_v59 = vld [vmem:[%s14859_s0 + $0xd0] sm:$0xff] }
  0xb5   :  { %v462_v7 = vrot.slane %v461_v54, 2  ;;  %v97_v14 = vpack.c.bf16 %v78_v62, %v77_v59  ;;  %v733_v45 = vmul.f32 1.0666667, %v717_v29 }
  0xb6   :  { %8143 = vmatmul.msk.bf16.gmra.mxu0 %vm104_vm1, %v95_v57  ;;  %15038 = vst [vmem:[#allocation9_spill] sm:$0xff] %v10090_v38  ;;  %v252_v52 = vmul.f32 %v10090_v38, %v10090_v38  ;;  %v10102_v53 = vsel %vm278_vm2, %v10090_v38, 0.0 }
  0xb7   :  { %v749_v4 = vmax.f32 %v733_v45, 0.0 }
  0xb8   :  { %v10118_v6 = vsel %vm278_vm2, %v252_v52, 0.0 }
  0xbb   :  { %v183_v8 = vpop.f32.mrf.mxu0 }
  0xbc   :  { %v10081_v31 = vadd.f32 %v9986_v46, %v183_v8  ;;  %v589_v8 = vadd.f32 %v588_v50, %v587_v37  ;;  %v702_v50 = vmul.f32 %v10128_v32, %v10128_v32 }
  0xbe   :  { %15037 = vst [vmem:[#allocation8_spill] sm:$0xff] %v10081_v31  ;;  %v253_v40 = vmul.f32 %v10081_v31, %v10081_v31  ;;  %v10096_v41 = vsel %vm278_vm2, %v10081_v31, 0.0  ;;  %v590_v23 = vrot.slane %v589_v8, 2 }
  0xbf   :  { %v466_v56 = vadd.f32 %v10096_v41, %v10102_v53 }
  0xc0   :  { %v10107_v57 = vsel %vm278_vm2, %v253_v40, 0.0  ;;  %v591_v37 = vadd.f32 %v590_v23, %v589_v8 }
  0xc1   :  { %v594_v11 = vadd.f32 %v10107_v57, %v10118_v6  ;;  %v467_v13 = vrot.slane %v466_v56, 4 }
  0xc3   :  { %v186_v27 = vpop.f32.mrf.mxu0  ;;  %v595_v24 = vrot.slane %v594_v11, 4  ;;  %v468_v25 = vadd.f32 %v467_v13, %v466_v56  ;;  %v592_v56 = vrot.slane %v591_v37, 1 }
  0xc4   :  { %v10131_v35 = vadd.f32 %v9986_v46, %v186_v27 }
  0xc5   :  { %v469_v39 = vrot.slane %v468_v25, 2  ;;  %v596_v40 = vadd.f32 %v595_v24, %v594_v11  ;;  %v10167_v24 = vadd.f32 1e-05, %v749_v4 }
  0xc6   :  { %8144 = vmatmul.msk.bf16.gmra.mxu0 %vm104_vm1, %v96_v22  ;;  %v463_v22 = vadd.f32 %v462_v7, %v461_v54  ;;  %15040 = vst [vmem:[#allocation11_spill] sm:$0xff] %v10131_v35  ;;  %v254_v27 = vmul.f32 %v10131_v35, %v10131_v35  ;;  %v10145_v52 = vsel %vm278_vm2, %v10131_v35, 0.0  ;;  %v718_v7 = vsub.f32 %v686_v48, %v702_v50 }
  0xc7   :  { %v470_v59 = vadd.f32 %v469_v39, %v468_v25  ;;  %v597_v62 = vrot.slane %v596_v40, 2  ;;  %9254 = vrsqrt.f32 %v10167_v24  ;;  %vm787_vm4 = vweird.f32 %v10167_v24 }
  0xc8   :  { %v464_v36 = vrot.slane %v463_v22, 1  ;;  %v10153_v8 = vsel %vm278_vm2, %v254_v27, 0.0  ;;  %v734_v25 = vmul.f32 1.0666667, %v718_v7 }
  0xc9   :  { %v471_v18 = vrot.slane %v470_v59, 1  ;;  %v598_v19 = vadd.f32 %v597_v62, %v596_v40 }
  0xca   :  { %v465_v54 = vadd.f32 %v464_v36, %v463_v22 }
  0xcb   :  { %v188_v43 = vpop.f32.mrf.mxu0  ;;  %v472_v40 = vadd.f32 %v471_v18, %v470_v59 }
  0xcc   :  { %v10125_v28 = vadd.f32 %v9986_v46, %v188_v43  ;;  %v10158_v13 = vmul.f32 0.0625, %v465_v54  ;;  %v750_v54 = vmax.f32 %v734_v25, 0.0 }
  0xce   :  { %15039 = vst [vmem:[#allocation10_spill] sm:$0xff] %v10125_v28  ;;  %v255_v42 = vmul.f32 %v10125_v28, %v10125_v28  ;;  %v10137_v43 = vsel %vm278_vm2, %v10125_v28, 0.0 }
  0xcf   :  { %v473_v1 = vadd.f32 %v10137_v43, %v10145_v52 }
  0xd0   :  { %v10150_v3 = vsel %vm278_vm2, %v255_v42, 0.0 }
  0xd1   :  { %v601_v17 = vadd.f32 %v10150_v3, %v10153_v8  ;;  %v474_v21 = vrot.slane %v473_v1, 4 }
  0xd3   :  { %v191_v15 = vpop.f32.mrf.mxu0  ;;  %v602_v39 = vrot.slane %v601_v17, 4  ;;  %v475_v42 = vadd.f32 %v474_v21, %v473_v1 }
  0xd4   :  { %v10163_v22 = vadd.f32 %v9986_v46, %v191_v15  ;;  %v599_v15 = vrot.slane %v598_v19, 1 }
  0xd5   :  { %v476_v62 = vrot.slane %v475_v42, 2  ;;  %v603_v1 = vadd.f32 %v602_v39, %v601_v17 }
  0xd6   :  { %8145 = vmatmul.msk.bf16.gmra.mxu0 %vm104_vm1, %v97_v14  ;;  %v593_v14 = vadd.f32 %v592_v56, %v591_v37  ;;  %15042 = vst [vmem:[#allocation13_spill] sm:$0xff] %v10163_v22  ;;  %v703_v37 = vmul.f32 %v10158_v13, %v10158_v13  ;;  %v10181_v45 = vsel %vm278_vm2, %v10163_v22, 0.0  ;;  %v10189_v56 = vmul.f32 0.0625, %v472_v40 }
  0xd7   :  { %v600_v59 = vadd.f32 %v599_v15, %v598_v19  ;;  %v477_v19 = vadd.f32 %v476_v62, %v475_v42 }
  0xd8   :  { %v687_v36 = vmul.f32 0.0625, %v593_v14  ;;  %v704_v25 = vmul.f32 %v10189_v56, %v10189_v56 }
  0xda   :  { %v719_v27 = vsub.f32 %v687_v36, %v703_v37  ;;  %v688_v36 = vmul.f32 0.0625, %v600_v59  ;;  %v604_v37 = vrot.slane %v603_v1, 2 }
  0xdb   :  { %v193_v44 = vpop.f32.mrf.mxu0 }
  0xdc   :  { %v10156_v11 = vadd.f32 %v9986_v46, %v193_v44  ;;  %v256_v44 = vmul.f32 %v10163_v22, %v10163_v22  ;;  %v735_v21 = vmul.f32 1.0666667, %v719_v27  ;;  %v478_v27 = vrot.slane %v477_v19, 1 }
  0xde   :  { %15041 = vst [vmem:[#allocation12_spill] sm:$0xff] %v10156_v11  ;;  %v257_v29 = vmul.f32 %v10156_v11, %v10156_v11  ;;  %v10173_v33 = vsel %vm278_vm2, %v10156_v11, 0.0  ;;  %v10192_v4 = vsel %vm278_vm2, %v256_v44, 0.0  ;;  %v10196_v11 = vadd.f32 1e-05, %v750_v54 }
  0xdf   :  { %15043 = vst [vmem:[#allocation14_spill] sm:$0xff] %v10173_v33  ;;  %v480_v48 = vadd.f32 %v10173_v33, %v10181_v45  ;;  %v751_v40 = vmax.f32 %v735_v21, 0.0  ;;  %v720_v44 = vsub.f32 %v688_v36, %v704_v25  ;;  %v605_v54 = vadd.f32 %v604_v37, %v603_v1 }
  0xe0   :  { %v10187_v50 = vsel %vm278_vm2, %v257_v29, 0.0  ;;  %v10198_v29 = vpop.eup %9254  ;;  %9256 = vrsqrt.f32 %v10196_v11  ;;  %v479_v62 = vadd.f32 %v478_v27, %v477_v19  ;;  %vm797_vm7 = vweird.f32 %v10196_v11 }
  0xe1   :  { %15044 = vst [vmem:[#allocation15_spill] sm:$0xff] %v10187_v50  ;;  %v608_v7 = vadd.f32 %v10187_v50, %v10192_v4  ;;  %v481_v18 = vrot.slane %v480_v48, 4  ;;  %v782_v15 = vmul.f32 %v10198_v29, %v10167_v24  ;;  %v10207_v35 = vadd.f32 1e-05, %v751_v40 }
  0xe2   :  { %v736_v31 = vmul.f32 1.0666667, %v720_v44  ;;  %v10213_v1 = vmul.f32 0.0625, %v479_v62  ;;  %vm788_vm3 = vweird.f32 %v10198_v29 }
  0xe3   :  { %v10165_v23 = vpop.f32.mrf.mxu0  ;;  %v609_v17 = vrot.slane %v608_v7, 4  ;;  %v482_v39 = vadd.f32 %v481_v18, %v480_v48  ;;  %v783_v42 = vmul.f32 %v10198_v29, %v782_v15  ;;  %v606_v48 = vrot.slane %v605_v54, 1  ;;  %vm789_vm5 = vmor %vm787_vm4, %vm788_vm3 }
  0xe4   :  { %9258 = vrsqrt.f32 %v10207_v35  ;;  %v752_v36 = vmax.f32 %v736_v31, 0.0  ;;  %15045 = vst [vmem:[#allocation16_spill] sm:$0xff] %v10213_v1  ;;  %vm807_vm10 = vweird.f32 %v10207_v35 }
  0xe5   :  { %v483_v28 = vrot.slane %v482_v39, 2  ;;  %v610_v59 = vadd.f32 %v609_v17, %v608_v7  ;;  %v784_v25 = vmul.f32 0.5, %v783_v42  ;;  %v607_v37 = vadd.f32 %v606_v48, %v605_v54 }
  0xe6   :  { %v10210_v18 = vpop.eup %9256  ;;  %v10219_v19 = vadd.f32 1e-05, %v752_v36  ;;  %v10236_v36 = vadd.f32 %v9986_v46, %v10165_v23  ;;  %v10254_v23 = vld [vmem:[%s14861_s5] sm:$0x1] }
  0xe7   :  { %v484_v21 = vadd.f32 %v483_v28, %v482_v39  ;;  %v611_v38 = vrot.slane %v610_v59, 2  ;;  %v792_v7 = vmul.f32 %v10210_v18, %v10196_v11  ;;  %v785_v44 = vsub.f32 1.5, %v784_v25 }
  0xe8   :  { %v689_v27 = vmul.f32 0.0625, %v607_v37  ;;  %v705_v28 = vmul.f32 %v10213_v1, %v10213_v1  ;;  %9260 = vrsqrt.f32 %v10219_v19  ;;  %15047 = vst [vmem:[#allocation18_spill] sm:$0xff] %v10236_v36  ;;  %vm798_vm6 = vweird.f32 %v10210_v18 }
  0xe9   :  { %v485_v40 = vrot.slane %v484_v21, 1  ;;  %v612_v15 = vadd.f32 %v611_v38, %v610_v59  ;;  %v793_v31 = vmul.f32 %v10210_v18, %v792_v7  ;;  %v786_v59 = vmul.f32 %v10198_v29, %v785_v44  ;;  %v10249_v44 = vpop.f32.mrf.mxu3  ;;  %vm799_vm8 = vmor %vm797_vm7, %vm798_vm6 }
  0xea   :  { %v10223_v39 = vpop.eup %9258  ;;  %v721_v48 = vsub.f32 %v689_v27, %v705_v28  ;;  %15050 = vst [vmem:[#allocation21_spill] sm:$0xff] %v10249_v44  ;;  %v258_v28 = vmul.f32 %v10236_v36, %v10236_v36  ;;  %vm817_vm13 = vweird.f32 %v10219_v19 }
  0xeb   :  { %v198_v14 = vpop.f32.mrf.mxu0  ;;  %v486_v42 = vadd.f32 %v485_v40, %v484_v21  ;;  %v613_v54 = vrot.slane %v612_v15, 1  ;;  %v802_v38 = vmul.f32 %v10223_v39, %v10207_v35  ;;  %v794_v25 = vmul.f32 0.5, %v793_v31 }
  0xec   :  { %v10227_v62 = vadd.f32 %v9986_v46, %v198_v14  ;;  %v790_v27 = vsel %vm789_vm5, %v10198_v29, %v786_v59  ;;  %v10262_v31 = vsel %vm278_vm2, %v10236_v36, 0.0  ;;  %v10275_v36 = vsel %vm278_vm2, %v258_v28, 0.0 }
  0xed   :  { %v10241_v14 = vmul.f32 0.0625, %v486_v42  ;;  %v614_v37 = vadd.f32 %v613_v54, %v612_v15  ;;  %v803_v24 = vmul.f32 %v10223_v39, %v802_v38  ;;  %v737_v15 = vmul.f32 1.0666667, %v721_v48  ;;  %15051 = vst [vmem:[#allocation22_spill] sm:$0xff] %v10262_v31 }
  0xee   :  { %15046 = vst [vmem:[#allocation17_spill] sm:$0xff] %v10227_v62  ;;  %v259_v7 = vmul.f32 %v10227_v62, %v10227_v62  ;;  %v10247_v40 = vsel %vm278_vm2, %v10227_v62, 0.0  ;;  %v795_v42 = vsub.f32 1.5, %v794_v25  ;;  %v10264_v54 = vpop.eup %9260  ;;  %v942_v59 = vmul.f32 %v10254_v23, %v790_v27  ;;  %v10290_v27 = vld [vmem:[%s14862_s6] sm:$0x1] }
  0xef   :  { %15048 = vst [vmem:[#allocation19_spill] sm:$0xff] %v10241_v14  ;;  %v690_v62 = vmul.f32 0.0625, %v614_v37  ;;  %v706_v1 = vmul.f32 %v10241_v14, %v10241_v14  ;;  %v487_v38 = vadd.f32 %v10247_v40, %v10262_v31  ;;  %v804_v48 = vmul.f32 0.5, %v803_v24 }
  0xf0   :  { %15049 = vst [vmem:[#allocation20_spill] sm:$0xff] %v10247_v40  ;;  %v10271_v29 = vsel %vm278_vm2, %v259_v7, 0.0  ;;  %v753_v44 = vmax.f32 %v737_v15, 0.0  ;;  %v812_v25 = vmul.f32 %v10264_v54, %v10219_v19  ;;  %v796_v37 = vmul.f32 %v10210_v18, %v795_v42 }
  0xf1   :  { %15052 = vst [vmem:[#allocation23_spill] sm:$0xff] %v10271_v29  ;;  %v615_v14 = vadd.f32 %v10271_v29, %v10275_v36  ;;  %v722_v7 = vsub.f32 %v690_v62, %v706_v1  ;;  %v488_v31 = vrot.slane %v487_v38, 4  ;;  %v959_v24 = vmul.f32 %v942_v59, %v10115_v63  ;;  %v10296_v1 = vpop.f32.mrf.mxu3 }
  0xf2   :  { %15053 = vst [vmem:[#allocation24_spill] sm:$0xff] %v10275_v36  ;;  %v805_v15 = vsub.f32 1.5, %v804_v48  ;;  %v10292_v28 = vadd.f32 1e-05, %v753_v44  ;;  %v813_v42 = vmul.f32 %v10264_v54, %v812_v25  ;;  %v800_v29 = vsel %vm799_vm8, %v10210_v18, %v796_v37 }
  0xf3   :  { %v10205_v22 = vpop.f32.mrf.mxu0  ;;  %v616_v36 = vrot.slane %v615_v14, 4  ;;  %v738_v62 = vmul.f32 1.0666667, %v722_v7  ;;  %v489_v63 = vadd.f32 %v488_v31, %v487_v38  ;;  %v975_v11 = vsub.f32 %v10290_v27, %v959_v24 }
  0xf4   :  { %v806_v50 = vmul.f32 %v10223_v39, %v805_v15  ;;  %vm808_vm9 = vweird.f32 %v10223_v39  ;;  %v10302_v48 = vmul.f32 %v10254_v23, %v800_v29  ;;  %9262 = vrsqrt.f32 %v10292_v28 }
  0xf5   :  { %v814_v44 = vmul.f32 0.5, %v813_v42  ;;  %v1055_v25 = vperm.slane %v942_v59, 0  ;;  %v754_v18 = vmax.f32 %v738_v62, 0.0  ;;  %v490_v37 = vrot.slane %v489_v63, 2  ;;  %vm10316_vm11 = vmor %vm807_vm10, %vm808_vm9 }
  0xf6   :  { %v617_v31 = vadd.f32 %v616_v36, %v615_v14  ;;  %v281_v38 = vadd.f32 %v10039_v5, %v10010_v55  ;;  %v345_v7 = vadd.f32 %v10050_v12, %v10021_v61  ;;  %v312_v29 = vadd.f32 %v10033_v2, %v9998_v51 }
  0xf7   :  { %v376_v24 = vadd.f32 %v10044_v9, %v10015_v58  ;;  %v810_v55 = vsel %vm10316_vm11, %v10223_v39, %v806_v50  ;;  %v1119_v5 = vperm.slane %v975_v11, 0  ;;  %v960_v61 = vmul.f32 %v10302_v48, %v10128_v32 }
  0xf8   :  { %v283_v51 = vadd.f32 %v10073_v26, %v281_v38  ;;  %v347_v58 = vadd.f32 %v10085_v34, %v345_v7  ;;  %v815_v2 = vsub.f32 1.5, %v814_v44  ;;  %v1071_v9 = vmul.f32 %v1055_v25, %v9992_v49 }
  0xf9   :  { %v10338_v36 = vadd.f32 1e-05, %v754_v18  ;;  %v491_v50 = vadd.f32 %v490_v37, %v489_v63  ;;  %v618_v39 = vrot.slane %v617_v31, 2  ;;  %v314_v14 = vadd.f32 %v10067_v20, %v312_v29  ;;  %v241_v42 = vpop.f32.mrf.mxu3 }
  0xfa   :  { %v10332_v12 = vpop.eup %9262  ;;  %v378_v32 = vadd.f32 %v10078_v30, %v376_v24  ;;  %v285_v26 = vadd.f32 %v10102_v53, %v283_v51  ;;  %v10344_v34 = vmul.f32 %v10254_v23, %v810_v55  ;;  %v10349_v62 = vadd.f32 %v1119_v5, %v1071_v9 }
  0xfb   :  { %v10217_v17 = vpop.f32.mrf.mxu0  ;;  %v976_v63 = vsub.f32 %v10290_v27, %v960_v61  ;;  %v816_v30 = vmul.f32 %v10264_v54, %v815_v2  ;;  %vm818_vm12 = vweird.f32 %v10264_v54  ;;  %v822_v53 = vmul.f32 %v10332_v12, %v10292_v28 }
  0xfc   :  { %v10322_v35 = vadd.f32 %v9986_v46, %v10217_v17  ;;  %v10336_v17 = vadd.f32 %v9986_v46, %v10205_v22  ;;  %v1072_v22 = vmul.f32 %v1055_v25, %v9989_v47  ;;  %15058 = vst [vmem:[#allocation27_spill] sm:$0xff] %v10349_v62  ;;  %9264 = vrsqrt.f32 %v10338_v36  ;;  %vm10378_vm14 = vmor %vm817_vm13, %vm818_vm12 }
  0xfd   :  { %v492_v25 = vrot.slane %v491_v50, 1  ;;  %v619_v18 = vadd.f32 %v618_v39, %v617_v31  ;;  %v961_v38 = vmul.f32 %v10344_v34, %v10158_v13  ;;  %v349_v29 = vadd.f32 %v10118_v6, %v347_v58 }
  0xfe   :  { %15056 = vst [vmem:[#allocation25_spill] sm:$0xff] %v10322_v35  ;;  %v261_v15 = vmul.f32 %v10322_v35, %v10322_v35  ;;  %v10354_v20 = vsel %vm278_vm2, %v10322_v35, 0.0  ;;  %v260_v11 = vmul.f32 %v10336_v17, %v10336_v17  ;;  %v10367_v37 = vsel %vm278_vm2, %v10336_v17, 0.0 }
  0xff   :  { %15057 = vst [vmem:[#allocation26_spill] sm:$0xff] %v10336_v17  ;;  %v10372_v7 = vadd.f32 %v1119_v5, %v1072_v22  ;;  %v1056_v31 = vperm.slane %v10302_v48, 0  ;;  %v494_v55 = vadd.f32 %v10354_v20, %v10367_v37  ;;  %v316_v19 = vadd.f32 %v10096_v41, %v314_v14 }
 0x100   :  { %v10376_v24 = vsel %vm278_vm2, %v261_v15, 0.0  ;;  %v380_v13 = vadd.f32 %v10107_v57, %v378_v32  ;;  %v820_v6 = vsel %vm10378_vm14, %v10264_v54, %v816_v30  ;;  %v1120_v5 = vperm.slane %v976_v63, 0  ;;  %v15072_v57 = vld [vmem:[#allocation21_spill] sm:$0xff] }
 0x101   :  { %15059 = vst [vmem:[#allocation28_spill] sm:$0xff] %v10372_v7  ;;  %v10391_v61 = vsel %vm278_vm2, %v260_v11, 0.0  ;;  %v823_v51 = vmul.f32 %v10332_v12, %v822_v53  ;;  %v493_v58 = vadd.f32 %v492_v25, %v491_v50  ;;  %v620_v2 = vrot.slane %v619_v18, 1  ;;  %v243_v30 = vpop.f32.mrf.mxu3  ;;  %v15084_v7 = vld [vmem:[#allocation23_spill] sm:$0xff] }
 0x102   :  { %v287_v48 = vadd.f32 %v10145_v52, %v285_v26  ;;  %v622_v9 = vadd.f32 %v10376_v24, %v10391_v61  ;;  %v977_v41 = vsub.f32 %v10290_v27, %v961_v38  ;;  %v10400_v39 = vpop.eup %9264  ;;  %v351_v54 = vadd.f32 %v10153_v8, %v349_v29 }
 0x103   :  { %v10238_v21 = vpop.f32.mrf.mxu0  ;;  %v1057_v14 = vperm.slane %v10344_v34, 0  ;;  %v1073_v32 = vmul.f32 %v1056_v31, %v10026_v0  ;;  %v495_v50 = vrot.slane %v494_v55, 4  ;;  %v318_v15 = vadd.f32 %v10137_v43, %v316_v19  ;;  %v15082_v0 = vld [vmem:[#allocation24_spill] sm:$0xff] }
 0x104   :  { %v382_v52 = vadd.f32 %v10150_v3, %v380_v13  ;;  %v945_v26 = vmul.f32 %v10254_v23, %v820_v6  ;;  %v1074_v22 = vmul.f32 %v1056_v31, %v10018_v60  ;;  %v824_v11 = vmul.f32 0.5, %v823_v51 }
 0x105   :  { %v10411_v53 = vadd.f32 %v1120_v5, %v1073_v32  ;;  %v10413_v8 = vmul.f32 0.0625, %v493_v58  ;;  %v621_v34 = vadd.f32 %v620_v2, %v619_v18  ;;  %v623_v25 = vrot.slane %v622_v9, 4 }
 0x106   :  { %v1121_v38 = vperm.slane %v977_v41, 0  ;;  %v10415_v29 = vadd.f32 %v1120_v5, %v1074_v22  ;;  %v832_v43 = vmul.f32 %v10400_v39, %v10338_v36  ;;  %v289_v3 = vadd.f32 %v10181_v45, %v287_v48 }
 0x107   :  { %15062 = vst [vmem:[#allocation29_spill] sm:$0xff] %v10411_v53  ;;  %v1075_v31 = vmul.f32 %v1057_v14, %v10055_v16  ;;  %v496_v19 = vadd.f32 %v495_v50, %v494_v55  ;;  %v10426_v13 = vadd.f32 %v9986_v46, %v241_v42  ;;  %v10429_v18 = vadd.f32 %v9986_v46, %v243_v30 }
 0x108   :  { %15063 = vst [vmem:[#allocation30_spill] sm:$0xff] %v10415_v29  ;;  %v962_v6 = vmul.f32 %v945_v26, %v10189_v56  ;;  %v1076_v5 = vmul.f32 %v1057_v14, %v10047_v10  ;;  %v10435_v45 = vadd.f32 %v9986_v46, %v10238_v21  ;;  %v825_v51 = vsub.f32 1.5, %v824_v11 }
 0x109   :  { %15065 = vst [vmem:[#allocation32_spill] sm:$0xff] %v10426_v13  ;;  %v707_v58 = vmul.f32 %v10413_v8, %v10413_v8  ;;  %v353_v55 = vadd.f32 %v10192_v4, %v351_v54  ;;  %v10440_v42 = vadd.f32 %v1121_v38, %v1075_v31  ;;  %v833_v2 = vmul.f32 %v10400_v39, %v832_v43 }
 0x10a   :  { %15066 = vst [vmem:[#allocation33_spill] sm:$0xff] %v10429_v18  ;;  %v624_v48 = vadd.f32 %v623_v25, %v622_v9  ;;  %v1058_v41 = vperm.slane %v945_v26, 0  ;;  %v10445_v14 = vadd.f32 %v1121_v38, %v1076_v5  ;;  %v497_v21 = vrot.slane %v496_v19, 2  ;;  %v15070_v5 = vld [vmem:[#allocation14_spill] sm:$0xff] }
 0x10b   :  { %v10283_v40 = vpop.f32.mrf.mxu0  ;;  %15067 = vst [vmem:[#allocation34_spill] sm:$0xff] %v10435_v45  ;;  %v10453_v50 = vsel %vm278_vm2, %v10426_v13, 0.0  ;;  %v10457_v4 = vsel %vm278_vm2, %v10429_v18, 0.0  ;;  %v978_v9 = vsub.f32 %v10290_v27, %v962_v6  ;;  %v262_v54 = vmul.f32 %v10435_v45, %v10435_v45 }
 0x10c   :  { %v10422_v59 = vadd.f32 %v9986_v46, %v10283_v40  ;;  %v691_v40 = vmul.f32 0.0625, %v621_v34  ;;  %15068 = vst [vmem:[#allocation35_spill] sm:$0xff] %v10440_v42  ;;  %v826_v22 = vmul.f32 %v10332_v12, %v825_v51  ;;  %vm828_vm15 = vweird.f32 %v10332_v12 }
 0x10d   :  { %15069 = vst [vmem:[#allocation36_spill] sm:$0xff] %v10445_v14  ;;  %v10468_v11 = vsel %vm278_vm2, %v10435_v45, 0.0  ;;  %v834_v34 = vmul.f32 0.5, %v833_v2  ;;  %vm827_vm0 = vweird.f32 %v10292_v28  ;;  %v625_v25 = vrot.slane %v624_v48, 2 }
 0x10e   :  { %15064 = vst [vmem:[#allocation31_spill] sm:$0xff] %v10422_v59  ;;  %v263_v56 = vmul.f32 %v10422_v59, %v10422_v59  ;;  %v10449_v32 = vsel %vm278_vm2, %v10422_v59, 0.0  ;;  %v723_v30 = vsub.f32 %v691_v40, %v707_v58  ;;  %v498_v31 = vadd.f32 %v497_v21, %v496_v19  ;;  %v15071_v40 = vld [vmem:[#allocation15_spill] sm:$0xff]  ;;  %vm10486_vm1 = vmor %vm827_vm0, %vm828_vm15  ;;  %v15077_v21 = vld [vmem:[#allocation9_spill] sm:$0xff] }
 0x10f   :  { %v501_v43 = vadd.f32 %v10449_v32, %v10468_v11  ;;  %v10478_v6 = vadd.f32 %v10457_v4, %v10453_v50  ;;  %v320_v51 = vadd.f32 %v15070_v5, %v318_v15  ;;  %v384_v58 = vadd.f32 %v15071_v40, %v382_v52  ;;  %v15078_v5 = vld [vmem:[#allocation8_spill] sm:$0xff] }
 0x110   :  { %v10472_v38 = vsel %vm278_vm2, %v263_v56, 0.0  ;;  %v10484_v2 = vadd.f32 %v9986_v46, %v15072_v57  ;;  %v1122_v28 = vperm.slane %v978_v9, 0  ;;  %v10491_v59 = vsel %vm278_vm2, %v262_v54, 0.0 }
 0x111   :  { %v10495_v19 = vadd.f32 %v9986_v46, %v10296_v1  ;;  %v830_v15 = vsel %vm10486_vm1, %v10332_v12, %v826_v22  ;;  %v739_v52 = vmul.f32 1.0666667, %v723_v30  ;;  %v629_v57 = vadd.f32 %v10472_v38, %v10491_v59  ;;  %v15081_v30 = vld [vmem:[#allocation22_spill] sm:$0xff] }
 0x112   :  { %15073 = vst [vmem:[#allocation14_spill] sm:$0xff] %v10484_v2  ;;  %v1077_v9 = vmul.f32 %v1058_v41, %v15077_v21  ;;  %v1078_v40 = vmul.f32 %v1058_v41, %v15078_v5  ;;  %v835_v45 = vsub.f32 1.5, %v834_v34  ;;  %v502_v35 = vrot.slane %v501_v43, 4 }
 0x113   :  { %v10305_v33 = vpop.f32.mrf.mxu0  ;;  %15076 = vst [vmem:[#allocation15_spill] sm:$0xff] %v10495_v19  ;;  %v499_v17 = vrot.slane %v498_v31, 1  ;;  %v626_v1 = vadd.f32 %v625_v25, %v624_v48  ;;  %v274_v29 = vmul.f32 %v10484_v2, %v10484_v2  ;;  %v946_v22 = vmul.f32 %v10254_v23, %v830_v15  ;;  %v15083_v48 = vld [vmem:[#allocation20_spill] sm:$0xff] }
 0x114   :  { %v10508_v56 = vadd.f32 %v1122_v28, %v1077_v9  ;;  %v10510_v12 = vadd.f32 %v1122_v28, %v1078_v40  ;;  %v291_v53 = vadd.f32 %v15081_v30, %v289_v3  ;;  %v355_v41 = vadd.f32 %v15082_v0, %v353_v55 }
 0x115   :  { %v275_v54 = vmul.f32 %v10495_v19, %v10495_v19  ;;  %v755_v62 = vmax.f32 %v739_v52, 0.0  ;;  %v322_v25 = vadd.f32 %v15083_v48, %v320_v51  ;;  %v386_v60 = vadd.f32 %v15084_v7, %v384_v58  ;;  %v15085_v52 = vld [vmem:[#allocation16_spill] sm:$0xff] }
 0x116   :  { %15079 = vst [vmem:[#allocation21_spill] sm:$0xff] %v10508_v56  ;;  %v630_v9 = vrot.slane %v629_v57, 4  ;;  %vm838_vm3 = vweird.f32 %v10400_v39  ;;  %v836_v28 = vmul.f32 %v10400_v39, %v835_v45  ;;  %v503_v15 = vadd.f32 %v502_v35, %v501_v43  ;;  %v15092_v56 = vld [vmem:[#allocation19_spill] sm:$0xff] }
 0x117   :  { %15080 = vst [vmem:[#allocation37_spill] sm:$0xff] %v10510_v12  ;;  %v500_v40 = vadd.f32 %v499_v17, %v498_v31  ;;  %v627_v3 = vrot.slane %v626_v1, 1  ;;  %v10525_v0 = vsel %vm278_vm2, %v10484_v2, 0.0  ;;  %v10528_v55 = vsel %vm278_vm2, %v274_v29, 0.0 }
 0x118   :  { %v963_v7 = vmul.f32 %v946_v22, %v15085_v52  ;;  %v10534_v58 = vsel %vm278_vm2, %v275_v54, 0.0  ;;  %v276_v35 = vmul.f32 %v10426_v13, %v10426_v13  ;;  %vm837_vm4 = vweird.f32 %v10338_v36 }
 0x119   :  { %v10539_v17 = vadd.f32 1e-05, %v755_v62  ;;  %v293_v45 = vadd.f32 %v10367_v37, %v291_v53  ;;  %v277_v43 = vmul.f32 %v10429_v18, %v10429_v18  ;;  %vm10550_vm5 = vmor %vm837_vm4, %vm838_vm3  ;;  %v631_v54 = vadd.f32 %v630_v9, %v629_v57 }
 0x11a   :  { %v840_v36 = vsel %vm10550_vm5, %v10400_v39, %v836_v28  ;;  %v504_v62 = vrot.slane %v503_v15, 2  ;;  %v10557_v37 = vmul.f32 0.0625, %v500_v40  ;;  %v628_v53 = vadd.f32 %v627_v3, %v626_v1 }
 0x11b   :  { %v10362_v44 = vpop.f32.mrf.mxu0  ;;  %v10565_v30 = vsel %vm278_vm2, %v10495_v19, 0.0  ;;  %v671_v48 = vadd.f32 %v10534_v58, %v10528_v55  ;;  %v979_v57 = vsub.f32 %v10290_v27, %v963_v7  ;;  %v357_v9 = vadd.f32 %v10391_v61, %v355_v41 }
 0x11c   :  { %v10544_v29 = vadd.f32 %v9986_v46, %v10362_v44  ;;  %15089 = vst [vmem:[#allocation24_spill] sm:$0xff] %v10557_v37  ;;  %v10561_v44 = vadd.f32 %v9986_v46, %v10305_v33  ;;  %v10572_v39 = vsel %vm278_vm2, %v276_v35, 0.0  ;;  %v1059_v1 = vperm.slane %v946_v22, 0 }
 0x11d   :  { %9266 = vrsqrt.f32 %v10539_v17  ;;  %v10580_v40 = vsel %vm278_vm2, %v277_v43, 0.0  ;;  %v947_v3 = vmul.f32 %v10254_v23, %v840_v36  ;;  %v632_v52 = vrot.slane %v631_v54, 2 }
 0x11e   :  { %15086 = vst [vmem:[#allocation22_spill] sm:$0xff] %v10544_v29  ;;  %v327_v33 = vsel %vm278_vm2, %v10544_v29, 0.0  ;;  %v505_v7 = vadd.f32 %v504_v62, %v503_v15  ;;  %v692_v31 = vmul.f32 0.0625, %v628_v53  ;;  %v708_v61 = vmul.f32 %v10557_v37, %v10557_v37  ;;  %v15091_v15 = vld [vmem:[#allocation11_spill] sm:$0xff] }
 0x11f   :  { %15090 = vst [vmem:[#allocation20_spill] sm:$0xff] %v10561_v44  ;;  %v543_v41 = vadd.f32 %v10565_v30, %v10525_v0  ;;  %v324_v22 = vadd.f32 %v10354_v20, %v322_v25  ;;  %v296_v35 = vsel %vm278_vm2, %v10561_v44, 0.0  ;;  %v672_v51 = vrot.slane %v671_v48, 4  ;;  %v15093_v20 = vld [vmem:[#allocation10_spill] sm:$0xff] }
 0x120   :  { %v1123_v42 = vperm.slane %v979_v57, 0  ;;  %v388_v43 = vadd.f32 %v10376_v24, %v386_v60  ;;  %v265_v36 = vmul.f32 %v10544_v29, %v10544_v29  ;;  %v1079_v62 = vmul.f32 %v1059_v1, %v15091_v15 }
 0x121   :  { %v508_v53 = vadd.f32 %v327_v33, %v296_v35  ;;  %v10596_v14 = vadd.f32 %v10580_v40, %v10572_v39  ;;  %v964_v12 = vmul.f32 %v947_v3, %v15092_v56  ;;  %v1080_v25 = vmul.f32 %v1059_v1, %v15093_v20 }
 0x122   :  { %v633_v18 = vadd.f32 %v632_v52, %v631_v54  ;;  %v264_v60 = vmul.f32 %v10561_v44, %v10561_v44  ;;  %v506_v24 = vrot.slane %v505_v7, 1  ;;  %v724_v57 = vsub.f32 %v692_v31, %v708_v61 }
 0x123   :  { %v10409_v63 = vpop.f32.mrf.mxu0  ;;  %v10600_v13 = vpop.eup %9266  ;;  %v544_v29 = vrot.slane %v543_v41, 4  ;;  %v295_v15 = vadd.f32 %v10468_v11, %v293_v45  ;;  %v1060_v19 = vperm.slane %v947_v3, 0  ;;  %v10605_v2 = vadd.f32 %v1123_v42, %v1079_v62  ;;  %v15096_v62 = vld [vmem:[#allocation13_spill] sm:$0xff] }
 0x124   :  { %v10607_v37 = vadd.f32 %v1123_v42, %v1080_v25  ;;  %v359_v56 = vadd.f32 %v10491_v59, %v357_v9  ;;  %v391_v1 = vsel %vm278_vm2, %v265_v36, 0.0  ;;  %v509_v52 = vrot.slane %v508_v53, 4 }
 0x125   :  { %15094 = vst [vmem:[#allocation23_spill] sm:$0xff] %v10605_v2  ;;  %v673_v20 = vadd.f32 %v672_v51, %v671_v48  ;;  %v980_v44 = vsub.f32 %v10290_v27, %v964_v12  ;;  %v842_v31 = vmul.f32 %v10600_v13, %v10539_v17  ;;  %v634_v11 = vrot.slane %v633_v18, 1  ;;  %v15098_v12 = vld [vmem:[#allocation12_spill] sm:$0xff] }
 0x126   :  { %15095 = vst [vmem:[#allocation16_spill] sm:$0xff] %v10607_v37  ;;  %v360_v45 = vsel %vm278_vm2, %v264_v60, 0.0  ;;  %v507_v3 = vadd.f32 %v506_v24, %v505_v7  ;;  %v740_v42 = vmul.f32 1.0666667, %v724_v57  ;;  %v545_v61 = vadd.f32 %v544_v29, %v543_v41 }
 0x127   :  { %v326_v59 = vadd.f32 %v10449_v32, %v324_v22  ;;  %v390_v9 = vadd.f32 %v10472_v38, %v388_v43  ;;  %v636_v36 = vadd.f32 %v391_v1, %v360_v45  ;;  %v10619_v51 = vmul.f32 %v1060_v19, %v15096_v62 }
 0x128   :  { %v10623_v27 = vadd.f32 %v9986_v46, %v10409_v63  ;;  %v10626_v48 = vmul.f32 %v1060_v19, %v15098_v12  ;;  %v510_v25 = vadd.f32 %v509_v52, %v508_v53  ;;  %v674_v60 = vrot.slane %v673_v20, 2 }
 0x129   :  { %v10632_v32 = vperm.slane %v980_v44, 0  ;;  %v843_v38 = vmul.f32 %v10600_v13, %v842_v31  ;;  %v635_v7 = vadd.f32 %v634_v11, %v633_v18  ;;  %v297_v41 = vadd.f32 %v296_v35, %v295_v15 }
 0x12a   :  { %15097 = vst [vmem:[#allocation19_spill] sm:$0xff] %v10623_v27  ;;  %v10635_v22 = vmul.f32 0.0625, %v507_v3  ;;  %v756_v43 = vmax.f32 %v740_v42, 0.0  ;;  %v546_v63 = vrot.slane %v545_v61, 2  ;;  %v361_v24 = vadd.f32 %v360_v45, %v359_v56 }
 0x12b   :  { %v10462_v26 = vpop.f32.mrf.mxu0  ;;  %v637_v57 = vrot.slane %v636_v36, 4  ;;  %v328_v44 = vadd.f32 %v327_v33, %v326_v59  ;;  %v266_v53 = vmul.f32 %v10623_v27, %v10623_v27  ;;  %v511_v35 = vrot.slane %v510_v25, 2 }
 0x12c   :  { %v10630_v29 = vadd.f32 %v9986_v46, %v10462_v26  ;;  %15100 = vst [vmem:[#allocation39_spill] sm:$0xff] %v10635_v22  ;;  %v10647_v15 = vadd.f32 %v674_v60, %v673_v20  ;;  %v693_v31 = vmul.f32 0.0625, %v635_v7  ;;  %v709_v33 = vmul.f32 %v10635_v22, %v10635_v22 }
 0x12d   :  { %v10660_v11 = vadd.f32 1e-05, %v756_v43  ;;  %v10662_v45 = vadd.f32 %v546_v63, %v545_v61  ;;  %v298_v20 = vsel %vm278_vm2, %v10623_v27, 0.0  ;;  %v638_v3 = vadd.f32 %v637_v57, %v636_v36 }
 0x12e   :  { %15099 = vst [vmem:[#allocation38_spill] sm:$0xff] %v10630_v29  ;;  %v267_v56 = vmul.f32 %v10630_v29, %v10630_v29  ;;  %v392_v42 = vadd.f32 %v391_v1, %v390_v9  ;;  %v362_v59 = vsel %vm278_vm2, %v266_v53, 0.0  ;;  %v299_v47 = vadd.f32 %v298_v20, %v297_v41  ;;  %v9798_v41 = vld [vmem:[%s14860_s2] ss:$0 sm:$0xff] }
 0x12f   :  { %v725_v36 = vsub.f32 %v693_v31, %v709_v33  ;;  %v363_v9 = vadd.f32 %v362_v59, %v361_v24  ;;  %v639_v53 = vrot.slane %v638_v3, 2  ;;  %9268 = vrsqrt.f32 %v10660_v11 }
 0x130   :  { %v393_v61 = vsel %vm278_vm2, %v267_v56, 0.0  ;;  %vm848_vm6 = vweird.f32 %v10600_v13  ;;  %vm847_vm7 = vweird.f32 %v10539_v17  ;;  %vm857_vm10 = vweird.f32 %v10660_v11 }
 0x131   :  { %v10699_v22 = vmul.f32 1.0666667, %v725_v36  ;;  %vm10768_vm8 = vmor %vm847_vm7, %vm848_vm6 }
 0x133   :  { %v10517_v34 = vpop.f32.mrf.mxu0 }
 0x134   :  { %v10639_v19 = vadd.f32 %v9986_v46, %v10517_v34  ;;  %v10654_v34 = vmul.f32 0.5, %v843_v38  ;;  %v512_v38 = vadd.f32 %v511_v35, %v510_v25  ;;  %v643_v35 = vadd.f32 %v393_v61, %v362_v59 }
 0x135   :  { %v10710_v10 = vpop.eup %9268 }
 0x136   :  { %15101 = vst [vmem:[#allocation40_spill] sm:$0xff] %v10639_v19  ;;  %v300_v7 = vsel %vm278_vm2, %v10639_v19, 0.0  ;;  %v644_v27 = vrot.slane %v643_v35, 4  ;;  %vm858_vm9 = vweird.f32 %v10710_v10 }
 0x137   :  { %v301_v56 = vadd.f32 %v300_v7, %v299_v47  ;;  %vm10839_vm14 = vmor %vm857_vm10, %vm858_vm9 }
 0x13b   :  { %v10574_v28 = vpop.f32.mrf.mxu0 }
 0x13c   :  { %v10643_v26 = vadd.f32 %v9986_v46, %v10574_v28  ;;  %v329_v28 = vsel %vm278_vm2, %v10630_v29, 0.0  ;;  %v513_v29 = vrot.slane %v512_v38, 1 }
 0x13d   :  { %v515_v63 = vadd.f32 %v329_v28, %v298_v20  ;;  %v330_v37 = vadd.f32 %v329_v28, %v328_v44  ;;  %v645_v44 = vadd.f32 %v644_v27, %v643_v35 }
 0x13e   :  { %15102 = vst [vmem:[#allocation41_spill] sm:$0xff] %v10643_v26  ;;  %v269_v60 = vmul.f32 %v10643_v26, %v10643_v26 }
 0x13f   :  { %v516_v33 = vrot.slane %v515_v63, 4 }
 0x141   :  { %v517_v12 = vadd.f32 %v516_v33, %v515_v63 }
 0x143   :  { %v226_v54 = vpop.f32.mrf.mxu0 }
 0x144   :  { %v10652_v52 = vadd.f32 %v9986_v46, %v226_v54  ;;  %v268_v46 = vmul.f32 %v10639_v19, %v10639_v19  ;;  %v331_v54 = vsel %vm278_vm2, %v10643_v26, 0.0  ;;  %v395_v26 = vsel %vm278_vm2, %v269_v60, 0.0 }
 0x145   :  { %v522_v1 = vadd.f32 %v331_v54, %v300_v7  ;;  %v332_v5 = vadd.f32 %v331_v54, %v330_v37 }
 0x146   :  { %15103 = vst [vmem:[#allocation42_spill] sm:$0xff] %v10652_v52  ;;  %v270_v43 = vmul.f32 %v10652_v52, %v10652_v52  ;;  %v364_v57 = vsel %vm278_vm2, %v268_v46, 0.0  ;;  %v302_v25 = vsel %vm278_vm2, %v10652_v52, 0.0 }
 0x147   :  { %v365_v20 = vadd.f32 %v364_v57, %v363_v9  ;;  %v303_v46 = vadd.f32 %v302_v25, %v301_v56  ;;  %v523_v47 = vrot.slane %v522_v1, 4  ;;  %v650_v59 = vadd.f32 %v395_v26, %v364_v57 }
 0x148   :  { %v366_v62 = vsel %vm278_vm2, %v270_v43, 0.0  ;;  %v640_v43 = vadd.f32 %v639_v53, %v638_v3  ;;  %v514_v57 = vadd.f32 %v513_v29, %v512_v38  ;;  %v394_v53 = vadd.f32 %v393_v61, %v392_v42 }
 0x149   :  { %v524_v3 = vadd.f32 %v523_v47, %v522_v1  ;;  %v518_v42 = vrot.slane %v517_v12, 2 }
 0x14a   :  { %v396_v28 = vadd.f32 %v395_v26, %v394_v53  ;;  %v10734_v54 = vmul.f32 0.0625, %v514_v57 }
 0x14b   :  { %v228_v18 = vpop.f32.mrf.mxu0  ;;  %v525_v47 = vrot.slane %v524_v3, 2 }
 0x14c   :  { %v10687_v31 = vadd.f32 %v9798_v41, %v228_v18  ;;  %v367_v18 = vadd.f32 %v366_v62, %v365_v20  ;;  %v651_v20 = vrot.slane %v650_v59, 4 }
 0x14d   :  { %v526_v53 = vadd.f32 %v525_v47, %v524_v3 }
 0x14e   :  { %v271_v9 = vmul.f32 %v10687_v31, %v10687_v31  ;;  %v333_v36 = vsel %vm278_vm2, %v10687_v31, 0.0 }
 0x14f   :  { %v334_v61 = vadd.f32 %v333_v36, %v332_v5 }
 0x153   :  { %v231_v19 = vpop.f32.mrf.mxu0 }
 0x154   :  { %v10689_v24 = vadd.f32 %v9798_v41, %v231_v19 }
 0x156   :  { %15104 = vst [vmem:[#allocation43_spill] sm:$0xff] %v10689_v24  ;;  %v272_v60 = vmul.f32 %v10689_v24, %v10689_v24  ;;  %v10696_v7 = vsel %vm278_vm2, %v10689_v24, 0.0 }
 0x157   :  { %v305_v19 = vadd.f32 %v10696_v7, %v303_v46  ;;  %v641_v46 = vrot.slane %v640_v43, 1 }
 0x158   :  { %v10704_v56 = vsel %vm278_vm2, %v272_v60, 0.0 }
 0x159   :  { %v307_v2 = vadd.f32 %v10525_v0, %v305_v19  ;;  %v369_v52 = vadd.f32 %v10704_v56, %v367_v18  ;;  %v397_v0 = vsel %vm278_vm2, %v271_v9, 0.0  ;;  %v642_v35 = vadd.f32 %v641_v46, %v640_v43 }
 0x15a   :  { %v398_v27 = vadd.f32 %v397_v0, %v396_v28  ;;  %v646_v19 = vrot.slane %v645_v44, 2  ;;  %v657_v9 = vadd.f32 %v397_v0, %v366_v62  ;;  %v757_v43 = vmax.f32 %v10699_v22, 0.0 }
 0x15b   :  { %v309_v60 = vadd.f32 %v10453_v50, %v307_v2  ;;  %v371_v29 = vadd.f32 %v10528_v55, %v369_v52  ;;  %v233_v38 = vpop.f32.mrf.mxu0  ;;  %v652_v2 = vadd.f32 %v651_v20, %v650_v59  ;;  %v529_v55 = vadd.f32 %v333_v36, %v302_v25 }
 0x15c   :  { %v10715_v63 = vadd.f32 %v9798_v41, %v233_v38  ;;  %v519_v41 = vadd.f32 %v518_v42, %v517_v12  ;;  %v548_v36 = vrot.slane %v10662_v45, 1  ;;  %v694_v12 = vmul.f32 0.0625, %v642_v35 }
 0x15d   :  { %v10717_v1 = vmul.f32 0.0625, %v309_v60  ;;  %v373_v33 = vadd.f32 %v10572_v39, %v371_v29  ;;  %v653_v20 = vrot.slane %v652_v2, 2  ;;  %v530_v57 = vrot.slane %v529_v55, 4 }
 0x15e   :  { %15105 = vst [vmem:[#allocation44_spill] sm:$0xff] %v10715_v63  ;;  %v273_v37 = vmul.f32 %v10715_v63, %v10715_v63  ;;  %v10724_v50 = vsel %vm278_vm2, %v10715_v63, 0.0  ;;  %v520_v46 = vrot.slane %v519_v41, 1  ;;  %v647_v0 = vadd.f32 %v646_v19, %v645_v44 }
 0x15f   :  { %v405_v26 = vmul.f32 0.0625, %v373_v33  ;;  %v407_v5 = vmul.f32 %v10717_v1, %v10717_v1  ;;  %v336_v52 = vadd.f32 %v10724_v50, %v334_v61  ;;  %v658_v42 = vrot.slane %v657_v9, 4 }
 0x160   :  { %v10731_v39 = vsel %vm278_vm2, %v273_v37, 0.0  ;;  %v527_v61 = vrot.slane %v526_v53, 1  ;;  %v654_v33 = vadd.f32 %v653_v20, %v652_v2  ;;  %v531_v37 = vadd.f32 %v530_v57, %v529_v55 }
 0x161   :  { %v409_v18 = vsub.f32 %v405_v26, %v407_v5  ;;  %v338_v59 = vadd.f32 %v10565_v30, %v336_v52  ;;  %v400_v25 = vadd.f32 %v10731_v39, %v398_v27  ;;  %v710_v30 = vmul.f32 %v10734_v54, %v10734_v54 }
 0x162   :  { %v10755_v27 = vadd.f32 1e-05, %v757_v43  ;;  %v676_v26 = vrot.slane %v10647_v15, 1  ;;  %v10762_v5 = vadd.f32 %v10632_v32, %v10619_v51  ;;  %v521_v55 = vadd.f32 %v520_v46, %v519_v41 }
 0x163   :  { %v411_v60 = vmax.f32 %v409_v18, 0.0  ;;  %v340_v29 = vadd.f32 %v10457_v4, %v338_v59  ;;  %v402_v38 = vadd.f32 %v10534_v58, %v400_v25  ;;  %v15106_v4 = vsub.f32 1.5, %v10654_v34 }
 0x164   :  { %v726_v44 = vsub.f32 %v694_v12, %v710_v30  ;;  %v648_v52 = vrot.slane %v647_v0, 1  ;;  %v10774_v35 = vadd.f32 %v10632_v32, %v10626_v48  ;;  %v528_v51 = vadd.f32 %v527_v61, %v526_v53 }
 0x165   :  { %v10744_v28 = vadd.f32 1e-05, %v411_v60  ;;  %v10746_v62 = vmul.f32 0.0625, %v340_v29  ;;  %v404_v3 = vadd.f32 %v10580_v40, %v402_v38  ;;  %v846_v58 = vmul.f32 %v10600_v13, %v15106_v4 }
 0x166   :  { %v852_v40 = vmul.f32 %v10710_v10, %v10660_v11  ;;  %v655_v59 = vrot.slane %v654_v33, 1  ;;  %v532_v19 = vrot.slane %v531_v37, 2  ;;  %v659_v20 = vadd.f32 %v658_v42, %v657_v9 }
 0x167   :  { %9270 = vrsqrt.f32 %v10744_v28  ;;  %v406_v22 = vmul.f32 0.0625, %v404_v3  ;;  %v408_v47 = vmul.f32 %v10746_v62, %v10746_v62  ;;  %v850_v18 = vsel %vm10768_vm8, %v10600_v13, %v846_v58 }
 0x168   :  { %v549_v17 = vadd.f32 %v548_v36, %v10662_v45  ;;  %9272 = vrsqrt.f32 %v10755_v27  ;;  %v853_v41 = vmul.f32 %v10710_v10, %v852_v40  ;;  %v742_v60 = vmul.f32 1.0666667, %v726_v44 }
 0x169   :  { %v410_v34 = vsub.f32 %v406_v22, %v408_v47  ;;  %v677_v29 = vadd.f32 %v676_v26, %v10647_v15  ;;  %v10786_v38 = vmul.f32 %v10254_v23, %v850_v18  ;;  %v10788_v13 = vmul.f32 0.0625, %v521_v55 }
 0x16a   :  { %v649_v53 = vadd.f32 %v648_v52, %v647_v0  ;;  %v10791_v57 = vmul.f32 0.0625, %v528_v51  ;;  %v656_v45 = vadd.f32 %v655_v59, %v654_v33  ;;  %v536_v36 = vadd.f32 %v10724_v50, %v10696_v7 }
 0x16b   :  { %v412_v25 = vmax.f32 %v410_v34, 0.0  ;;  %v664_v15 = vadd.f32 %v10731_v39, %v10704_v56  ;;  %v533_v43 = vadd.f32 %v532_v19, %v531_v37  ;;  %v660_v12 = vrot.slane %v659_v20, 2 }
 0x16c   :  { %v854_v30 = vmul.f32 0.5, %v853_v41  ;;  %v758_v46 = vmax.f32 %v742_v60, 0.0  ;;  %v10798_v3 = vmul.f32 0.0625, %v549_v17  ;;  %v695_v0 = vmul.f32 0.0625, %v649_v53 }
 0x16d   :  { %v9271_v48 = vpop.eup %9270  ;;  %v10783_v32 = vadd.f32 1e-05, %v412_v25  ;;  %v711_v42 = vmul.f32 %v10788_v13, %v10788_v13  ;;  %v551_v7 = vrot.slane %v10478_v6, 4  ;;  %v696_v56 = vmul.f32 0.0625, %v656_v45  ;;  %v435_v25 = vld [vmem:[%s14863_s3] sm:$0xff] }
 0x16e   :  { %v416_v9 = vmul.f32 %v9271_v48, %v10744_v28  ;;  %v10804_v50 = vpop.eup %9272  ;;  %v10807_v39 = vmul.f32 0.0625, %v677_v29  ;;  %v537_v58 = vrot.slane %v536_v36, 4  ;;  %v665_v61 = vrot.slane %v664_v15, 4 }
 0x16f   :  { %9274 = vrsqrt.f32 %v10783_v32  ;;  %v712_v33 = vmul.f32 %v10791_v57, %v10791_v57  ;;  %v534_v22 = vrot.slane %v533_v43, 1  ;;  %v661_v47 = vadd.f32 %v660_v12, %v659_v20 }
 0x170   :  { %v417_v23 = vmul.f32 %v9271_v48, %v416_v9  ;;  %vm422_vm11 = vweird.f32 %v9271_v48  ;;  %v855_v40 = vsub.f32 1.5, %v854_v30  ;;  %v10811_v44 = vadd.f32 1e-05, %v758_v46 }
 0x171   :  { %v862_v34 = vmul.f32 %v10804_v50, %v10755_v27  ;;  %v727_v2 = vsub.f32 %v695_v0, %v711_v42  ;;  %v715_v55 = vmul.f32 %v10798_v3, %v10798_v3  ;;  %v552_v52 = vadd.f32 %v551_v7, %v10478_v6 }
 0x172   :  { %v418_v4 = vmul.f32 0.5, %v417_v23  ;;  %vm421_vm12 = vweird.f32 %v10744_v28  ;;  %v538_v59 = vadd.f32 %v537_v58, %v536_v36  ;;  %v728_v19 = vsub.f32 %v696_v56, %v712_v33 }
 0x173   :  { %vm423_vm13 = vmor %vm421_vm12, %vm422_vm11  ;;  %v535_v20 = vadd.f32 %v534_v22, %v533_v43  ;;  %v662_v17 = vrot.slane %v661_v47, 1  ;;  %v666_v41 = vadd.f32 %v665_v61, %v664_v15  ;;  %v856_v53 = vmul.f32 %v10710_v10, %v855_v40  ;;  %v15112_v43 = vld [vmem:[#allocation8_spill] sm:$0xff] }
 0x174   :  { %v419_v37 = vsub.f32 1.5, %v418_v4  ;;  %9276 = vrsqrt.f32 %v10811_v44  ;;  %v863_v6 = vmul.f32 %v10804_v50, %v862_v34  ;;  %v743_v28 = vmul.f32 1.0666667, %v727_v2 }
 0x175   :  { %v9275_v26 = vpop.eup %9274  ;;  %v553_v9 = vrot.slane %v552_v52, 2  ;;  %v15109_v45 = vrot.slane %v10596_v14, 4  ;;  %v10833_v15 = vmul.f32 %v10786_v38, %v10413_v8  ;;  %v744_v30 = vmul.f32 1.0666667, %v728_v19 }
 0x176   :  { %v420_v18 = vmul.f32 %v9271_v48, %v419_v37  ;;  %v426_v51 = vmul.f32 %v9275_v26, %v10783_v32  ;;  %v10843_v46 = vmul.f32 0.0625, %v535_v20  ;;  %v667_v0 = vrot.slane %v666_v41, 2  ;;  %v440_v20 = vld [vmem:[%s14864_s4 + $0x8] sm:$0xff] }
 0x177   :  { %v680_v36 = vadd.f32 %v15109_v45, %v10596_v14  ;;  %v663_v14 = vadd.f32 %v662_v17, %v661_v47  ;;  %vm432_vm15 = vweird.f32 %v9275_v26  ;;  %v860_v8 = vsel %vm10839_vm14, %v10710_v10, %v856_v53  ;;  %v436_v47 = vld [vmem:[%s14863_s3 + $0x8] sm:$0xff]  ;;  %v439_v10 = vld [vmem:[%s14864_s4] sm:$0xff] }
 0x178   :  { %v424_v60 = vsel %vm423_vm13, %v9271_v48, %v420_v18  ;;  %v427_v29 = vmul.f32 %v9275_v26, %v426_v51  ;;  %v539_v48 = vrot.slane %v538_v59, 2  ;;  %v731_v7 = vsub.f32 %v10807_v39, %v715_v55 }
 0x179   :  { %v10829_v12 = vmul.f32 %v435_v25, %v424_v60  ;;  %v864_v4 = vmul.f32 0.5, %v863_v6  ;;  %v759_v56 = vmax.f32 %v743_v28, 0.0  ;;  %v554_v11 = vadd.f32 %v553_v9, %v552_v52 }
 0x17a   :  { %v428_v23 = vmul.f32 0.5, %v427_v29  ;;  %v681_v58 = vrot.slane %v680_v36, 2  ;;  %v10849_v61 = vpop.eup %9276  ;;  %vm431_vm0 = vweird.f32 %v10783_v32  ;;  %v540_v37 = vadd.f32 %v539_v48, %v538_v59  ;;  %v10866_v32 = vld [vmem:[%s14861_s5] sm:$0x1] }
 0x17b   :  { %v441_v33 = vmul.f32 %v10829_v12, %v10717_v1  ;;  %vm433_vm1 = vmor %vm431_vm0, %vm432_vm15  ;;  %v760_v39 = vmax.f32 %v744_v30, 0.0  ;;  %v697_v40 = vmul.f32 0.0625, %v663_v14  ;;  %v713_v34 = vmul.f32 %v10843_v46, %v10843_v46  ;;  %v15113_v30 = vld [vmem:[#allocation6_spill] sm:$0xff] }
 0x17c   :  { %v429_v42 = vsub.f32 1.5, %v428_v23  ;;  %v668_v2 = vadd.f32 %v667_v0, %v666_v41  ;;  %v10869_v52 = vmul.f32 %v10866_v32, %v860_v8  ;;  %v10871_v18 = vmul.f32 1.0666667, %v731_v7  ;;  %v15114_v0 = vld [vmem:[#allocation2_spill] sm:$0xff] }
 0x17d   :  { %v865_v59 = vsub.f32 1.5, %v864_v4  ;;  %vm868_vm3 = vweird.f32 %v10804_v50  ;;  %v555_v25 = vrot.slane %v554_v11, 1  ;;  %v10878_v19 = vsub.f32 %v439_v10, %v441_v33 }
 0x17e   :  { %v430_v22 = vmul.f32 %v9275_v26, %v429_v42  ;;  %v10883_v17 = vadd.f32 1e-05, %v759_v56  ;;  %v541_v41 = vrot.slane %v540_v37, 1  ;;  %v682_v60 = vadd.f32 %v681_v58, %v680_v36 }
 0x17f   :  { %v10887_v53 = vadd.f32 1e-05, %v760_v39  ;;  %v729_v6 = vsub.f32 %v697_v40, %v713_v34  ;;  %v669_v28 = vrot.slane %v668_v2, 1  ;;  %v997_v9 = vmul.f32 %v10829_v12, %v15077_v21  ;;  %v15135_v21 = vld [vmem:[#allocation28_spill] sm:$0xff] }
 0x180   :  { %v434_v1 = vsel %vm433_vm1, %v9275_v26, %v430_v22  ;;  %v872_v26 = vmul.f32 %v10849_v61, %v10811_v44  ;;  %v995_v45 = vmul.f32 %v10829_v12, %v10055_v16  ;;  %v991_v23 = vmul.f32 %v10829_v12, %v9992_v49  ;;  %v15152_v16 = vld [vmem:[#allocation26_spill] sm:$0xff] }
 0x181   :  { %v10873_v51 = vmul.f32 %v436_v47, %v434_v1  ;;  %v1017_v48 = vmul.f32 %v10829_v12, %v10689_v24  ;;  %v1029_v8 = vadd.f32 %v997_v9, %v10878_v19  ;;  %v542_v56 = vadd.f32 %v541_v41, %v540_v37  ;;  %v15115_v41 = vld [vmem:[#allocation42_spill] sm:$0xff] }
 0x182   :  { %v1027_v7 = vadd.f32 %v995_v45, %v10878_v19  ;;  %v1023_v22 = vadd.f32 %v991_v23, %v10878_v19  ;;  %v10915_v10 = vmul.f32 %v10804_v50, %v865_v59  ;;  %v670_v39 = vadd.f32 %v669_v28, %v668_v2  ;;  %v15118_v28 = vld [vmem:[#allocation24_spill] sm:$0xff] }
 0x183   :  { %v442_v29 = vmul.f32 %v10873_v51, %v10746_v62  ;;  %v998_v62 = vmul.f32 %v10873_v51, %v15112_v43  ;;  %v996_v14 = vmul.f32 %v10873_v51, %v15113_v30  ;;  %v992_v42 = vmul.f32 %v10873_v51, %v15114_v0  ;;  %v15136_v0 = vld [vmem:[#allocation27_spill] sm:$0xff]  ;;  %v15139_v43 = vld [vmem:[#allocation5_spill] sm:$0xff] }
 0x184   :  { %v10908_v4 = vadd.f32 %v1017_v48, %v10878_v19  ;;  %v556_v40 = vadd.f32 %v555_v25, %v554_v11  ;;  %v683_v34 = vrot.slane %v682_v60, 1  ;;  %9278 = vrsqrt.f32 %v10883_v17 }
 0x185   :  { %v10897_v36 = vsub.f32 %v440_v20, %v442_v29  ;;  %v1018_v37 = vmul.f32 %v10873_v51, %v10715_v63  ;;  %v1015_v9 = vmul.f32 %v10829_v12, %v15115_v41  ;;  %v745_v45 = vmul.f32 1.0666667, %v729_v6 }
 0x186   :  { %v10922_v23 = vmul.f32 0.0625, %v542_v56  ;;  %vm867_vm4 = vweird.f32 %v10755_v27  ;;  %v873_v11 = vmul.f32 %v10849_v61, %v872_v26  ;;  %9280 = vrsqrt.f32 %v10887_v53 }
 0x187   :  { %v1030_v58 = vadd.f32 %v998_v62, %v10897_v36  ;;  %v1028_v33 = vadd.f32 %v996_v14, %v10897_v36  ;;  %v1024_v47 = vadd.f32 %v992_v42, %v10897_v36  ;;  %v763_v2 = vmax.f32 %v10871_v18, 0.0  ;;  %vm10933_vm5 = vmor %vm867_vm4, %vm868_vm3 }
 0x188   :  { %v10938_v25 = vadd.f32 %v1018_v37, %v10897_v36  ;;  %v1016_v27 = vmul.f32 %v10873_v51, %v10687_v31  ;;  %v10943_v26 = vadd.f32 %v1015_v9, %v10878_v19  ;;  %v698_v6 = vmul.f32 0.0625, %v670_v39 }
 0x189   :  { %v8780_v1 = vpack.i.bf16 %v1030_v58, %v1029_v8  ;;  %v8760_v20 = vpack.i.bf16 %v1028_v33, %v1027_v7  ;;  %v8770_v29 = vpack.i.bf16 %v1024_v47, %v1023_v22  ;;  %v870_v18 = vsel %vm10933_vm5, %v10804_v50, %v10915_v10  ;;  %v15119_v33 = vld [vmem:[#allocation14_spill] sm:$0xff]  ;;  %v15120_v47 = vld [vmem:[#allocation15_spill] sm:$0xff] }
 0x18a   :  { %v10951_v48 = vmul.f32 %v10869_v52, %v15118_v28  ;;  %v10953_v62 = vmul.f32 0.0625, %v556_v40  ;;  %v684_v14 = vadd.f32 %v683_v34, %v682_v60  ;;  %v10958_v8 = vadd.f32 %v1016_v27, %v10897_v36  ;;  %v10962_v58 = vpop.eup %9278  ;;  %v15121_v60 = vld [vmem:[#allocation32_spill] sm:$0xff] }
 0x18b   :  { %8781 = vrot.lane.b32.xlu2 %v8780_v1, %s9806_s20  ;;  %8761 = vrot.lane.b32.xlu0 %v8760_v20, %s9806_s20  ;;  %v761_v7 = vmax.f32 %v745_v45, 0.0  ;;  %v714_v56 = vmul.f32 %v10922_v23, %v10922_v23  ;;  %v874_v50 = vmul.f32 0.5, %v873_v11  ;;  %v1019_v22 = vmul.f32 %v10829_v12, %v15119_v33  ;;  %v15122_v20 = vld [vmem:[#allocation33_spill] sm:$0xff] }
 0x18c   :  { %8771 = vrot.lane.b32.xlu1 %v8770_v29, %s9806_s20  ;;  %v1020_v10 = vmul.f32 %v10873_v51, %v15120_v47  ;;  %v1021_v39 = vmul.f32 %v10829_v12, %v15121_v60  ;;  %v10972_v34 = vadd.f32 1e-05, %v763_v2  ;;  %v1022_v29 = vmul.f32 %v10873_v51, %v15122_v20  ;;  %v10976_v37 = vpop.eup %9280 }
 0x18d   :  { %v730_v1 = vsub.f32 %v698_v6, %v714_v56  ;;  %v10979_v9 = vadd.f32 %v1019_v22, %v10878_v19  ;;  %v700_v59 = vmul.f32 0.0625, %v684_v14  ;;  %v10987_v27 = vadd.f32 1e-05, %v761_v7  ;;  %v15127_v56 = vld [vmem:[#allocation37_spill] sm:$0xff]  ;;  %v15133_v14 = vld [vmem:[#allocation10_spill] sm:$0xff] }
 0x18e   :  { %v10982_v45 = vadd.f32 %v1020_v10, %v10897_v36  ;;  %v10985_v11 = vadd.f32 %v1021_v39, %v10878_v19  ;;  %v10990_v6 = vadd.f32 %v1022_v29, %v10897_v36  ;;  %v716_v28 = vmul.f32 %v10953_v62, %v10953_v62  ;;  %v15128_v22 = vld [vmem:[#allocation21_spill] sm:$0xff]  ;;  %v15130_v10 = vld [vmem:[#allocation36_spill] sm:$0xff]  ;;  %v15131_v39 = vld [vmem:[#allocation35_spill] sm:$0xff] }
 0x18f   :  { %15123 = vst [vmem:[#allocation42_spill] sm:$0xff] %v10979_v9  ;;  %v746_v2 = vmul.f32 1.0666667, %v730_v1  ;;  %v15129_v40 = vpack.i.bf16 %v15127_v56, %v15128_v22  ;;  %v15132_v42 = vpack.i.bf16 %v15130_v10, %v15131_v39  ;;  %v1000_v7 = vmul.f32 %v10873_v51, %v15133_v14  ;;  %v15134_v1 = vld [vmem:[#allocation4_spill] sm:$0xff] }
 0x190   :  { %15124 = vst [vmem:[#allocation24_spill] sm:$0xff] %v10982_v45  ;;  %v994_v29 = vmul.f32 %v10873_v51, %v15134_v1  ;;  %v875_v55 = vsub.f32 1.5, %v874_v50  ;;  %v15137_v56 = vpack.i.bf16 %v15135_v21, %v15136_v0  ;;  %v882_v10 = vmul.f32 %v10962_v58, %v10883_v17 }
 0x191   :  { %15125 = vst [vmem:[#allocation45_spill] sm:$0xff] %v10985_v11  ;;  %v1032_v39 = vadd.f32 %v1000_v7, %v10897_v36  ;;  %v993_v14 = vmul.f32 %v10829_v12, %v15139_v43  ;;  %v762_v0 = vmax.f32 %v746_v2, 0.0  ;;  %9282 = vrsqrt.f32 %v10987_v27 }
 0x192   :  { %15126 = vst [vmem:[#allocation46_spill] sm:$0xff] %v10990_v6  ;;  %v1026_v21 = vadd.f32 %v994_v29, %v10897_v36  ;;  %v732_v7 = vsub.f32 %v700_v59, %v716_v28  ;;  %v876_v2 = vmul.f32 %v10849_v61, %v875_v55  ;;  %vm878_vm6 = vweird.f32 %v10849_v61  ;;  %v15140_v28 = vld [vmem:[#allocation29_spill] sm:$0xff] }
 0x193   :  { %8786 = vrot.lane.b32.xlu2 %v15129_v40, %s9807_s21  ;;  %8766 = vrot.lane.b32.xlu0 %v15132_v42, %s9807_s21  ;;  %v15138_v40 = vld [vmem:[#allocation11_spill] sm:$0xff]  ;;  %v892_v42 = vmul.f32 %v10976_v37, %v10887_v53  ;;  %v1025_v43 = vadd.f32 %v993_v14, %v10878_v19  ;;  %v11039_v29 = vmul.f32 %v10866_v32, %v870_v18  ;;  %vm877_vm7 = vweird.f32 %v10811_v44  ;;  %v15141_v14 = vld [vmem:[#allocation30_spill] sm:$0xff] }
 0x194   :  { %8776 = vrot.lane.b32.xlu1 %v15137_v56, %s9807_s21  ;;  %v999_v22 = vmul.f32 %v10829_v12, %v15138_v40  ;;  %v11027_v56 = vld [vmem:[%s14862_s6] sm:$0x1]  ;;  %9284 = vrsqrt.f32 %v10972_v34  ;;  %v11045_v59 = vadd.f32 1e-05, %v762_v0  ;;  %v8795_v55 = vpack.i.bf16 %v15141_v14, %v15140_v28  ;;  %vm11049_vm8 = vmor %vm877_vm7, %vm878_vm6  ;;  %v15146_v0 = vld [vmem:[#allocation12_spill] sm:$0xff] }
 0x195   :  { %v981_v40 = vsub.f32 %v11027_v56, %v10833_v15  ;;  %v982_v1 = vsub.f32 %v11027_v56, %v10951_v48  ;;  %v893_v15 = vmul.f32 %v10976_v37, %v892_v42  ;;  %v883_v48 = vmul.f32 %v10962_v58, %v882_v10  ;;  %v15145_v42 = vld [vmem:[#allocation16_spill] sm:$0xff] }
 0x196   :  { %v1031_v50 = vadd.f32 %v999_v22, %v10878_v19  ;;  %v8790_v30 = vpack.i.bf16 %v1026_v21, %v1025_v43  ;;  %v748_v18 = vmul.f32 1.0666667, %v732_v7  ;;  %v8815_v44 = vpack.i.bf16 %v10774_v35, %v10762_v5  ;;  %v15144_v43 = vld [vmem:[#allocation23_spill] sm:$0xff]  ;;  %v15147_v5 = vld [vmem:[#allocation18_spill] sm:$0xff] }
 0x197   :  { %v8805_v10 = vpack.i.bf16 %v15145_v42, %v15144_v43  ;;  %v11063_v21 = vpop.eup %9282  ;;  %v894_v7 = vmul.f32 0.5, %v893_v15  ;;  %v884_v28 = vmul.f32 0.5, %v883_v48  ;;  %v15148_v35 = vperm.slane %v10786_v38, 0  ;;  %v15149_v43 = vld [vmem:[#allocation39_spill] sm:$0xff]  ;;  %v15151_v48 = vld [vmem:[#allocation17_spill] sm:$0xff] }
 0x198   :  { %v8800_v49 = vpack.i.bf16 %v1032_v39, %v1031_v50  ;;  %v1062_v50 = vperm.slane %v10869_v52, 0  ;;  %v880_v39 = vsel %vm11049_vm8, %v10849_v61, %v876_v2  ;;  %v967_v52 = vmul.f32 %v11039_v29, %v15149_v43  ;;  %v15150_v61 = vld [vmem:[#allocation13_spill] sm:$0xff] }
 0x199   :  { %v1083_v14 = vmul.f32 %v15148_v35, %v15147_v5  ;;  %v1126_v42 = vperm.slane %v982_v1, 0  ;;  %9286 = vrsqrt.f32 %v11045_v59  ;;  %v1001_v2 = vmul.f32 %v10829_v12, %v15150_v61  ;;  %v15153_v1 = vld [vmem:[#allocation25_spill] sm:$0xff] }
 0x19a   :  { %v11078_v22 = vmul.f32 %v10866_v32, %v880_v39  ;;  %v11080_v15 = vpop.eup %9284  ;;  %v1085_v43 = vmul.f32 %v1062_v50, %v15152_v16  ;;  %v1086_v11 = vmul.f32 %v1062_v50, %v15153_v1  ;;  %v902_v6 = vmul.f32 %v11063_v21, %v10987_v27 }
 0x19b   :  { %8801 = vrot.lane.b32.xlu2 %v8800_v49, %s9806_s20  ;;  %8791 = vrot.lane.b32.xlu0 %v8790_v30, %s9806_s20  ;;  %v1002_v49 = vmul.f32 %v10873_v51, %v15146_v0  ;;  %v1125_v30 = vperm.slane %v981_v40, 0  ;;  %v764_v40 = vmax.f32 %v748_v18, 0.0  ;;  %v1084_v0 = vmul.f32 %v15148_v35, %v15151_v48 }
 0x19c   :  { %8796 = vrot.lane.b32.xlu1 %v8795_v55, %s9807_s21  ;;  %v1033_v61 = vadd.f32 %v1001_v2, %v10878_v19  ;;  %v895_v9 = vsub.f32 1.5, %v894_v7  ;;  %v885_v39 = vsub.f32 1.5, %v884_v28  ;;  %v983_v18 = vsub.f32 %v11027_v56, %v967_v52 }
 0x19d   :  { %v1034_v55 = vadd.f32 %v1002_v49, %v10897_v36  ;;  %v1163_v49 = vadd.f32 %v1125_v30, %v1083_v14  ;;  %v1164_v45 = vadd.f32 %v1125_v30, %v1084_v0  ;;  %v11091_v20 = vadd.f32 %v1126_v42, %v1085_v43 }
 0x19e   :  { %v11093_v60 = vadd.f32 %v1126_v42, %v1086_v11  ;;  %v968_v35 = vmul.f32 %v11078_v22, %v10734_v54  ;;  %v922_v50 = vmul.f32 %v11080_v15, %v10972_v34  ;;  %v11099_v63 = vadd.f32 1e-05, %v764_v40 }
 0x19f   :  { %v8810_v38 = vpack.i.bf16 %v1034_v55, %v1033_v61  ;;  %v11101_v2 = vpop.eup %9286  ;;  %v1006_v0 = vmul.f32 %v10873_v51, %v15153_v1  ;;  %v1004_v11 = vmul.f32 %v10873_v51, %v15151_v48  ;;  %v903_v30 = vmul.f32 %v11063_v21, %v902_v6  ;;  %v15161_v61 = vld [vmem:[#allocation22_spill] sm:$0xff] }
 0x1a0   :  { %v896_v54 = vmul.f32 %v10976_v37, %v895_v9  ;;  %vm898_vm9 = vweird.f32 %v10976_v37  ;;  %v886_v7 = vmul.f32 %v10962_v58, %v885_v39  ;;  %vm888_vm10 = vweird.f32 %v10962_v58 }
 0x1a1   :  { %v1003_v28 = vmul.f32 %v10829_v12, %v15147_v5  ;;  %v1036_v6 = vadd.f32 %v1004_v11, %v10897_v36  ;;  %v1063_v14 = vperm.slane %v11039_v29, 0  ;;  %vm887_vm11 = vweird.f32 %v10883_v17 }
 0x1a2   :  { %v912_v9 = vmul.f32 %v11101_v2, %v11045_v59  ;;  %9288 = vrsqrt.f32 %v11099_v63  ;;  %vm897_vm12 = vweird.f32 %v10887_v53  ;;  %vm11129_vm13 = vmor %vm887_vm11, %vm888_vm10  ;;  %v904_v55 = vmul.f32 0.5, %v903_v30 }
 0x1a3   :  { %8816 = vrot.lane.b32.xlu2 %v8815_v44, %s9807_s21  ;;  %8806 = vrot.lane.b32.xlu0 %v8805_v10, %s9807_s21  ;;  %v1005_v44 = vmul.f32 %v10829_v12, %v15152_v16  ;;  %v1038_v10 = vadd.f32 %v1006_v0, %v10897_v36  ;;  %v1035_v42 = vadd.f32 %v1003_v28, %v10878_v19  ;;  %v1127_v40 = vperm.slane %v983_v18, 0  ;;  %vm11136_vm14 = vmor %vm897_vm12, %vm898_vm9 }
 0x1a4   :  { %8811 = vrot.lane.b32.xlu1 %v8810_v38, %s9806_s20  ;;  %v984_v29 = vsub.f32 %v11027_v56, %v968_v35  ;;  %v923_v43 = vmul.f32 %v11080_v15, %v922_v50  ;;  %v900_v53 = vsel %vm11136_vm14, %v10976_v37, %v896_v54  ;;  %v890_v18 = vsel %vm11129_vm13, %v10962_v58, %v886_v7  ;;  %v15158_v50 = vld [vmem:[#allocation34_spill] sm:$0xff] }
 0x1a5   :  { %v1037_v52 = vadd.f32 %v1005_v44, %v10878_v19  ;;  %v8820_v38 = vpack.i.bf16 %v1036_v6, %v1035_v42  ;;  %v8825_v0 = vpack.i.bf16 %v1164_v45, %v1163_v49  ;;  %v1064_v35 = vperm.slane %v11078_v22, 0  ;;  %v15159_v44 = vld [vmem:[#allocation31_spill] sm:$0xff] }
 0x1a6   :  { %v913_v11 = vmul.f32 %v11101_v2, %v912_v9  ;;  %v1087_v30 = vmul.f32 %v1063_v14, %v15158_v50  ;;  %v8835_v37 = vpack.i.bf16 %v11093_v60, %v11091_v20  ;;  %v905_v54 = vsub.f32 1.5, %v904_v55  ;;  %v15160_v9 = vld [vmem:[#allocation20_spill] sm:$0xff] }
 0x1a7   :  { %v8830_v39 = vpack.i.bf16 %v1038_v10, %v1037_v52  ;;  %v1088_v10 = vmul.f32 %v1063_v14, %v15159_v44  ;;  %v1008_v58 = vmul.f32 %v10873_v51, %v15159_v44  ;;  %v11161_v45 = vmul.f32 %v10866_v32, %v900_v53 }
 0x1a8   :  { %v11155_v28 = vpop.eup %9288  ;;  %v952_v22 = vmul.f32 %v10866_v32, %v890_v18  ;;  %v924_v49 = vmul.f32 0.5, %v923_v43  ;;  %v1167_v7 = vadd.f32 %v1127_v40, %v1087_v30  ;;  %v1128_v14 = vperm.slane %v984_v29, 0 }
 0x1a9   :  { %v1168_v6 = vadd.f32 %v1127_v40, %v1088_v10  ;;  %vm927_vm15 = vweird.f32 %v10972_v34  ;;  %v1007_v60 = vmul.f32 %v10829_v12, %v15158_v50  ;;  %v1040_v20 = vadd.f32 %v1008_v58, %v10897_v36  ;;  %v15170_v10 = vld [vmem:[#allocation40_spill] sm:$0xff] }
 0x1aa   :  { %v1089_v52 = vmul.f32 %v1064_v35, %v15160_v9  ;;  %v914_v42 = vmul.f32 0.5, %v913_v11  ;;  %v1090_v55 = vmul.f32 %v1064_v35, %v15161_v61  ;;  %v906_v17 = vmul.f32 %v11063_v21, %v905_v54  ;;  %v15162_v35 = vld [vmem:[#allocation38_spill] sm:$0xff] }
 0x1ab   :  { %8831 = vrot.lane.b32.xlu2 %v8830_v39, %s9806_s20  ;;  %8821 = vrot.lane.b32.xlu0 %v8820_v38, %s9806_s20  ;;  %vm908_vm0 = vweird.f32 %v11063_v21  ;;  %v932_v40 = vmul.f32 %v11155_v28, %v11099_v63  ;;  %v1039_v29 = vadd.f32 %v1007_v60, %v10878_v19  ;;  %v970_v43 = vmul.f32 %v11161_v45, %v10791_v57 }
 0x1ac   :  { %8826 = vrot.lane.b32.xlu1 %v8825_v0, %s9807_s21  ;;  %v969_v39 = vmul.f32 %v952_v22, %v10788_v13  ;;  %v925_v38 = vsub.f32 1.5, %v924_v49  ;;  %v8845_v53 = vpack.i.bf16 %v1168_v6, %v1167_v7  ;;  %v1169_v18 = vadd.f32 %v1128_v14, %v1089_v52 }
 0x1ad   :  { %vm907_vm1 = vweird.f32 %v10987_v27  ;;  %vm928_vm3 = vweird.f32 %v11080_v15  ;;  %v8840_v0 = vpack.i.bf16 %v1040_v20, %v1039_v29  ;;  %v1012_v11 = vmul.f32 %v10873_v51, %v15162_v35 }
 0x1ae   :  { %v1170_v30 = vadd.f32 %v1128_v14, %v1090_v55  ;;  %vm11182_vm4 = vmor %vm907_vm1, %vm908_vm0  ;;  %v915_v54 = vsub.f32 1.5, %v914_v42  ;;  %v1010_v13 = vmul.f32 %v10873_v51, %v15161_v61  ;;  %v933_v27 = vmul.f32 %v11155_v28, %v932_v40  ;;  %v15165_v14 = vld [vmem:[#allocation19_spill] sm:$0xff] }
 0x1af   :  { %v910_v57 = vsel %vm11182_vm4, %v11063_v21, %v906_v17  ;;  %v986_v58 = vsub.f32 %v11027_v56, %v970_v43  ;;  %v985_v49 = vsub.f32 %v11027_v56, %v969_v39  ;;  %v1065_v7 = vperm.slane %v952_v22, 0  ;;  %vm11208_vm5 = vmor %vm927_vm15, %vm928_vm3 }
 0x1b0   :  { %v926_v6 = vmul.f32 %v11080_v15, %v925_v38  ;;  %v1044_v60 = vadd.f32 %v1012_v11, %v10897_v36  ;;  %v1009_v20 = vmul.f32 %v10829_v12, %v15160_v9  ;;  %v1042_v21 = vadd.f32 %v1010_v13, %v10897_v36 }
 0x1b1   :  { %v1066_v22 = vperm.slane %v11161_v45, 0  ;;  %v954_v42 = vmul.f32 %v10866_v32, %v910_v57  ;;  %v916_v55 = vmul.f32 %v11101_v2, %v915_v54  ;;  %vm918_vm6 = vweird.f32 %v11101_v2 }
 0x1b2   :  { %v1041_v40 = vadd.f32 %v1009_v20, %v10878_v19  ;;  %v934_v29 = vmul.f32 0.5, %v933_v27  ;;  %v1130_v43 = vperm.slane %v986_v58, 0  ;;  %v1129_v39 = vperm.slane %v985_v49, 0 }
 0x1b3   :  { %8846 = vrot.lane.b32.xlu2 %v8845_v53, %s9807_s21  ;;  %8836 = vrot.lane.b32.xlu0 %v8835_v37, %s9807_s21  ;;  %v1011_v37 = vmul.f32 %v10829_v12, %v15165_v14  ;;  %v930_v34 = vsel %vm11208_vm5, %v11080_v15, %v926_v6  ;;  %vm917_vm7 = vweird.f32 %v11045_v59  ;;  %v8855_v53 = vpack.i.bf16 %v1170_v30, %v1169_v18  ;;  %v15171_v59 = vld [vmem:[#allocation41_spill] sm:$0xff] }
 0x1b4   :  { %8841 = vrot.lane.b32.xlu1 %v8840_v0, %s9806_s20  ;;  %v8850_v38 = vpack.i.bf16 %v1042_v21, %v1041_v40  ;;  %v1091_v0 = vmul.f32 %v1065_v7, %v15165_v14  ;;  %vm11223_vm8 = vmor %vm917_vm7, %vm918_vm6  ;;  %v1093_v54 = vmul.f32 %v1066_v22, %v15170_v10  ;;  %v1092_v13 = vmul.f32 %v1065_v7, %v15162_v35 }
 0x1b5   :  { %v1043_v17 = vadd.f32 %v1011_v37, %v10878_v19  ;;  %v971_v57 = vmul.f32 %v954_v42, %v10843_v46  ;;  %v920_v15 = vsel %vm11223_vm8, %v11101_v2, %v916_v55  ;;  %v1094_v18 = vmul.f32 %v1066_v22, %v15171_v59 }
 0x1b6   :  { %v956_v30 = vmul.f32 %v10866_v32, %v930_v34  ;;  %v935_v27 = vsub.f32 1.5, %v934_v29  ;;  %v1173_v58 = vadd.f32 %v1130_v43, %v1093_v54  ;;  %v1171_v49 = vadd.f32 %v1129_v39, %v1091_v0 }
 0x1b7   :  { %v8860_v45 = vpack.i.bf16 %v1044_v60, %v1043_v17  ;;  %v1172_v7 = vadd.f32 %v1129_v39, %v1092_v13  ;;  %v1014_v46 = vmul.f32 %v10873_v51, %v15171_v59  ;;  %v1174_v6 = vadd.f32 %v1130_v43, %v1094_v18  ;;  %v15176_v18 = vld [vmem:[#allocation44_spill] sm:$0xff] }
 0x1b8   :  { %v955_v2 = vmul.f32 %v10866_v32, %v920_v15  ;;  %vm937_vm9 = vweird.f32 %v11099_v63  ;;  %vm938_vm10 = vweird.f32 %v11155_v28  ;;  %v1013_v37 = vmul.f32 %v10829_v12, %v15170_v10 }
 0x1b9   :  { %v1046_v60 = vadd.f32 %v1014_v46, %v10897_v36  ;;  %v987_v20 = vsub.f32 %v11027_v56, %v971_v57  ;;  %v936_v21 = vmul.f32 %v11155_v28, %v935_v27  ;;  %v1067_v22 = vperm.slane %v954_v42, 0  ;;  %vm11249_vm11 = vmor %vm937_vm9, %vm938_vm10 }
 0x1ba   :  { %v1045_v52 = vadd.f32 %v1013_v37, %v10878_v19  ;;  %v8875_v55 = vpack.i.bf16 %v1174_v6, %v1173_v58  ;;  %v8865_v63 = vpack.i.bf16 %v1172_v7, %v1171_v49  ;;  %v973_v17 = vmul.f32 %v956_v30, %v10798_v3  ;;  %v15177_v6 = vld [vmem:[#allocation32_spill] sm:$0xff]  ;;  %v15178_v37 = vld [vmem:[#allocation33_spill] sm:$0xff] }
 0x1bb   :  { %8861 = vrot.lane.b32.xlu2 %v8860_v45, %s9806_s20  ;;  %8851 = vrot.lane.b32.xlu0 %v8850_v38, %s9806_s20  ;;  %v972_v40 = vmul.f32 %v955_v2, %v10922_v23  ;;  %v1131_v29 = vperm.slane %v987_v20, 0  ;;  %v940_v19 = vsel %vm11249_vm11, %v11155_v28, %v936_v21  ;;  %v1095_v36 = vmul.f32 %v1067_v22, %v15115_v41  ;;  %v15180_v21 = vld [vmem:[#allocation42_spill] sm:$0xff] }
 0x1bc   :  { %8856 = vrot.lane.b32.xlu1 %v8855_v53, %s9807_s21  ;;  %v8870_v12 = vpack.i.bf16 %v1046_v60, %v1045_v52  ;;  %v1096_v42 = vmul.f32 %v1067_v22, %v10687_v31  ;;  %v989_v3 = vsub.f32 %v11027_v56, %v973_v17  ;;  %v1069_v43 = vperm.slane %v956_v30, 0  ;;  %v8699_v17 = vld [vmem:[%s14865_s7 + $0x18] sm:$0xff] }
 0x1bd   :  { %v988_v23 = vsub.f32 %v11027_v56, %v972_v40  ;;  %v1175_v39 = vadd.f32 %v1131_v29, %v1095_v36  ;;  %v957_v45 = vmul.f32 %v10866_v32, %v940_v19  ;;  %v1068_v38 = vperm.slane %v955_v2, 0  ;;  %v8705_v40 = vld [vmem:[%s14865_s7 + $0x48] sm:$0xff]  ;;  %v15183_v19 = vld [vmem:[#allocation45_spill] sm:$0xff] }
 0x1be   :  { %v1176_v34 = vadd.f32 %v1131_v29, %v1096_v42  ;;  %v1099_v53 = vmul.f32 %v1069_v43, %v15119_v33  ;;  %v1100_v28 = vmul.f32 %v1069_v43, %v15120_v47  ;;  %v1133_v0 = vperm.slane %v989_v3, 0  ;;  %v15182_v29 = vld [vmem:[#allocation46_spill] sm:$0xff]  ;;  %v8698_v42 = vld [vmem:[%s14865_s7 + $0x10] sm:$0xff]  ;;  %v8697_v43 = vld [vmem:[%s14865_s7 + $0x8] sm:$0xff] }
 0x1bf   :  { %v1132_v11 = vperm.slane %v988_v23, 0  ;;  %v974_v13 = vmul.f32 %v957_v45, %v10953_v62  ;;  %v15174_v57 = vpack.i.bf16 %v10938_v25, %v10908_v4  ;;  %v15175_v15 = vpack.i.bf16 %v10958_v8, %v10943_v26  ;;  %v8701_v4 = vld [vmem:[%s14865_s7 + $0x28] sm:$0xff]  ;;  %v8707_v25 = vld [vmem:[%s14865_s7 + $0x58] sm:$0xff]  ;;  %v8704_v3 = vld [vmem:[%s14865_s7 + $0x40] sm:$0xff] }
 0x1c0   :  { %v8885_v54 = vpack.i.bf16 %v1176_v34, %v1175_v39  ;;  %v1097_v32 = vmul.f32 %v1068_v38, %v10689_v24  ;;  %v1098_v30 = vmul.f32 %v1068_v38, %v15176_v18  ;;  %v1179_v27 = vadd.f32 %v1133_v0, %v1099_v53  ;;  %1612 = vmatpush.bf16.msra.mxu1 %v8701_v4  ;;  %v8703_v23 = vld [vmem:[%s14865_s7 + $0x38] sm:$0xff]  ;;  %v8696_v39 = vld [vmem:[%s14865_s7] sm:$0xff]  ;;  %v8702_v34 = vld [vmem:[%s14865_s7 + $0x30] sm:$0xff] }
 0x1c1   :  { %v1180_v58 = vadd.f32 %v1133_v0, %v1100_v28  ;;  %v990_v7 = vsub.f32 %v11027_v56, %v974_v13  ;;  %v1070_v46 = vperm.slane %v957_v45, 0  ;;  %1779 = vmatpush.bf16.msra.mxu2 %v8707_v25  ;;  %v15179_v56 = vld [vmem:[#allocation24_spill] sm:$0xff]  ;;  %v15184_v36 = vpack.i.bf16 %v15182_v29, %v15183_v19  ;;  %v15188_v25 = vld [vmem:[#allocation2_spill] sm:$0xff] }
 0x1c2   :  { %v1177_v49 = vadd.f32 %v1132_v11, %v1097_v32  ;;  %v1178_v62 = vadd.f32 %v1132_v11, %v1098_v30  ;;  %v15181_v52 = vpack.i.bf16 %v15179_v56, %v15180_v21  ;;  %vm1471_vm12 = vcmask 523264  }
 0x1c3   :  { %8876 = vrot.lane.b32.xlu2 %v8875_v55, %s9807_s21  ;;  %8866 = vrot.lane.b32.xlu0 %v8865_v63, %s9807_s21  ;;  %v8905_v26 = vpack.i.bf16 %v1180_v58, %v1179_v27  ;;  %v1101_v2 = vmul.f32 %v1070_v46, %v15177_v6  ;;  %v1102_v60 = vmul.f32 %v1070_v46, %v15178_v37  ;;  %v1134_v20 = vperm.slane %v990_v7, 0  ;;  %v8700_v55 = vld [vmem:[%s14865_s7 + $0x20] sm:$0xff]  ;;  %v8706_v63 = vld [vmem:[%s14865_s7 + $0x50] sm:$0xff]  ;;  %v15185_v58 = vld [vmem:[#allocation7_spill] sm:$0xff] }
 0x1c4   :  { %8871 = vrot.lane.b32.xlu1 %v8870_v12, %s9806_s20  ;;  %v8895_v8 = vpack.i.bf16 %v1178_v62, %v1177_v49  ;;  %1613 = vmatpush.bf16.msra.mxu1 %v8700_v55  ;;  %vm1567_vm13 = vcmask 785408   ;;  %v15186_v62 = vld [vmem:[#allocation6_spill] sm:$0xff]  ;;  %v15187_v46 = vld [vmem:[#allocation3_spill] sm:$0xff] }
 0x1c5   :  { %v1181_v22 = vadd.f32 %v1134_v20, %v1101_v2  ;;  %v1182_v51 = vadd.f32 %v1134_v20, %v1102_v60  ;;  %1780 = vmatpush.bf16.msra.mxu2 %v8706_v63 }
 0x1c7   :  { %v8915_v12 = vpack.i.bf16 %v1182_v51, %v1181_v22 }
 0x1c8   :  { %1614 = vmatpush.bf16.msra.mxu1 %v8699_v17 }
 0x1c9   :  { %1781 = vmatpush.bf16.msra.mxu2 %v8705_v40 }
 0x1cb   :  { %8891 = vrot.lane.b32.xlu2 %v15174_v57, %s9806_s20  ;;  %8881 = vrot.lane.b32.xlu0 %v15175_v15, %s9806_s20 }
 0x1cc   :  { %8886 = vrot.lane.b32.xlu1 %v8885_v54, %s9807_s21  ;;  %1615 = vmatpush.bf16.msra.mxu1 %v8698_v42  ;;  %v15189_v42 = vld [vmem:[#allocation5_spill] sm:$0xff] }
 0x1cd   :  { %1782 = vmatpush.bf16.msra.mxu2 %v8704_v3 }
 0x1d0   :  { %1616 = vmatpush.bf16.msra.mxu1 %v8697_v43  ;;  %v15190_v43 = vld [vmem:[#allocation4_spill] sm:$0xff] }
 0x1d1   :  { %1783 = vmatpush.bf16.msra.mxu2 %v8703_v23 }
 0x1d3   :  { %8906 = vrot.lane.b32.xlu2 %v8905_v26, %s9807_s21  ;;  %8896 = vrot.lane.b32.xlu0 %v8895_v8, %s9807_s21 }
 0x1d4   :  { %8901 = vrot.lane.b32.xlu1 %v15181_v52, %s9806_s20  ;;  %1617 = vmatpush.bf16.msra.mxu1 %v8696_v39  ;;  %v15191_v39 = vld [vmem:[#allocation9_spill] sm:$0xff] }
 0x1d5   :  { %1784 = vmatpush.bf16.msra.mxu2 %v8702_v34 }
 0x1db   :  { %8911 = vrot.lane.b32.xlu0 %v15184_v36, %s9806_s20 }
 0x1dc   :  { %8916 = vrot.lane.b32.xlu1 %v8915_v12, %s9807_s21 }
 0x1e5   :  { %v8782_v54 = vpop.permute.xlu2 %8781 }
 0x1e6   :  { %v8784_v17 = vunpack.i.h.bf16 %v8782_v54  ;;  %v8783_v40 = vunpack.i.l.bf16 %v8782_v54 }
 0x1e8   :  { %v1445_v34 = vsel %vm278_vm2, %v15191_v39, %v8783_v40 }
 0x1ed   :  { %v8787_v22 = vpop.permute.xlu2 %8786 }
 0x1ee   :  { %v8789_v12 = vunpack.i.h.bf16 %v8787_v22  ;;  %v8788_v29 = vunpack.i.l.bf16 %v8787_v22  ;;  %v15195_v22 = vld [vmem:[#allocation13_spill] sm:$0xff] }
 0x1fd   :  { %v8762_v45 = vpop.permute.xlu0 %8761 }
 0x1fe   :  { %v8772_v38 = vpop.permute.xlu1 %8771  ;;  %v8764_v53 = vunpack.i.h.bf16 %v8762_v45  ;;  %v8763_v28 = vunpack.i.l.bf16 %v8762_v45  ;;  %v15192_v45 = vld [vmem:[#allocation8_spill] sm:$0xff] }
 0x1ff   :  { %v8774_v0 = vunpack.i.h.bf16 %v8772_v38  ;;  %v8773_v11 = vunpack.i.l.bf16 %v8772_v38  ;;  %v1446_v38 = vsel %vm278_vm2, %v15192_v45, %v8784_v17 }
 0x200   :  { %v1443_v49 = vsel %vm278_vm2, %v15185_v58, %v8763_v28  ;;  %v1444_v7 = vsel %vm278_vm2, %v15186_v62, %v8764_v53  ;;  %v1478_v53 = vsel %vm1471_vm12, %v1445_v34, %v8788_v29  ;;  %v1479_v28 = vsel %vm1471_vm12, %v1446_v38, %v8789_v12 }
 0x201   :  { %v1439_v4 = vsel %vm278_vm2, %v15187_v46, %v8773_v11  ;;  %v1440_v26 = vsel %vm278_vm2, %v15188_v25, %v8774_v0  ;;  %v1520_v54 = vpack.c.bf16 %v1479_v28, %v1478_v53 }
 0x205   :  { %v8767_v13 = vpop.permute.xlu0 %8766 }
 0x206   :  { %v8769_v57 = vunpack.i.h.bf16 %v8767_v13  ;;  %v8768_v15 = vunpack.i.l.bf16 %v8767_v13  ;;  %v8777_v32 = vpop.permute.xlu1 %8776 }
 0x207   :  { %v8779_v30 = vunpack.i.h.bf16 %v8777_v32  ;;  %v8778_v27 = vunpack.i.l.bf16 %v8777_v32 }
 0x208   :  { %v1476_v8 = vsel %vm1471_vm12, %v1443_v49, %v8768_v15  ;;  %v1477_v2 = vsel %vm1471_vm12, %v1444_v7, %v8769_v57  ;;  %v8802_v57 = vpop.permute.xlu2 %8801  ;;  %v15193_v7 = vld [vmem:[#allocation11_spill] sm:$0xff] }
 0x209   :  { %v1472_v60 = vsel %vm1471_vm12, %v1439_v4, %v8778_v27  ;;  %v1473_v20 = vsel %vm1471_vm12, %v1440_v26, %v8779_v30  ;;  %v1519_v56 = vpack.c.bf16 %v1477_v2, %v1476_v8  ;;  %v8804_v32 = vunpack.i.h.bf16 %v8802_v57  ;;  %v15194_v4 = vld [vmem:[#allocation10_spill] sm:$0xff] }
 0x20a   :  { %v1517_v21 = vpack.c.bf16 %v1473_v20, %v1472_v60  ;;  %v8803_v30 = vunpack.i.l.bf16 %v8802_v57 }
 0x20b   :  { %8222 = vmatmul.msk.bf16.vlgmr.msra.gmra.mxu2 %vm1567_vm13, %v1519_v56  ;;  %v1448_v25 = vsel %vm278_vm2, %v15194_v4, %v8804_v32 }
 0x20c   :  { %8172 = vmatmul.msk.bf16.vlgmr.msra.gmra.mxu1 %vm1567_vm13, %v1517_v21  ;;  %v1447_v46 = vsel %vm278_vm2, %v15193_v7, %v8803_v30 }
 0x20d   :  { %v8792_v52 = vpop.permute.xlu0 %8791 }
 0x20e   :  { %v8794_v51 = vunpack.i.h.bf16 %v8792_v52  ;;  %v8793_v55 = vunpack.i.l.bf16 %v8792_v52  ;;  %v8797_v63 = vpop.permute.xlu1 %8796 }
 0x20f   :  { %v8799_v19 = vunpack.i.h.bf16 %v8797_v63  ;;  %v8798_v36 = vunpack.i.l.bf16 %v8797_v63 }
 0x210   :  { %v1441_v3 = vsel %vm278_vm2, %v15189_v42, %v8793_v55  ;;  %v1442_v23 = vsel %vm278_vm2, %v15190_v43, %v8794_v51  ;;  %v8817_v52 = vpop.permute.xlu2 %8816  ;;  %v15196_v55 = vld [vmem:[#allocation12_spill] sm:$0xff] }
 0x211   :  { %v1474_v0 = vsel %vm1471_vm12, %v1441_v3, %v8798_v36  ;;  %v1475_v11 = vsel %vm1471_vm12, %v1442_v23, %v8799_v19  ;;  %v8819_v17 = vunpack.i.h.bf16 %v8817_v52  ;;  %v8818_v40 = vunpack.i.l.bf16 %v8817_v52 }
 0x212   :  { %v1518_v13 = vpack.c.bf16 %v1475_v11, %v1474_v0 }
 0x215   :  { %v8807_v15 = vpop.permute.xlu0 %8806 }
 0x216   :  { %v8809_v27 = vunpack.i.h.bf16 %v8807_v15  ;;  %v8808_v49 = vunpack.i.l.bf16 %v8807_v15  ;;  %v8812_v60 = vpop.permute.xlu1 %8811 }
 0x217   :  { %v8814_v20 = vunpack.i.h.bf16 %v8812_v60  ;;  %v8813_v21 = vunpack.i.l.bf16 %v8812_v60 }
 0x218   :  { %v1480_v26 = vsel %vm1471_vm12, %v1447_v46, %v8808_v49  ;;  %v1481_v8 = vsel %vm1471_vm12, %v1448_v25, %v8809_v27  ;;  %v8832_v11 = vpop.permute.xlu2 %8831 }
 0x219   :  { %v1521_v2 = vpack.c.bf16 %v1481_v8, %v1480_v26  ;;  %v1449_v51 = vsel %vm278_vm2, %v15195_v22, %v8813_v21  ;;  %v1450_v63 = vsel %vm278_vm2, %v15196_v55, %v8814_v20  ;;  %v8833_v57 = vunpack.i.l.bf16 %v8832_v11 }
 0x21a   :  { %v1482_v12 = vsel %vm1471_vm12, %v1449_v51, %v8818_v40  ;;  %v1483_v29 = vsel %vm1471_vm12, %v1450_v63, %v8819_v17 }
 0x21b   :  { %8223 = vmatmul.msk.bf16.gmra.mxu2 %vm1567_vm13, %v1520_v54  ;;  %v1522_v19 = vpack.c.bf16 %v1483_v29, %v1482_v12  ;;  %v1453_v30 = vsel %vm278_vm2, %v15152_v16, %v8833_v57 }
 0x21c   :  { %8173 = vmatmul.msk.bf16.gmra.mxu1 %vm1567_vm13, %v1518_v13  ;;  %v8834_v13 = vunpack.i.h.bf16 %v8832_v11 }
 0x21d   :  { %v8822_v36 = vpop.permute.xlu0 %8821 }
 0x21e   :  { %v8823_v42 = vunpack.i.l.bf16 %v8822_v36  ;;  %v8827_v3 = vpop.permute.xlu1 %8826  ;;  %v1454_v27 = vsel %vm278_vm2, %v15153_v1, %v8834_v13 }
 0x21f   :  { %v8829_v43 = vunpack.i.h.bf16 %v8827_v3  ;;  %v8828_v23 = vunpack.i.l.bf16 %v8827_v3 }
 0x220   :  { %v1451_v34 = vsel %vm278_vm2, %v15147_v5, %v8823_v42  ;;  %v8847_v60 = vpop.permute.xlu2 %8846 }
 0x221   :  { %v1484_v53 = vsel %vm1471_vm12, %v1451_v34, %v8828_v23  ;;  %v8849_v52 = vunpack.i.h.bf16 %v8847_v60  ;;  %v8848_v51 = vunpack.i.l.bf16 %v8847_v60 }
 0x226   :  { %v8842_v26 = vpop.permute.xlu1 %8841 }
 0x227   :  { %v8844_v8 = vunpack.i.h.bf16 %v8842_v26 }
 0x229   :  { %v1456_v21 = vsel %vm278_vm2, %v15159_v44, %v8844_v8 }
 0x22a   :  { %v1489_v17 = vsel %vm1471_vm12, %v1456_v21, %v8849_v52 }
 0x22b   :  { %8224 = vmatmul.msk.bf16.gmra.mxu2 %vm1567_vm13, %v1521_v2 }
 0x22c   :  { %8174 = vmatmul.msk.bf16.gmra.mxu1 %vm1567_vm13, %v1519_v56  ;;  %v8824_v56 = vunpack.i.h.bf16 %v8822_v36 }
 0x22e   :  { %v1452_v38 = vsel %vm278_vm2, %v15151_v48, %v8824_v56  ;;  %v8857_v36 = vpop.permute.xlu1 %8856 }
 0x22f   :  { %v1485_v28 = vsel %vm1471_vm12, %v1452_v38, %v8829_v43  ;;  %v8859_v56 = vunpack.i.h.bf16 %v8857_v36  ;;  %v8858_v42 = vunpack.i.l.bf16 %v8857_v36 }
 0x230   :  { %v1523_v0 = vpack.c.bf16 %v1485_v28, %v1484_v53  ;;  %v8862_v53 = vpop.permute.xlu2 %8861 }
 0x231   :  { %v8863_v11 = vunpack.i.l.bf16 %v8862_v53 }
 0x233   :  { %v1459_v57 = vsel %vm278_vm2, %v15165_v14, %v8863_v11 }
 0x238   :  { %v8877_v21 = vpop.permute.xlu2 %8876 }
 0x23b   :  { %8225 = vmatmul.msk.bf16.gmra.mxu2 %vm1567_vm13, %v1522_v19 }
 0x23c   :  { %8175 = vmatmul.msk.bf16.gmra.mxu1 %vm1567_vm13, %v1520_v54  ;;  %v8837_v54 = vpop.permute.xlu0 %8836 }
 0x23d   :  { %v8839_v15 = vunpack.i.h.bf16 %v8837_v54  ;;  %v8838_v32 = vunpack.i.l.bf16 %v8837_v54 }
 0x23f   :  { %v1486_v49 = vsel %vm1471_vm12, %v1453_v30, %v8838_v32  ;;  %v1487_v46 = vsel %vm1471_vm12, %v1454_v27, %v8839_v15 }
 0x240   :  { %v1524_v25 = vpack.c.bf16 %v1487_v46, %v1486_v49  ;;  %v11415_v49 = vld [vmem:[%s14866_s8] ss:$0 sm:$0xff] }
 0x244   :  { %v8852_v12 = vpop.permute.xlu0 %8851 }
 0x245   :  { %v8854_v29 = vunpack.i.h.bf16 %v8852_v12 }
 0x247   :  { %v1458_v43 = vsel %vm278_vm2, %v15161_v61, %v8854_v29 }
 0x248   :  { %v1491_v34 = vsel %vm1471_vm12, %v1458_v43, %v8859_v56 }
 0x24b   :  { %8226 = vmatmul.msk.bf16.gmra.mxu2 %vm1567_vm13, %v1523_v0 }
 0x24c   :  { %8176 = vmatmul.msk.bf16.gmra.mxu1 %vm1567_vm13, %v1521_v2  ;;  %v8843_v2 = vunpack.i.l.bf16 %v8842_v26  ;;  %v8867_v28 = vpop.permute.xlu0 %8866 }
 0x24d   :  { %v8869_v54 = vunpack.i.h.bf16 %v8867_v28  ;;  %v8868_v13 = vunpack.i.l.bf16 %v8867_v28 }
 0x24e   :  { %v1455_v20 = vsel %vm278_vm2, %v15158_v50, %v8843_v2 }
 0x24f   :  { %v1488_v63 = vsel %vm1471_vm12, %v1455_v20, %v8848_v51  ;;  %v1492_v32 = vsel %vm1471_vm12, %v1459_v57, %v8868_v13 }
 0x250   :  { %v1525_v40 = vpack.c.bf16 %v1489_v17, %v1488_v63 }
 0x254   :  { %v8882_v28 = vpop.permute.xlu0 %8881 }
 0x255   :  { %v8883_v13 = vunpack.i.l.bf16 %v8882_v28 }
 0x25b   :  { %8227 = vmatmul.msk.bf16.gmra.mxu2 %vm1567_vm13, %v1524_v25 }
 0x25c   :  { %8177 = vmatmul.msk.bf16.gmra.mxu1 %vm1567_vm13, %v1522_v19  ;;  %v8853_v19 = vunpack.i.l.bf16 %v8852_v12  ;;  %v8879_v12 = vunpack.i.h.bf16 %v8877_v21 }
 0x25e   :  { %v1457_v3 = vsel %vm278_vm2, %v15160_v9, %v8853_v19 }
 0x25f   :  { %v1490_v23 = vsel %vm1471_vm12, %v1457_v3, %v8858_v42 }
 0x260   :  { %v1526_v38 = vpack.c.bf16 %v1491_v34, %v1490_v23 }
 0x26b   :  { %8228 = vmatmul.msk.bf16.gmra.mxu2 %vm1567_vm13, %v1525_v40 }
 0x26c   :  { %8178 = vmatmul.msk.bf16.gmra.mxu1 %vm1567_vm13, %v1523_v0  ;;  %v8864_v0 = vunpack.i.h.bf16 %v8862_v53 }
 0x26e   :  { %v1460_v15 = vsel %vm278_vm2, %v15162_v35, %v8864_v0 }
 0x26f   :  { %v1493_v30 = vsel %vm1471_vm12, %v1460_v15, %v8869_v54  ;;  %v8884_v54 = vunpack.i.h.bf16 %v8882_v28 }
 0x270   :  { %v11417_v46 = vpack.c.bf16 %v1493_v30, %v1492_v32 }
 0x27b   :  { %8229 = vmatmul.msk.bf16.gmra.mxu2 %vm1567_vm13, %v1526_v38 }
 0x27c   :  { %8179 = vmatmul.msk.bf16.gmra.mxu1 %vm1567_vm13, %v1524_v25  ;;  %v8872_v25 = vpop.permute.xlu1 %8871 }
 0x27d   :  { %v8874_v2 = vunpack.i.h.bf16 %v8872_v25  ;;  %v8873_v60 = vunpack.i.l.bf16 %v8872_v25 }
 0x27f   :  { %v1461_v63 = vsel %vm278_vm2, %v15170_v10, %v8873_v60  ;;  %v1462_v17 = vsel %vm278_vm2, %v15171_v59, %v8874_v2  ;;  %v1464_v60 = vsel %vm278_vm2, %v10687_v31, %v8884_v54 }
 0x280   :  { %v1495_v56 = vsel %vm1471_vm12, %v1462_v17, %v8879_v12 }
 0x284   :  { %v8887_v57 = vpop.permute.xlu1 %8886 }
 0x289   :  { %v1619_v27 = vpop.f32.mrf.mxu1 }
 0x28a   :  { %v1692_v26 = vadd.f32 %v11415_v49, %v1619_v27 }
 0x28b   :  { %8230 = vmatmul.msk.bf16.gmra.mxu2 %vm1567_vm13, %v11417_v46 }
 0x28c   :  { %8180 = vmatmul.msk.bf16.gmra.mxu1 %vm1567_vm13, %v1525_v40  ;;  %v8878_v40 = vunpack.i.l.bf16 %v8877_v21 }
 0x28e   :  { %v1786_v8 = vpop.f32.mrf.mxu2  ;;  %v1494_v36 = vsel %vm1471_vm12, %v1461_v63, %v8878_v40 }
 0x28f   :  { %v11423_v20 = vadd.f32 %v1786_v8, %v1692_v26  ;;  %v11436_v34 = vpack.c.bf16 %v1495_v56, %v1494_v36  ;;  %v8889_v26 = vunpack.i.h.bf16 %v8887_v57  ;;  %v8888_v8 = vunpack.i.l.bf16 %v8887_v57 }
 0x291   :  { %v8236_v52 = vmul.f32 -1.442695, %v11423_v20  ;;  %v1621_v51 = vpop.f32.mrf.mxu1  ;;  %v1497_v12 = vsel %vm1471_vm12, %v1464_v60, %v8889_v26 }
 0x292   :  { %v1693_v29 = vadd.f32 %v11415_v49, %v1621_v51 }
 0x293   :  { %9290 = vpow2.f32 %v8236_v52 }
 0x296   :  { %v1788_v19 = vpop.f32.mrf.mxu2 }
 0x297   :  { %v11433_v42 = vadd.f32 %v1788_v19, %v1693_v29 }
 0x299   :  { %v9291_v3 = vpop.eup %9290  ;;  %v8237_v43 = vmul.f32 -1.442695, %v11433_v42  ;;  %v1624_v23 = vpop.f32.mrf.mxu1 }
 0x29a   :  { %v1996_v53 = vadd.f32 1.0, %v9291_v3  ;;  %v1694_v0 = vadd.f32 %v11415_v49, %v1624_v23 }
 0x29b   :  { %9292 = vpow2.f32 %v8237_v43  ;;  %8231 = vmatmul.msk.bf16.gmra.mxu2 %vm1567_vm13, %v11436_v34 }
 0x29c   :  { %9294 = vrcp.f32 %v1996_v53  ;;  %8181 = vmatmul.msk.bf16.gmra.mxu1 %vm1567_vm13, %v1526_v38  ;;  %v1463_v38 = vsel %vm278_vm2, %v15115_v41, %v8883_v13  ;;  %v2035_v40 = vand.u32 2147483648, %v1996_v53  ;;  %v2033_v36 = vand.u32 2147483647, %v1996_v53 }
 0x29d   :  { %v1496_v17 = vsel %vm1471_vm12, %v1463_v38, %v8888_v8  ;;  %vm2029_vm15 = vweird.f32 %v1996_v53  ;;  %v8897_v38 = vpop.permute.xlu0 %8896 }
 0x29e   :  { %v1791_v11 = vpop.f32.mrf.mxu2  ;;  %v11455_v23 = vpack.c.bf16 %v1497_v12, %v1496_v17  ;;  %v2036_v54 = vor.u32 1.1754944e-38, %v2035_v40  ;;  %vm2034_vm1 = vcmp.eq.f32.partialorder %v2033_v36, 8.507059e+37  ;;  %v8898_v36 = vunpack.i.l.bf16 %v8897_v38 }
 0x29f   :  { %v11442_v15 = vadd.f32 %v1791_v11, %v1694_v0 }
 0x2a1   :  { %v9293_v32 = vpop.eup %9292  ;;  %v8238_v30 = vmul.f32 -1.442695, %v11442_v15  ;;  %v1626_v27 = vpop.f32.mrf.mxu1 }
 0x2a2   :  { %v9295_v25 = vpop.eup %9294  ;;  %v1997_v2 = vadd.f32 1.0, %v9293_v32  ;;  %v1695_v52 = vadd.f32 %v11415_v49, %v1626_v27 }
 0x2a3   :  { %9296 = vpow2.f32 %v8238_v30  ;;  %v2025_v21 = vmul.f32 %v9295_v25, %v1996_v53  ;;  %vm2030_vm14 = vweird.f32 %v9295_v25  ;;  %v8892_v30 = vpop.permute.xlu2 %8891 }
 0x2a4   :  { %9298 = vrcp.f32 %v1997_v2  ;;  %vm2031_vm0 = vmor %vm2029_vm15, %vm2030_vm14  ;;  %v2050_v8 = vand.u32 2147483648, %v1997_v2  ;;  %vm2044_vm4 = vweird.f32 %v1997_v2 }
 0x2a5   :  { %v2026_v51 = vsub.f32 1.0, %v2025_v21  ;;  %v2048_v21 = vand.u32 2147483647, %v1997_v2 }
 0x2a6   :  { %v1793_v63 = vpop.f32.mrf.mxu2 }
 0x2a7   :  { %v11452_v29 = vadd.f32 %v1793_v63, %v1695_v52  ;;  %v2027_v19 = vmul.f32 %v9295_v25, %v2026_v51  ;;  %v8894_v52 = vunpack.i.h.bf16 %v8892_v30  ;;  %v8893_v63 = vunpack.i.l.bf16 %v8892_v30 }
 0x2a8   :  { %vm2049_vm6 = vcmp.eq.f32.partialorder %v2048_v21, 8.507059e+37 }
 0x2a9   :  { %v9297_v56 = vpop.eup %9296  ;;  %v8239_v3 = vmul.f32 -1.442695, %v11452_v29  ;;  %v1629_v43 = vpop.f32.mrf.mxu1  ;;  %v2028_v28 = vadd.f32 %v9295_v25, %v2027_v19  ;;  %v8899_v19 = vunpack.i.h.bf16 %v8897_v38 }
 0x2aa   :  { %v9299_v0 = vpop.eup %9298  ;;  %v11457_v11 = vadd.f32 1.0, %v9297_v56  ;;  %v1696_v53 = vadd.f32 %v11415_v49, %v1629_v43 }
 0x2ab   :  { %9300 = vpow2.f32 %v8239_v3  ;;  %8232 = vmatmul.msk.bf16.gmra.mxu2 %vm1567_vm13, %v11455_v23  ;;  %v2032_v13 = vsel %vm2031_vm0, %v9295_v25, %v2028_v28  ;;  %v2040_v57 = vmul.f32 %v9299_v0, %v1997_v2  ;;  %vm2045_vm3 = vweird.f32 %v9299_v0 }
 0x2ac   :  { %9302 = vrcp.f32 %v11457_v11  ;;  %8182 = vmatmul.msk.bf16.gmra.mxu1 %vm1567_vm13, %v11417_v46  ;;  %v2037_v32 = vsel %vm2034_vm1, %v2036_v54, %v2032_v13  ;;  %vm2046_vm5 = vmor %vm2044_vm4, %vm2045_vm3  ;;  %v2051_v3 = vor.u32 1.1754944e-38, %v2050_v8  ;;  %v1465_v2 = vsel %vm278_vm2, %v10689_v24, %v8893_v63 }
 0x2ad   :  { %2472 = vrot.lane.b32.xlu2 %v2037_v32, %s9808_s30  ;;  %v2041_v27 = vsub.f32 1.0, %v2040_v57  ;;  %v1466_v57 = vsel %vm278_vm2, %v15176_v18, %v8894_v52  ;;  %v2063_v38 = vand.u32 2147483647, %v11457_v11  ;;  %vm2059_vm8 = vweird.f32 %v11457_v11 }
 0x2ae   :  { %v1796_v26 = vpop.f32.mrf.mxu2 }
 0x2af   :  { %v11466_v60 = vadd.f32 %v1796_v26, %v1696_v53  ;;  %v2042_v25 = vmul.f32 %v9299_v0, %v2041_v27  ;;  %v1499_v53 = vsel %vm1471_vm12, %v1466_v57, %v8899_v19  ;;  %v2065_v27 = vand.u32 2147483648, %v11457_v11  ;;  %v8902_v19 = vpop.permute.xlu1 %8901 }
 0x2b0   :  { %vm2064_vm10 = vcmp.eq.f32.partialorder %v2063_v38, 8.507059e+37 }
 0x2b1   :  { %v9301_v51 = vpop.eup %9300  ;;  %v8240_v46 = vmul.f32 -1.442695, %v11466_v60  ;;  %v1631_v17 = vpop.f32.mrf.mxu1  ;;  %v2043_v12 = vadd.f32 %v9299_v0, %v2042_v25 }
 0x2b2   :  { %v9303_v40 = vpop.eup %9302  ;;  %v11469_v56 = vadd.f32 1.0, %v9301_v51  ;;  %v1697_v13 = vadd.f32 %v11415_v49, %v1631_v17 }
 0x2b3   :  { %9304 = vpow2.f32 %v8240_v46  ;;  %v2047_v43 = vsel %vm2046_vm5, %v9299_v0, %v2043_v12  ;;  %v2055_v28 = vmul.f32 %v9303_v40, %v11457_v11  ;;  %v1498_v0 = vsel %vm1471_vm12, %v1465_v2, %v8898_v36 }
 0x2b4   :  { %9306 = vrcp.f32 %v11469_v56  ;;  %v2052_v54 = vsel %vm2049_vm6, %v2051_v3, %v2047_v43  ;;  %vm2060_vm7 = vweird.f32 %v9303_v40  ;;  %v11486_v63 = vpack.c.bf16 %v1499_v53, %v1498_v0  ;;  %v8907_v53 = vpop.permute.xlu2 %8906 }
 0x2b5   :  { %2474 = vrot.lane.b32.xlu0 %v2052_v54, %s9808_s30  ;;  %v2056_v32 = vsub.f32 1.0, %v2055_v28  ;;  %vm2061_vm9 = vmor %vm2059_vm8, %vm2060_vm7  ;;  %v2066_v12 = vor.u32 1.1754944e-38, %v2065_v27  ;;  %v8904_v54 = vunpack.i.h.bf16 %v8902_v19  ;;  %v2080_v57 = vand.u32 2147483648, %v11469_v56 }
 0x2b6   :  { %v1798_v30 = vpop.f32.mrf.mxu2  ;;  %vm2074_vm14 = vweird.f32 %v11469_v56 }
 0x2b7   :  { %v11482_v26 = vadd.f32 %v1798_v30, %v1697_v13  ;;  %v2057_v8 = vmul.f32 %v9303_v40, %v2056_v32  ;;  %v8903_v13 = vunpack.i.l.bf16 %v8902_v19  ;;  %v2078_v30 = vand.u32 2147483647, %v11469_v56 }
 0x2b9   :  { %v9305_v25 = vpop.eup %9304  ;;  %v8241_v21 = vmul.f32 -1.442695, %v11482_v26  ;;  %v1634_v51 = vpop.f32.mrf.mxu1  ;;  %v2058_v52 = vadd.f32 %v9303_v40, %v2057_v8  ;;  %vm2079_vm0 = vcmp.eq.f32.partialorder %v2078_v30, 8.507059e+37 }
 0x2ba   :  { %v9307_v46 = vpop.eup %9306  ;;  %v11489_v17 = vadd.f32 1.0, %v9305_v25  ;;  %v1698_v43 = vadd.f32 %v11415_v49, %v1634_v51  ;;  %v1468_v25 = vsel %vm278_vm2, %v15120_v47, %v8904_v54 }
 0x2bb   :  { %9308 = vpow2.f32 %v8241_v21  ;;  %8233 = vmatmul.msk.bf16.gmra.mxu2 %vm1567_vm13, %v11486_v63  ;;  %v2062_v36 = vsel %vm2061_vm9, %v9303_v40, %v2058_v52  ;;  %v2070_v3 = vmul.f32 %v9307_v46, %v11469_v56  ;;  %vm2075_vm11 = vweird.f32 %v9307_v46 }
 0x2bc   :  { %9310 = vrcp.f32 %v11489_v17  ;;  %8183 = vmatmul.msk.bf16.gmra.mxu1 %vm1567_vm13, %v11436_v34  ;;  %v2067_v11 = vsel %vm2064_vm10, %v2066_v12, %v2062_v36  ;;  %v1467_v21 = vsel %vm278_vm2, %v15119_v33, %v8903_v13  ;;  %vm2076_vm15 = vmor %vm2074_vm14, %vm2075_vm11  ;;  %v2081_v52 = vor.u32 1.1754944e-38, %v2080_v57 }
 0x2bd   :  { %2476 = vrot.lane.b32.xlu1 %v2067_v11, %s9808_s30  ;;  %v2071_v28 = vsub.f32 1.0, %v2070_v3  ;;  %v8909_v36 = vunpack.i.h.bf16 %v8907_v53  ;;  %v8908_v3 = vunpack.i.l.bf16 %v8907_v53  ;;  %vm2089_vm3 = vweird.f32 %v11489_v17 }
 0x2be   :  { %v1801_v2 = vpop.f32.mrf.mxu2 }
 0x2bf   :  { %v11500_v40 = vadd.f32 %v1801_v2, %v1698_v43  ;;  %v2072_v32 = vmul.f32 %v9307_v46, %v2071_v28  ;;  %v1500_v54 = vsel %vm1471_vm12, %v1467_v21, %v8908_v3  ;;  %v1501_v13 = vsel %vm1471_vm12, %v1468_v25, %v8909_v36 }
 0x2c1   :  { %v9309_v0 = vpop.eup %9308  ;;  %v8242_v34 = vmul.f32 -1.442695, %v11500_v40  ;;  %v1636_v27 = vpop.f32.mrf.mxu1  ;;  %v2073_v8 = vadd.f32 %v9307_v46, %v2072_v32  ;;  %v2093_v32 = vand.u32 2147483647, %v11489_v17 }
 0x2c2   :  { %v9311_v38 = vpop.eup %9310  ;;  %v11509_v51 = vadd.f32 1.0, %v9309_v0  ;;  %v1699_v11 = vadd.f32 %v11415_v49, %v1636_v27 }
 0x2c3   :  { %9312 = vpow2.f32 %v8242_v34  ;;  %v2077_v12 = vsel %vm2076_vm15, %v9307_v46, %v2073_v8  ;;  %v2085_v19 = vmul.f32 %v9311_v38, %v11489_v17  ;;  %v2095_v46 = vand.u32 2147483648, %v11489_v17  ;;  %v8917_v17 = vpop.permute.xlu1 %8916 }
 0x2c4   :  { %9314 = vrcp.f32 %v11509_v51  ;;  %v2082_v56 = vsel %vm2079_vm0, %v2081_v52, %v2077_v12  ;;  %vm2090_vm1 = vweird.f32 %v9311_v38  ;;  %v1733_v34 = vpack.c.bf16 %v1501_v13, %v1500_v54  ;;  %v8912_v52 = vpop.permute.xlu0 %8911 }
 0x2c5   :  { %2478 = vrot.lane.b32.xlu2 %v2082_v56, %s9808_s30  ;;  %v2086_v43 = vsub.f32 1.0, %v2085_v19  ;;  %vm2091_vm4 = vmor %vm2089_vm3, %vm2090_vm1  ;;  %v2096_v25 = vor.u32 1.1754944e-38, %v2095_v46  ;;  %vm2094_vm5 = vcmp.eq.f32.partialorder %v2093_v32, 8.507059e+37  ;;  %v2108_v46 = vand.u32 2147483647, %v11509_v51 }
 0x2c6   :  { %v1803_v28 = vpop.f32.mrf.mxu2  ;;  %v8918_v32 = vunpack.i.l.bf16 %v8917_v17  ;;  %vm2104_vm7 = vweird.f32 %v11509_v51 }
 0x2c7   :  { %v11518_v2 = vadd.f32 %v1803_v28, %v1699_v11  ;;  %v2087_v57 = vmul.f32 %v9311_v38, %v2086_v43  ;;  %v8914_v11 = vunpack.i.h.bf16 %v8912_v52  ;;  %v8913_v43 = vunpack.i.l.bf16 %v8912_v52 }
 0x2c8   :  { %vm2109_vm9 = vcmp.eq.f32.partialorder %v2108_v46, 8.507059e+37 }
 0x2c9   :  { %v9313_v30 = vpop.eup %9312  ;;  %v8243_v0 = vmul.f32 -1.442695, %v11518_v2  ;;  %v1639_v53 = vpop.f32.mrf.mxu1  ;;  %v2088_v27 = vadd.f32 %v9311_v38, %v2087_v57  ;;  %v8919_v57 = vunpack.i.h.bf16 %v8917_v17 }
 0x2ca   :  { %v9315_v8 = vpop.eup %9314  ;;  %v11523_v21 = vadd.f32 1.0, %v9313_v30  ;;  %v1700_v3 = vadd.f32 %v11415_v49, %v1639_v53 }
 0x2cb   :  { %9316 = vpow2.f32 %v8243_v0  ;;  %8234 = vmatmul.msk.bf16.gmra.mxu2 %vm1567_vm13, %v1733_v34  ;;  %v2092_v12 = vsel %vm2091_vm4, %v9311_v38, %v2088_v27  ;;  %v2100_v19 = vmul.f32 %v9315_v8, %v11509_v51  ;;  %v2110_v38 = vand.u32 2147483648, %v11509_v51 }
 0x2cc   :  { %9318 = vrcp.f32 %v11523_v21  ;;  %8184 = vmatmul.msk.bf16.gmra.mxu1 %vm1567_vm13, %v11455_v23  ;;  %v2097_v36 = vsel %vm2094_vm5, %v2096_v25, %v2092_v12  ;;  %vm2105_vm6 = vweird.f32 %v9315_v8  ;;  %v1470_v27 = vsel %vm278_vm2, %v15178_v37, %v8914_v11 }
 0x2cd   :  { %2480 = vrot.lane.b32.xlu0 %v2097_v36, %s9808_s30  ;;  %v2101_v56 = vsub.f32 1.0, %v2100_v19  ;;  %v1469_v25 = vsel %vm278_vm2, %v15177_v6, %v8913_v43  ;;  %vm2106_vm8 = vmor %vm2104_vm7, %vm2105_vm6  ;;  %v2111_v12 = vor.u32 1.1754944e-38, %v2110_v38  ;;  %vm2119_vm11 = vweird.f32 %v11523_v21 }
 0x2ce   :  { %v1806_v28 = vpop.f32.mrf.mxu2  ;;  %v1502_v11 = vsel %vm1471_vm12, %v1469_v25, %v8918_v32 }
 0x2cf   :  { %v11533_v54 = vadd.f32 %v1806_v28, %v1700_v3  ;;  %v2102_v13 = vmul.f32 %v9315_v8, %v2101_v56  ;;  %v1503_v56 = vsel %vm1471_vm12, %v1470_v27, %v8919_v57  ;;  %v2125_v28 = vand.u32 2147483648, %v11523_v21 }
 0x2d1   :  { %v9317_v23 = vpop.eup %9316  ;;  %v8244_v30 = vmul.f32 -1.442695, %v11533_v54  ;;  %v1641_v0 = vpop.f32.mrf.mxu1  ;;  %v2103_v53 = vadd.f32 %v9315_v8, %v2102_v13  ;;  %v2123_v13 = vand.u32 2147483647, %v11523_v21  ;;  %v2126_v32 = vor.u32 1.1754944e-38, %v2125_v28 }
 0x2d2   :  { %v9319_v34 = vpop.eup %9318  ;;  %v2003_v52 = vadd.f32 1.0, %v9317_v23  ;;  %v1701_v3 = vadd.f32 %v11415_v49, %v1641_v0  ;;  %v1734_v0 = vpack.c.bf16 %v1503_v56, %v1502_v11 }
 0x2d3   :  { %9320 = vpow2.f32 %v8244_v30  ;;  %v2107_v19 = vsel %vm2106_vm8, %v9315_v8, %v2103_v53  ;;  %v2115_v36 = vmul.f32 %v9319_v34, %v11523_v21  ;;  %vm2120_vm10 = vweird.f32 %v9319_v34 }
 0x2d4   :  { %9322 = vrcp.f32 %v2003_v52  ;;  %v2112_v17 = vsel %vm2109_vm9, %v2111_v12, %v2107_v19  ;;  %vm2121_vm14 = vmor %vm2119_vm11, %vm2120_vm10  ;;  %vm2124_vm15 = vcmp.eq.f32.partialorder %v2123_v13, 8.507059e+37  ;;  %v2138_v11 = vand.u32 2147483647, %v2003_v52 }
 0x2d5   :  { %2482 = vrot.lane.b32.xlu1 %v2112_v17, %s9808_s30  ;;  %v2116_v51 = vsub.f32 1.0, %v2115_v36  ;;  %vm2134_vm1 = vweird.f32 %v2003_v52 }
 0x2d6   :  { %v1808_v43 = vpop.f32.mrf.mxu2  ;;  %vm2139_vm4 = vcmp.eq.f32.partialorder %v2138_v11, 8.507059e+37 }
 0x2d7   :  { %v11548_v38 = vadd.f32 %v1808_v43, %v1701_v3  ;;  %v2117_v8 = vmul.f32 %v9319_v34, %v2116_v51  ;;  %v2140_v3 = vand.u32 2147483648, %v2003_v52 }
 0x2d9   :  { %v9321_v46 = vpop.eup %9320  ;;  %v8245_v23 = vmul.f32 -1.442695, %v11548_v38  ;;  %v1644_v30 = vpop.f32.mrf.mxu1  ;;  %v2118_v53 = vadd.f32 %v9319_v34, %v2117_v8 }
 0x2da   :  { %v9323_v57 = vpop.eup %9322  ;;  %v2004_v27 = vadd.f32 1.0, %v9321_v46  ;;  %v1702_v36 = vadd.f32 %v11415_v49, %v1644_v30  ;;  %v2141_v46 = vor.u32 1.1754944e-38, %v2140_v3 }
 0x2db   :  { %9324 = vpow2.f32 %v8245_v23  ;;  %8235 = vmatmul.msk.bf16.gmra.mxu2 %vm1567_vm13, %v1734_v0  ;;  %v2122_v25 = vsel %vm2121_vm14, %v9319_v34, %v2118_v53  ;;  %v2130_v12 = vmul.f32 %v9323_v57, %v2003_v52  ;;  %vm2135_vm0 = vweird.f32 %v9323_v57 }
 0x2dc   :  { %9326 = vrcp.f32 %v2004_v27  ;;  %8185 = vmatmul.msk.bf16.gmra.mxu1 %vm1567_vm13, %v11486_v63  ;;  %v2127_v19 = vsel %vm2124_vm15, %v2126_v32, %v2122_v25  ;;  %vm2136_vm3 = vmor %vm2134_vm1, %vm2135_vm0  ;;  %vm2149_vm6 = vweird.f32 %v2004_v27 }
 0x2dd   :  { %2484 = vrot.lane.b32.xlu2 %v2127_v19, %s9808_s30  ;;  %v2131_v21 = vsub.f32 1.0, %v2130_v12  ;;  %v2155_v12 = vand.u32 2147483648, %v2004_v27 }
 0x2de   :  { %v1811_v17 = vpop.f32.mrf.mxu2 }
 0x2df   :  { %v11558_v51 = vadd.f32 %v1811_v17, %v1702_v36  ;;  %v2132_v56 = vmul.f32 %v9323_v57, %v2131_v21  ;;  %v2153_v36 = vand.u32 2147483647, %v2004_v27 }
 0x2e1   :  { %v9325_v34 = vpop.eup %9324  ;;  %v8246_v43 = vmul.f32 -1.442695, %v11558_v51  ;;  %v1646_v28 = vpop.f32.mrf.mxu1  ;;  %v2133_v8 = vadd.f32 %v9323_v57, %v2132_v56  ;;  %vm2154_vm8 = vcmp.eq.f32.partialorder %v2153_v36, 8.507059e+37 }
 0x2e2   :  { %v9327_v63 = vpop.eup %9326  ;;  %v2005_v13 = vadd.f32 1.0, %v9325_v34  ;;  %v1703_v53 = vadd.f32 %v11415_v49, %v1646_v28  ;;  %v2156_v34 = vor.u32 1.1754944e-38, %v2155_v12 }
 0x2e3   :  { %9328 = vpow2.f32 %v8246_v43  ;;  %v2137_v23 = vsel %vm2136_vm3, %v9323_v57, %v2133_v8  ;;  %v2145_v30 = vmul.f32 %v9327_v63, %v2004_v27  ;;  %vm2150_vm5 = vweird.f32 %v9327_v63 }
 0x2e4   :  { %9330 = vrcp.f32 %v2005_v13  ;;  %v2142_v0 = vsel %vm2139_vm4, %v2141_v46, %v2137_v23  ;;  %vm2151_vm7 = vmor %vm2149_vm6, %vm2150_vm5  ;;  %vm2164_vm10 = vweird.f32 %v2005_v13 }
 0x2e5   :  { %2486 = vrot.lane.b32.xlu0 %v2142_v0, %s9808_s30  ;;  %v2146_v32 = vsub.f32 1.0, %v2145_v30  ;;  %v2170_v0 = vand.u32 2147483648, %v2005_v13 }
 0x2e6   :  { %v1813_v25 = vpop.f32.mrf.mxu2 }
 0x2e7   :  { %v11563_v19 = vadd.f32 %v1813_v25, %v1703_v53  ;;  %v2147_v52 = vmul.f32 %v9327_v63, %v2146_v32  ;;  %v2168_v32 = vand.u32 2147483647, %v2005_v13 }
 0x2e9   :  { %v9329_v21 = vpop.eup %9328  ;;  %v8247_v17 = vmul.f32 -1.442695, %v11563_v19  ;;  %v1649_v57 = vpop.f32.mrf.mxu1  ;;  %v2148_v3 = vadd.f32 %v9327_v63, %v2147_v52  ;;  %vm2169_vm14 = vcmp.eq.f32.partialorder %v2168_v32, 8.507059e+37 }
 0x2ea   :  { %v9331_v56 = vpop.eup %9330  ;;  %v2006_v11 = vadd.f32 1.0, %v9329_v21  ;;  %v1704_v46 = vadd.f32 %v11415_v49, %v1649_v57 }
 0x2eb   :  { %9332 = vpow2.f32 %v8247_v17  ;;  %v2152_v43 = vsel %vm2151_vm7, %v9327_v63, %v2148_v3  ;;  %v2160_v28 = vmul.f32 %v9331_v56, %v2005_v13  ;;  %vm2165_vm9 = vweird.f32 %v9331_v56 }
 0x2ec   :  { %9334 = vrcp.f32 %v2006_v11  ;;  %v2157_v8 = vsel %vm2154_vm8, %v2156_v34, %v2152_v43  ;;  %vm2166_vm11 = vmor %vm2164_vm10, %vm2165_vm9  ;;  %v2171_v17 = vor.u32 1.1754944e-38, %v2170_v0  ;;  %v8709_v43 = vld [vmem:[%s14867_s9 + $0x8] sm:$0xff]  ;;  %vm2179_vm0 = vweird.f32 %v2006_v11 }
 0x2ed   :  { %2488 = vrot.lane.b32.xlu1 %v2157_v8, %s9808_s30  ;;  %v2161_v23 = vsub.f32 1.0, %v2160_v28  ;;  %2666 = vmatpush.bf16.msrb.mxu3 %v8709_v43 }
 0x2ee   :  { %v1816_v30 = vpop.f32.mrf.mxu2 }
 0x2ef   :  { %v11568_v53 = vadd.f32 %v1816_v30, %v1704_v46  ;;  %v2162_v27 = vmul.f32 %v9331_v56, %v2161_v23  ;;  %v2185_v46 = vand.u32 2147483648, %v2006_v11 }
 0x2f1   :  { %v9333_v25 = vpop.eup %9332  ;;  %v8248_v12 = vmul.f32 -1.442695, %v11568_v53  ;;  %v1651_v63 = vpop.f32.mrf.mxu1  ;;  %v2163_v52 = vadd.f32 %v9331_v56, %v2162_v27 }
 0x2f2   :  { %v9335_v36 = vpop.eup %9334  ;;  %v2007_v21 = vadd.f32 1.0, %v9333_v25  ;;  %v1705_v28 = vadd.f32 %v11415_v49, %v1651_v63  ;;  %v2186_v63 = vor.u32 1.1754944e-38, %v2185_v46 }
 0x2f3   :  { %9336 = vpow2.f32 %v8248_v12  ;;  %v2167_v57 = vsel %vm2166_vm11, %v9331_v56, %v2163_v52  ;;  %v2175_v3 = vmul.f32 %v9335_v36, %v2006_v11  ;;  %vm2180_vm15 = vweird.f32 %v9335_v36 }
 0x2f4   :  { %9338 = vrcp.f32 %v2007_v21  ;;  %v2172_v34 = vsel %vm2169_vm14, %v2171_v17, %v2167_v57  ;;  %v2183_v56 = vand.u32 2147483647, %v2006_v11  ;;  %vm2181_vm1 = vmor %vm2179_vm0, %vm2180_vm15  ;;  %vm2194_vm5 = vweird.f32 %v2007_v21 }
 0x2f5   :  { %2490 = vrot.lane.b32.xlu2 %v2172_v34, %s9808_s30  ;;  %v2176_v8 = vsub.f32 1.0, %v2175_v3 }
 0x2f6   :  { %v1818_v13 = vpop.f32.mrf.mxu2  ;;  %vm2184_vm3 = vcmp.eq.f32.partialorder %v2183_v56, 8.507059e+37 }
 0x2f7   :  { %v11576_v23 = vadd.f32 %v1818_v13, %v1705_v28  ;;  %v2177_v30 = vmul.f32 %v9335_v36, %v2176_v8  ;;  %v2200_v8 = vand.u32 2147483648, %v2007_v21 }
 0x2f9   :  { %v9337_v0 = vpop.eup %9336  ;;  %v8249_v27 = vmul.f32 -1.442695, %v11576_v23  ;;  %v1654_v32 = vpop.f32.mrf.mxu1  ;;  %v2178_v25 = vadd.f32 %v9335_v36, %v2177_v30  ;;  %v2198_v30 = vand.u32 2147483647, %v2007_v21 }
 0x2fa   :  { %v9339_v12 = vpop.eup %9338  ;;  %v2008_v52 = vadd.f32 1.0, %v9337_v0  ;;  %v1706_v34 = vadd.f32 %v11415_v49, %v1654_v32  ;;  %v2201_v32 = vor.u32 1.1754944e-38, %v2200_v8 }
 0x2fb   :  { %9340 = vpow2.f32 %v8249_v27  ;;  %v2182_v17 = vsel %vm2181_vm1, %v9335_v36, %v2178_v25  ;;  %v2190_v57 = vmul.f32 %v9339_v12, %v2007_v21  ;;  %vm2195_vm4 = vweird.f32 %v9339_v12 }
 0x2fc   :  { %9342 = vrcp.f32 %v2008_v52  ;;  %v2187_v3 = vsel %vm2184_vm3, %v2186_v63, %v2182_v17  ;;  %vm2196_vm6 = vmor %vm2194_vm5, %vm2195_vm4  ;;  %vm2199_vm7 = vcmp.eq.f32.partialorder %v2198_v30, 8.507059e+37  ;;  %vm2209_vm9 = vweird.f32 %v2008_v52 }
 0x2fd   :  { %2492 = vrot.lane.b32.xlu0 %v2187_v3, %s9808_s30  ;;  %v2191_v43 = vsub.f32 1.0, %v2190_v57  ;;  %v8708_v3 = vld [vmem:[%s14867_s9] sm:$0xff] }
 0x2fe   :  { %v1821_v28 = vpop.f32.mrf.mxu2  ;;  %2667 = vmatpush.bf16.msrb.mxu3 %v8708_v3 }
 0x2ff   :  { %v11581_v13 = vadd.f32 %v1821_v28, %v1706_v34  ;;  %v2192_v11 = vmul.f32 %v9339_v12, %v2191_v43  ;;  %v2215_v28 = vand.u32 2147483648, %v2008_v52 }
 0x301   :  { %v9341_v0 = vpop.eup %9340  ;;  %v8250_v46 = vmul.f32 -1.442695, %v11581_v13  ;;  %v1656_v36 = vpop.f32.mrf.mxu1  ;;  %v2193_v56 = vadd.f32 %v9339_v12, %v2192_v11 }
 0x302   :  { %v9343_v27 = vpop.eup %9342  ;;  %v2009_v25 = vadd.f32 1.0, %v9341_v0  ;;  %v1707_v34 = vadd.f32 %v11415_v49, %v1656_v36  ;;  %v2216_v36 = vor.u32 1.1754944e-38, %v2215_v28 }
 0x303   :  { %9344 = vpow2.f32 %v8250_v46  ;;  %v2197_v63 = vsel %vm2196_vm6, %v9339_v12, %v2193_v56  ;;  %v2205_v17 = vmul.f32 %v9343_v27, %v2008_v52  ;;  %vm2210_vm8 = vweird.f32 %v9343_v27 }
 0x304   :  { %9346 = vrcp.f32 %v2009_v25  ;;  %v2202_v57 = vsel %vm2199_vm7, %v2201_v32, %v2197_v63  ;;  %v2213_v12 = vand.u32 2147483647, %v2008_v52  ;;  %vm2211_vm10 = vmor %vm2209_vm9, %vm2210_vm8  ;;  %v2230_v47 = vand.u32 2147483648, %v2009_v25 }
 0x305   :  { %2494 = vrot.lane.b32.xlu1 %v2202_v57, %s9808_s30  ;;  %v2206_v43 = vsub.f32 1.0, %v2205_v17  ;;  %vm2224_vm15 = vweird.f32 %v2009_v25 }
 0x306   :  { %v1823_v21 = vpop.f32.mrf.mxu2  ;;  %vm2214_vm11 = vcmp.eq.f32.partialorder %v2213_v12, 8.507059e+37 }
 0x307   :  { %v11589_v11 = vadd.f32 %v1823_v21, %v1707_v34  ;;  %v2207_v8 = vmul.f32 %v9343_v27, %v2206_v43 }
 0x309   :  { %v9345_v30 = vpop.eup %9344  ;;  %v8251_v0 = vmul.f32 -1.442695, %v11589_v11  ;;  %v1659_v46 = vpop.f32.mrf.mxu1  ;;  %v2208_v56 = vadd.f32 %v9343_v27, %v2207_v8  ;;  %v2228_v8 = vand.u32 2147483647, %v2009_v25 }
 0x30a   :  { %v9347_v32 = vpop.eup %9346  ;;  %v2010_v63 = vadd.f32 1.0, %v9345_v30  ;;  %v1708_v34 = vadd.f32 %v11415_v49, %v1659_v46  ;;  %v2231_v46 = vor.u32 1.1754944e-38, %v2230_v47 }
 0x30b   :  { %9348 = vpow2.f32 %v8251_v0  ;;  %v2212_v17 = vsel %vm2211_vm10, %v9343_v27, %v2208_v56  ;;  %v2220_v57 = vmul.f32 %v9347_v32, %v2009_v25  ;;  %vm2225_vm14 = vweird.f32 %v9347_v32 }
 0x30c   :  { %9350 = vrcp.f32 %v2010_v63  ;;  %v2217_v3 = vsel %vm2214_vm11, %v2216_v36, %v2212_v17  ;;  %vm2226_vm0 = vmor %vm2224_vm15, %vm2225_vm14  ;;  %vm2229_vm1 = vcmp.eq.f32.partialorder %v2228_v8, 8.507059e+37  ;;  %vm2239_vm4 = vweird.f32 %v2010_v63 }
 0x30d   :  { %2496 = vrot.lane.b32.xlu2 %v2217_v3, %s9808_s30  ;;  %v2221_v43 = vsub.f32 1.0, %v2220_v57 }
 0x30e   :  { %v1826_v21 = vpop.f32.mrf.mxu2 }
 0x30f   :  { %v11594_v37 = vadd.f32 %v1826_v21, %v1708_v34  ;;  %v2222_v52 = vmul.f32 %v9347_v32, %v2221_v43  ;;  %v2245_v21 = vand.u32 2147483648, %v2010_v63 }
 0x311   :  { %v9349_v30 = vpop.eup %9348  ;;  %v8252_v28 = vmul.f32 -1.442695, %v11594_v37  ;;  %v1661_v27 = vpop.f32.mrf.mxu1  ;;  %v2223_v12 = vadd.f32 %v9347_v32, %v2222_v52  ;;  %v2243_v52 = vand.u32 2147483647, %v2010_v63 }
 0x312   :  { %v9351_v0 = vpop.eup %9350  ;;  %v2011_v56 = vadd.f32 1.0, %v9349_v30  ;;  %v1709_v3 = vadd.f32 %v11415_v49, %v1661_v27  ;;  %v2246_v27 = vor.u32 1.1754944e-38, %v2245_v21 }
 0x313   :  { %9352 = vpow2.f32 %v8252_v28  ;;  %v2227_v36 = vsel %vm2226_vm0, %v9347_v32, %v2223_v12  ;;  %v2235_v17 = vmul.f32 %v9351_v0, %v2010_v63  ;;  %vm2240_vm3 = vweird.f32 %v9351_v0 }
 0x314   :  { %9354 = vrcp.f32 %v2011_v56  ;;  %v2232_v57 = vsel %vm2229_vm1, %v2231_v46, %v2227_v36  ;;  %vm2241_vm5 = vmor %vm2239_vm4, %vm2240_vm3  ;;  %vm2244_vm6 = vcmp.eq.f32.partialorder %v2243_v52, 8.507059e+37  ;;  %vm2254_vm8 = vweird.f32 %v2011_v56 }
 0x315   :  { %2498 = vrot.lane.b32.xlu0 %v2232_v57, %s9808_s30  ;;  %v2236_v34 = vsub.f32 1.0, %v2235_v17 }
 0x316   :  { %v1828_v43 = vpop.f32.mrf.mxu2 }
 0x317   :  { %v11599_v24 = vadd.f32 %v1828_v43, %v1709_v3  ;;  %v2237_v25 = vmul.f32 %v9351_v0, %v2236_v34  ;;  %v2260_v43 = vand.u32 2147483648, %v2011_v56 }
 0x319   :  { %v9353_v30 = vpop.eup %9352  ;;  %v8253_v47 = vmul.f32 -1.442695, %v11599_v24  ;;  %v1664_v32 = vpop.f32.mrf.mxu1  ;;  %v2238_v8 = vadd.f32 %v9351_v0, %v2237_v25 }
 0x31a   :  { %v9355_v28 = vpop.eup %9354  ;;  %v11602_v12 = vadd.f32 1.0, %v9353_v30  ;;  %v1710_v57 = vadd.f32 %v11415_v49, %v1664_v32  ;;  %v2258_v30 = vand.u32 2147483647, %v2011_v56 }
 0x31b   :  { %9356 = vpow2.f32 %v8253_v47  ;;  %v2242_v46 = vsel %vm2241_vm5, %v9351_v0, %v2238_v8  ;;  %v2250_v36 = vmul.f32 %v9355_v28, %v2011_v56  ;;  %vm2255_vm7 = vweird.f32 %v9355_v28 }
 0x31c   :  { %9358 = vrcp.f32 %v11602_v12  ;;  %v2247_v17 = vsel %vm2244_vm6, %v2246_v27, %v2242_v46  ;;  %vm2256_vm9 = vmor %vm2254_vm8, %vm2255_vm7  ;;  %v2261_v27 = vor.u32 1.1754944e-38, %v2260_v43  ;;  %vm2259_vm10 = vcmp.eq.f32.partialorder %v2258_v30, 8.507059e+37 }
 0x31d   :  { %2500 = vrot.lane.b32.xlu1 %v2247_v17, %s9808_s30  ;;  %v2251_v3 = vsub.f32 1.0, %v2250_v36  ;;  %9360 = vtanh.f32 %v11423_v20  ;;  %v2473_v17 = vpop.permute.xlu2 %2472  ;;  %vm2269_vm14 = vweird.f32 %v11602_v12 }
 0x31e   :  { %v1831_v34 = vpop.f32.mrf.mxu2  ;;  %9362 = vtanh.f32 %v11433_v42 }
 0x31f   :  { %v11607_v63 = vadd.f32 %v1831_v34, %v1710_v57  ;;  %v2252_v25 = vmul.f32 %v9355_v28, %v2251_v3  ;;  %v2275_v34 = vand.u32 2147483648, %v11602_v12 }
 0x321   :  { %v9357_v0 = vpop.eup %9356  ;;  %v8254_v21 = vmul.f32 -1.442695, %v11607_v63  ;;  %v1666_v52 = vpop.f32.mrf.mxu1  ;;  %v2253_v47 = vadd.f32 %v9355_v28, %v2252_v25 }
 0x322   :  { %v9359_v32 = vpop.eup %9358  ;;  %v11612_v8 = vadd.f32 1.0, %v9357_v0  ;;  %v1711_v42 = vadd.f32 %v11415_v49, %v1666_v52  ;;  %v2273_v0 = vand.u32 2147483647, %v11602_v12 }
 0x323   :  { %9364 = vpow2.f32 %v8254_v21  ;;  %v2257_v46 = vsel %vm2256_vm9, %v9355_v28, %v2253_v47  ;;  %v2265_v36 = vmul.f32 %v9359_v32, %v11602_v12  ;;  %v9361_v56 = vpop.eup %9360  ;;  %vm2270_vm11 = vweird.f32 %v9359_v32  ;;  %v11634_v12 = vld [vmem:[%s14866_s8] ss:$0 sm:$0xff] }
 0x324   :  { %9366 = vrcp.f32 %v11612_v8  ;;  %v2262_v20 = vsel %vm2259_vm10, %v2261_v27, %v2257_v46  ;;  %v9363_v25 = vpop.eup %9362  ;;  %v2556_v21 = vmul.f32 %v9361_v56, %v2473_v17  ;;  %vm2271_vm15 = vmor %vm2269_vm14, %vm2270_vm11  ;;  %vm2274_vm0 = vcmp.eq.f32.partialorder %v2273_v0, 8.507059e+37 }
 0x325   :  { %2502 = vrot.lane.b32.xlu2 %v2262_v20, %s9808_s30  ;;  %v2266_v57 = vsub.f32 1.0, %v2265_v36  ;;  %9368 = vtanh.f32 %v11442_v15  ;;  %v2479_v17 = vpop.permute.xlu2 %2478  ;;  %vm2284_vm3 = vweird.f32 %v11612_v8 }
 0x326   :  { %v1833_v3 = vpop.f32.mrf.mxu2  ;;  %9370 = vtanh.f32 %v11452_v29 }
 0x327   :  { %v11619_v43 = vadd.f32 %v1833_v3, %v1711_v42  ;;  %v2475_v28 = vpop.permute.xlu0 %2474  ;;  %v2267_v30 = vmul.f32 %v9359_v32, %v2266_v57  ;;  %v2276_v57 = vor.u32 1.1754944e-38, %v2275_v34 }
 0x328   :  { %v2557_v47 = vmul.f32 %v9363_v25, %v2475_v28  ;;  %v2290_v28 = vand.u32 2147483648, %v11612_v8 }
 0x329   :  { %v9365_v49 = vpop.eup %9364  ;;  %v8255_v52 = vmul.f32 -1.442695, %v11619_v43  ;;  %v1669_v27 = vpop.f32.mrf.mxu1  ;;  %v2268_v46 = vadd.f32 %v9359_v32, %v2267_v30 }
 0x32a   :  { %v9367_v36 = vpop.eup %9366  ;;  %v11626_v20 = vadd.f32 1.0, %v9365_v49  ;;  %v2588_v42 = vpack.c.bf16 %v2557_v47, %v2556_v21  ;;  %v1712_v56 = vadd.f32 %v11634_v12, %v1669_v27  ;;  %v2288_v49 = vand.u32 2147483647, %v11612_v8 }
 0x32b   :  { %9372 = vpow2.f32 %v8255_v52  ;;  %v2272_v3 = vsel %vm2271_vm15, %v9359_v32, %v2268_v46  ;;  %v2280_v15 = vmul.f32 %v9367_v36, %v11612_v8  ;;  %v9369_v32 = vpop.eup %9368  ;;  %vm2285_vm1 = vweird.f32 %v9367_v36 }
 0x32c   :  { %9374 = vrcp.f32 %v11626_v20  ;;  %8272 = vmatmul.msk.bf16.vlgmr.msrb.gmra.mxu3 %vm278_vm2, %v2588_v42  ;;  %v2277_v29 = vsel %vm2274_vm0, %v2276_v57, %v2272_v3  ;;  %v9371_v30 = vpop.eup %9370  ;;  %vm2286_vm4 = vmor %vm2284_vm3, %vm2285_vm1  ;;  %vm2289_vm5 = vcmp.eq.f32.partialorder %v2288_v49, 8.507059e+37  ;;  %v2305_v8 = vand.u32 2147483648, %v11626_v20 }
 0x32d   :  { %2504 = vrot.lane.b32.xlu0 %v2277_v29, %s9808_s30  ;;  %v2281_v34 = vsub.f32 1.0, %v2280_v15  ;;  %v2559_v52 = vmul.f32 %v9371_v30, %v2479_v17  ;;  %vm2299_vm7 = vweird.f32 %v11626_v20 }
 0x32e   :  { %v1836_v25 = vpop.f32.mrf.mxu2 }
 0x32f   :  { %v11639_v0 = vadd.f32 %v1836_v25, %v1712_v56  ;;  %v2477_v21 = vpop.permute.xlu1 %2476  ;;  %v2282_v47 = vmul.f32 %v9367_v36, %v2281_v34  ;;  %v2291_v56 = vor.u32 1.1754944e-38, %v2290_v28  ;;  %v2303_v28 = vand.u32 2147483647, %v11626_v20 }
 0x330   :  { %v2558_v46 = vmul.f32 %v9369_v32, %v2477_v21 }
 0x331   :  { %v9373_v42 = vpop.eup %9372  ;;  %v8256_v27 = vmul.f32 -1.442695, %v11639_v0  ;;  %v1671_v57 = vpop.f32.mrf.mxu1  ;;  %v2283_v3 = vadd.f32 %v9367_v36, %v2282_v47  ;;  %vm2304_vm9 = vcmp.eq.f32.partialorder %v2303_v28, 8.507059e+37 }
 0x332   :  { %v9375_v15 = vpop.eup %9374  ;;  %v2015_v29 = vadd.f32 1.0, %v9373_v42  ;;  %v2589_v33 = vpack.c.bf16 %v2559_v52, %v2558_v46  ;;  %v1713_v32 = vadd.f32 %v11634_v12, %v1671_v57 }
 0x333   :  { %9376 = vpow2.f32 %v8256_v27  ;;  %v2287_v25 = vsel %vm2286_vm4, %v9367_v36, %v2283_v3  ;;  %v2295_v34 = vmul.f32 %v9375_v15, %v11626_v20  ;;  %vm2300_vm6 = vweird.f32 %v9375_v15 }
 0x334   :  { %9378 = vrcp.f32 %v2015_v29  ;;  %v2292_v17 = vsel %vm2289_vm5, %v2291_v56, %v2287_v25  ;;  %vm2301_vm8 = vmor %vm2299_vm7, %vm2300_vm6  ;;  %v2306_v3 = vor.u32 1.1754944e-38, %v2305_v8  ;;  %v2318_v8 = vand.u32 2147483647, %v2015_v29 }
 0x335   :  { %2506 = vrot.lane.b32.xlu1 %v2292_v17, %s9808_s30  ;;  %v2296_v30 = vsub.f32 1.0, %v2295_v34  ;;  %vm2314_vm11 = vweird.f32 %v2015_v29 }
 0x336   :  { %v1838_v21 = vpop.f32.mrf.mxu2  ;;  %vm2319_vm15 = vcmp.eq.f32.partialorder %v2318_v8, 8.507059e+37 }
 0x337   :  { %v11648_v47 = vadd.f32 %v1838_v21, %v1713_v32  ;;  %v2297_v52 = vmul.f32 %v9375_v15, %v2296_v30  ;;  %v2320_v30 = vand.u32 2147483648, %v2015_v29 }
 0x339   :  { %v9377_v36 = vpop.eup %9376  ;;  %v8257_v49 = vmul.f32 -1.442695, %v11648_v47  ;;  %v1674_v46 = vpop.f32.mrf.mxu1  ;;  %v2298_v42 = vadd.f32 %v9375_v15, %v2297_v52 }
 0x33a   :  { %v9379_v27 = vpop.eup %9378  ;;  %v11653_v57 = vadd.f32 1.0, %v9377_v36  ;;  %v1714_v17 = vadd.f32 %v11634_v12, %v1674_v46 }
 0x33b   :  { %9380 = vpow2.f32 %v8257_v49  ;;  %v2302_v56 = vsel %vm2301_vm8, %v9375_v15, %v2298_v42  ;;  %v2310_v25 = vmul.f32 %v9379_v27, %v2015_v29  ;;  %vm2315_vm10 = vweird.f32 %v9379_v27 }
 0x33c   :  { %9382 = vrcp.f32 %v11653_v57  ;;  %8273 = vmatmul.msk.bf16.gmra.mxu3 %vm278_vm2, %v2589_v33  ;;  %v2307_v34 = vsel %vm2304_vm9, %v2306_v3, %v2302_v56  ;;  %vm2316_vm14 = vmor %vm2314_vm11, %vm2315_vm10  ;;  %v2321_v42 = vor.u32 1.1754944e-38, %v2320_v30  ;;  %v2333_v8 = vand.u32 2147483647, %v11653_v57 }
 0x33d   :  { %2508 = vrot.lane.b32.xlu2 %v2307_v34, %s9808_s30  ;;  %v2311_v32 = vsub.f32 1.0, %v2310_v25  ;;  %9384 = vtanh.f32 %v11466_v60  ;;  %vm2329_vm1 = vweird.f32 %v11653_v57 }
 0x33e   :  { %v1841_v20 = vpop.f32.mrf.mxu2  ;;  %9386 = vtanh.f32 %v11482_v26  ;;  %vm2334_vm4 = vcmp.eq.f32.partialorder %v2333_v8, 8.507059e+37 }
 0x33f   :  { %v11659_v21 = vadd.f32 %v1841_v20, %v1714_v17  ;;  %v2312_v52 = vmul.f32 %v9379_v27, %v2311_v32  ;;  %v2481_v25 = vpop.permute.xlu0 %2480  ;;  %v2335_v32 = vand.u32 2147483648, %v11653_v57 }
 0x341   :  { %15197 = vst [vmem:[#allocation37_spill] sm:$0xff] %v11659_v21  ;;  %v9381_v15 = vpop.eup %9380  ;;  %v8258_v33 = vmul.f32 -1.442695, %v11659_v21  ;;  %v1676_v28 = vpop.f32.mrf.mxu1  ;;  %v2313_v36 = vadd.f32 %v9379_v27, %v2312_v52 }
 0x342   :  { %v9383_v49 = vpop.eup %9382  ;;  %v11664_v46 = vadd.f32 1.0, %v9381_v15  ;;  %v1715_v26 = vadd.f32 %v11634_v12, %v1676_v28 }
 0x343   :  { %9388 = vpow2.f32 %v8258_v33  ;;  %v2317_v3 = vsel %vm2316_vm14, %v9379_v27, %v2313_v36  ;;  %v2325_v56 = vmul.f32 %v9383_v49, %v11653_v57  ;;  %v9385_v29 = vpop.eup %9384  ;;  %vm2330_vm0 = vweird.f32 %v9383_v49 }
 0x344   :  { %9390 = vrcp.f32 %v11664_v46  ;;  %v2322_v60 = vsel %vm2319_vm15, %v2321_v42, %v2317_v3  ;;  %v9387_v20 = vpop.eup %9386  ;;  %v2560_v15 = vmul.f32 %v9385_v29, %v2481_v25  ;;  %vm2331_vm3 = vmor %vm2329_vm1, %vm2330_vm0  ;;  %vm2344_vm6 = vweird.f32 %v11664_v46 }
 0x345   :  { %2510 = vrot.lane.b32.xlu0 %v2322_v60, %s9808_s30  ;;  %v2326_v34 = vsub.f32 1.0, %v2325_v56 }
 0x346   :  { %v1843_v17 = vpop.f32.mrf.mxu2 }
 0x347   :  { %v11671_v30 = vadd.f32 %v1843_v17, %v1715_v26  ;;  %v2483_v27 = vpop.permute.xlu1 %2482  ;;  %v2327_v52 = vmul.f32 %v9383_v49, %v2326_v34  ;;  %v2336_v26 = vor.u32 1.1754944e-38, %v2335_v32 }
 0x348   :  { %v2561_v33 = vmul.f32 %v9387_v20, %v2483_v27  ;;  %v2350_v27 = vand.u32 2147483648, %v11664_v46 }
 0x349   :  { %v9389_v36 = vpop.eup %9388  ;;  %v8259_v28 = vmul.f32 -1.442695, %v11671_v30  ;;  %v1679_v42 = vpop.f32.mrf.mxu1  ;;  %v2328_v3 = vadd.f32 %v9383_v49, %v2327_v52 }
 0x34a   :  { %v9391_v56 = vpop.eup %9390  ;;  %v11676_v60 = vadd.f32 1.0, %v9389_v36  ;;  %v2590_v21 = vpack.c.bf16 %v2561_v33, %v2560_v15  ;;  %v1716_v29 = vadd.f32 %v11634_v12, %v1679_v42  ;;  %v2351_v42 = vor.u32 1.1754944e-38, %v2350_v27 }
 0x34b   :  { %9392 = vpow2.f32 %v8259_v28  ;;  %v2332_v34 = vsel %vm2331_vm3, %v9383_v49, %v2328_v3  ;;  %v2340_v17 = vmul.f32 %v9391_v56, %v11664_v46  ;;  %vm2345_vm5 = vweird.f32 %v9391_v56 }
 0x34c   :  { %9394 = vrcp.f32 %v11676_v60  ;;  %8274 = vmatmul.msk.bf16.gmra.mxu3 %vm278_vm2, %v2590_v21  ;;  %v2337_v25 = vsel %vm2334_vm4, %v2336_v26, %v2332_v34  ;;  %v2348_v49 = vand.u32 2147483647, %v11664_v46  ;;  %vm2346_vm7 = vmor %vm2344_vm6, %vm2345_vm5  ;;  %vm2359_vm10 = vweird.f32 %v11676_v60 }
 0x34d   :  { %2512 = vrot.lane.b32.xlu1 %v2337_v25, %s9808_s30  ;;  %v2341_v57 = vsub.f32 1.0, %v2340_v17  ;;  %9396 = vtanh.f32 %v11500_v40 }
 0x34e   :  { %v1846_v20 = vpop.f32.mrf.mxu2  ;;  %9398 = vtanh.f32 %v11518_v2  ;;  %vm2349_vm8 = vcmp.eq.f32.partialorder %v2348_v49, 8.507059e+37  ;;  %v2485_v2 = vpop.permute.xlu2 %2484 }
 0x34f   :  { %v11684_v52 = vadd.f32 %v1846_v20, %v1716_v29  ;;  %v2342_v32 = vmul.f32 %v9391_v56, %v2341_v57  ;;  %v2365_v29 = vand.u32 2147483648, %v11676_v60 }
 0x351   :  { %v9393_v8 = vpop.eup %9392  ;;  %v8260_v21 = vmul.f32 -1.442695, %v11684_v52  ;;  %v1681_v15 = vpop.f32.mrf.mxu1  ;;  %v2343_v33 = vadd.f32 %v9391_v56, %v2342_v32  ;;  %v2363_v32 = vand.u32 2147483647, %v11676_v60 }
 0x352   :  { %v9395_v36 = vpop.eup %9394  ;;  %v11691_v28 = vadd.f32 1.0, %v9393_v8  ;;  %v1717_v34 = vadd.f32 %v11634_v12, %v1681_v15 }
 0x353   :  { %9400 = vpow2.f32 %v8260_v21  ;;  %v2347_v3 = vsel %vm2346_vm7, %v9391_v56, %v2343_v33  ;;  %v2355_v26 = vmul.f32 %v9395_v36, %v11676_v60  ;;  %v9397_v46 = vpop.eup %9396  ;;  %vm2360_vm9 = vweird.f32 %v9395_v36 }
 0x354   :  { %9402 = vrcp.f32 %v11691_v28  ;;  %v2352_v40 = vsel %vm2349_vm8, %v2351_v42, %v2347_v3  ;;  %v9399_v57 = vpop.eup %9398  ;;  %v2562_v49 = vmul.f32 %v9397_v46, %v2485_v2  ;;  %vm2361_vm11 = vmor %vm2359_vm10, %vm2360_vm9  ;;  %vm2364_vm14 = vcmp.eq.f32.partialorder %v2363_v32, 8.507059e+37 }
 0x355   :  { %2514 = vrot.lane.b32.xlu2 %v2352_v40, %s9808_s30  ;;  %v2356_v17 = vsub.f32 1.0, %v2355_v26  ;;  %9404 = vtanh.f32 %v11533_v54  ;;  %vm2374_vm0 = vweird.f32 %v11691_v28 }
 0x356   :  { %v1848_v25 = vpop.f32.mrf.mxu2  ;;  %9406 = vtanh.f32 %v11548_v38  ;;  %v2491_v2 = vpop.permute.xlu2 %2490 }
 0x357   :  { %v11698_v20 = vadd.f32 %v1848_v25, %v1717_v34  ;;  %v2487_v56 = vpop.permute.xlu0 %2486  ;;  %v2357_v27 = vmul.f32 %v9395_v36, %v2356_v17  ;;  %v2366_v34 = vor.u32 1.1754944e-38, %v2365_v29 }
 0x358   :  { %v2563_v8 = vmul.f32 %v9399_v57, %v2487_v56  ;;  %v2380_v56 = vand.u32 2147483648, %v11691_v28 }
 0x359   :  { %v9401_v21 = vpop.eup %9400  ;;  %v8261_v15 = vmul.f32 -1.442695, %v11698_v20  ;;  %v1684_v33 = vpop.f32.mrf.mxu1  ;;  %v2358_v42 = vadd.f32 %v9395_v36, %v2357_v27 }
 0x35a   :  { %v9403_v3 = vpop.eup %9402  ;;  %v2020_v26 = vadd.f32 1.0, %v9401_v21  ;;  %v2591_v40 = vpack.c.bf16 %v2563_v8, %v2562_v49  ;;  %v1718_v46 = vadd.f32 %v11634_v12, %v1684_v33  ;;  %v2378_v49 = vand.u32 2147483647, %v11691_v28 }
 0x35b   :  { %9408 = vpow2.f32 %v8261_v15  ;;  %v2362_v17 = vsel %vm2361_vm11, %v9395_v36, %v2358_v42  ;;  %v2370_v54 = vmul.f32 %v9403_v3, %v11691_v28  ;;  %v9405_v25 = vpop.eup %9404  ;;  %vm2375_vm15 = vweird.f32 %v9403_v3 }
 0x35c   :  { %9410 = vrcp.f32 %v2020_v26  ;;  %8275 = vmatmul.msk.bf16.gmra.mxu3 %vm278_vm2, %v2591_v40  ;;  %v2367_v38 = vsel %vm2364_vm14, %v2366_v34, %v2362_v17  ;;  %v9407_v29 = vpop.eup %9406  ;;  %vm2376_vm1 = vmor %vm2374_vm0, %vm2375_vm15  ;;  %vm2379_vm3 = vcmp.eq.f32.partialorder %v2378_v49, 8.507059e+37  ;;  %vm2389_vm5 = vweird.f32 %v2020_v26 }
 0x35d   :  { %2516 = vrot.lane.b32.xlu0 %v2367_v38, %s9808_s30  ;;  %v2371_v60 = vsub.f32 1.0, %v2370_v54  ;;  %v2565_v8 = vmul.f32 %v9407_v29, %v2491_v2  ;;  %v2381_v38 = vor.u32 1.1754944e-38, %v2380_v56 }
 0x35e   :  { %v1851_v57 = vpop.f32.mrf.mxu2 }
 0x35f   :  { %v11710_v27 = vadd.f32 %v1851_v57, %v1718_v46  ;;  %v2489_v36 = vpop.permute.xlu1 %2488  ;;  %v2372_v32 = vmul.f32 %v9403_v3, %v2371_v60 }
 0x360   :  { %v2564_v21 = vmul.f32 %v9405_v25, %v2489_v36  ;;  %v2395_v36 = vand.u32 2147483648, %v2020_v26 }
 0x361   :  { %v9409_v15 = vpop.eup %9408  ;;  %v8262_v33 = vmul.f32 -1.442695, %v11710_v27  ;;  %v2373_v42 = vadd.f32 %v9403_v3, %v2372_v32  ;;  %v1686_v54 = vpop.f32.mrf.mxu1 }
 0x362   :  { %v9411_v40 = vpop.eup %9410  ;;  %v2021_v34 = vadd.f32 1.0, %v9409_v15  ;;  %v2592_v17 = vpack.c.bf16 %v2565_v8, %v2564_v21  ;;  %v1719_v2 = vadd.f32 %v11634_v12, %v1686_v54  ;;  %v2393_v8 = vand.u32 2147483647, %v2020_v26 }
 0x363   :  { %9412 = vpow2.f32 %v8262_v33  ;;  %v2377_v46 = vsel %vm2376_vm1, %v9403_v3, %v2373_v42  ;;  %v2385_v60 = vmul.f32 %v9411_v40, %v2020_v26  ;;  %vm2390_vm4 = vweird.f32 %v9411_v40 }
 0x364   :  { %9414 = vrcp.f32 %v2021_v34  ;;  %v2382_v57 = vsel %vm2379_vm3, %v2381_v38, %v2377_v46  ;;  %vm2391_vm6 = vmor %vm2389_vm5, %vm2390_vm4  ;;  %v2396_v33 = vor.u32 1.1754944e-38, %v2395_v36  ;;  %vm2394_vm7 = vcmp.eq.f32.partialorder %v2393_v8, 8.507059e+37 }
 0x365   :  { %2518 = vrot.lane.b32.xlu1 %v2382_v57, %s9808_s30  ;;  %v2386_v25 = vsub.f32 1.0, %v2385_v60  ;;  %v2410_v46 = vand.u32 2147483648, %v2021_v34  ;;  %v2408_v57 = vand.u32 2147483647, %v2021_v34  ;;  %vm2404_vm9 = vweird.f32 %v2021_v34 }
 0x366   :  { %v1853_v29 = vpop.f32.mrf.mxu2 }
 0x367   :  { %v11717_v28 = vadd.f32 %v1853_v29, %v1719_v2  ;;  %v2387_v32 = vmul.f32 %v9411_v40, %v2386_v25  ;;  %v2411_v29 = vor.u32 1.1754944e-38, %v2410_v46  ;;  %vm2409_vm11 = vcmp.eq.f32.partialorder %v2408_v57, 8.507059e+37 }
 0x369   :  { %v9413_v21 = vpop.eup %9412  ;;  %v8263_v56 = vmul.f32 -1.442695, %v11717_v28  ;;  %v2388_v3 = vadd.f32 %v9411_v40, %v2387_v32 }
 0x36a   :  { %v9415_v49 = vpop.eup %9414  ;;  %v2022_v15 = vadd.f32 1.0, %v9413_v21 }
 0x36b   :  { %9416 = vpow2.f32 %v8263_v56  ;;  %v2392_v12 = vsel %vm2391_vm6, %v9411_v40, %v2388_v3  ;;  %v2400_v42 = vmul.f32 %v9415_v49, %v2021_v34  ;;  %vm2405_vm8 = vweird.f32 %v9415_v49 }
 0x36c   :  { %9418 = vrcp.f32 %v2022_v15  ;;  %8276 = vmatmul.msk.bf16.gmra.mxu3 %vm278_vm2, %v2592_v17  ;;  %v2397_v54 = vsel %vm2394_vm7, %v2396_v33, %v2392_v12  ;;  %vm2406_vm10 = vmor %vm2404_vm9, %vm2405_vm8  ;;  %v2423_v34 = vand.u32 2147483647, %v2022_v15  ;;  %vm2419_vm15 = vweird.f32 %v2022_v15 }
 0x36d   :  { %2520 = vrot.lane.b32.xlu2 %v2397_v54, %s9808_s30  ;;  %v2401_v38 = vsub.f32 1.0, %v2400_v42  ;;  %9420 = vtanh.f32 %v11558_v51  ;;  %v2425_v51 = vand.u32 2147483648, %v2022_v15  ;;  %vm2907_vm7 = vcmask 523520  }
 0x36e   :  { %9422 = vtanh.f32 %v11563_v19  ;;  %vm2424_vm1 = vcmp.eq.f32.partialorder %v2423_v34, 8.507059e+37 }
 0x36f   :  { %v2402_v60 = vmul.f32 %v9415_v49, %v2401_v38  ;;  %v2493_v8 = vpop.permute.xlu0 %2492  ;;  %v2426_v46 = vor.u32 1.1754944e-38, %v2425_v51 }
 0x371   :  { %v9417_v26 = vpop.eup %9416  ;;  %v2403_v2 = vadd.f32 %v9415_v49, %v2402_v60 }
 0x372   :  { %v9419_v40 = vpop.eup %9418  ;;  %v2023_v25 = vadd.f32 1.0, %v9417_v26 }
 0x373   :  { %v2407_v17 = vsel %vm2406_vm10, %v9415_v49, %v2403_v2  ;;  %v2415_v36 = vmul.f32 %v9419_v40, %v2022_v15  ;;  %v9421_v56 = vpop.eup %9420  ;;  %vm2420_vm14 = vweird.f32 %v9419_v40 }
 0x374   :  { %9424 = vrcp.f32 %v2023_v25  ;;  %v2412_v32 = vsel %vm2409_vm11, %v2411_v29, %v2407_v17  ;;  %v9423_v3 = vpop.eup %9422  ;;  %v2566_v12 = vmul.f32 %v9421_v56, %v2493_v8  ;;  %vm2421_vm0 = vmor %vm2419_vm15, %vm2420_vm14  ;;  %v2440_v29 = vand.u32 2147483648, %v2023_v25 }
 0x375   :  { %2522 = vrot.lane.b32.xlu0 %v2412_v32, %s9808_s30  ;;  %v2416_v21 = vsub.f32 1.0, %v2415_v36  ;;  %v2438_v15 = vand.u32 2147483647, %v2023_v25  ;;  %9426 = vtanh.f32 %v11568_v53  ;;  %vm2434_vm4 = vweird.f32 %v2023_v25 }
 0x376   :  { %9428 = vtanh.f32 %v11576_v23  ;;  %v2441_v36 = vor.u32 1.1754944e-38, %v2440_v29 }
 0x377   :  { %v2495_v33 = vpop.permute.xlu1 %2494  ;;  %v2417_v19 = vmul.f32 %v9419_v40, %v2416_v21  ;;  %vm2439_vm6 = vcmp.eq.f32.partialorder %v2438_v15, 8.507059e+37  ;;  %v2497_v21 = vpop.permute.xlu2 %2496  ;;  %9430 = vtanh.f32 %v11581_v13 }
 0x378   :  { %v2567_v42 = vmul.f32 %v9423_v3, %v2495_v33  ;;  %9432 = vtanh.f32 %v11589_v11 }
 0x379   :  { %v2418_v54 = vadd.f32 %v9419_v40, %v2417_v19  ;;  %9434 = vtanh.f32 %v11594_v37 }
 0x37a   :  { %v9425_v49 = vpop.eup %9424  ;;  %v2593_v38 = vpack.c.bf16 %v2567_v42, %v2566_v12  ;;  %9436 = vtanh.f32 %v11599_v24  ;;  %v15198_v12 = vld [vmem:[#allocation14_spill] sm:$0xff]  ;;  %v15200_v42 = vld [vmem:[#allocation33_spill] sm:$0xff] }
 0x37b   :  { %v2422_v60 = vsel %vm2421_vm0, %v9419_v40, %v2418_v54  ;;  %v2430_v57 = vmul.f32 %v9425_v49, %v2023_v25  ;;  %vm2435_vm3 = vweird.f32 %v9425_v49  ;;  %9438 = vtanh.f32 %v11607_v63  ;;  %v15201_v54 = vld [vmem:[#allocation15_spill] sm:$0xff] }
 0x37c   :  { %8277 = vmatmul.msk.bf16.gmra.mxu3 %vm278_vm2, %v2593_v38  ;;  %v2427_v26 = vsel %vm2424_vm1, %v2426_v46, %v2422_v60  ;;  %vm2436_vm5 = vmor %vm2434_vm4, %vm2435_vm3  ;;  %9440 = vtanh.f32 %v11619_v43  ;;  %v15202_v38 = vld [vmem:[#allocation37_spill] sm:$0xff] }
 0x37d   :  { %2767 = vrot.lane.b32.xlu0 %v15185_v58, %s9806_s20  ;;  %2524 = vrot.lane.b32.xlu1 %v2427_v26, %s9808_s30  ;;  %v2431_v2 = vsub.f32 1.0, %v2430_v57  ;;  %v9427_v58 = vpop.eup %9426  ;;  %9442 = vtanh.f32 %v11639_v0 }
 0x37e   :  { %v9429_v53 = vpop.eup %9428  ;;  %v2568_v23 = vmul.f32 %v9427_v58, %v2497_v21  ;;  %9444 = vtanh.f32 %v11648_v47 }
 0x37f   :  { %v2432_v17 = vmul.f32 %v9425_v49, %v2431_v2  ;;  %v2503_v3 = vpop.permute.xlu2 %2502  ;;  %9446 = vtanh.f32 %v15202_v38 }
 0x380   :  { %9448 = vtanh.f32 %v11671_v30 }
 0x381   :  { %v2433_v40 = vadd.f32 %v9425_v49, %v2432_v17  ;;  %9450 = vtanh.f32 %v11684_v52 }
 0x382   :  { %9452 = vtanh.f32 %v11698_v20 }
 0x383   :  { %v2437_v32 = vsel %vm2436_vm5, %v9425_v49, %v2433_v40  ;;  %9454 = vtanh.f32 %v11710_v27 }
 0x384   :  { %v2442_v8 = vsel %vm2439_vm6, %v2441_v36, %v2437_v32  ;;  %9456 = vtanh.f32 %v11717_v28 }
 0x385   :  { %2785 = vrot.lane.b32.xlu0 %v15151_v48, %s9806_s20  ;;  %2769 = vrot.lane.b32.xlu1 %v15186_v62, %s9806_s20  ;;  %v9431_v48 = vpop.eup %9430 }
 0x386   :  { %2526 = vrot.lane.b32.xlu2 %v2442_v8, %s9808_s30  ;;  %v9433_v62 = vpop.eup %9432 }
 0x387   :  { %v2499_v56 = vpop.permute.xlu0 %2498  ;;  %v2571_v33 = vmul.f32 %v9433_v62, %v2503_v3 }
 0x388   :  { %v2569_v25 = vmul.f32 %v9429_v53, %v2499_v56 }
 0x38a   :  { %v2594_v51 = vpack.c.bf16 %v2569_v25, %v2568_v23 }
 0x38c   :  { %8278 = vmatmul.msk.bf16.gmra.mxu3 %vm278_vm2, %v2594_v51 }
 0x38d   :  { %2787 = vrot.lane.b32.xlu0 %v15152_v16, %s9806_s20  ;;  %2771 = vrot.lane.b32.xlu1 %v15191_v39, %s9806_s20 }
 0x38e   :  { %2783 = vrot.lane.b32.xlu2 %v15147_v5, %s9806_s20  ;;  %v9435_v5 = vpop.eup %9434 }
 0x38f   :  { %v2501_v13 = vpop.permute.xlu1 %2500 }
 0x390   :  { %v2570_v19 = vmul.f32 %v9431_v48, %v2501_v13  ;;  %v11826_v48 = vld [vmem:[%s14868_s10] ss:$0 sm:$0xff] }
 0x392   :  { %v2595_v34 = vpack.c.bf16 %v2571_v33, %v2570_v19 }
 0x395   :  { %2777 = vrot.lane.b32.xlu0 %v15194_v4, %s9806_s20  ;;  %2789 = vrot.lane.b32.xlu1 %v15153_v1, %s9806_s20  ;;  %v9437_v1 = vpop.eup %9436 }
 0x396   :  { %2773 = vrot.lane.b32.xlu2 %v15192_v45, %s9806_s20 }
 0x39c   :  { %8279 = vmatmul.msk.bf16.gmra.mxu3 %vm278_vm2, %v2595_v34 }
 0x39d   :  { %2791 = vrot.lane.b32.xlu0 %v15158_v50, %s9806_s20  ;;  %2779 = vrot.lane.b32.xlu1 %v15195_v22, %s9806_s20 }
 0x39e   :  { %2775 = vrot.lane.b32.xlu2 %v15193_v7, %s9806_s20 }
 0x39f   :  { %v2505_v16 = vpop.permute.xlu0 %2504 }
 0x3a0   :  { %v2572_v39 = vmul.f32 %v9435_v5, %v2505_v16 }
 0x3a5   :  { %2797 = vrot.lane.b32.xlu0 %v15161_v61, %s9806_s20  ;;  %2793 = vrot.lane.b32.xlu1 %v15159_v44, %s9806_s20  ;;  %v2509_v44 = vpop.permute.xlu2 %2508  ;;  %v9439_v61 = vpop.eup %9438 }
 0x3a6   :  { %2781 = vrot.lane.b32.xlu2 %v15196_v55, %s9806_s20  ;;  %v2574_v37 = vmul.f32 %v9439_v61, %v2509_v44 }
 0x3a7   :  { %v2507_v50 = vpop.permute.xlu1 %2506 }
 0x3a8   :  { %v2573_v45 = vmul.f32 %v9437_v1, %v2507_v50 }
 0x3aa   :  { %v2596_v7 = vpack.c.bf16 %v2573_v45, %v2572_v39 }
 0x3ac   :  { %8280 = vmatmul.msk.bf16.gmra.mxu3 %vm278_vm2, %v2596_v7 }
 0x3ad   :  { %2803 = vrot.lane.b32.xlu0 %v15170_v10, %s9806_s20  ;;  %2799 = vrot.lane.b32.xlu1 %v15165_v14, %s9806_s20  ;;  %v9441_v14 = vpop.eup %9440 }
 0x3ae   :  { %2795 = vrot.lane.b32.xlu2 %v15160_v9, %s9806_s20 }
 0x3af   :  { %v11773_v24 = vpop.f32.mrf.mxu3 }
 0x3b0   :  { %v2670_v45 = vadd.f32 %v11826_v48, %v11773_v24 }
 0x3b5   :  { %2807 = vrot.lane.b32.xlu0 %v15115_v41, %s9806_s20  ;;  %2805 = vrot.lane.b32.xlu1 %v15171_v59, %s9806_s20  ;;  %v9243_v41 = vld [vmem:[%s14861_s5 + $0x1] ss:$0 sm:$0xff]  ;;  %v2515_v59 = vpop.permute.xlu2 %2514 }
 0x3b6   :  { %2801 = vrot.lane.b32.xlu2 %v15162_v35, %s9806_s20  ;;  %v9443_v35 = vpop.eup %9442 }
 0x3b7   :  { %v11783_v10 = vpop.f32.mrf.mxu3  ;;  %v2511_v9 = vpop.permute.xlu0 %2510 }
 0x3b8   :  { %v2575_v4 = vmul.f32 %v9441_v14, %v2511_v9  ;;  %v9445_v55 = vpop.eup %9444  ;;  %v2672_v34 = vadd.f32 %v11826_v48, %v11783_v10 }
 0x3b9   :  { %v2577_v43 = vmul.f32 %v9445_v55, %v2515_v59  ;;  %v9447_v46 = vpop.eup %9446 }
 0x3ba   :  { %v2597_v22 = vpack.c.bf16 %v2575_v4, %v2574_v37  ;;  %v9449_v60 = vpop.eup %9448 }
 0x3bb   :  { %v9451_v32 = vpop.eup %9450 }
 0x3bc   :  { %8281 = vmatmul.msk.bf16.gmra.mxu3 %vm278_vm2, %v2597_v22  ;;  %v9453_v30 = vpop.eup %9452 }
 0x3bd   :  { %2813 = vrot.lane.b32.xlu0 %v15176_v18, %s9806_s20  ;;  %2809 = vrot.lane.b32.xlu1 %v10687_v31, %s9806_s20  ;;  %v15199_v18 = vld [vmem:[#allocation43_spill] sm:$0xff]  ;;  %v9455_v52 = vpop.eup %9454 }
 0x3be   :  { %3514 = vrot.lane.b32.xlu2 %v9243_v41, %s9806_s20  ;;  %v9457_v20 = vpop.eup %9456 }
 0x3bf   :  { %v11796_v11 = vpop.f32.mrf.mxu3  ;;  %v2513_v63 = vpop.permute.xlu1 %2512 }
 0x3c0   :  { %v2576_v0 = vmul.f32 %v9443_v35, %v2513_v63  ;;  %v2675_v24 = vadd.f32 %v11826_v48, %v11796_v11 }
 0x3c2   :  { %v2598_v47 = vpack.c.bf16 %v2577_v43, %v2576_v0 }
 0x3c5   :  { %2819 = vrot.lane.b32.xlu0 %v15177_v6, %s9806_s20  ;;  %2815 = vrot.lane.b32.xlu1 %v15198_v12, %s9806_s20 }
 0x3c6   :  { %2811 = vrot.lane.b32.xlu2 %v15199_v18, %s9806_s20  ;;  %v8286_v18 = vld [vmem:[%s14863_s3 + $0x10] sm:$0xff] }
 0x3c7   :  { %v2676_v31 = vpop.f32.mrf.mxu3  ;;  %v2521_v2 = vpop.permute.xlu2 %2520 }
 0x3c8   :  { %v2580_v58 = vmul.f32 %v9451_v32, %v2521_v2  ;;  %v2677_v27 = vadd.f32 %v11826_v48, %v2676_v31  ;;  %v8287_v2 = vld [vmem:[%s14863_s3 + $0x18] sm:$0xff] }
 0x3cc   :  { %8282 = vmatmul.msk.bf16.gmra.mxu3 %vm278_vm2, %v2598_v47 }
 0x3cd   :  { %2821 = vrot.lane.b32.xlu1 %v15200_v42, %s9806_s20  ;;  %3055 = vrot.lane.b32.xlu0 %v8287_v2, %s9806_s20 }
 0x3ce   :  { %2817 = vrot.lane.b32.xlu2 %v15201_v54, %s9806_s20 }
 0x3cf   :  { %v2679_v49 = vpop.f32.mrf.mxu3  ;;  %v2517_v6 = vpop.permute.xlu0 %2516 }
 0x3d0   :  { %v2578_v29 = vmul.f32 %v9447_v46, %v2517_v6  ;;  %v2680_v61 = vadd.f32 %v11826_v48, %v2679_v49 }
 0x3d6   :  { %3053 = vrot.lane.b32.xlu2 %v8286_v18, %s9806_s20 }
 0x3d7   :  { %v2681_v57 = vpop.f32.mrf.mxu3  ;;  %v2519_v26 = vpop.permute.xlu1 %2518 }
 0x3d8   :  { %v2579_v17 = vmul.f32 %v9449_v60, %v2519_v26  ;;  %v2682_v47 = vadd.f32 %v11826_v48, %v2681_v57 }
 0x3da   :  { %v2599_v15 = vpack.c.bf16 %v2579_v17, %v2578_v29 }
 0x3dc   :  { %8283 = vmatmul.msk.bf16.gmra.mxu3 %vm278_vm2, %v2599_v15 }
 0x3df   :  { %v11812_v40 = vpop.f32.mrf.mxu3 }
 0x3e0   :  { %v2527_v36 = vpop.permute.xlu2 %2526 }
 0x3e1   :  { %v2583_v62 = vmul.f32 %v9457_v20, %v2527_v36 }
 0x3e7   :  { %v11816_v8 = vpop.f32.mrf.mxu3  ;;  %v2523_v21 = vpop.permute.xlu0 %2522 }
 0x3e8   :  { %v2581_v53 = vmul.f32 %v9453_v30, %v2523_v21  ;;  %v11818_v56 = vpop.permute.xlu2 %2783  ;;  %v2685_v30 = vadd.f32 %v11826_v48, %v11812_v40 }
 0x3ea   :  { %v2600_v23 = vpack.c.bf16 %v2581_v53, %v2580_v58  ;;  %v2687_v58 = vadd.f32 %v11826_v48, %v11816_v8 }
 0x3ec   :  { %8284 = vmatmul.msk.bf16.gmra.mxu3 %vm278_vm2, %v2600_v23 }
 0x3ef   :  { %v2689_v25 = vpop.f32.mrf.mxu3  ;;  %v2768_v51 = vpop.permute.xlu0 %2767 }
 0x3f0   :  { %v2525_v3 = vpop.permute.xlu1 %2524  ;;  %v2774_v33 = vpop.permute.xlu2 %2773  ;;  %v11845_v14 = vadd.f32 %v2768_v51, %v2670_v45  ;;  %v2690_v57 = vadd.f32 %v11826_v48, %v2689_v25 }
 0x3f1   :  { %v2582_v13 = vmul.f32 %v9455_v52, %v2525_v3  ;;  %v11829_v28 = vadd.f32 %v2774_v33, %v2677_v27 }
 0x3f2   :  { %v2879_v35 = vmul.f32 %v11845_v14, %v11845_v14  ;;  %v11899_v29 = vsel %vm2907_vm7, %v11845_v14, 0.0  ;;  %v11914_v53 = vadd.f32 %v11818_v56, %v2690_v57 }
 0x3f3   :  { %v2601_v19 = vpack.c.bf16 %v2583_v62, %v2582_v13  ;;  %v2882_v50 = vmul.f32 %v11829_v28, %v11829_v28 }
 0x3f4   :  { %v2964_v11 = vsel %vm2907_vm7, %v2879_v35, 0.0  ;;  %v2887_v40 = vmul.f32 %v11914_v53, %v11914_v53 }
 0x3f5   :  { %v11848_v10 = vsel %vm2907_vm7, %v2882_v50, 0.0 }
 0x3f7   :  { %v2691_v16 = vpop.f32.mrf.mxu3  ;;  %v11833_v5 = vpop.permute.xlu0 %2785 }
 0x3f8   :  { %v2770_v1 = vpop.permute.xlu1 %2769  ;;  %v2776_v44 = vpop.permute.xlu2 %2775  ;;  %v2692_v25 = vadd.f32 %v11826_v48, %v2691_v16 }
 0x3f9   :  { %v11837_v39 = vadd.f32 %v2770_v1, %v2672_v34  ;;  %v11854_v4 = vadd.f32 %v2776_v44, %v2680_v61 }
 0x3fb   :  { %v2880_v7 = vmul.f32 %v11837_v39, %v11837_v39  ;;  %15203 = vst [vmem:[#allocation21_spill] sm:$0xff] %v11854_v4  ;;  %v2883_v63 = vmul.f32 %v11854_v4, %v11854_v4  ;;  %v11903_v17 = vsel %vm2907_vm7, %v11837_v39, 0.0 }
 0x3fc   :  { %8285 = vmatmul.msk.bf16.gmra.mxu3 %vm278_vm2, %v2601_v19  ;;  %v3076_v36 = vadd.f32 %v11903_v17, %v11899_v29  ;;  %v11928_v19 = vadd.f32 %v11833_v5, %v2692_v25 }
 0x3fd   :  { %v2991_v9 = vsel %vm2907_vm7, %v2880_v7, 0.0  ;;  %v11878_v31 = vsel %vm2907_vm7, %v2883_v63, 0.0  ;;  %v2971_v7 = vsel %vm2907_vm7, %v2887_v40, 0.0 }
 0x3fe   :  { %v2993_v37 = vadd.f32 %v11848_v10, %v2991_v9  ;;  %v3188_v46 = vadd.f32 %v2991_v9, %v2964_v11  ;;  %v3077_v23 = vrot.slane %v3076_v36, 4  ;;  %v2888_v5 = vmul.f32 %v11928_v19, %v11928_v19 }
 0x3ff   :  { %v11856_v22 = vpop.f32.mrf.mxu3  ;;  %v11858_v41 = vpop.permute.xlu0 %2787 }
 0x400   :  { %v2772_v59 = vpop.permute.xlu1 %2771  ;;  %v3189_v32 = vrot.slane %v3188_v46, 4  ;;  %v2782_v21 = vpop.permute.xlu2 %2781  ;;  %v3078_v62 = vadd.f32 %v3077_v23, %v3076_v36  ;;  %v2998_v18 = vsel %vm2907_vm7, %v2888_v5, 0.0 }
 0x401   :  { %v11862_v55 = vadd.f32 %v2772_v59, %v2675_v24  ;;  %v11917_v20 = vadd.f32 %v2782_v21, %v2687_v58 }
 0x402   :  { %v3190_v52 = vadd.f32 %v3189_v32, %v3188_v46  ;;  %v3079_v56 = vrot.slane %v3078_v62, 2  ;;  %v3216_v46 = vadd.f32 %v2998_v18, %v2971_v7 }
 0x403   :  { %v2881_v43 = vmul.f32 %v11862_v55, %v11862_v55  ;;  %15205 = vst [vmem:[#allocation35_spill] sm:$0xff] %v11917_v20  ;;  %v2886_v34 = vmul.f32 %v11917_v20, %v11917_v20 }
 0x404   :  { %v3191_v13 = vrot.slane %v3190_v52, 2  ;;  %v3080_v1 = vadd.f32 %v3079_v56, %v3078_v62  ;;  %v3217_v2 = vrot.slane %v3216_v46, 4 }
 0x405   :  { %v11870_v0 = vsel %vm2907_vm7, %v2881_v43, 0.0 }
 0x406   :  { %v2966_v12 = vadd.f32 %v11870_v0, %v2964_v11  ;;  %v3192_v27 = vadd.f32 %v3191_v13, %v3190_v52  ;;  %v3081_v44 = vrot.slane %v3080_v1, 1  ;;  %v3218_v32 = vadd.f32 %v3217_v2, %v3216_v46 }
 0x407   :  { %v2778_v42 = vpop.permute.xlu0 %2777  ;;  %v11881_v54 = vpop.f32.mrf.mxu3 }
 0x408   :  { %v11883_v49 = vadd.f32 %v2778_v42, %v2682_v47  ;;  %v11885_v38 = vpop.permute.xlu1 %2789  ;;  %v2968_v6 = vadd.f32 %v11878_v31, %v2966_v12  ;;  %v3193_v50 = vrot.slane %v3192_v27, 1  ;;  %v3082_v24 = vadd.f32 %v3081_v44, %v3080_v1  ;;  %v11964_v21 = vpop.permute.xlu2 %2795 }
 0x409   :  { %v11953_v47 = vsel %vm2907_vm7, %v11914_v53, 0.0  ;;  %v11957_v12 = vsel %vm2907_vm7, %v11928_v19, 0.0  ;;  %v3219_v23 = vrot.slane %v3218_v32, 2  ;;  %v3195_v1 = vadd.f32 %v11848_v10, %v11870_v0 }
 0x40a   :  { %15204 = vst [vmem:[#allocation36_spill] sm:$0xff] %v11883_v49  ;;  %v2884_v60 = vmul.f32 %v11883_v49, %v11883_v49  ;;  %v3194_v61 = vadd.f32 %v3193_v50, %v3192_v27  ;;  %v11945_v35 = vmul.f32 0.0625, %v3082_v24  ;;  %v2695_v44 = vadd.f32 %v11826_v48, %v11856_v22 }
 0x40b   :  { %v3220_v62 = vadd.f32 %v3219_v23, %v3218_v32  ;;  %v11998_v23 = vsel %vm2907_vm7, %v11917_v20, 0.0 }
 0x40c   :  { %v11892_v26 = vsel %vm2907_vm7, %v2884_v60, 0.0  ;;  %v3286_v63 = vmul.f32 0.0625, %v3194_v61  ;;  %v3300_v11 = vmul.f32 %v11945_v35, %v11945_v35 }
 0x40d   :  { %v2995_v15 = vadd.f32 %v11892_v26, %v2993_v37  ;;  %v11942_v37 = vsel %vm2907_vm7, %v2886_v34, 0.0  ;;  %v3221_v40 = vrot.slane %v3220_v62, 1 }
 0x40e   :  { %v3314_v60 = vsub.f32 %v3286_v63, %v3300_v11  ;;  %v3196_v63 = vrot.slane %v3195_v1, 4 }
 0x40f   :  { %v11921_v33 = vpop.f32.mrf.mxu3  ;;  %v2997_v59 = vadd.f32 %v11942_v37, %v2995_v15  ;;  %v3222_v34 = vadd.f32 %v3221_v40, %v3220_v62 }
 0x410   :  { %v2780_v51 = vpop.permute.xlu1 %2779  ;;  %v3328_v15 = vmul.f32 1.0666667, %v3314_v60  ;;  %v11977_v61 = vpop.permute.xlu2 %2801  ;;  %v3197_v46 = vadd.f32 %v3196_v63, %v3195_v1  ;;  %v11989_v60 = vadd.f32 %v11858_v41, %v2695_v44  ;;  %v2700_v62 = vadd.f32 %v11826_v48, %v11921_v33 }
 0x411   :  { %v11919_v3 = vadd.f32 %v2780_v51, %v2685_v30  ;;  %v11960_v42 = vadd.f32 %v2998_v18, %v2997_v59  ;;  %v2697_v59 = vadd.f32 %v11826_v48, %v11881_v54  ;;  %v3202_v1 = vadd.f32 %v11892_v26, %v11878_v31 }
 0x412   :  { %v3342_v30 = vmax.f32 %v3328_v15, 0.0  ;;  %v2911_v15 = vsel %vm2907_vm7, %v11854_v4, 0.0  ;;  %v2938_v33 = vsel %vm2907_vm7, %v11883_v49, 0.0 }
 0x413   :  { %15206 = vst [vmem:[#allocation28_spill] sm:$0xff] %v11919_v3  ;;  %v2885_v8 = vmul.f32 %v11919_v3, %v11919_v3  ;;  %v11994_v54 = vadd.f32 %v11885_v38, %v2697_v59  ;;  %v2889_v38 = vmul.f32 %v11989_v60, %v11989_v60  ;;  %v12022_v31 = vsel %vm2907_vm7, %v11919_v3, 0.0 }
 0x414   :  { %v3356_v52 = vadd.f32 1e-05, %v3342_v30 }
 0x415   :  { %v11933_v16 = vsel %vm2907_vm7, %v2885_v8, 0.0  ;;  %v2936_v8 = vsel %vm2907_vm7, %v11829_v28, 0.0  ;;  %15207 = vst [vmem:[#allocation27_spill] sm:$0xff] %v11994_v54 }
 0x416   :  { %v2970_v45 = vadd.f32 %v11933_v16, %v2968_v6  ;;  %v3104_v6 = vadd.f32 %v11957_v12, %v11953_v47  ;;  %9458 = vrsqrt.f32 %v3356_v52  ;;  %v2937_v56 = vadd.f32 %v2936_v8, %v11903_v17 }
 0x417   :  { %v11947_v43 = vpop.f32.mrf.mxu3  ;;  %v2909_v17 = vsel %vm2907_vm7, %v11862_v55, 0.0  ;;  %vm3376_vm9 = vweird.f32 %v3356_v52 }
 0x418   :  { %v11937_v9 = vadd.f32 %v2971_v7, %v2970_v45  ;;  %v3105_v57 = vrot.slane %v3104_v6, 4  ;;  %v3290_v45 = vmul.f32 0.0625, %v3222_v34  ;;  %v2910_v10 = vadd.f32 %v2909_v17, %v11899_v29 }
 0x419   :  { %v3083_v0 = vadd.f32 %v2936_v8, %v2909_v17  ;;  %v2890_v8 = vmul.f32 %v11994_v54, %v11994_v54  ;;  %v2939_v59 = vadd.f32 %v2938_v33, %v2937_v56  ;;  %v2917_v56 = vsel %vm2907_vm7, %v11989_v60, 0.0 }
 0x41a   :  { %v3106_v36 = vadd.f32 %v3105_v57, %v3104_v6  ;;  %v2912_v32 = vadd.f32 %v2911_v15, %v2910_v10 }
 0x41b   :  { %v3084_v6 = vrot.slane %v3083_v0, 4 }
 0x41c   :  { %v3107_v58 = vrot.slane %v3106_v36, 2  ;;  %v9459_v7 = vpop.eup %9458 }
 0x41d   :  { %v3371_v5 = vmul.f32 %v9459_v7, %v3356_v52  ;;  %v3085_v29 = vadd.f32 %v3084_v6, %v3083_v0  ;;  %vm3377_vm8 = vweird.f32 %v9459_v7  ;;  %v2792_v52 = vpop.permute.xlu0 %2791  ;;  %v2944_v0 = vsel %vm2907_vm7, %v11994_v54, 0.0 }
 0x41e   :  { %v3108_v51 = vadd.f32 %v3107_v58, %v3106_v36  ;;  %v3198_v36 = vrot.slane %v3197_v46, 2  ;;  %vm3378_vm10 = vmor %vm3376_vm9, %vm3377_vm8  ;;  %v12018_v10 = vadd.f32 %v2792_v52, %v2700_v62 }
 0x41f   :  { %v11966_v25 = vpop.f32.mrf.mxu3  ;;  %v3372_v18 = vmul.f32 %v9459_v7, %v3371_v5  ;;  %v3086_v41 = vrot.slane %v3085_v29, 2 }
 0x420   :  { %v3109_v13 = vrot.slane %v3108_v51, 1  ;;  %15208 = vst [vmem:[#allocation29_spill] sm:$0xff] %v12018_v10 }
 0x421   :  { %v3373_v57 = vmul.f32 0.5, %v3372_v18 }
 0x422   :  { %v3110_v27 = vadd.f32 %v3109_v13, %v3108_v51  ;;  %v3199_v51 = vadd.f32 %v3198_v36, %v3197_v46  ;;  %v2973_v46 = vsel %vm2907_vm7, %v2889_v38, 0.0  ;;  %v3203_v36 = vrot.slane %v3202_v1, 4 }
 0x423   :  { %v3374_v30 = vsub.f32 1.5, %v3373_v57  ;;  %v3000_v57 = vsel %vm2907_vm7, %v2890_v8, 0.0  ;;  %v2914_v8 = vadd.f32 %v12022_v31, %v2912_v32 }
 0x424   :  { %v11973_v50 = vmul.f32 0.0625, %v3110_v27  ;;  %v3087_v27 = vadd.f32 %v3086_v41, %v3085_v29  ;;  %v3200_v34 = vrot.slane %v3199_v51, 1  ;;  %v3223_v62 = vadd.f32 %v3000_v57, %v2973_v46 }
 0x425   :  { %v3375_v13 = vmul.f32 %v9459_v7, %v3374_v30  ;;  %v2916_v32 = vadd.f32 %v11953_v47, %v2914_v8  ;;  %v2974_v47 = vadd.f32 %v2973_v46, %v11937_v9 }
 0x426   :  { %v3304_v24 = vmul.f32 %v11973_v50, %v11973_v50  ;;  %v3201_v17 = vadd.f32 %v3200_v34, %v3199_v51 }
 0x427   :  { %v11986_v11 = vpop.f32.mrf.mxu3  ;;  %v3379_v44 = vsel %vm3378_vm10, %v9459_v7, %v3375_v13  ;;  %v3090_v7 = vadd.f32 %v2938_v33, %v2911_v15  ;;  %v2794_v33 = vpop.permute.xlu1 %2793 }
 0x428   :  { %v3318_v22 = vsub.f32 %v3290_v45, %v3304_v24  ;;  %v12010_v45 = vpop.permute.xlu2 %3514  ;;  %v3088_v24 = vrot.slane %v3087_v27, 1  ;;  %v3287_v29 = vmul.f32 0.0625, %v3201_v17 }
 0x429   :  { %v12016_v5 = vmul.f32 %v12010_v45, %v3379_v44  ;;  %v3091_v6 = vrot.slane %v3090_v7, 4  ;;  %v3204_v44 = vadd.f32 %v3203_v36, %v3202_v1 }
 0x42a   :  { %v3332_v2 = vmul.f32 1.0666667, %v3318_v22  ;;  %v3089_v18 = vadd.f32 %v3088_v24, %v3087_v27  ;;  %v2941_v22 = vadd.f32 %v11998_v23, %v2939_v59  ;;  %v2891_v27 = vmul.f32 %v12018_v10, %v12018_v10 }
 0x42b   :  { %v3533_v63 = vmul.f32 %v12016_v5, %v11945_v35  ;;  %v3092_v41 = vadd.f32 %v3091_v6, %v3090_v7 }
 0x42c   :  { %v3346_v58 = vmax.f32 %v3332_v2, 0.0  ;;  %v3111_v2 = vadd.f32 %v2944_v0, %v2917_v56  ;;  %v12036_v15 = vmul.f32 0.0625, %v3089_v18  ;;  %v2943_v35 = vadd.f32 %v11957_v12, %v2941_v22 }
 0x42d   :  { %3561 = vrot.lane.b32.xlu1 %v3533_v63, %s9808_s30  ;;  %v3093_v34 = vrot.slane %v3092_v41, 2  ;;  %v3205_v63 = vrot.slane %v3204_v44, 2  ;;  %v3224_v18 = vrot.slane %v3223_v62, 4 }
 0x42e   :  { %v12002_v40 = vadd.f32 1e-05, %v3346_v58  ;;  %v2702_v58 = vadd.f32 %v11826_v48, %v11947_v43  ;;  %v3112_v51 = vrot.slane %v3111_v2, 4  ;;  %v3301_v38 = vmul.f32 %v12036_v15, %v12036_v15 }
 0x42f   :  { %v12024_v26 = vpop.f32.mrf.mxu3  ;;  %v2945_v12 = vadd.f32 %v2944_v0, %v2943_v35  ;;  %v3001_v43 = vadd.f32 %v3000_v57, %v11960_v42  ;;  %v3094_v7 = vadd.f32 %v3093_v34, %v3092_v41  ;;  %v3206_v0 = vadd.f32 %v3205_v63, %v3204_v44 }
 0x430   :  { %9460 = vrsqrt.f32 %v12002_v40  ;;  %v3315_v24 = vsub.f32 %v3287_v29, %v3301_v38  ;;  %v3113_v17 = vadd.f32 %v3112_v51, %v3111_v2  ;;  %v12048_v59 = vadd.f32 %v2794_v33, %v2702_v58 }
 0x431   :  { %v3095_v1 = vrot.slane %v3094_v7, 1  ;;  %v3225_v36 = vadd.f32 %v3224_v18, %v3223_v62  ;;  %v2918_v42 = vadd.f32 %v2917_v56, %v2916_v32  ;;  %vm3416_vm14 = vweird.f32 %v12002_v40 }
 0x432   :  { %15209 = vst [vmem:[#allocation30_spill] sm:$0xff] %v12048_v59  ;;  %v3329_v6 = vmul.f32 1.0666667, %v3315_v24  ;;  %v3114_v20 = vrot.slane %v3113_v17, 2  ;;  %v3207_v58 = vrot.slane %v3206_v0, 1  ;;  %v2892_v8 = vmul.f32 %v12048_v59, %v12048_v59 }
 0x433   :  { %v3096_v2 = vadd.f32 %v3095_v1, %v3094_v7  ;;  %v3226_v41 = vrot.slane %v3225_v36, 2  ;;  %v2919_v44 = vsel %vm2907_vm7, %v12018_v10, 0.0  ;;  %v2975_v7 = vsel %vm2907_vm7, %v2891_v27, 0.0 }
 0x434   :  { %v3343_v35 = vmax.f32 %v3329_v6, 0.0  ;;  %v3115_v57 = vadd.f32 %v3114_v20, %v3113_v17  ;;  %v3208_v34 = vadd.f32 %v3207_v58, %v3206_v0  ;;  %v12069_v17 = vadd.f32 %v2919_v44, %v2918_v42 }
 0x435   :  { %v12058_v62 = vmul.f32 0.0625, %v3096_v2  ;;  %v3227_v56 = vadd.f32 %v3226_v41, %v3225_v36  ;;  %v12080_v1 = vadd.f32 %v2975_v7, %v2974_v47  ;;  %v3002_v27 = vsel %vm2907_vm7, %v2892_v8, 0.0 }
 0x436   :  { %v9461_v30 = vpop.eup %9460  ;;  %v3116_v38 = vrot.slane %v3115_v57, 1  ;;  %v3288_v9 = vmul.f32 0.0625, %v3208_v34 }
 0x437   :  { %v3411_v13 = vmul.f32 %v9461_v30, %v12002_v40  ;;  %vm3417_vm11 = vweird.f32 %v9461_v30  ;;  %v12051_v3 = vpop.f32.mrf.mxu3  ;;  %v3302_v46 = vmul.f32 %v12058_v62, %v12058_v62 }
 0x438   :  { %vm3418_vm15 = vmor %vm3416_vm14, %vm3417_vm11  ;;  %v3117_v40 = vadd.f32 %v3116_v38, %v3115_v57  ;;  %v3230_v38 = vadd.f32 %v3002_v27, %v2975_v7 }
 0x439   :  { %v3412_v52 = vmul.f32 %v9461_v30, %v3411_v13  ;;  %v3357_v13 = vadd.f32 1e-05, %v3343_v35  ;;  %v3316_v18 = vsub.f32 %v3288_v9, %v3302_v46 }
 0x43a   :  { %v12067_v24 = vmul.f32 0.0625, %v3117_v40  ;;  %v3231_v40 = vrot.slane %v3230_v38, 4 }
 0x43b   :  { %v3413_v22 = vmul.f32 0.5, %v3412_v52  ;;  %9462 = vrsqrt.f32 %v3357_v13  ;;  %v3228_v52 = vrot.slane %v3227_v56, 1  ;;  %v3330_v0 = vmul.f32 1.0666667, %v3316_v18 }
 0x43c   :  { %v3305_v32 = vmul.f32 %v12067_v24, %v12067_v24  ;;  %vm3386_vm1 = vweird.f32 %v3357_v13 }
 0x43d   :  { %v3414_v29 = vsub.f32 1.5, %v3413_v22  ;;  %v3229_v22 = vadd.f32 %v3228_v52, %v3227_v56  ;;  %v3344_v57 = vmax.f32 %v3330_v0, 0.0 }
 0x43f   :  { %v3415_v51 = vmul.f32 %v9461_v30, %v3414_v29  ;;  %v3291_v36 = vmul.f32 0.0625, %v3229_v22  ;;  %v12083_v29 = vpop.f32.mrf.mxu3  ;;  %v3358_v41 = vadd.f32 1e-05, %v3344_v57  ;;  %v3097_v22 = vadd.f32 %v11998_v23, %v12022_v31 }
 0x440   :  { %v3209_v57 = vadd.f32 %v11942_v37, %v11933_v16 }
 0x441   :  { %v3419_v20 = vsel %vm3418_vm15, %v9461_v30, %v3415_v51  ;;  %v2946_v30 = vsel %vm2907_vm7, %v12048_v59, 0.0  ;;  %v9463_v35 = vpop.eup %9462  ;;  %v3319_v2 = vsub.f32 %v3291_v36, %v3305_v32  ;;  %9464 = vrsqrt.f32 %v3358_v41 }
 0x442   :  { %v12063_v33 = vmul.f32 %v12010_v45, %v3419_v20  ;;  %v12076_v6 = vadd.f32 %v2946_v30, %v2945_v12  ;;  %v3118_v42 = vadd.f32 %v2946_v30, %v2919_v44  ;;  %v12086_v12 = vadd.f32 %v3002_v27, %v3001_v43 }
 0x443   :  { %v3333_v51 = vmul.f32 1.0666667, %v3319_v2  ;;  %vm3387_vm0 = vweird.f32 %v9463_v35  ;;  %v3232_v44 = vadd.f32 %v3231_v40, %v3230_v38  ;;  %v3210_v37 = vrot.slane %v3209_v57, 4 }
 0x444   :  { %v3537_v63 = vmul.f32 %v12063_v33, %v11973_v50  ;;  %v3381_v50 = vmul.f32 %v9463_v35, %v3357_v13  ;;  %v3119_v47 = vrot.slane %v3118_v42, 4  ;;  %vm3388_vm3 = vmor %vm3386_vm1, %vm3387_vm0  ;;  %vm3396_vm5 = vweird.f32 %v3358_v41 }
 0x445   :  { %v3347_v56 = vmax.f32 %v3333_v51, 0.0 }
 0x446   :  { %3569 = vrot.lane.b32.xlu2 %v3537_v63, %s9808_s30  ;;  %v3382_v58 = vmul.f32 %v9463_v35, %v3381_v50  ;;  %v3120_v20 = vadd.f32 %v3119_v47, %v3118_v42  ;;  %v3233_v63 = vrot.slane %v3232_v44, 2 }
 0x447   :  { %v3361_v8 = vadd.f32 1e-05, %v3347_v56  ;;  %v12088_v43 = vpop.f32.mrf.mxu3  ;;  %v9465_v18 = vpop.eup %9464 }
 0x448   :  { %v3383_v34 = vmul.f32 0.5, %v3382_v58  ;;  %v3121_v46 = vrot.slane %v3120_v20, 2  ;;  %v3391_v0 = vmul.f32 %v9465_v18, %v3358_v41  ;;  %v3234_v27 = vadd.f32 %v3233_v63, %v3232_v44 }
 0x449   :  { %9466 = vrsqrt.f32 %v3361_v8  ;;  %vm3397_vm4 = vweird.f32 %v9465_v18  ;;  %vm3426_vm9 = vweird.f32 %v3361_v8 }
 0x44a   :  { %v3384_v9 = vsub.f32 1.5, %v3383_v34  ;;  %v3122_v30 = vadd.f32 %v3121_v46, %v3120_v20  ;;  %v3392_v42 = vmul.f32 %v9465_v18, %v3391_v0  ;;  %v3235_v58 = vrot.slane %v3234_v27, 1  ;;  %vm3398_vm6 = vmor %vm3396_vm5, %vm3397_vm4 }
 0x44b   :  { %v2707_v46 = vadd.f32 %v11826_v48, %v11986_v11 }
 0x44c   :  { %v3385_v52 = vmul.f32 %v9463_v35, %v3384_v9  ;;  %v3123_v36 = vrot.slane %v3122_v30, 1  ;;  %v3393_v23 = vmul.f32 0.5, %v3392_v42  ;;  %v3236_v47 = vadd.f32 %v3235_v58, %v3234_v27  ;;  %v2798_v27 = vpop.permute.xlu0 %2797 }
 0x44e   :  { %v3389_v7 = vsel %vm3388_vm3, %v9463_v35, %v3385_v52  ;;  %v3124_v2 = vadd.f32 %v3123_v36, %v3122_v30  ;;  %v3098_v35 = vrot.slane %v3097_v22, 4  ;;  %v3394_v38 = vsub.f32 1.5, %v3393_v23 }
 0x44f   :  { %v12093_v32 = vmul.f32 %v12010_v45, %v3389_v7  ;;  %v9467_v50 = vpop.eup %9466  ;;  %v3292_v56 = vmul.f32 0.0625, %v3236_v47  ;;  %v12104_v20 = vpop.f32.mrf.mxu3  ;;  %v2705_v52 = vadd.f32 %v11826_v48, %v11966_v25  ;;  %v3211_v36 = vadd.f32 %v3210_v37, %v3209_v57 }
 0x450   :  { %v3421_v31 = vmul.f32 %v9467_v50, %v3361_v8  ;;  %v12100_v51 = vmul.f32 0.0625, %v3124_v2  ;;  %v3099_v16 = vadd.f32 %v3098_v35, %v3097_v22  ;;  %v3395_v40 = vmul.f32 %v9465_v18, %v3394_v38 }
 0x451   :  { %v3534_v13 = vmul.f32 %v12093_v32, %v12036_v15  ;;  %vm3427_vm8 = vweird.f32 %v9467_v50  ;;  %v12118_v25 = vadd.f32 %v11964_v21, %v2705_v52  ;;  %v3212_v8 = vrot.slane %v3211_v36, 2 }
 0x452   :  { %v3422_v34 = vmul.f32 %v9467_v50, %v3421_v31  ;;  %v3306_v15 = vmul.f32 %v12100_v51, %v12100_v51  ;;  %v3399_v30 = vsel %vm3398_vm6, %v9465_v18, %v3395_v40  ;;  %v3100_v22 = vrot.slane %v3099_v16, 2  ;;  %vm3428_vm10 = vmor %vm3426_vm9, %vm3427_vm8 }
 0x453   :  { %3563 = vrot.lane.b32.xlu0 %v3534_v13, %s9808_s30  ;;  %v12111_v7 = vmul.f32 %v12010_v45, %v3399_v30  ;;  %v12113_v13 = vadd.f32 %v2798_v27, %v2707_v46  ;;  %15212 = vst [vmem:[#allocation18_spill] sm:$0xff] %v12118_v25  ;;  %v3213_v47 = vadd.f32 %v3212_v8, %v3211_v36 }
 0x454   :  { %v3423_v9 = vmul.f32 0.5, %v3422_v34  ;;  %v3320_v44 = vsub.f32 %v3292_v56, %v3306_v15  ;;  %v3101_v35 = vadd.f32 %v3100_v22, %v3099_v16  ;;  %v2893_v38 = vmul.f32 %v12118_v25, %v12118_v25 }
 0x455   :  { %15210 = vst [vmem:[#allocation23_spill] sm:$0xff] %v12111_v7  ;;  %v3535_v11 = vmul.f32 %v12111_v7, %v12058_v62  ;;  %v12128_v62 = vsel %vm2907_vm7, %v12113_v13, 0.0  ;;  %v2894_v21 = vmul.f32 %v12113_v13, %v12113_v13  ;;  %v2712_v56 = vadd.f32 %v11826_v48, %v12051_v3 }
 0x456   :  { %v3424_v63 = vsub.f32 1.5, %v3423_v9  ;;  %v3334_v0 = vmul.f32 1.0666667, %v3320_v44  ;;  %15211 = vst [vmem:[#allocation16_spill] sm:$0xff] %v12113_v13  ;;  %v3102_v31 = vrot.slane %v3101_v35, 1  ;;  %v2710_v37 = vadd.f32 %v11826_v48, %v12024_v26 }
 0x457   :  { %3565 = vrot.lane.b32.xlu2 %v3535_v11, %s9808_s30  ;;  %v2721_v58 = vpop.f32.mrf.mxu3  ;;  %v12144_v15 = vsel %vm2907_vm7, %v2894_v21, 0.0  ;;  %v3214_v46 = vrot.slane %v3213_v47, 1  ;;  %v12151_v44 = vsel %vm2907_vm7, %v2893_v38, 0.0  ;;  %v12156_v3 = vadd.f32 %v11977_v61, %v2712_v56 }
 0x458   :  { %v3425_v41 = vmul.f32 %v9467_v50, %v3424_v63  ;;  %v3348_v42 = vmax.f32 %v3334_v0, 0.0  ;;  %v3103_v9 = vadd.f32 %v3102_v31, %v3101_v35  ;;  %v3237_v63 = vadd.f32 %v12144_v15, %v12151_v44 }
 0x459   :  { %15213 = vst [vmem:[#allocation39_spill] sm:$0xff] %v12156_v3  ;;  %v3215_v26 = vadd.f32 %v3214_v46, %v3213_v47  ;;  %v2896_v8 = vmul.f32 %v12156_v3, %v12156_v3  ;;  %v2804_v47 = vpop.permute.xlu0 %2803 }
 0x45a   :  { %v3429_v18 = vsel %vm3428_vm10, %v9467_v50, %v3425_v41  ;;  %v3362_v57 = vadd.f32 1e-05, %v3348_v42  ;;  %v12135_v50 = vsel %vm2907_vm7, %v12118_v25, 0.0  ;;  %v12160_v36 = vmul.f32 0.0625, %v3103_v9 }
 0x45b   :  { %v12122_v2 = vmul.f32 %v12010_v45, %v3429_v18  ;;  %v3125_v34 = vadd.f32 %v12128_v62, %v12135_v50  ;;  %v3238_v11 = vrot.slane %v3237_v63, 4  ;;  %v12164_v18 = vsel %vm2907_vm7, %v12156_v3, 0.0 }
 0x45c   :  { %9468 = vrsqrt.f32 %v3362_v57  ;;  %v3289_v21 = vmul.f32 0.0625, %v3215_v26  ;;  %v3303_v31 = vmul.f32 %v12160_v36, %v12160_v36  ;;  %vm3436_vm14 = vweird.f32 %v3362_v57 }
 0x45d   :  { %v3538_v23 = vmul.f32 %v12122_v2, %v12067_v24  ;;  %v2800_v24 = vpop.permute.xlu1 %2799  ;;  %v3126_v30 = vrot.slane %v3125_v34, 4  ;;  %v3239_v56 = vadd.f32 %v3238_v11, %v3237_v63  ;;  %v12181_v46 = vsel %vm2907_vm7, %v2896_v8, 0.0 }
 0x45e   :  { %v12158_v22 = vadd.f32 %v2800_v24, %v2710_v37  ;;  %v12192_v63 = vadd.f32 %v11826_v48, %v2721_v58  ;;  %v2715_v58 = vadd.f32 %v11826_v48, %v12083_v29 }
 0x45f   :  { %3571 = vrot.lane.b32.xlu1 %v3538_v23, %s9808_s30  ;;  %v12148_v40 = vpop.f32.mrf.mxu3  ;;  %v3127_v41 = vadd.f32 %v3126_v30, %v3125_v34  ;;  %v3317_v30 = vsub.f32 %v3289_v21, %v3303_v31 }
 0x460   :  { %15214 = vst [vmem:[#allocation17_spill] sm:$0xff] %v12158_v22  ;;  %v2895_v61 = vmul.f32 %v12158_v22, %v12158_v22  ;;  %v12176_v24 = vsel %vm2907_vm7, %v12158_v22, 0.0  ;;  %v12215_v22 = vadd.f32 %v2804_v47, %v2715_v58 }
 0x461   :  { %v3128_v34 = vrot.slane %v3127_v41, 2  ;;  %v3132_v37 = vadd.f32 %v12164_v18, %v12176_v24  ;;  %15216 = vst [vmem:[#allocation25_spill] sm:$0xff] %v12192_v63 }
 0x462   :  { %v9469_v16 = vpop.eup %9468  ;;  %15221 = vst [vmem:[#allocation38_spill] sm:$0xff] %v12215_v22  ;;  %v2897_v13 = vmul.f32 %v12215_v22, %v12215_v22 }
 0x463   :  { %v3431_v52 = vmul.f32 %v9469_v16, %v3362_v57  ;;  %vm3437_vm11 = vweird.f32 %v9469_v16  ;;  %v12187_v57 = vsel %vm2907_vm7, %v2895_v61, 0.0  ;;  %v3133_v11 = vrot.slane %v3132_v37, 4 }
 0x464   :  { %vm3438_vm15 = vmor %vm3436_vm14, %vm3437_vm11  ;;  %v12201_v61 = vadd.f32 %v11826_v48, %v12104_v20 }
 0x465   :  { %v3432_v0 = vmul.f32 %v9469_v16, %v3431_v52  ;;  %v2806_v42 = vpop.permute.xlu1 %2805 }
 0x466   :  { %15217 = vst [vmem:[#allocation34_spill] sm:$0xff] %v12201_v61 }
 0x467   :  { %v3433_v27 = vmul.f32 0.5, %v3432_v0  ;;  %v12170_v23 = vpop.f32.mrf.mxu3  ;;  %v3129_v0 = vadd.f32 %v3128_v34, %v3127_v41  ;;  %v3134_v34 = vadd.f32 %v3133_v11, %v3132_v37 }
 0x468   :  { %v12272_v10 = vadd.f32 %v11826_v48, %v12170_v23 }
 0x469   :  { %v3434_v35 = vsub.f32 1.5, %v3433_v27  ;;  %v3240_v27 = vrot.slane %v3239_v56, 2  ;;  %v3130_v21 = vrot.slane %v3129_v0, 1  ;;  %v3135_v37 = vrot.slane %v3134_v34, 2 }
 0x46a   :  { %15223 = vst [vmem:[#allocation40_spill] sm:$0xff] %v12272_v10 }
 0x46b   :  { %v3435_v38 = vmul.f32 %v9469_v16, %v3434_v35  ;;  %v2717_v35 = vadd.f32 %v11826_v48, %v12088_v43  ;;  %v2808_v43 = vpop.permute.xlu0 %2807 }
 0x46c   :  { %v12213_v20 = vadd.f32 %v2808_v43, %v12201_v61  ;;  %v2925_v43 = vsel %vm2907_vm7, %v12215_v22, 0.0 }
 0x46d   :  { %v3439_v9 = vsel %vm3438_vm15, %v9469_v16, %v3435_v38  ;;  %v3244_v16 = vadd.f32 %v12181_v46, %v12187_v57  ;;  %v2810_v8 = vpop.permute.xlu1 %2809  ;;  %v3241_v38 = vadd.f32 %v3240_v27, %v3239_v56 }
 0x46e   :  { %v12184_v52 = vmul.f32 %v12010_v45, %v3439_v9  ;;  %v12208_v31 = vadd.f32 %v2810_v8, %v12192_v63  ;;  %15220 = vst [vmem:[#allocation22_spill] sm:$0xff] %v12213_v20  ;;  %v2899_v11 = vmul.f32 %v12213_v20, %v12213_v20  ;;  %v12231_v47 = vsel %vm2907_vm7, %v12213_v20, 0.0 }
 0x46f   :  { %v12203_v41 = vpop.f32.mrf.mxu3  ;;  %v3245_v9 = vrot.slane %v3244_v16, 4  ;;  %v3242_v56 = vrot.slane %v3241_v38, 1  ;;  %v3136_v63 = vadd.f32 %v3135_v37, %v3134_v34 }
 0x470   :  { %15215 = vst [vmem:[#allocation26_spill] sm:$0xff] %v12184_v52  ;;  %v3539_v26 = vmul.f32 %v12184_v52, %v12100_v51  ;;  %v3331_v51 = vmul.f32 1.0666667, %v3317_v30  ;;  %v3131_v30 = vadd.f32 %v3130_v21, %v3129_v0  ;;  %v2900_v29 = vmul.f32 %v12208_v31, %v12208_v31 }
 0x471   :  { %15218 = vst [vmem:[#allocation31_spill] sm:$0xff] %v12208_v31  ;;  %v12221_v8 = vsel %vm2907_vm7, %v12208_v31, 0.0  ;;  %v3246_v27 = vadd.f32 %v3245_v9, %v3244_v16  ;;  %v2812_v16 = vpop.permute.xlu2 %2811  ;;  %v3243_v9 = vadd.f32 %v3242_v56, %v3241_v38  ;;  %v12249_v20 = vsel %vm2907_vm7, %v2899_v11, 0.0 }
 0x472   :  { %3573 = vrot.lane.b32.xlu2 %v3539_v26, %s9808_s30  ;;  %v12210_v26 = vadd.f32 %v2806_v42, %v2717_v35  ;;  %v3345_v3 = vmax.f32 %v3331_v51, 0.0  ;;  %v12235_v51 = vmul.f32 0.0625, %v3131_v30  ;;  %v3146_v58 = vadd.f32 %v12221_v8, %v12231_v47 }
 0x473   :  { %v12240_v21 = vsel %vm2907_vm7, %v2900_v29, 0.0  ;;  %v3247_v31 = vrot.slane %v3246_v27, 2  ;;  %v2922_v30 = vadd.f32 %v12135_v50, %v12069_v17  ;;  %v2949_v38 = vadd.f32 %v12128_v62, %v12076_v6 }
 0x474   :  { %15219 = vst [vmem:[#allocation20_spill] sm:$0xff] %v12210_v26  ;;  %v2952_v42 = vsel %vm2907_vm7, %v12210_v26, 0.0  ;;  %v12233_v0 = vadd.f32 1e-05, %v3345_v3  ;;  %v2898_v61 = vmul.f32 %v12210_v26, %v12210_v26  ;;  %v3147_v29 = vrot.slane %v3146_v58, 4 }
 0x475   :  { %v3139_v3 = vadd.f32 %v2952_v42, %v2925_v43  ;;  %v3307_v34 = vmul.f32 %v12235_v51, %v12235_v51  ;;  %v3258_v56 = vadd.f32 %v12240_v21, %v12249_v20  ;;  %v12262_v17 = vadd.f32 %v11826_v48, %v12148_v40 }
 0x476   :  { %9470 = vrsqrt.f32 %v12233_v0  ;;  %v3293_v50 = vmul.f32 0.0625, %v3243_v9  ;;  %v3137_v37 = vrot.slane %v3136_v63, 1  ;;  %v3148_v11 = vadd.f32 %v3147_v29, %v3146_v58 }
 0x477   :  { %v12227_v35 = vpop.f32.mrf.mxu3  ;;  %15222 = vst [vmem:[#allocation19_spill] sm:$0xff] %v12262_v17  ;;  %v12265_v26 = vsel %vm2907_vm7, %v2898_v61, 0.0  ;;  %v3248_v22 = vadd.f32 %v3247_v31, %v3246_v27  ;;  %v3140_v25 = vrot.slane %v3139_v3, 4  ;;  %v3259_v59 = vrot.slane %v3258_v56, 4 }
 0x478   :  { %v2951_v6 = vadd.f32 %v12164_v18, %v2949_v38  ;;  %v2978_v62 = vadd.f32 %v12151_v44, %v12080_v1  ;;  %v3005_v58 = vadd.f32 %v12144_v15, %v12086_v12  ;;  %v2924_v61 = vadd.f32 %v12176_v24, %v2922_v30  ;;  %v2814_v38 = vpop.permute.xlu0 %2813 }
 0x479   :  { %v2981_v31 = vsel %vm2907_vm7, %v2897_v13, 0.0  ;;  %v3149_v27 = vrot.slane %v3148_v11, 2  ;;  %v3321_v18 = vsub.f32 %v3293_v50, %v3307_v34  ;;  %v3138_v29 = vadd.f32 %v3137_v37, %v3136_v63  ;;  %v2818_v12 = vpop.permute.xlu2 %2817 }
 0x47a   :  { %v3251_v1 = vadd.f32 %v12265_v26, %v2981_v31  ;;  %v3260_v44 = vadd.f32 %v3259_v59, %v3258_v56  ;;  %v12284_v23 = vadd.f32 %v2812_v16, %v12262_v17  ;;  %v3249_v52 = vrot.slane %v3248_v22, 1  ;;  %v2816_v16 = vpop.permute.xlu1 %2815 }
 0x47b   :  { %v3141_v49 = vadd.f32 %v3140_v25, %v3139_v3  ;;  %v3150_v4 = vadd.f32 %v3149_v27, %v3148_v11  ;;  %v2953_v15 = vadd.f32 %v2952_v42, %v2951_v6  ;;  %v12287_v24 = vadd.f32 %v2814_v38, %v12272_v10 }
 0x47c   :  { %v12280_v9 = vpop.eup %9470  ;;  %15224 = vst [vmem:[#allocation41_spill] sm:$0xff] %v12284_v23  ;;  %v2980_v13 = vadd.f32 %v12187_v57, %v2978_v62  ;;  %v3261_v30 = vrot.slane %v3260_v44, 2  ;;  %v3007_v63 = vadd.f32 %v12181_v46, %v3005_v58  ;;  %v2926_v34 = vadd.f32 %v2925_v43, %v2924_v61 }
 0x47d   :  { %15225 = vst [vmem:[#allocation44_spill] sm:$0xff] %v12287_v24  ;;  %v3401_v59 = vmul.f32 %v12280_v9, %v12233_v0  ;;  %v3151_v56 = vrot.slane %v3150_v4, 1  ;;  %v3335_v50 = vmul.f32 1.0666667, %v3321_v18  ;;  %v12293_v37 = vmul.f32 0.0625, %v3138_v29 }
 0x47e   :  { %v3252_v25 = vrot.slane %v3251_v1, 4  ;;  %v3262_v3 = vadd.f32 %v3261_v30, %v3260_v44  ;;  %v2901_v42 = vmul.f32 %v12284_v23, %v12284_v23  ;;  %v3250_v11 = vadd.f32 %v3249_v52, %v3248_v22 }
 0x47f   :  { %v12274_v40 = vpop.f32.mrf.mxu3  ;;  %v3142_v6 = vrot.slane %v3141_v49, 2  ;;  %v3152_v57 = vadd.f32 %v3151_v56, %v3150_v4  ;;  %v2902_v46 = vmul.f32 %v12287_v24, %v12287_v24  ;;  %v2956_v43 = vsel %vm2907_vm7, %v12287_v24, 0.0 }
 0x480   :  { %v12303_v62 = vsel %vm2907_vm7, %v12284_v23, 0.0  ;;  %v3263_v58 = vrot.slane %v3262_v3, 1  ;;  %v2982_v61 = vadd.f32 %v2981_v31, %v2980_v13  ;;  %v3402_v27 = vmul.f32 %v12280_v9, %v3401_v59 }
 0x481   :  { %v12306_v18 = vmul.f32 0.0625, %v3152_v57  ;;  %v3153_v22 = vadd.f32 %v2956_v43, %v12303_v62  ;;  %v3012_v4 = vsel %vm2907_vm7, %v2902_v46, 0.0  ;;  %v3349_v29 = vmax.f32 %v3335_v50, 0.0  ;;  %v12315_v13 = vpop.permute.xlu2 %3053 }
 0x482   :  { %v3253_v44 = vadd.f32 %v3252_v25, %v3251_v1  ;;  %v3264_v38 = vadd.f32 %v3263_v58, %v3262_v3  ;;  %v12311_v30 = vsel %vm2907_vm7, %v2901_v42, 0.0  ;;  %v3143_v56 = vadd.f32 %v3142_v6, %v3141_v49  ;;  %v9802_v25 = vld [vmem:[%s14868_s10] ss:$0 sm:$0xff] }
 0x483   :  { %v3310_v10 = vmul.f32 %v12306_v18, %v12306_v18  ;;  %v3154_v31 = vrot.slane %v3153_v22, 4  ;;  %v12317_v59 = vmul.f32 0.0625, %v3250_v11  ;;  %v12321_v57 = vmul.f32 %v12293_v37, %v12293_v37 }
 0x484   :  { %v3296_v46 = vmul.f32 0.0625, %v3264_v38  ;;  %v3265_v1 = vadd.f32 %v3012_v4, %v12311_v30  ;;  %v12326_v50 = vadd.f32 %v11826_v48, %v12203_v41  ;;  %v12330_v49 = vadd.f32 %v11826_v48, %v12227_v35  ;;  %v2822_v48 = vpop.permute.xlu1 %2821 }
 0x485   :  { %v3155_v42 = vadd.f32 %v3154_v31, %v3153_v22  ;;  %v12337_v11 = vmul.f32 0.5, %v3402_v27  ;;  %v12339_v6 = vadd.f32 1e-05, %v3349_v29  ;;  %v3009_v41 = vadd.f32 %v12265_v26, %v3007_v63 }
 0x486   :  { %15226 = vst [vmem:[#allocation32_spill] sm:$0xff] %v12326_v50  ;;  %v3324_v58 = vsub.f32 %v3296_v46, %v3310_v10  ;;  %v3266_v38 = vrot.slane %v3265_v1, 4  ;;  %v3144_v17 = vrot.slane %v3143_v56, 1  ;;  %v3254_v24 = vrot.slane %v3253_v44, 2 }
 0x487   :  { %v2736_v52 = vpop.f32.mrf.mxu3  ;;  %15227 = vst [vmem:[#allocation24_spill] sm:$0xff] %v12330_v49  ;;  %v3156_v23 = vrot.slane %v3155_v42, 2  ;;  %v2928_v35 = vadd.f32 %v12231_v47, %v2926_v34  ;;  %v12346_v27 = vadd.f32 %v2816_v16, %v12326_v50  ;;  %v12349_v22 = vadd.f32 %v2818_v12, %v12330_v49  ;;  %v12363_v12 = vld [vmem:[%s14862_s6 + $0x1] sm:$0x1] }
 0x488   :  { %v12335_v3 = vadd.f32 %v9802_v25, %v2736_v52  ;;  %v3338_v52 = vmul.f32 1.0666667, %v3324_v58  ;;  %v3267_v54 = vadd.f32 %v3266_v38, %v3265_v1  ;;  %v2955_v63 = vadd.f32 %v12221_v8, %v2953_v15 }
 0x489   :  { %v3157_v26 = vadd.f32 %v3156_v23, %v3155_v42  ;;  %v2984_v29 = vadd.f32 %v12249_v20, %v2982_v61  ;;  %v3011_v31 = vadd.f32 %v12240_v21, %v3009_v41  ;;  %v3145_v46 = vadd.f32 %v3144_v17, %v3143_v56 }
 0x48a   :  { %15228 = vst [vmem:[#allocation42_spill] sm:$0xff] %v12335_v3  ;;  %v12352_v10 = vadd.f32 %v2822_v48, %v12335_v3  ;;  %v3352_v47 = vmax.f32 %v3338_v52, 0.0  ;;  %v3268_v34 = vrot.slane %v3267_v54, 2  ;;  %v3255_v1 = vadd.f32 %v3254_v24, %v3253_v44 }
 0x48b   :  { %v3158_v58 = vrot.slane %v3157_v26, 1  ;;  %v12358_v16 = vadd.f32 %v9802_v25, %v12274_v40  ;;  %v2957_v23 = vadd.f32 %v2956_v43, %v2955_v63  ;;  %v2904_v20 = vmul.f32 %v12349_v22, %v12349_v22 }
 0x48c   :  { %15229 = vst [vmem:[#allocation46_spill] sm:$0xff] %v12352_v10  ;;  %v12365_v42 = vadd.f32 1e-05, %v3352_v47  ;;  %v3269_v8 = vadd.f32 %v3268_v34, %v3267_v54  ;;  %v2906_v21 = vmul.f32 %v12352_v10, %v12352_v10  ;;  %v2958_v17 = vsel %vm2907_vm7, %v12349_v22, 0.0 }
 0x48d   :  { %15230 = vst [vmem:[#allocation45_spill] sm:$0xff] %v12358_v16  ;;  %v12375_v40 = vsel %vm2907_vm7, %v12352_v10, 0.0  ;;  %v2959_v24 = vadd.f32 %v2958_v17, %v2957_v23  ;;  %v3013_v61 = vadd.f32 %v3012_v4, %v3011_v31  ;;  %v2903_v43 = vmul.f32 %v12346_v27, %v12346_v27 }
 0x48e   :  { %9472 = vrsqrt.f32 %v12365_v42  ;;  %v3014_v44 = vsel %vm2907_vm7, %v2904_v20, 0.0  ;;  %v12383_v56 = vsel %vm2907_vm7, %v2906_v21, 0.0  ;;  %v3159_v25 = vadd.f32 %v3158_v58, %v3157_v26  ;;  %v2820_v26 = vpop.permute.xlu0 %2819 }
 0x48f   :  { %v2961_v38 = vadd.f32 %v12375_v40, %v2959_v24  ;;  %v3015_v41 = vadd.f32 %v3014_v44, %v3013_v61  ;;  %v2931_v48 = vsel %vm2907_vm7, %v12346_v27, 0.0  ;;  %v3270_v4 = vrot.slane %v3269_v8, 1 }
 0x490   :  { %v3160_v63 = vadd.f32 %v2958_v17, %v2931_v48  ;;  %v3256_v47 = vrot.slane %v3255_v1, 1  ;;  %v12388_v34 = vmul.f32 0.0625, %v3159_v25  ;;  %v2987_v20 = vsel %vm2907_vm7, %v2903_v43, 0.0 }
 0x491   :  { %v12390_v31 = vmul.f32 0.071428575, %v2961_v38  ;;  %v3017_v23 = vadd.f32 %v12383_v56, %v3015_v41  ;;  %v3271_v21 = vadd.f32 %v3270_v4, %v3269_v8  ;;  %v3272_v58 = vadd.f32 %v3014_v44, %v2987_v20 }
 0x492   :  { %v3311_v24 = vmul.f32 %v12388_v34, %v12388_v34  ;;  %v3161_v17 = vrot.slane %v3160_v63, 4  ;;  %v2930_v8 = vadd.f32 %v12303_v62, %v2928_v35  ;;  %v3257_v7 = vadd.f32 %v3256_v47, %v3255_v1 }
 0x493   :  { %v3019_v25 = vmul.f32 0.071428575, %v3017_v23  ;;  %v3021_v38 = vmul.f32 %v12390_v31, %v12390_v31  ;;  %v3297_v43 = vmul.f32 0.0625, %v3271_v21  ;;  %vm3476_vm1 = vweird.f32 %v12365_v42 }
 0x494   :  { %v9473_v61 = vpop.eup %9472  ;;  %v3162_v44 = vadd.f32 %v3161_v17, %v3160_v63  ;;  %v2932_v49 = vadd.f32 %v2931_v48, %v2930_v8  ;;  %vm3407_vm4 = vweird.f32 %v12280_v9  ;;  %vm3406_vm10 = vweird.f32 %v12233_v0 }
 0x495   :  { %v3471_v41 = vmul.f32 %v9473_v61, %v12365_v42  ;;  %v3023_v4 = vsub.f32 %v3019_v25, %v3021_v38  ;;  %v3325_v3 = vsub.f32 %v3297_v43, %v3311_v24  ;;  %vm3477_vm0 = vweird.f32 %v9473_v61  ;;  %vm12469_vm14 = vmor %vm3406_vm10, %vm3407_vm4 }
 0x496   :  { %vm3478_vm3 = vmor %vm3476_vm1, %vm3477_vm0 }
 0x497   :  { %v3472_v50 = vmul.f32 %v9473_v61, %v3471_v41  ;;  %v3025_v23 = vmax.f32 %v3023_v4, 0.0  ;;  %v3339_v17 = vmul.f32 1.0666667, %v3325_v3  ;;  %v3295_v41 = vmul.f32 0.0625, %v3257_v7 }
 0x499   :  { %v3473_v63 = vmul.f32 0.5, %v3472_v50  ;;  %v12411_v38 = vadd.f32 1e-05, %v3025_v23 }
 0x49b   :  { %v3474_v47 = vsub.f32 1.5, %v3473_v63  ;;  %9474 = vrsqrt.f32 %v12411_v38  ;;  %vm3044_vm6 = vweird.f32 %v12411_v38 }
 0x49d   :  { %v3475_v24 = vmul.f32 %v9473_v61, %v3474_v47 }
 0x49f   :  { %v3479_v42 = vsel %vm3478_vm3, %v9473_v61, %v3475_v24 }
 0x4a0   :  { %v3570_v15 = vpop.permute.xlu2 %3569 }
 0x4a1   :  { %v3607_v54 = vsub.f32 %v12363_v12, %v3570_v15  ;;  %v12395_v15 = vmul.f32 0.0625, %v3145_v46  ;;  %v3273_v46 = vrot.slane %v3272_v58, 4  ;;  %v9475_v23 = vpop.eup %9474 }
 0x4a2   :  { %vm3045_vm5 = vweird.f32 %v9475_v23 }
 0x4a3   :  { %v3741_v52 = vperm.slane %v3607_v54, 0  ;;  %v12400_v54 = vadd.f32 %v2820_v26, %v12358_v16  ;;  %v3163_v26 = vrot.slane %v3162_v44, 2  ;;  %v3274_v16 = vadd.f32 %v3273_v46, %v3272_v58  ;;  %vm3046_vm8 = vmor %vm3044_vm6, %vm3045_vm5 }
 0x4a4   :  { %v3353_v58 = vmax.f32 %v3339_v17, 0.0  ;;  %v3039_v17 = vmul.f32 %v9475_v23, %v12411_v38 }
 0x4a5   :  { %3759 = vrot.lane.b32.xlu2 %v3741_v52, %s9806_s20  ;;  %v2986_v52 = vadd.f32 %v12311_v30, %v2984_v29  ;;  %v2905_v10 = vmul.f32 %v12400_v54, %v12400_v54  ;;  %v2933_v62 = vsel %vm2907_vm7, %v12400_v54, 0.0  ;;  %v3164_v25 = vadd.f32 %v3163_v26, %v3162_v44 }
 0x4a6   :  { %v2934_v21 = vadd.f32 %v2933_v62, %v2932_v49  ;;  %v3275_v29 = vrot.slane %v3274_v16, 2  ;;  %v12420_v43 = vadd.f32 1e-05, %v3353_v58 }
 0x4a7   :  { %v2988_v35 = vadd.f32 %v2987_v20, %v2986_v52  ;;  %v2989_v30 = vsel %vm2907_vm7, %v2905_v10, 0.0  ;;  %v3165_v20 = vrot.slane %v3164_v25, 1  ;;  %v15231_v10 = vsub.f32 %v12317_v59, %v12321_v57 }
 0x4a8   :  { %v12414_v1 = vmul.f32 0.071428575, %v2934_v21  ;;  %v3276_v49 = vadd.f32 %v3275_v29, %v3274_v16  ;;  %v3309_v16 = vmul.f32 %v12395_v15, %v12395_v15  ;;  %9476 = vrsqrt.f32 %v12420_v43 }
 0x4a9   :  { %v2990_v48 = vadd.f32 %v2989_v30, %v2988_v35  ;;  %v3336_v8 = vmul.f32 1.0666667, %v15231_v10  ;;  %v3166_v44 = vadd.f32 %v3165_v20, %v3164_v25  ;;  %9478 = vrsqrt.f32 %v12339_v6 }
 0x4aa   :  { %v3020_v3 = vmul.f32 %v12414_v1, %v12414_v1  ;;  %v3277_v46 = vrot.slane %v3276_v49, 1  ;;  %v12431_v52 = vmul.f32 %v12010_v45, %v3479_v42  ;;  %v3167_v57 = vadd.f32 %v12375_v40, %v2933_v62 }
 0x4ab   :  { %v3018_v50 = vmul.f32 0.071428575, %v2990_v48  ;;  %v12433_v26 = vmul.f32 0.0625, %v3166_v44  ;;  %v3350_v35 = vmax.f32 %v3336_v8, 0.0  ;;  %v3323_v48 = vsub.f32 %v3295_v41, %v3309_v16 }
 0x4ac   :  { %v3278_v59 = vadd.f32 %v3277_v46, %v3276_v49  ;;  %v12438_v21 = vmul.f32 %v12431_v52, %v12306_v18  ;;  %v3168_v29 = vrot.slane %v3167_v57, 4  ;;  %v3279_v47 = vadd.f32 %v12383_v56, %v2989_v30 }
 0x4ad   :  { %v3022_v4 = vsub.f32 %v3018_v50, %v3020_v3  ;;  %v3312_v63 = vmul.f32 %v12433_v26, %v12433_v26  ;;  %v3404_v40 = vsub.f32 1.5, %v12337_v11  ;;  %v3040_v20 = vmul.f32 %v9475_v23, %v3039_v17 }
 0x4ae   :  { %v3298_v61 = vmul.f32 0.0625, %v3278_v59  ;;  %v9477_v58 = vpop.eup %9476  ;;  %v3169_v18 = vadd.f32 %v3168_v29, %v3167_v57  ;;  %v3280_v50 = vrot.slane %v3279_v47, 4  ;;  %v12450_v3 = vadd.f32 1e-05, %v3350_v35 }
 0x4af   :  { %v3024_v7 = vmax.f32 %v3022_v4, 0.0  ;;  %v12448_v49 = vpop.eup %9478  ;;  %v3481_v24 = vmul.f32 %v9477_v58, %v12420_v43  ;;  %v3041_v8 = vmul.f32 0.5, %v3040_v20  ;;  %v3337_v56 = vmul.f32 1.0666667, %v3323_v48 }
 0x4b0   :  { %v3326_v62 = vsub.f32 %v3298_v61, %v3312_v63  ;;  %v3170_v30 = vrot.slane %v3169_v18, 2  ;;  %v3405_v11 = vmul.f32 %v12280_v9, %v3404_v40  ;;  %v3281_v46 = vadd.f32 %v3280_v50, %v3279_v47  ;;  %v3056_v47 = vpop.permute.xlu0 %3055 }
 0x4b1   :  { %v12443_v25 = vadd.f32 1e-05, %v3024_v7  ;;  %v3482_v41 = vmul.f32 %v9477_v58, %v3481_v24  ;;  %v3042_v4 = vsub.f32 1.5, %v3041_v8  ;;  %v3441_v16 = vmul.f32 %v12448_v49, %v12339_v6 }
 0x4b2   :  { %v3340_v10 = vmul.f32 1.0666667, %v3326_v62  ;;  %v3171_v42 = vadd.f32 %v3170_v30, %v3169_v18  ;;  %v3282_v57 = vrot.slane %v3281_v46, 2  ;;  %v3351_v63 = vmax.f32 %v3337_v56, 0.0 }
 0x4b3   :  { %9480 = vrsqrt.f32 %v12443_v25  ;;  %v3483_v59 = vmul.f32 0.5, %v3482_v41  ;;  %v3043_v61 = vmul.f32 %v9475_v23, %v3042_v4  ;;  %vm3487_vm9 = vweird.f32 %v9477_v58 }
 0x4b4   :  { %v3354_v44 = vmax.f32 %v3340_v10, 0.0  ;;  %9482 = vrsqrt.f32 %v12450_v3  ;;  %v3172_v17 = vrot.slane %v3171_v42, 1  ;;  %vm3486_vm11 = vweird.f32 %v12420_v43 }
 0x4b5   :  { %v3484_v48 = vsub.f32 1.5, %v3483_v59  ;;  %v3047_v40 = vsel %vm3046_vm8, %v9475_v23, %v3043_v61  ;;  %v3283_v24 = vadd.f32 %v3282_v57, %v3281_v46  ;;  %v3409_v23 = vsel %vm12469_vm14, %v12280_v9, %v3405_v11  ;;  %vm3488_vm15 = vmor %vm3486_vm11, %vm3487_vm9 }
 0x4b6   :  { %v12458_v7 = vadd.f32 1e-05, %v3354_v44  ;;  %v3173_v62 = vadd.f32 %v3172_v17, %v3171_v42  ;;  %v12465_v20 = vmul.f32 %v3056_v47, %v3047_v40  ;;  %v3442_v0 = vmul.f32 %v12448_v49, %v3441_v16 }
 0x4b7   :  { %v3485_v50 = vmul.f32 %v9477_v58, %v3484_v48  ;;  %v12477_v10 = vadd.f32 1e-05, %v3351_v63  ;;  %v3284_v44 = vrot.slane %v3283_v24, 1  ;;  %v12493_v42 = vmul.f32 %v12010_v45, %v3409_v23 }
 0x4b8   :  { %9484 = vrsqrt.f32 %v12458_v7  ;;  %v12480_v43 = vmul.f32 0.0625, %v3173_v62  ;;  %v3065_v30 = vmul.f32 %v12465_v20, %v12390_v31  ;;  %v3443_v59 = vmul.f32 0.5, %v3442_v0 }
 0x4b9   :  { %v9481_v35 = vpop.eup %9480  ;;  %v3489_v41 = vsel %vm3488_vm15, %v9477_v58, %v3485_v50  ;;  %v3285_v4 = vadd.f32 %v3284_v44, %v3283_v24  ;;  %vm3034_vm1 = vweird.f32 %v12443_v25  ;;  %9486 = vrsqrt.f32 %v12477_v10 }
 0x4ba   :  { %v3029_v29 = vmul.f32 %v9481_v35, %v12443_v25  ;;  %v12482_v8 = vpop.eup %9482  ;;  %v12487_v46 = vmul.f32 %v12010_v45, %v3489_v41  ;;  %vm3035_vm0 = vweird.f32 %v9481_v35  ;;  %3070 = vrot.lane.b32.xlu1 %v3065_v30, %s9808_s30  ;;  %v3313_v16 = vmul.f32 %v12480_v43, %v12480_v43 }
 0x4bb   :  { %v3299_v61 = vmul.f32 0.0625, %v3285_v4  ;;  %vm3036_vm3 = vmor %vm3034_vm1, %vm3035_vm0  ;;  %v3451_v63 = vmul.f32 %v12482_v8, %v12450_v3  ;;  %v3536_v40 = vmul.f32 %v12493_v42, %v12160_v36  ;;  %v3444_v62 = vsub.f32 1.5, %v3443_v59  ;;  %v3566_v59 = vpop.permute.xlu2 %3565 }
 0x4bc   :  { %v3030_v18 = vmul.f32 %v9481_v35, %v3029_v29  ;;  %v12497_v31 = vmul.f32 %v12487_v46, %v12388_v34  ;;  %vm3496_vm5 = vweird.f32 %v12458_v7  ;;  %vm3447_vm6 = vweird.f32 %v12448_v49 }
 0x4bd   :  { %v3327_v48 = vsub.f32 %v3299_v61, %v3313_v16  ;;  %v3452_v50 = vmul.f32 %v12482_v8, %v3451_v63  ;;  %vm3446_vm9 = vweird.f32 %v12339_v6  ;;  %v3605_v6 = vsub.f32 %v12363_v12, %v3566_v59 }
 0x4be   :  { %v3031_v56 = vmul.f32 0.5, %v3030_v18  ;;  %v9485_v9 = vpop.eup %9484  ;;  %vm3448_vm10 = vmor %vm3446_vm9, %vm3447_vm6  ;;  %vm3457_vm11 = vweird.f32 %v12482_v8  ;;  %vm3456_vm14 = vweird.f32 %v12450_v3 }
 0x4bf   :  { %v3491_v58 = vmul.f32 %v9485_v9, %v12458_v7  ;;  %v3341_v18 = vmul.f32 1.0666667, %v3327_v48  ;;  %vm3497_vm4 = vweird.f32 %v9485_v9  ;;  %v12512_v23 = vpop.eup %9486  ;;  %v3453_v41 = vmul.f32 0.5, %v3452_v50  ;;  %vm3458_vm15 = vmor %vm3456_vm14, %vm3457_vm11 }
 0x4c0   :  { %v3032_v11 = vsub.f32 1.5, %v3031_v56  ;;  %v3445_v56 = vmul.f32 %v12448_v49, %v3444_v62  ;;  %vm3498_vm8 = vmor %vm3496_vm5, %vm3497_vm4  ;;  %v3461_v44 = vmul.f32 %v12512_v23, %v12477_v10  ;;  %v3739_v62 = vperm.slane %v3605_v6, 0 }
 0x4c1   :  { %v3492_v17 = vmul.f32 %v9485_v9, %v3491_v58  ;;  %v3454_v61 = vsub.f32 1.5, %v3453_v41  ;;  %vm3467_vm1 = vweird.f32 %v12512_v23  ;;  %vm3466_vm5 = vweird.f32 %v12477_v10 }
 0x4c2   :  { %v3033_v57 = vmul.f32 %v9481_v35, %v3032_v11  ;;  %3567 = vrot.lane.b32.xlu1 %v3536_v40, %s9808_s30  ;;  %v3462_v63 = vmul.f32 %v12512_v23, %v3461_v44  ;;  %vm3468_vm6 = vmor %vm3466_vm5, %vm3467_vm1  ;;  %v8920_v41 = vpack.i.bf16 %v11837_v39, %v11845_v14 }
 0x4c3   :  { %v3493_v34 = vmul.f32 0.5, %v3492_v17 }
 0x4c4   :  { %v3037_v29 = vsel %vm3036_vm3, %v9481_v35, %v3033_v57  ;;  %v3562_v35 = vpop.permute.xlu1 %3561  ;;  %v3449_v57 = vsel %vm3448_vm10, %v12448_v49, %v3445_v56 }
 0x4c5   :  { %v12505_v47 = vmul.f32 %v12315_v13, %v3037_v29  ;;  %v3564_v25 = vpop.permute.xlu0 %3563  ;;  %v3494_v24 = vsub.f32 1.5, %v3493_v34  ;;  %v3355_v13 = vmax.f32 %v3341_v18, 0.0  ;;  %v3603_v30 = vsub.f32 %v12363_v12, %v3562_v35 }
 0x4c6   :  { %v3604_v36 = vsub.f32 %v12363_v12, %v3564_v25  ;;  %v12537_v17 = vmul.f32 %v12010_v45, %v3449_v57  ;;  %v3463_v29 = vmul.f32 0.5, %v3462_v63 }
 0x4c7   :  { %v3064_v38 = vmul.f32 %v12505_v47, %v12414_v1  ;;  %v3495_v0 = vmul.f32 %v9485_v9, %v3494_v24  ;;  %v3369_v1 = vadd.f32 1e-05, %v3355_v13  ;;  %v3737_v58 = vperm.slane %v3603_v30, 0 }
 0x4c8   :  { %v3738_v7 = vperm.slane %v3604_v36, 0  ;;  %v3540_v18 = vmul.f32 %v12537_v17, %v12235_v51  ;;  %v3464_v24 = vsub.f32 1.5, %v3463_v29  ;;  %v3682_v29 = vperm.slane %v12093_v32, 0 }
 0x4c9   :  { %3068 = vrot.lane.b32.xlu0 %v3064_v38, %s9808_s30  ;;  %v3499_v11 = vsel %vm3498_vm8, %v9485_v9, %v3495_v0  ;;  %9488 = vrsqrt.f32 %v3369_v1  ;;  %vm3506_vm3 = vweird.f32 %v3369_v1 }
 0x4ca   :  { %v12524_v4 = vmul.f32 %v12010_v45, %v3499_v11  ;;  %3753 = vrot.lane.b32.xlu1 %v3738_v7, %s9806_s20  ;;  %v3465_v51 = vmul.f32 %v12512_v23, %v3464_v24 }
 0x4cc   :  { %v12529_v16 = vmul.f32 %v12524_v4, %v12433_v26  ;;  %v3455_v26 = vmul.f32 %v12482_v8, %v3454_v61  ;;  %v3574_v25 = vpop.permute.xlu2 %3573  ;;  %v3469_v11 = vsel %vm3468_vm6, %v12512_v23, %v3465_v51 }
 0x4cd   :  { %v3609_v3 = vsub.f32 %v12363_v12, %v3574_v25  ;;  %v12572_v10 = vmul.f32 %v12010_v45, %v3469_v11 }
 0x4ce   :  { %v3459_v50 = vsel %vm3458_vm15, %v12482_v8, %v3455_v26 }
 0x4cf   :  { %v9489_v9 = vpop.eup %9488  ;;  %v12551_v0 = vmul.f32 %v12010_v45, %v3459_v50  ;;  %v3743_v56 = vperm.slane %v3609_v3, 0  ;;  %v3542_v7 = vmul.f32 %v12572_v10, %v12395_v15  ;;  %v3686_v50 = vperm.slane %v12122_v2, 0  ;;  %v8715_v2 = vld [vmem:[%s14865_s7 + $0x88] sm:$0xff] }
 0x4d0   :  { %v3501_v48 = vmul.f32 %v9489_v9, %v3369_v1  ;;  %vm3507_vm0 = vweird.f32 %v9489_v9  ;;  %4194 = vmatpush.bf16.msra.mxu3 %v8715_v2  ;;  %v15241_v2 = vld [vmem:[#allocation28_spill] sm:$0xff] }
 0x4d1   :  { %3751 = vrot.lane.b32.xlu0 %v3737_v58, %s9806_s20  ;;  %v3572_v49 = vpop.permute.xlu1 %3571  ;;  %vm3508_vm4 = vmor %vm3506_vm3, %vm3507_vm0  ;;  %v3541_v44 = vmul.f32 %v12551_v0, %v12293_v37  ;;  %v3685_v37 = vperm.slane %v12063_v33, 0  ;;  %v8288_v33 = vld [vmem:[%s14864_s4 + $0x10] sm:$0xff] }
 0x4d2   :  { %v3608_v34 = vsub.f32 %v12363_v12, %v3572_v49  ;;  %v3502_v40 = vmul.f32 %v9489_v9, %v3501_v48  ;;  %3755 = vrot.lane.b32.xlu1 %v3739_v62, %s9806_s20  ;;  %v3681_v48 = vperm.slane %v12016_v5, 0 }
 0x4d3   :  { %v3703_v23 = vmul.f32 %v3685_v37, %v11914_v53  ;;  %v3704_v59 = vmul.f32 %v3685_v37, %v11928_v19  ;;  %v15235_v37 = vld [vmem:[#allocation23_spill] sm:$0xff] }
 0x4d4   :  { %v3742_v38 = vperm.slane %v3608_v34, 0  ;;  %v3503_v35 = vmul.f32 0.5, %v3502_v40  ;;  %v3697_v34 = vmul.f32 %v3682_v29, %v11862_v55  ;;  %v3698_v40 = vmul.f32 %v3682_v29, %v11829_v28  ;;  %v15238_v29 = vld [vmem:[#allocation26_spill] sm:$0xff] }
 0x4d5   :  { %v3695_v62 = vmul.f32 %v3681_v48, %v11845_v14 }
 0x4d6   :  { %3761 = vrot.lane.b32.xlu2 %v3742_v38, %s9806_s20  ;;  %v3504_v13 = vsub.f32 1.5, %v3503_v35 }
 0x4d8   :  { %v3505_v8 = vmul.f32 %v9489_v9, %v3504_v13 }
 0x4d9   :  { %3575 = vrot.lane.b32.xlu0 %v3540_v18, %s9808_s30  ;;  %v3696_v18 = vmul.f32 %v3681_v48, %v11837_v39  ;;  %v3687_v48 = vperm.slane %v15238_v29, 0 }
 0x4da   :  { %v3509_v36 = vsel %vm3508_vm4, %v9489_v9, %v3505_v8  ;;  %3763 = vrot.lane.b32.xlu1 %v3743_v56, %s9806_s20  ;;  %v15234_v56 = vld [vmem:[#allocation27_spill] sm:$0xff] }
 0x4db   :  { %v12557_v30 = vmul.f32 %v12010_v45, %v3509_v36  ;;  %v8289_v45 = vld [vmem:[%s14864_s4 + $0x18] sm:$0xff]  ;;  %v3705_v36 = vmul.f32 %v3686_v50, %v11989_v60 }
 0x4dd   :  { %v12567_v1 = vmul.f32 %v12557_v30, %v12480_v43 }
 0x4de   :  { %8921 = vrot.lane.b32.xlu2 %v8920_v41, %s9808_s30  ;;  %v3706_v41 = vmul.f32 %v3686_v50, %v15234_v56 }
 0x4e1   :  { %3577 = vrot.lane.b32.xlu0 %v3541_v44, %s9808_s30 }
 0x4e2   :  { %3579 = vrot.lane.b32.xlu1 %v3542_v7, %s9808_s30 }
 0x4ff   :  { %v3760_v43 = vpop.permute.xlu2 %3759 }
 0x500   :  { %v3801_v58 = vadd.f32 %v3760_v43, %v3703_v23  ;;  %v3802_v57 = vadd.f32 %v3760_v43, %v3704_v59  ;;  %v3683_v23 = vperm.slane %v15235_v37, 0  ;;  %v15243_v37 = vld [vmem:[#allocation18_spill] sm:$0xff] }
 0x502   :  { %v8935_v61 = vpack.i.bf16 %v3802_v57, %v3801_v58 }
 0x504   :  { %8936 = vrot.lane.b32.xlu1 %v8935_v61, %s9806_s20  ;;  %v8930_v61 = vpack.i.bf16 %v11928_v19, %v11914_v53 }
 0x52c   :  { %v3071_v63 = vpop.permute.xlu1 %3070 }
 0x52d   :  { %v3075_v15 = vsub.f32 %v8289_v45, %v3071_v63  ;;  %v15236_v45 = vld [vmem:[#allocation21_spill] sm:$0xff] }
 0x52e   :  { %v3699_v63 = vmul.f32 %v3683_v23, %v15236_v45 }
 0x52f   :  { %3649 = vrot.lane.b32.xlu0 %v3075_v15, %s9806_s20  ;;  %v15237_v15 = vld [vmem:[#allocation36_spill] sm:$0xff] }
 0x530   :  { %v3762_v51 = vpop.permute.xlu2 %3761 }
 0x531   :  { %v3803_v44 = vadd.f32 %v3762_v51, %v3705_v36  ;;  %v3804_v11 = vadd.f32 %v3762_v51, %v3706_v41  ;;  %v8955_v51 = vpack.i.bf16 %v15237_v15, %v15236_v45 }
 0x533   :  { %v8960_v58 = vpack.i.bf16 %v3804_v11, %v3803_v44  ;;  %v15242_v44 = vld [vmem:[#allocation35_spill] sm:$0xff] }
 0x534   :  { %v3568_v9 = vpop.permute.xlu1 %3567  ;;  %v8975_v11 = vpack.i.bf16 %v15242_v44, %v15241_v2 }
 0x535   :  { %v3606_v49 = vsub.f32 %v12363_v12, %v3568_v9  ;;  %v8721_v9 = vld [vmem:[%s14865_s7 + $0xb8] sm:$0xff] }
 0x536   :  { %4341 = vmatpush.bf16.msrb.mxu1 %v8721_v9  ;;  %v8718_v9 = vld [vmem:[%s14865_s7 + $0xa0] sm:$0xff] }
 0x537   :  { %v3740_v25 = vperm.slane %v3606_v49, 0 }
 0x53b   :  { %v3069_v6 = vpop.permute.xlu0 %3068 }
 0x53c   :  { %v3074_v26 = vsub.f32 %v8288_v33, %v3069_v6  ;;  %v3754_v38 = vpop.permute.xlu1 %3753  ;;  %v3700_v33 = vmul.f32 %v3683_v23, %v15237_v15  ;;  %v15244_v23 = vld [vmem:[#allocation16_spill] sm:$0xff] }
 0x53d   :  { %v3795_v32 = vadd.f32 %v3754_v38, %v3697_v34  ;;  %v3796_v35 = vadd.f32 %v3754_v38, %v3698_v40  ;;  %v8940_v34 = vpack.i.bf16 %v11829_v28, %v11862_v55  ;;  %v15240_v38 = vld [vmem:[#allocation30_spill] sm:$0xff] }
 0x53e   :  { %3647 = vrot.lane.b32.xlu2 %v3074_v26, %s9806_s20  ;;  %v3708_v50 = vmul.f32 %v3687_v48, %v15240_v38 }
 0x53f   :  { %v8945_v5 = vpack.i.bf16 %v3796_v35, %v3795_v32 }
 0x541   :  { %8946 = vrot.lane.b32.xlu1 %v8945_v5, %s9806_s20  ;;  %v8950_v5 = vpack.i.bf16 %v15234_v56, %v11989_v60 }
 0x543   :  { %v3752_v24 = vpop.permute.xlu0 %3751 }
 0x544   :  { %v3793_v13 = vadd.f32 %v3752_v24, %v3695_v62  ;;  %v3794_v3 = vadd.f32 %v3752_v24, %v3696_v18  ;;  %v3756_v43 = vpop.permute.xlu1 %3755  ;;  %v15239_v18 = vld [vmem:[#allocation29_spill] sm:$0xff] }
 0x545   :  { %v3797_v6 = vadd.f32 %v3756_v43, %v3699_v63  ;;  %v3798_v26 = vadd.f32 %v3756_v43, %v3700_v33  ;;  %v8970_v41 = vpack.i.bf16 %v15240_v38, %v15239_v18  ;;  %v8922_v43 = vpop.permute.xlu2 %8921  ;;  %v3684_v63 = vperm.slane %v12493_v42, 0  ;;  %v8710_v33 = vld [vmem:[%s14865_s7 + $0x60] sm:$0xff]  ;;  %v8717_v42 = vld [vmem:[%s14865_s7 + $0x98] sm:$0xff] }
 0x546   :  { %v8925_v8 = vpack.i.bf16 %v3794_v3, %v3793_v13  ;;  %3757 = vrot.lane.b32.xlu2 %v3740_v25, %s9806_s20  ;;  %v3707_v25 = vmul.f32 %v3687_v48, %v15239_v18 }
 0x547   :  { %v8965_v49 = vpack.i.bf16 %v3798_v26, %v3797_v6  ;;  %v3701_v6 = vmul.f32 %v3684_v63, %v15241_v2  ;;  %v3702_v26 = vmul.f32 %v3684_v63, %v15242_v44 }
 0x548   :  { %8926 = vrot.lane.b32.xlu0 %v8925_v8, %s9806_s20 }
 0x549   :  { %8961 = vrot.lane.b32.xlu1 %v8960_v58, %s9806_s20  ;;  %v8712_v58 = vld [vmem:[%s14865_s7 + $0x70] sm:$0xff] }
 0x54b   :  { %v3576_v7 = vpop.permute.xlu0 %3575 }
 0x54c   :  { %v3610_v59 = vsub.f32 %v12363_v12, %v3576_v7  ;;  %v3764_v40 = vpop.permute.xlu1 %3763  ;;  %v8720_v7 = vld [vmem:[%s14865_s7 + $0xb0] sm:$0xff] }
 0x54d   :  { %v3805_v24 = vadd.f32 %v3764_v40, %v3707_v25  ;;  %v3806_v32 = vadd.f32 %v3764_v40, %v3708_v50  ;;  %4342 = vmatpush.bf16.msrb.mxu1 %v8720_v7  ;;  %v3688_v40 = vperm.slane %v12537_v17, 0 }
 0x54e   :  { %v3744_v57 = vperm.slane %v3610_v59, 0  ;;  %v8990_v59 = vpack.i.bf16 %v15244_v23, %v15243_v37 }
 0x54f   :  { %v8980_v13 = vpack.i.bf16 %v3806_v32, %v3805_v24  ;;  %v3709_v25 = vmul.f32 %v3688_v40, %v15243_v37  ;;  %v3710_v50 = vmul.f32 %v3688_v40, %v15244_v23 }
 0x550   :  { %8931 = vrot.lane.b32.xlu0 %v8930_v61, %s9808_s30  ;;  %3765 = vrot.lane.b32.xlu2 %v3744_v57, %s9806_s20  ;;  %v8711_v57 = vld [vmem:[%s14865_s7 + $0x68] sm:$0xff] }
 0x551   :  { %8966 = vrot.lane.b32.xlu1 %v8965_v49, %s9806_s20  ;;  %v8719_v61 = vld [vmem:[%s14865_s7 + $0xa8] sm:$0xff] }
 0x552   :  { %4343 = vmatpush.bf16.msrb.mxu1 %v8719_v61 }
 0x553   :  { %v3578_v62 = vpop.permute.xlu0 %3577 }
 0x554   :  { %v3611_v35 = vsub.f32 %v12363_v12, %v3578_v62  ;;  %v3580_v8 = vpop.permute.xlu1 %3579  ;;  %v8716_v62 = vld [vmem:[%s14865_s7 + $0x90] sm:$0xff] }
 0x556   :  { %v3745_v3 = vperm.slane %v3611_v35, 0  ;;  %4344 = vmatpush.bf16.msrb.mxu1 %v8718_v9 }
 0x558   :  { %8941 = vrot.lane.b32.xlu0 %v8940_v34, %s9808_s30  ;;  %3581 = vrot.lane.b32.xlu2 %v12438_v21, %s9808_s30  ;;  %v3612_v21 = vsub.f32 %v12363_v12, %v3580_v8  ;;  %v15245_v8 = vld [vmem:[#allocation17_spill] sm:$0xff] }
 0x559   :  { %8981 = vrot.lane.b32.xlu1 %v8980_v13, %s9806_s20 }
 0x55a   :  { %v3746_v36 = vperm.slane %v3612_v21, 0  ;;  %4345 = vmatpush.bf16.msrb.mxu1 %v8717_v42  ;;  %v15246_v21 = vld [vmem:[#allocation39_spill] sm:$0xff] }
 0x55e   :  { %4346 = vmatpush.bf16.msrb.mxu1 %v8716_v62 }
 0x560   :  { %8951 = vrot.lane.b32.xlu0 %v8950_v5, %s9808_s30  ;;  %3767 = vrot.lane.b32.xlu2 %v3745_v3, %s9806_s20 }
 0x568   :  { %8956 = vrot.lane.b32.xlu0 %v8955_v51, %s9808_s30  ;;  %3583 = vrot.lane.b32.xlu2 %v12497_v31, %s9808_s30  ;;  %v8714_v31 = vld [vmem:[%s14865_s7 + $0x80] sm:$0xff] }
 0x569   :  { %4195 = vmatpush.bf16.msra.mxu3 %v8714_v31  ;;  %v3618_v31 = vmul.f32 %v12465_v20, %v11837_v39 }
 0x570   :  { %8971 = vrot.lane.b32.xlu0 %v8970_v41, %s9808_s30  ;;  %3769 = vrot.lane.b32.xlu2 %v3746_v36, %s9806_s20  ;;  %v9000_v36 = vpack.i.bf16 %v15246_v21, %v15245_v8  ;;  %v3689_v41 = vperm.slane %v12551_v0, 0  ;;  %v8923_v0 = vunpack.i.l.bf16 %v8922_v43 }
 0x578   :  { %8976 = vrot.lane.b32.xlu0 %v8975_v11, %s9808_s30  ;;  %3585 = vrot.lane.b32.xlu2 %v12529_v16, %s9808_s30  ;;  %v8713_v16 = vld [vmem:[%s14865_s7 + $0x78] sm:$0xff]  ;;  %v3617_v11 = vmul.f32 %v12505_v47, %v11845_v14  ;;  %v8937_v14 = vpop.permute.xlu1 %8936 }
 0x579   :  { %4196 = vmatpush.bf16.msra.mxu3 %v8713_v16  ;;  %v3711_v16 = vmul.f32 %v3689_v41, %v15245_v8 }
 0x57d   :  { %4197 = vmatpush.bf16.msra.mxu3 %v8712_v58  ;;  %v3712_v58 = vmul.f32 %v3689_v41, %v15246_v21  ;;  %v8939_v41 = vunpack.i.h.bf16 %v8937_v14 }
 0x580   :  { %8991 = vrot.lane.b32.xlu0 %v8990_v59, %s9808_s30 }
 0x581   :  { %4198 = vmatpush.bf16.msra.mxu3 %v8711_v57  ;;  %v8924_v57 = vunpack.i.h.bf16 %v8922_v43 }
 0x585   :  { %4199 = vmatpush.bf16.msra.mxu3 %v8710_v33 }
 0x588   :  { %3587 = vrot.lane.b32.xlu0 %v12567_v1, %s9808_s30 }
 0x598   :  { %v12670_v1 = vpop.permute.xlu2 %3647 }
 0x599   :  { %v3653_v7 = vadd.f32 %v12670_v1, %v3617_v11  ;;  %v8938_v11 = vunpack.i.l.bf16 %v8937_v14  ;;  %v3619_v14 = vmul.f32 %v12505_v47, %v11862_v55 }
 0x5a0   :  { %v3758_v29 = vpop.permute.xlu2 %3757 }
 0x5a1   :  { %v3799_v48 = vadd.f32 %v3758_v29, %v3701_v6  ;;  %v3800_v49 = vadd.f32 %v3758_v29, %v3702_v26  ;;  %v12692_v3 = vpop.permute.xlu0 %3649  ;;  %v4045_v26 = vsel %vm278_vm2, %v8923_v0, %v3653_v7  ;;  %v15250_v7 = vld [vmem:[#allocation31_spill] sm:$0xff]  ;;  %v3690_v0 = vperm.slane %v12572_v10, 0 }
 0x5a2   :  { %v3654_v59 = vadd.f32 %v12692_v3, %v3618_v31  ;;  %v15249_v31 = vld [vmem:[#allocation22_spill] sm:$0xff] }
 0x5a3   :  { %v8985_v34 = vpack.i.bf16 %v3800_v49, %v3799_v48  ;;  %v15247_v49 = vld [vmem:[#allocation38_spill] sm:$0xff] }
 0x5a4   :  { %v4046_v29 = vsel %vm278_vm2, %v8924_v57, %v3654_v59  ;;  %v9020_v59 = vpack.i.bf16 %v15250_v7, %v15249_v31  ;;  %v3713_v10 = vmul.f32 %v3690_v0, %v15247_v49 }
 0x5a5   :  { %8986 = vrot.lane.b32.xlu1 %v8985_v34, %s9806_s20  ;;  %v15248_v34 = vld [vmem:[#allocation20_spill] sm:$0xff] }
 0x5a6   :  { %v9010_v40 = vpack.i.bf16 %v15248_v34, %v15247_v49 }
 0x5aa   :  { %v3766_v24 = vpop.permute.xlu2 %3765 }
 0x5ab   :  { %v3807_v32 = vadd.f32 %v3766_v24, %v3709_v25  ;;  %v3808_v35 = vadd.f32 %v3766_v24, %v3710_v50  ;;  %v3625_v25 = vmul.f32 %v12505_v47, %v11914_v53  ;;  %v3626_v50 = vmul.f32 %v12465_v20, %v11928_v19 }
 0x5ad   :  { %v8995_v13 = vpack.i.bf16 %v3808_v35, %v3807_v32  ;;  %v3661_v24 = vadd.f32 %v12670_v1, %v3625_v25 }
 0x5af   :  { %8996 = vrot.lane.b32.xlu1 %v8995_v13, %s9806_s20  ;;  %v3662_v13 = vadd.f32 %v12692_v3, %v3626_v50 }
 0x5b2   :  { %v3582_v5 = vpop.permute.xlu2 %3581 }
 0x5b3   :  { %v3613_v17 = vsub.f32 %v12363_v12, %v3582_v5 }
 0x5b5   :  { %v3747_v51 = vperm.slane %v3613_v17, 0 }
 0x5b7   :  { %9001 = vrot.lane.b32.xlu1 %v9000_v36, %s9808_s30  ;;  %3771 = vrot.lane.b32.xlu2 %v3747_v51, %s9806_s20  ;;  %v8947_v51 = vpop.permute.xlu1 %8946 }
 0x5b8   :  { %v8948_v25 = vunpack.i.l.bf16 %v8947_v51 }
 0x5ba   :  { %v8927_v61 = vpop.permute.xlu0 %8926  ;;  %v3768_v63 = vpop.permute.xlu2 %3767 }
 0x5bb   :  { %v8929_v33 = vunpack.i.h.bf16 %v8927_v61  ;;  %v8928_v9 = vunpack.i.l.bf16 %v8927_v61  ;;  %v3809_v39 = vadd.f32 %v3768_v63, %v3711_v16  ;;  %v3810_v6 = vadd.f32 %v3768_v63, %v3712_v58 }
 0x5bd   :  { %v4074_v42 = vsel %vm1471_vm12, %v4046_v29, %v8929_v33  ;;  %v4073_v48 = vsel %vm1471_vm12, %v4045_v26, %v8928_v9  ;;  %v9005_v62 = vpack.i.bf16 %v3810_v6, %v3809_v39  ;;  %v3620_v9 = vmul.f32 %v12465_v20, %v11829_v28 }
 0x5be   :  { %v4116_v43 = vpack.c.bf16 %v4074_v42, %v4073_v48  ;;  %v3714_v39 = vmul.f32 %v3690_v0, %v15248_v34  ;;  %v3655_v6 = vadd.f32 %v12670_v1, %v3619_v14 }
 0x5bf   :  { %9011 = vrot.lane.b32.xlu1 %v9010_v40, %s9808_s30  ;;  %9006 = vrot.lane.b32.xlu2 %v9005_v62, %s9806_s20  ;;  %v3656_v26 = vadd.f32 %v12692_v3, %v3620_v9 }
 0x5c0   :  { %8329 = vmatmul.msk.bf16.vlgmr.msra.gmra.mxu3 %vm1567_vm13, %v4116_v43  ;;  %v8949_v43 = vunpack.i.h.bf16 %v8947_v51  ;;  %v3627_v51 = vmul.f32 %v12505_v47, %v11989_v60 }
 0x5c2   :  { %v8932_v32 = vpop.permute.xlu0 %8931  ;;  %v3584_v35 = vpop.permute.xlu2 %3583 }
 0x5c3   :  { %v8934_v5 = vunpack.i.h.bf16 %v8932_v32  ;;  %v8933_v17 = vunpack.i.l.bf16 %v8932_v32  ;;  %v3614_v36 = vsub.f32 %v12363_v12, %v3584_v35  ;;  %v15251_v32 = vld [vmem:[#allocation41_spill] sm:$0xff]  ;;  %v15252_v35 = vld [vmem:[#allocation44_spill] sm:$0xff] }
 0x5c5   :  { %v4054_v16 = vsel %vm278_vm2, %v8934_v5, %v3662_v13  ;;  %v4053_v58 = vsel %vm278_vm2, %v8933_v17, %v3661_v24  ;;  %v3748_v57 = vperm.slane %v3614_v36, 0  ;;  %v8962_v24 = vpop.permute.xlu1 %8961  ;;  %v9030_v13 = vpack.i.bf16 %v15252_v35, %v15251_v32 }
 0x5c6   :  { %v4082_v61 = vsel %vm1471_vm12, %v4054_v16, %v8939_v41  ;;  %v4081_v63 = vsel %vm1471_vm12, %v4053_v58, %v8938_v11  ;;  %v3628_v11 = vmul.f32 %v12465_v20, %v15234_v56  ;;  %v8964_v14 = vunpack.i.h.bf16 %v8962_v24 }
 0x5c7   :  { %v12731_v33 = vpack.c.bf16 %v4082_v61, %v4081_v63  ;;  %9021 = vrot.lane.b32.xlu1 %v9020_v59, %s9808_s30  ;;  %3773 = vrot.lane.b32.xlu0 %v3748_v57, %s9806_s20  ;;  %v3663_v59 = vadd.f32 %v12670_v1, %v3627_v51  ;;  %v8963_v9 = vunpack.i.l.bf16 %v8962_v24  ;;  %v3630_v51 = vmul.f32 %v12465_v20, %v15240_v38 }
 0x5c8   :  { %v3664_v57 = vadd.f32 %v12692_v3, %v3628_v11 }
 0x5c9   :  { %8375 = vmatmul.msk.bf16.vlgmr.msrb.gmra.mxu1 %vm1567_vm13, %v12731_v33 }
 0x5ca   :  { %v8942_v29 = vpop.permute.xlu0 %8941  ;;  %v3770_v42 = vpop.permute.xlu2 %3769 }
 0x5cb   :  { %v8944_v48 = vunpack.i.h.bf16 %v8942_v29  ;;  %v8943_v40 = vunpack.i.l.bf16 %v8942_v29  ;;  %v3811_v62 = vadd.f32 %v3770_v42, %v3713_v10  ;;  %v3812_v55 = vadd.f32 %v3770_v42, %v3714_v39 }
 0x5cd   :  { %v4048_v28 = vsel %vm278_vm2, %v8944_v48, %v3656_v26  ;;  %v4047_v50 = vsel %vm278_vm2, %v8943_v40, %v3655_v6  ;;  %v9015_v5 = vpack.i.bf16 %v3812_v55, %v3811_v62  ;;  %v8967_v42 = vpop.permute.xlu1 %8966  ;;  %v3622_v40 = vmul.f32 %v12465_v20, %v15237_v15 }
 0x5ce   :  { %v4075_v17 = vsel %vm1471_vm12, %v4047_v50, %v8948_v25  ;;  %v4076_v36 = vsel %vm1471_vm12, %v4048_v28, %v8949_v43  ;;  %v8969_v50 = vunpack.i.h.bf16 %v8967_v42  ;;  %v8968_v24 = vunpack.i.l.bf16 %v8967_v42  ;;  %v9803_v42 = vld [vmem:[%s14862_s6 + $0x1] sm:$0x1] }
 0x5cf   :  { %9031 = vrot.lane.b32.xlu1 %v9030_v13, %s9808_s30  ;;  %9016 = vrot.lane.b32.xlu2 %v9015_v5, %s9806_s20  ;;  %v4117_v41 = vpack.c.bf16 %v4076_v36, %v4075_v17  ;;  %v3658_v43 = vadd.f32 %v12692_v3, %v3622_v40  ;;  %v3629_v15 = vmul.f32 %v12505_v47, %v15239_v18 }
 0x5d1   :  { %8330 = vmatmul.msk.bf16.gmra.mxu3 %vm1567_vm13, %v4117_v41 }
 0x5d2   :  { %v8952_v16 = vpop.permute.xlu0 %8951  ;;  %v3586_v58 = vpop.permute.xlu2 %3585 }
 0x5d3   :  { %v8954_v0 = vunpack.i.h.bf16 %v8952_v16  ;;  %v8953_v61 = vunpack.i.l.bf16 %v8952_v16  ;;  %v3615_v63 = vsub.f32 %v12363_v12, %v3586_v58  ;;  %v3621_v12 = vmul.f32 %v12505_v47, %v15236_v45 }
 0x5d4   :  { %v3666_v16 = vadd.f32 %v12692_v3, %v3630_v51 }
 0x5d5   :  { %v4056_v10 = vsel %vm278_vm2, %v8954_v0, %v3664_v57  ;;  %v4055_v39 = vsel %vm278_vm2, %v8953_v61, %v3663_v59  ;;  %v3749_v6 = vperm.slane %v3615_v63, 0  ;;  %v3657_v55 = vadd.f32 %v12670_v1, %v3621_v12  ;;  %v8982_v41 = vpop.permute.xlu1 %8981 }
 0x5d6   :  { %v4083_v26 = vsel %vm1471_vm12, %v4055_v39, %v8963_v9  ;;  %v4084_v29 = vsel %vm1471_vm12, %v4056_v10, %v8964_v14  ;;  %v3665_v59 = vadd.f32 %v12670_v1, %v3629_v15  ;;  %v8984_v0 = vunpack.i.h.bf16 %v8982_v41 }
 0x5d7   :  { %3775 = vrot.lane.b32.xlu0 %v3749_v6, %s9806_s20  ;;  %v12766_v48 = vpack.c.bf16 %v4084_v29, %v4083_v26  ;;  %v8983_v61 = vunpack.i.l.bf16 %v8982_v41 }
 0x5d9   :  { %8376 = vmatmul.msk.bf16.gmra.mxu1 %vm1567_vm13, %v12766_v48 }
 0x5da   :  { %v8957_v62 = vpop.permute.xlu0 %8956 }
 0x5db   :  { %v8959_v25 = vunpack.i.h.bf16 %v8957_v62  ;;  %v8958_v28 = vunpack.i.l.bf16 %v8957_v62  ;;  %v9040_v62 = vpack.i.bf16 %v12349_v22, %v12346_v27 }
 0x5dd   :  { %v4050_v13 = vsel %vm278_vm2, %v8959_v25, %v3658_v43  ;;  %v4049_v5 = vsel %vm278_vm2, %v8958_v28, %v3657_v55  ;;  %v3691_v55 = vperm.slane %v12431_v52, 0 }
 0x5de   :  { %v4077_v17 = vsel %vm1471_vm12, %v4049_v5, %v8968_v24  ;;  %v4078_v45 = vsel %vm1471_vm12, %v4050_v13, %v8969_v50  ;;  %v3623_v5 = vmul.f32 %v12505_v47, %v15241_v2 }
 0x5df   :  { %v4118_v36 = vpack.c.bf16 %v4078_v45, %v4077_v17  ;;  %v3715_v43 = vmul.f32 %v3691_v55, %v15249_v31  ;;  %v3716_v25 = vmul.f32 %v3691_v55, %v15250_v7  ;;  %v3624_v17 = vmul.f32 %v12465_v20, %v15242_v44 }
 0x5e0   :  { %v3659_v52 = vadd.f32 %v12670_v1, %v3623_v5 }
 0x5e1   :  { %8331 = vmatmul.msk.bf16.gmra.mxu3 %vm1567_vm13, %v4118_v36  ;;  %v3660_v41 = vadd.f32 %v12692_v3, %v3624_v17 }
 0x5e2   :  { %v8972_v11 = vpop.permute.xlu0 %8971 }
 0x5e3   :  { %v8974_v58 = vunpack.i.h.bf16 %v8972_v11  ;;  %v8973_v57 = vunpack.i.l.bf16 %v8972_v11 }
 0x5e5   :  { %v4058_v63 = vsel %vm278_vm2, %v8974_v58, %v3666_v16  ;;  %v4057_v14 = vsel %vm278_vm2, %v8973_v57, %v3665_v59  ;;  %v3631_v57 = vmul.f32 %v12505_v47, %v15243_v37 }
 0x5e6   :  { %v4085_v9 = vsel %vm1471_vm12, %v4057_v14, %v8983_v61  ;;  %v4086_v10 = vsel %vm1471_vm12, %v4058_v63, %v8984_v0  ;;  %v3632_v0 = vmul.f32 %v12465_v20, %v15244_v23 }
 0x5e7   :  { %v12791_v39 = vpack.c.bf16 %v4086_v10, %v4085_v9  ;;  %v3667_v14 = vadd.f32 %v12670_v1, %v3631_v57 }
 0x5e8   :  { %v3668_v9 = vadd.f32 %v12692_v3, %v3632_v0 }
 0x5e9   :  { %8377 = vmatmul.msk.bf16.gmra.mxu1 %vm1567_vm13, %v12791_v39 }
 0x5ea   :  { %v8977_v6 = vpop.permute.xlu0 %8976 }
 0x5eb   :  { %v8979_v45 = vunpack.i.h.bf16 %v8977_v6  ;;  %v8978_v36 = vunpack.i.l.bf16 %v8977_v6 }
 0x5ed   :  { %v4052_v59 = vsel %vm278_vm2, %v8979_v45, %v3660_v41  ;;  %v4051_v16 = vsel %vm278_vm2, %v8978_v36, %v3659_v52 }
 0x5f2   :  { %v8992_v26 = vpop.permute.xlu0 %8991 }
 0x5f3   :  { %v8994_v61 = vunpack.i.h.bf16 %v8992_v26  ;;  %v8993_v63 = vunpack.i.l.bf16 %v8992_v26 }
 0x5fa   :  { %v3588_v29 = vpop.permute.xlu0 %3587 }
 0x5fb   :  { %v3616_v12 = vsub.f32 %v9803_v42, %v3588_v29  ;;  %v4060_v42 = vsel %vm278_vm2, %v8994_v61, %v3668_v9  ;;  %v3692_v9 = vperm.slane %v12487_v46, 0  ;;  %v12868_v46 = vld [vmem:[%s14866_s8 + $0x1] ss:$0 sm:$0xff] }
 0x5fd   :  { %v3750_v40 = vperm.slane %v3616_v12, 0  ;;  %v4059_v12 = vsel %vm278_vm2, %v8993_v63, %v3667_v14 }
 0x5ff   :  { %3777 = vrot.lane.b32.xlu0 %v3750_v40, %s9806_s20 }
 0x607   :  { %9041 = vrot.lane.b32.xlu0 %v9040_v62, %s9808_s30 }
 0x611   :  { %v3772_v28 = vpop.permute.xlu2 %3771 }
 0x612   :  { %v3813_v50 = vadd.f32 %v3772_v28, %v3715_v43  ;;  %v3814_v24 = vadd.f32 %v3772_v28, %v3716_v25  ;;  %v3633_v43 = vmul.f32 %v12505_v47, %v15245_v8  ;;  %v3634_v25 = vmul.f32 %v12465_v20, %v15246_v21 }
 0x614   :  { %v9025_v13 = vpack.i.bf16 %v3814_v24, %v3813_v50  ;;  %v3669_v50 = vadd.f32 %v12670_v1, %v3633_v43  ;;  %v3670_v5 = vadd.f32 %v12692_v3, %v3634_v25 }
 0x616   :  { %9026 = vrot.lane.b32.xlu2 %v9025_v13, %s9806_s20 }
 0x617   :  { %v8987_v15 = vpop.permute.xlu1 %8986 }
 0x618   :  { %v8989_v51 = vunpack.i.h.bf16 %v8987_v15  ;;  %v8988_v11 = vunpack.i.l.bf16 %v8987_v15 }
 0x619   :  { %v9007_v26 = vpop.permute.xlu2 %9006 }
 0x61a   :  { %v4079_v2 = vsel %vm1471_vm12, %v4051_v16, %v8988_v11  ;;  %v4080_v58 = vsel %vm1471_vm12, %v4052_v59, %v8989_v51  ;;  %v9009_v17 = vunpack.i.h.bf16 %v9007_v26  ;;  %v9008_v45 = vunpack.i.l.bf16 %v9007_v26 }
 0x61b   :  { %v4119_v44 = vpack.c.bf16 %v4080_v58, %v4079_v2  ;;  %v3635_v59 = vmul.f32 %v12505_v47, %v15247_v49  ;;  %v3636_v16 = vmul.f32 %v12465_v20, %v15248_v34 }
 0x61d   :  { %8332 = vmatmul.msk.bf16.gmra.mxu3 %vm1567_vm13, %v4119_v44  ;;  %v3671_v58 = vadd.f32 %v12670_v1, %v3635_v59 }
 0x621   :  { %v8997_v10 = vpop.permute.xlu1 %8996 }
 0x622   :  { %v8999_v6 = vunpack.i.h.bf16 %v8997_v10  ;;  %v8998_v29 = vunpack.i.l.bf16 %v8997_v10 }
 0x624   :  { %v4087_v40 = vsel %vm1471_vm12, %v4059_v12, %v8998_v29  ;;  %v4088_v62 = vsel %vm1471_vm12, %v4060_v42, %v8999_v6  ;;  %v3717_v42 = vmul.f32 %v3692_v9, %v15251_v32  ;;  %v3718_v12 = vmul.f32 %v3692_v9, %v15252_v35 }
 0x625   :  { %v12827_v55 = vpack.c.bf16 %v4088_v62, %v4087_v40 }
 0x627   :  { %8378 = vmatmul.msk.bf16.gmra.mxu1 %vm1567_vm13, %v12827_v55 }
 0x629   :  { %v9002_v28 = vpop.permute.xlu1 %9001  ;;  %v9017_v11 = vpop.permute.xlu2 %9016 }
 0x62a   :  { %v9004_v24 = vunpack.i.h.bf16 %v9002_v28  ;;  %v9003_v13 = vunpack.i.l.bf16 %v9002_v28  ;;  %v9019_v0 = vunpack.i.h.bf16 %v9017_v11  ;;  %v9018_v61 = vunpack.i.l.bf16 %v9017_v11 }
 0x62c   :  { %v4061_v36 = vsel %vm278_vm2, %v9003_v13, %v3669_v50  ;;  %v4062_v52 = vsel %vm278_vm2, %v9004_v24, %v3670_v5  ;;  %v15253_v50 = vld [vmem:[#allocation46_spill] sm:$0xff]  ;;  %v3693_v13 = vperm.slane %v12524_v4, 0 }
 0x62d   :  { %8333 = vmatmul.msk.bf16.gmra.mxu3 %vm1567_vm13, %v12731_v33  ;;  %v4089_v41 = vsel %vm1471_vm12, %v4061_v36, %v9008_v45  ;;  %v4090_v15 = vsel %vm1471_vm12, %v4062_v52, %v9009_v17  ;;  %v3672_v33 = vadd.f32 %v12692_v3, %v3636_v16  ;;  %v9050_v24 = vpack.i.bf16 %v15253_v50, %v12400_v54 }
 0x62e   :  { %v12843_v51 = vpack.c.bf16 %v4090_v15, %v4089_v41  ;;  %v3720_v45 = vmul.f32 %v3693_v13, %v12349_v22 }
 0x631   :  { %v9012_v2 = vpop.permute.xlu1 %9011 }
 0x632   :  { %v9014_v44 = vunpack.i.h.bf16 %v9012_v2  ;;  %v9013_v57 = vunpack.i.l.bf16 %v9012_v2 }
 0x634   :  { %v4063_v63 = vsel %vm278_vm2, %v9013_v57, %v3671_v58  ;;  %v4064_v14 = vsel %vm278_vm2, %v9014_v44, %v3672_v33 }
 0x635   :  { %v4091_v10 = vsel %vm1471_vm12, %v4063_v63, %v9018_v61  ;;  %v4092_v6 = vsel %vm1471_vm12, %v4064_v14, %v9019_v0 }
 0x636   :  { %v12856_v29 = vpack.c.bf16 %v4092_v6, %v4091_v10 }
 0x637   :  { %8379 = vmatmul.msk.bf16.gmra.mxu1 %vm1567_vm13, %v12843_v51 }
 0x639   :  { %v3774_v40 = vpop.permute.xlu0 %3773 }
 0x63a   :  { %v3815_v62 = vadd.f32 %v3774_v40, %v3717_v42  ;;  %v3816_v26 = vadd.f32 %v3774_v40, %v3718_v12 }
 0x63c   :  { %v9035_v43 = vpack.i.bf16 %v3816_v26, %v3815_v62 }
 0x63d   :  { %8334 = vmatmul.msk.bf16.gmra.mxu3 %vm1567_vm13, %v12766_v48  ;;  %v3719_v48 = vmul.f32 %v3693_v13, %v12346_v27 }
 0x63e   :  { %9036 = vrot.lane.b32.xlu2 %v9035_v43, %s9806_s20 }
 0x643   :  { %v4201_v25 = vpop.f32.mrf.mxu3 }
 0x644   :  { %v4254_v28 = vadd.f32 %v12868_v46, %v4201_v25 }
 0x646   :  { %v4348_v5 = vpop.f32.mrf.mxu1  ;;  %9051 = vrot.lane.b32.xlu2 %v9050_v24, %s9808_s30 }
 0x647   :  { %v12875_v17 = vadd.f32 %v4348_v5, %v4254_v28  ;;  %8380 = vmatmul.msk.bf16.gmra.mxu1 %vm1567_vm13, %v12856_v29 }
 0x649   :  { %v8385_v36 = vmul.f32 -1.442695, %v12875_v17  ;;  %v3776_v52 = vpop.permute.xlu0 %3775 }
 0x64a   :  { %v3817_v41 = vadd.f32 %v3776_v52, %v3719_v48  ;;  %v3818_v15 = vadd.f32 %v3776_v52, %v3720_v45 }
 0x64b   :  { %9490 = vpow2.f32 %v8385_v36  ;;  %v4203_v11 = vpop.f32.mrf.mxu3 }
 0x64c   :  { %v9045_v4 = vpack.i.bf16 %v3818_v15, %v3817_v41  ;;  %v4255_v59 = vadd.f32 %v12868_v46, %v4203_v11 }
 0x64d   :  { %8335 = vmatmul.msk.bf16.gmra.mxu3 %vm1567_vm13, %v12791_v39 }
 0x64e   :  { %v4350_v16 = vpop.f32.mrf.mxu1  ;;  %9046 = vrot.lane.b32.xlu1 %v9045_v4, %s9806_s20 }
 0x64f   :  { %v12886_v2 = vadd.f32 %v4350_v16, %v4255_v59 }
 0x651   :  { %v9491_v58 = vpop.eup %9490  ;;  %v8386_v44 = vmul.f32 -1.442695, %v12886_v2 }
 0x652   :  { %v4498_v57 = vadd.f32 1.0, %v9491_v58 }
 0x653   :  { %9492 = vpow2.f32 %v8386_v44 }
 0x654   :  { %9494 = vrcp.f32 %v4498_v57  ;;  %v4206_v33 = vpop.f32.mrf.mxu3  ;;  %v4529_v26 = vand.u32 2147483648, %v4498_v57  ;;  %v4527_v28 = vand.u32 2147483647, %v4498_v57  ;;  %vm4523_vm9 = vweird.f32 %v4498_v57 }
 0x655   :  { %v4256_v0 = vadd.f32 %v12868_v46, %v4206_v33 }
 0x656   :  { %v4353_v61 = vpop.f32.mrf.mxu1  ;;  %v4530_v36 = vor.u32 1.1754944e-38, %v4529_v26  ;;  %vm4528_vm11 = vcmp.eq.f32.partialorder %v4527_v28, 8.507059e+37  ;;  %v3638_v28 = vmul.f32 %v12465_v20, %v15250_v7 }
 0x657   :  { %v12890_v63 = vadd.f32 %v4353_v61, %v4256_v0  ;;  %v9022_v0 = vpop.permute.xlu1 %9021 }
 0x659   :  { %v9493_v14 = vpop.eup %9492  ;;  %v8387_v39 = vmul.f32 -1.442695, %v12890_v63 }
 0x65a   :  { %v9495_v9 = vpop.eup %9494  ;;  %v4499_v10 = vadd.f32 1.0, %v9493_v14 }
 0x65b   :  { %9496 = vpow2.f32 %v8387_v39  ;;  %v4519_v6 = vmul.f32 %v9495_v9, %v4498_v57  ;;  %vm4524_vm8 = vweird.f32 %v9495_v9 }
 0x65c   :  { %9498 = vrcp.f32 %v4499_v10  ;;  %v4208_v42 = vpop.f32.mrf.mxu3  ;;  %vm4525_vm10 = vmor %vm4523_vm9, %vm4524_vm8  ;;  %v4544_v16 = vand.u32 2147483648, %v4499_v10  ;;  %v4542_v57 = vand.u32 2147483647, %v4499_v10  ;;  %vm4538_vm15 = vweird.f32 %v4499_v10 }
 0x65d   :  { %v4257_v12 = vadd.f32 %v12868_v46, %v4208_v42  ;;  %8336 = vmatmul.msk.bf16.gmra.mxu3 %vm1567_vm13, %v12827_v55  ;;  %v4520_v40 = vsub.f32 1.0, %v4519_v6 }
 0x65e   :  { %v4355_v62 = vpop.f32.mrf.mxu1  ;;  %v4545_v42 = vor.u32 1.1754944e-38, %v4544_v16  ;;  %vm4543_vm1 = vcmp.eq.f32.partialorder %v4542_v57, 8.507059e+37 }
 0x65f   :  { %v12896_v43 = vadd.f32 %v4355_v62, %v4257_v12  ;;  %v4521_v25 = vmul.f32 %v9495_v9, %v4520_v40  ;;  %v9023_v62 = vunpack.i.l.bf16 %v9022_v0 }
 0x661   :  { %v9497_v24 = vpop.eup %9496  ;;  %v8388_v13 = vmul.f32 -1.442695, %v12896_v43  ;;  %v4522_v5 = vadd.f32 %v9495_v9, %v4521_v25  ;;  %v3694_v25 = vperm.slane %v12557_v30, 0  ;;  %v3674_v30 = vadd.f32 %v12692_v3, %v3638_v28 }
 0x662   :  { %v9499_v48 = vpop.eup %9498  ;;  %v12899_v45 = vadd.f32 1.0, %v9497_v24  ;;  %v9024_v24 = vunpack.i.h.bf16 %v9022_v0 }
 0x663   :  { %9500 = vpow2.f32 %v8388_v13  ;;  %v4526_v55 = vsel %vm4525_vm10, %v9495_v9, %v4522_v5  ;;  %v4534_v52 = vmul.f32 %v9499_v48, %v4499_v10  ;;  %vm4539_vm14 = vweird.f32 %v9499_v48  ;;  %v8723_v5 = vld [vmem:[%s14867_s9 + $0x18] sm:$0xff] }
 0x664   :  { %9502 = vrcp.f32 %v12899_v45  ;;  %v4211_v41 = vpop.f32.mrf.mxu3  ;;  %v4531_v15 = vsel %vm4528_vm11, %v4530_v36, %v4526_v55  ;;  %v3637_v9 = vmul.f32 %v12505_v47, %v15249_v31  ;;  %vm4540_vm0 = vmor %vm4538_vm15, %vm4539_vm14  ;;  %4986 = vmatpush.bf16.msrb.mxu2 %v8723_v5  ;;  %vm4553_vm5 = vweird.f32 %v12899_v45 }
 0x665   :  { %v4258_v11 = vadd.f32 %v12868_v46, %v4211_v41  ;;  %4838 = vrot.lane.b32.xlu1 %v4531_v15, %s9808_s30  ;;  %v4535_v4 = vsub.f32 1.0, %v4534_v52  ;;  %v3721_v15 = vmul.f32 %v3694_v25, %v12400_v54 }
 0x666   :  { %v4358_v59 = vpop.f32.mrf.mxu1 }
 0x667   :  { %v12904_v58 = vadd.f32 %v4358_v59, %v4258_v11  ;;  %v4536_v44 = vmul.f32 %v9499_v48, %v4535_v4  ;;  %v3722_v11 = vmul.f32 %v3694_v25, %v15253_v50  ;;  %v4066_v59 = vsel %vm278_vm2, %v9024_v24, %v3674_v30 }
 0x669   :  { %v9501_v33 = vpop.eup %9500  ;;  %v8389_v61 = vmul.f32 -1.442695, %v12904_v58  ;;  %v4537_v14 = vadd.f32 %v9499_v48, %v4536_v44 }
 0x66a   :  { %v12907_v39 = vpop.eup %9502  ;;  %v12911_v6 = vadd.f32 1.0, %v9501_v33 }
 0x66b   :  { %9504 = vpow2.f32 %v8389_v61  ;;  %v4541_v12 = vsel %vm4540_vm0, %v9499_v48, %v4537_v14  ;;  %v4549_v40 = vmul.f32 %v12907_v39, %v12899_v45  ;;  %v3673_v48 = vadd.f32 %v12670_v1, %v3637_v9 }
 0x66c   :  { %9506 = vrcp.f32 %v12911_v6  ;;  %v4213_v26 = vpop.f32.mrf.mxu3  ;;  %v4546_v10 = vsel %vm4543_vm1, %v4545_v42, %v4541_v12  ;;  %v4574_v28 = vand.u32 2147483648, %v12911_v6  ;;  %vm4554_vm3 = vweird.f32 %v12907_v39 }
 0x66d   :  { %v4259_v13 = vadd.f32 %v12868_v46, %v4213_v26  ;;  %4840 = vrot.lane.b32.xlu2 %v4546_v10, %s9808_s30  ;;  %8337 = vmatmul.msk.bf16.gmra.mxu3 %vm1567_vm13, %v12843_v51  ;;  %v4550_v55 = vsub.f32 1.0, %v4549_v40  ;;  %v4065_v41 = vsel %vm278_vm2, %v9023_v62, %v3673_v48  ;;  %v4572_v5 = vand.u32 2147483647, %v12911_v6  ;;  %vm4555_vm8 = vmor %vm4553_vm5, %vm4554_vm3 }
 0x66e   :  { %v4360_v36 = vpop.f32.mrf.mxu1  ;;  %v4559_v48 = vand.u32 2147483648, %v12899_v45  ;;  %vm4568_vm6 = vweird.f32 %v12911_v6 }
 0x66f   :  { %v12928_v52 = vadd.f32 %v4360_v36, %v4259_v13  ;;  %v4551_v42 = vmul.f32 %v12907_v39, %v4550_v55  ;;  %v4557_v36 = vand.u32 2147483647, %v12899_v45  ;;  %vm4573_vm10 = vcmp.eq.f32.partialorder %v4572_v5, 8.507059e+37 }
 0x670   :  { %v9027_v51 = vpop.permute.xlu2 %9026  ;;  %v3639_v5 = vmul.f32 %v12505_v47, %v15251_v32 }
 0x671   :  { %v9505_v4 = vpop.eup %9504  ;;  %v8390_v16 = vmul.f32 -1.442695, %v12928_v52  ;;  %v3778_v44 = vpop.permute.xlu0 %3777  ;;  %v9029_v57 = vunpack.i.h.bf16 %v9027_v51  ;;  %v9028_v33 = vunpack.i.l.bf16 %v9027_v51  ;;  %v4552_v24 = vadd.f32 %v12907_v39, %v4551_v42 }
 0x672   :  { %v9507_v0 = vpop.eup %9506  ;;  %v4502_v61 = vadd.f32 1.0, %v9505_v4  ;;  %v3819_v14 = vadd.f32 %v3778_v44, %v3721_v15  ;;  %v3820_v9 = vadd.f32 %v3778_v44, %v3722_v11  ;;  %v4575_v11 = vor.u32 1.1754944e-38, %v4574_v28 }
 0x673   :  { %9508 = vpow2.f32 %v8390_v16  ;;  %v4093_v12 = vsel %vm1471_vm12, %v4065_v41, %v9028_v33  ;;  %v4094_v40 = vsel %vm1471_vm12, %v4066_v59, %v9029_v57  ;;  %v4564_v62 = vmul.f32 %v9507_v0, %v12911_v6 }
 0x674   :  { %9510 = vrcp.f32 %v4502_v61  ;;  %v9055_v26 = vpack.i.bf16 %v3820_v9, %v3819_v14  ;;  %v4287_v10 = vpack.c.bf16 %v4094_v40, %v4093_v12  ;;  %vm4569_vm4 = vweird.f32 %v9507_v0 }
 0x675   :  { %v4565_v25 = vsub.f32 1.0, %v4564_v62  ;;  %vm4570_vm9 = vmor %vm4568_vm6, %vm4569_vm4  ;;  %v4556_v51 = vsel %vm4555_vm8, %v12907_v39, %v4552_v24  ;;  %v4560_v59 = vor.u32 1.1754944e-38, %v4559_v48  ;;  %vm4558_vm11 = vcmp.eq.f32.partialorder %v4557_v36, 8.507059e+37 }
 0x676   :  { %9056 = vrot.lane.b32.xlu0 %v9055_v26, %s9806_s20  ;;  %8381 = vmatmul.msk.bf16.gmra.mxu1 %vm1567_vm13, %v4287_v10  ;;  %v4589_v57 = vand.u32 2147483648, %v4502_v61  ;;  %v4587_v39 = vand.u32 2147483647, %v4502_v61  ;;  %vm4583_vm15 = vweird.f32 %v4502_v61  ;;  %v3640_v48 = vmul.f32 %v12465_v20, %v15252_v35 }
 0x677   :  { %v4566_v13 = vmul.f32 %v9507_v0, %v4565_v25  ;;  %v4561_v45 = vsel %vm4558_vm11, %v4560_v59, %v4556_v51 }
 0x678   :  { %v4590_v9 = vor.u32 1.1754944e-38, %v4589_v57  ;;  %vm4588_vm1 = vcmp.eq.f32.partialorder %v4587_v39, 8.507059e+37 }
 0x679   :  { %v9509_v55 = vpop.eup %9508  ;;  %v4567_v30 = vadd.f32 %v9507_v0, %v4566_v13  ;;  %v9032_v13 = vpop.permute.xlu1 %9031 }
 0x67a   :  { %v9511_v41 = vpop.eup %9510  ;;  %v4503_v15 = vadd.f32 1.0, %v9509_v55  ;;  %v9034_v36 = vunpack.i.h.bf16 %v9032_v13  ;;  %v9033_v55 = vunpack.i.l.bf16 %v9032_v13 }
 0x67b   :  { %v4571_v4 = vsel %vm4570_vm9, %v9507_v0, %v4567_v30  ;;  %v4579_v16 = vmul.f32 %v9511_v41, %v4502_v61  ;;  %vm4584_vm14 = vweird.f32 %v9511_v41  ;;  %v3675_v30 = vadd.f32 %v12670_v1, %v3639_v5  ;;  %v9042_v5 = vpop.permute.xlu0 %9041 }
 0x67c   :  { %9512 = vrcp.f32 %v4503_v15  ;;  %v4576_v44 = vsel %vm4573_vm10, %v4575_v11, %v4571_v4  ;;  %vm4585_vm0 = vmor %vm4583_vm15, %vm4584_vm14  ;;  %v4602_v10 = vand.u32 2147483647, %v4503_v15  ;;  %vm4598_vm4 = vweird.f32 %v4503_v15 }
 0x67d   :  { %4844 = vrot.lane.b32.xlu1 %v4576_v44, %s9808_s30  ;;  %8338 = vmatmul.msk.bf16.gmra.mxu3 %vm1567_vm13, %v12856_v29  ;;  %v4580_v6 = vsub.f32 1.0, %v4579_v16  ;;  %v4604_v29 = vand.u32 2147483648, %v4503_v15  ;;  %v4067_v4 = vsel %vm278_vm2, %v9033_v55, %v3675_v30 }
 0x67e   :  { %4842 = vrot.lane.b32.xlu0 %v4561_v45, %s9808_s30  ;;  %vm4603_vm6 = vcmp.eq.f32.partialorder %v4602_v10, 8.507059e+37 }
 0x67f   :  { %v4581_v33 = vmul.f32 %v9511_v41, %v4580_v6  ;;  %v4605_v28 = vor.u32 1.1754944e-38, %v4604_v29 }
 0x681   :  { %v4582_v0 = vadd.f32 %v9511_v41, %v4581_v33 }
 0x682   :  { %v9513_v14 = vpop.eup %9512 }
 0x683   :  { %v4586_v42 = vsel %vm4585_vm0, %v9511_v41, %v4582_v0  ;;  %v4594_v12 = vmul.f32 %v9513_v14, %v4503_v15  ;;  %vm4599_vm3 = vweird.f32 %v9513_v14  ;;  %v3676_v41 = vadd.f32 %v12692_v3, %v3640_v48 }
 0x684   :  { %v4591_v40 = vsel %vm4588_vm1, %v4590_v9, %v4586_v42  ;;  %vm4600_vm5 = vmor %vm4598_vm4, %vm4599_vm3 }
 0x685   :  { %4846 = vrot.lane.b32.xlu2 %v4591_v40, %s9808_s30  ;;  %v4595_v62 = vsub.f32 1.0, %v4594_v12  ;;  %v4068_v59 = vsel %vm278_vm2, %v9034_v36, %v3676_v41  ;;  %v8722_v41 = vld [vmem:[%s14867_s9 + $0x10] sm:$0xff] }
 0x686   :  { %4987 = vmatpush.bf16.msrb.mxu2 %v8722_v41 }
 0x687   :  { %v4596_v26 = vmul.f32 %v9513_v14, %v4595_v62 }
 0x689   :  { %v4597_v25 = vadd.f32 %v9513_v14, %v4596_v26 }
 0x68b   :  { %v4601_v24 = vsel %vm4600_vm5, %v9513_v14, %v4597_v25 }
 0x68c   :  { %v4606_v61 = vsel %vm4603_vm6, %v4605_v28, %v4601_v24 }
 0x68d   :  { %4848 = vrot.lane.b32.xlu0 %v4606_v61, %s9808_s30 }
 0x698   :  { %v9037_v15 = vpop.permute.xlu2 %9036 }
 0x699   :  { %v9039_v11 = vunpack.i.h.bf16 %v9037_v15  ;;  %v9038_v51 = vunpack.i.l.bf16 %v9037_v15  ;;  %v3642_v15 = vmul.f32 %v12465_v20, %v12349_v22 }
 0x69b   :  { %v4096_v16 = vsel %vm1471_vm12, %v4068_v59, %v9039_v11  ;;  %v4095_v44 = vsel %vm1471_vm12, %v4067_v4, %v9038_v51  ;;  %v9044_v11 = vunpack.i.h.bf16 %v9042_v5  ;;  %v3641_v4 = vmul.f32 %v12505_v47, %v12346_v27 }
 0x69c   :  { %v4288_v45 = vpack.c.bf16 %v4096_v16, %v4095_v44  ;;  %v9043_v59 = vunpack.i.l.bf16 %v9042_v5 }
 0x69e   :  { %8382 = vmatmul.msk.bf16.gmra.mxu1 %vm1567_vm13, %v4288_v45  ;;  %v3678_v45 = vadd.f32 %v12692_v3, %v3642_v15 }
 0x6a0   :  { %v4216_v6 = vpop.f32.mrf.mxu3 }
 0x6a1   :  { %v4260_v57 = vadd.f32 %v12868_v46, %v4216_v6 }
 0x6a4   :  { %v4363_v33 = vpop.f32.mrf.mxu1 }
 0x6a5   :  { %v12968_v39 = vadd.f32 %v4363_v33, %v4260_v57  ;;  %v3677_v33 = vadd.f32 %v12670_v1, %v3641_v4 }
 0x6a7   :  { %v8391_v0 = vmul.f32 -1.442695, %v12968_v39 }
 0x6a8   :  { %v4218_v14 = vpop.f32.mrf.mxu3 }
 0x6a9   :  { %9514 = vpow2.f32 %v8391_v0  ;;  %v4261_v9 = vadd.f32 %v12868_v46, %v4218_v14 }
 0x6ac   :  { %v4365_v42 = vpop.f32.mrf.mxu1 }
 0x6ad   :  { %v12972_v12 = vadd.f32 %v4365_v42, %v4261_v9  ;;  %v4070_v9 = vsel %vm278_vm2, %v9044_v11, %v3678_v45 }
 0x6af   :  { %v9515_v40 = vpop.eup %9514  ;;  %v8392_v62 = vmul.f32 -1.442695, %v12972_v12 }
 0x6b0   :  { %v4504_v29 = vadd.f32 1.0, %v9515_v40  ;;  %v4221_v26 = vpop.f32.mrf.mxu3 }
 0x6b1   :  { %9516 = vpow2.f32 %v8392_v62  ;;  %v4262_v10 = vadd.f32 %v12868_v46, %v4221_v26  ;;  %v4069_v26 = vsel %vm278_vm2, %v9043_v59, %v3677_v33 }
 0x6b2   :  { %9518 = vrcp.f32 %v4504_v29  ;;  %v4619_v44 = vand.u32 2147483648, %v4504_v29  ;;  %v4617_v0 = vand.u32 2147483647, %v4504_v29  ;;  %vm4613_vm9 = vweird.f32 %v4504_v29 }
 0x6b4   :  { %v4368_v25 = vpop.f32.mrf.mxu1  ;;  %vm4618_vm11 = vcmp.eq.f32.partialorder %v4617_v0, 8.507059e+37 }
 0x6b5   :  { %v12976_v28 = vadd.f32 %v4368_v25, %v4262_v10 }
 0x6b7   :  { %v9517_v24 = vpop.eup %9516  ;;  %v8393_v61 = vmul.f32 -1.442695, %v12976_v28 }
 0x6b8   :  { %v9519_v13 = vpop.eup %9518  ;;  %v12979_v48 = vadd.f32 1.0, %v9517_v24  ;;  %v4223_v36 = vpop.f32.mrf.mxu3 }
 0x6b9   :  { %9520 = vpow2.f32 %v8393_v61  ;;  %v4263_v55 = vadd.f32 %v12868_v46, %v4223_v36  ;;  %v4609_v30 = vmul.f32 %v9519_v13, %v4504_v29  ;;  %vm4614_vm8 = vweird.f32 %v9519_v13 }
 0x6ba   :  { %9522 = vrcp.f32 %v12979_v48  ;;  %v4620_v61 = vor.u32 1.1754944e-38, %v4619_v44  ;;  %vm4615_vm10 = vmor %vm4613_vm9, %vm4614_vm8  ;;  %v4634_v44 = vand.u32 2147483648, %v12979_v48  ;;  %v4632_v45 = vand.u32 2147483647, %v12979_v48 }
 0x6bb   :  { %v4610_v51 = vsub.f32 1.0, %v4609_v30  ;;  %vm4628_vm15 = vweird.f32 %v12979_v48 }
 0x6bc   :  { %v4370_v16 = vpop.f32.mrf.mxu1  ;;  %vm4633_vm1 = vcmp.eq.f32.partialorder %v4632_v45, 8.507059e+37 }
 0x6bd   :  { %v12991_v6 = vadd.f32 %v4370_v16, %v4263_v55  ;;  %v4611_v57 = vmul.f32 %v9519_v13, %v4610_v51 }
 0x6bf   :  { %v9521_v14 = vpop.eup %9520  ;;  %v8394_v42 = vmul.f32 -1.442695, %v12991_v6  ;;  %v4612_v40 = vadd.f32 %v9519_v13, %v4611_v57 }
 0x6c0   :  { %v9523_v62 = vpop.eup %9522  ;;  %v12997_v10 = vadd.f32 1.0, %v9521_v14  ;;  %v9047_v25 = vpop.permute.xlu1 %9046 }
 0x6c1   :  { %v4226_v24 = vpop.f32.mrf.mxu3  ;;  %9524 = vpow2.f32 %v8394_v42  ;;  %v9049_v5 = vunpack.i.h.bf16 %v9047_v25  ;;  %v9048_v36 = vunpack.i.l.bf16 %v9047_v25  ;;  %v4616_v30 = vsel %vm4615_vm10, %v9519_v13, %v4612_v40 }
 0x6c2   :  { %v4264_v55 = vadd.f32 %v12868_v46, %v4226_v24  ;;  %9526 = vrcp.f32 %v12997_v10  ;;  %v4624_v41 = vmul.f32 %v9523_v62, %v12979_v48  ;;  %v4621_v51 = vsel %vm4618_vm11, %v4620_v61, %v4616_v30  ;;  %v13017_v30 = vpop.permute.xlu2 %9051 }
 0x6c3   :  { %v4097_v15 = vsel %vm1471_vm12, %v4069_v26, %v9048_v36  ;;  %v4098_v11 = vsel %vm1471_vm12, %v4070_v9, %v9049_v5  ;;  %4850 = vrot.lane.b32.xlu1 %v4621_v51, %s9808_s30  ;;  %vm4629_vm14 = vweird.f32 %v9523_v62  ;;  %v4635_v26 = vor.u32 1.1754944e-38, %v4634_v44 }
 0x6c4   :  { %v4289_v29 = vpack.c.bf16 %v4098_v11, %v4097_v15  ;;  %v4373_v4 = vpop.f32.mrf.mxu1  ;;  %v4625_v59 = vsub.f32 1.0, %v4624_v41  ;;  %vm4630_vm0 = vmor %vm4628_vm15, %vm4629_vm14  ;;  %v4647_v15 = vand.u32 2147483647, %v12997_v10  ;;  %vm4643_vm4 = vweird.f32 %v12997_v10 }
 0x6c5   :  { %v13006_v16 = vadd.f32 %v4373_v4, %v4264_v55  ;;  %v4649_v55 = vand.u32 2147483648, %v12997_v10 }
 0x6c6   :  { %8383 = vmatmul.msk.bf16.gmra.mxu1 %vm1567_vm13, %v4289_v29  ;;  %v4626_v13 = vmul.f32 %v9523_v62, %v4625_v59  ;;  %vm4648_vm6 = vcmp.eq.f32.partialorder %v4647_v15, 8.507059e+37 }
 0x6c7   :  { %v9525_v57 = vpop.eup %9524  ;;  %v8395_v33 = vmul.f32 -1.442695, %v13006_v16  ;;  %v4650_v59 = vor.u32 1.1754944e-38, %v4649_v55 }
 0x6c8   :  { %v9527_v0 = vpop.eup %9526  ;;  %v4507_v14 = vadd.f32 1.0, %v9525_v57  ;;  %v4627_v42 = vadd.f32 %v9523_v62, %v4626_v13 }
 0x6c9   :  { %v4228_v9 = vpop.f32.mrf.mxu3  ;;  %9528 = vpow2.f32 %v8395_v33  ;;  %v4639_v25 = vmul.f32 %v9527_v0, %v12997_v10  ;;  %vm4644_vm3 = vweird.f32 %v9527_v0 }
 0x6ca   :  { %v4265_v40 = vadd.f32 %v12868_v46, %v4228_v9  ;;  %9530 = vrcp.f32 %v4507_v14  ;;  %v4631_v24 = vsel %vm4630_vm0, %v9523_v62, %v4627_v42  ;;  %vm4645_vm5 = vmor %vm4643_vm4, %vm4644_vm3  ;;  %v4664_v57 = vand.u32 2147483648, %v4507_v14  ;;  %v4841_v9 = vpop.permute.xlu2 %4840 }
 0x6cb   :  { %v4636_v61 = vsel %vm4633_vm1, %v4635_v26, %v4631_v24  ;;  %v4640_v5 = vsub.f32 1.0, %v4639_v25  ;;  %9532 = vtanh.f32 %v12875_v17  ;;  %v4662_v10 = vand.u32 2147483647, %v4507_v14 }
 0x6cc   :  { %4852 = vrot.lane.b32.xlu2 %v4636_v61, %s9808_s30  ;;  %v4375_v36 = vpop.f32.mrf.mxu1  ;;  %9534 = vtanh.f32 %v12886_v2  ;;  %vm4658_vm9 = vweird.f32 %v4507_v14 }
 0x6cd   :  { %v13019_v48 = vadd.f32 %v4375_v36, %v4265_v40  ;;  %v4641_v41 = vmul.f32 %v9527_v0, %v4640_v5  ;;  %v4665_v36 = vor.u32 1.1754944e-38, %v4664_v57  ;;  %vm4663_vm11 = vcmp.eq.f32.partialorder %v4662_v10, 8.507059e+37 }
 0x6cf   :  { %v9529_v11 = vpop.eup %9528  ;;  %v8396_v62 = vmul.f32 -1.442695, %v13019_v48  ;;  %v4642_v51 = vadd.f32 %v9527_v0, %v4641_v41 }
 0x6d0   :  { %v9531_v29 = vpop.eup %9530  ;;  %v4508_v4 = vadd.f32 1.0, %v9529_v11 }
 0x6d1   :  { %9536 = vpow2.f32 %v8396_v62  ;;  %v4646_v44 = vsel %vm4645_vm5, %v9527_v0, %v4642_v51  ;;  %v4654_v13 = vmul.f32 %v9531_v29, %v4507_v14  ;;  %v9533_v33 = vpop.eup %9532  ;;  %vm4659_vm8 = vweird.f32 %v9531_v29 }
 0x6d2   :  { %9538 = vrcp.f32 %v4508_v4  ;;  %v4651_v45 = vsel %vm4648_vm6, %v4650_v59, %v4646_v44  ;;  %v9535_v40 = vpop.eup %9534  ;;  %vm4660_vm10 = vmor %vm4658_vm9, %vm4659_vm8  ;;  %v4679_v51 = vand.u32 2147483648, %v4508_v4  ;;  %v4677_v14 = vand.u32 2147483647, %v4508_v4 }
 0x6d3   :  { %4854 = vrot.lane.b32.xlu0 %v4651_v45, %s9808_s30  ;;  %v4655_v17 = vsub.f32 1.0, %v4654_v13  ;;  %v4899_v0 = vmul.f32 %v9535_v40, %v4841_v9  ;;  %vm4673_vm15 = vweird.f32 %v4508_v4  ;;  %v3643_v40 = vmul.f32 %v12505_v47, %v12400_v54 }
 0x6d4   :  { %v4680_v45 = vor.u32 1.1754944e-38, %v4679_v51  ;;  %vm4678_vm1 = vcmp.eq.f32.partialorder %v4677_v14, 8.507059e+37 }
 0x6d5   :  { %v4656_v42 = vmul.f32 %v9531_v29, %v4655_v17 }
 0x6d7   :  { %v9537_v2 = vpop.eup %9536  ;;  %v4839_v26 = vpop.permute.xlu1 %4838  ;;  %v4657_v25 = vadd.f32 %v9531_v29, %v4656_v42 }
 0x6d8   :  { %v9539_v24 = vpop.eup %9538  ;;  %v4509_v61 = vadd.f32 1.0, %v9537_v2  ;;  %v4898_v5 = vmul.f32 %v9533_v33, %v4839_v26  ;;  %v9054_v2 = vunpack.i.h.bf16 %v13017_v30  ;;  %v9053_v26 = vunpack.i.l.bf16 %v13017_v30 }
 0x6d9   :  { %v4661_v55 = vsel %vm4660_vm10, %v9531_v29, %v4657_v25  ;;  %v4669_v41 = vmul.f32 %v9539_v24, %v4508_v4  ;;  %vm4674_vm14 = vweird.f32 %v9539_v24  ;;  %v3644_v4 = vmul.f32 %v12465_v20, %v15253_v50 }
 0x6da   :  { %9540 = vrcp.f32 %v4509_v61  ;;  %v4923_v15 = vpack.c.bf16 %v4899_v0, %v4898_v5  ;;  %v4666_v11 = vsel %vm4663_vm11, %v4665_v36, %v4661_v55  ;;  %vm4675_vm0 = vmor %vm4673_vm15, %vm4674_vm14  ;;  %v4694_v9 = vand.u32 2147483648, %v4509_v61 }
 0x6db   :  { %4856 = vrot.lane.b32.xlu1 %v4666_v11, %s9808_s30  ;;  %v4670_v62 = vsub.f32 1.0, %v4669_v41  ;;  %v4692_v10 = vand.u32 2147483647, %v4509_v61  ;;  %vm4688_vm4 = vweird.f32 %v4509_v61  ;;  %9542 = vtanh.f32 %v12896_v43 }
 0x6dc   :  { %8418 = vmatmul.msk.bf16.vlgmr.msrb.gmra.mxu2 %vm278_vm2, %v4923_v15  ;;  %v3680_v0 = vadd.f32 %v12692_v3, %v3644_v4  ;;  %v4695_v36 = vor.u32 1.1754944e-38, %v4694_v9  ;;  %9544 = vtanh.f32 %v12890_v63  ;;  %v4231_v15 = vpop.f32.mrf.mxu3 }
 0x6dd   :  { %v4671_v59 = vmul.f32 %v9539_v24, %v4670_v62  ;;  %vm4693_vm6 = vcmp.eq.f32.partialorder %v4692_v10, 8.507059e+37  ;;  %9546 = vtanh.f32 %v12904_v58 }
 0x6de   :  { %v4072_v20 = vsel %vm278_vm2, %v9054_v2, %v3680_v0 }
 0x6df   :  { %v4672_v44 = vadd.f32 %v9539_v24, %v4671_v59 }
 0x6e0   :  { %v9541_v13 = vpop.eup %9540 }
 0x6e1   :  { %v4676_v29 = vsel %vm4675_vm0, %v9539_v24, %v4672_v44  ;;  %v4684_v17 = vmul.f32 %v9541_v13, %v4509_v61  ;;  %vm4689_vm3 = vweird.f32 %v9541_v13  ;;  %v3679_v24 = vadd.f32 %v12670_v1, %v3643_v40  ;;  %v9543_v11 = vpop.eup %9542  ;;  %v4847_v40 = vpop.permute.xlu2 %4846 }
 0x6e2   :  { %v4681_v57 = vsel %vm4678_vm1, %v4680_v45, %v4676_v29  ;;  %vm4690_vm5 = vmor %vm4688_vm4, %vm4689_vm3  ;;  %v9545_v51 = vpop.eup %9544  ;;  %v4266_v44 = vadd.f32 %v12868_v46, %v4231_v15 }
 0x6e3   :  { %4858 = vrot.lane.b32.xlu2 %v4681_v57, %s9808_s30  ;;  %v4685_v33 = vsub.f32 1.0, %v4684_v17  ;;  %v4071_v30 = vsel %vm278_vm2, %v9053_v26, %v3679_v24  ;;  %v9547_v10 = vpop.eup %9546 }
 0x6e4   :  { %v4233_v57 = vpop.f32.mrf.mxu3  ;;  %v4902_v0 = vmul.f32 %v9547_v10, %v4847_v40 }
 0x6e5   :  { %v4686_v42 = vmul.f32 %v9541_v13, %v4685_v33  ;;  %v4267_v33 = vadd.f32 %v12868_v46, %v4233_v57 }
 0x6e7   :  { %v4687_v25 = vadd.f32 %v9541_v13, %v4686_v42 }
 0x6e8   :  { %v9057_v5 = vpop.permute.xlu0 %9056 }
 0x6e9   :  { %v9059_v55 = vunpack.i.h.bf16 %v9057_v5  ;;  %v9058_v47 = vunpack.i.l.bf16 %v9057_v5  ;;  %v4691_v41 = vsel %vm4690_vm5, %v9541_v13, %v4687_v25 }
 0x6ea   :  { %v4696_v61 = vsel %vm4693_vm6, %v4695_v36, %v4691_v41 }
 0x6eb   :  { %v4100_v43 = vsel %vm1471_vm12, %v4072_v20, %v9059_v55  ;;  %v4099_v1 = vsel %vm1471_vm12, %v4071_v30, %v9058_v47  ;;  %4860 = vrot.lane.b32.xlu0 %v4696_v61, %s9808_s30 }
 0x6ec   :  { %v4290_v3 = vpack.c.bf16 %v4100_v43, %v4099_v1 }
 0x6ee   :  { %8384 = vmatmul.msk.bf16.gmra.mxu1 %vm1567_vm13, %v4290_v3 }
 0x6ef   :  { %v4845_v62 = vpop.permute.xlu1 %4844 }
 0x6f0   :  { %v4901_v59 = vmul.f32 %v9543_v11, %v4845_v62  ;;  %v4843_v63 = vpop.permute.xlu0 %4842 }
 0x6f1   :  { %v4900_v14 = vmul.f32 %v9545_v51, %v4843_v63 }
 0x6f3   :  { %v4924_v13 = vpack.c.bf16 %v4901_v59, %v4900_v14  ;;  %v4378_v45 = vpop.f32.mrf.mxu1 }
 0x6f4   :  { %v13047_v29 = vadd.f32 %v4378_v45, %v4266_v44  ;;  %v4236_v44 = vpop.f32.mrf.mxu3 }
 0x6f5   :  { %8419 = vmatmul.msk.bf16.gmra.mxu2 %vm278_vm2, %v4924_v13 }
 0x6f6   :  { %v8397_v17 = vmul.f32 -1.442695, %v13047_v29 }
 0x6f8   :  { %9548 = vpow2.f32 %v8397_v17 }
 0x6f9   :  { %9550 = vtanh.f32 %v12928_v52 }
 0x6fb   :  { %v4380_v9 = vpop.f32.mrf.mxu1 }
 0x6fc   :  { %v13054_v42 = vadd.f32 %v4380_v9, %v4267_v33  ;;  %v4268_v33 = vadd.f32 %v12868_v46, %v4236_v44 }
 0x6fe   :  { %v9549_v4 = vpop.eup %9548  ;;  %v8398_v2 = vmul.f32 -1.442695, %v13054_v42 }
 0x6ff   :  { %v9551_v26 = vpop.eup %9550  ;;  %v4510_v25 = vadd.f32 1.0, %v9549_v4  ;;  %v4849_v24 = vpop.permute.xlu0 %4848 }
 0x700   :  { %9552 = vpow2.f32 %v8398_v2  ;;  %v4903_v58 = vmul.f32 %v9551_v26, %v4849_v24  ;;  %v4238_v4 = vpop.f32.mrf.mxu3 }
 0x701   :  { %9554 = vrcp.f32 %v4510_v25  ;;  %v4709_v20 = vand.u32 2147483648, %v4510_v25  ;;  %v4707_v61 = vand.u32 2147483647, %v4510_v25  ;;  %vm4703_vm9 = vweird.f32 %v4510_v25 }
 0x702   :  { %v4925_v5 = vpack.c.bf16 %v4903_v58, %v4902_v0  ;;  %v4269_v2 = vadd.f32 %v12868_v46, %v4238_v4  ;;  %v13075_v4 = vld [vmem:[%s14866_s8 + $0x1] ss:$0 sm:$0xff] }
 0x703   :  { %v4710_v3 = vor.u32 1.1754944e-38, %v4709_v20  ;;  %vm4708_vm11 = vcmp.eq.f32.partialorder %v4707_v61, 8.507059e+37 }
 0x705   :  { %8420 = vmatmul.msk.bf16.gmra.mxu2 %vm278_vm2, %v4925_v5 }
 0x706   :  { %v9553_v52 = vpop.eup %9552 }
 0x707   :  { %v9555_v36 = vpop.eup %9554  ;;  %v4511_v55 = vadd.f32 1.0, %v9553_v52 }
 0x708   :  { %v4699_v47 = vmul.f32 %v9555_v36, %v4510_v25  ;;  %vm4704_vm8 = vweird.f32 %v9555_v36 }
 0x709   :  { %9556 = vrcp.f32 %v4511_v55  ;;  %vm4705_vm10 = vmor %vm4703_vm9, %vm4704_vm8  ;;  %v4724_v59 = vand.u32 2147483648, %v4511_v55  ;;  %v4722_v14 = vand.u32 2147483647, %v4511_v55  ;;  %vm4718_vm15 = vweird.f32 %v4511_v55 }
 0x70a   :  { %v4700_v41 = vsub.f32 1.0, %v4699_v47 }
 0x70b   :  { %v4725_v45 = vor.u32 1.1754944e-38, %v4724_v59  ;;  %vm4723_vm1 = vcmp.eq.f32.partialorder %v4722_v14, 8.507059e+37 }
 0x70c   :  { %v4701_v30 = vmul.f32 %v9555_v36, %v4700_v41 }
 0x70e   :  { %v4702_v43 = vadd.f32 %v9555_v36, %v4701_v30 }
 0x70f   :  { %v9557_v1 = vpop.eup %9556 }
 0x710   :  { %v4706_v15 = vsel %vm4705_vm10, %v9555_v36, %v4702_v43  ;;  %v4714_v11 = vmul.f32 %v9557_v1, %v4511_v55  ;;  %vm4719_vm14 = vweird.f32 %v9557_v1 }
 0x711   :  { %v4711_v62 = vsel %vm4708_vm11, %v4710_v3, %v4706_v15  ;;  %vm4720_vm0 = vmor %vm4718_vm15, %vm4719_vm14 }
 0x712   :  { %4862 = vrot.lane.b32.xlu1 %v4711_v62, %s9808_s30  ;;  %v4715_v51 = vsub.f32 1.0, %v4714_v11 }
 0x714   :  { %v4716_v63 = vmul.f32 %v9557_v1, %v4715_v51 }
 0x716   :  { %v4717_v13 = vadd.f32 %v9557_v1, %v4716_v63 }
 0x718   :  { %v4721_v17 = vsel %vm4720_vm0, %v9557_v1, %v4717_v13 }
 0x719   :  { %v4726_v57 = vsel %vm4723_vm1, %v4725_v45, %v4721_v17  ;;  %v4241_v17 = vpop.f32.mrf.mxu3 }
 0x71a   :  { %4864 = vrot.lane.b32.xlu2 %v4726_v57, %s9808_s30 }
 0x71b   :  { %v4383_v9 = vpop.f32.mrf.mxu1 }
 0x71c   :  { %v13061_v10 = vadd.f32 %v4383_v9, %v4268_v33 }
 0x71e   :  { %v8399_v40 = vmul.f32 -1.442695, %v13061_v10 }
 0x720   :  { %9558 = vpow2.f32 %v8399_v40 }
 0x723   :  { %v4385_v26 = vpop.f32.mrf.mxu1 }
 0x724   :  { %v13065_v25 = vadd.f32 %v4385_v26, %v4269_v2  ;;  %v4270_v2 = vadd.f32 %v13075_v4, %v4241_v17 }
 0x726   :  { %v9559_v24 = vpop.eup %9558  ;;  %v8400_v0 = vmul.f32 -1.442695, %v13065_v25  ;;  %v4853_v41 = vpop.permute.xlu2 %4852 }
 0x727   :  { %v4512_v58 = vadd.f32 1.0, %v9559_v24 }
 0x728   :  { %9560 = vpow2.f32 %v8400_v0 }
 0x729   :  { %9562 = vrcp.f32 %v4512_v58  ;;  %v4739_v46 = vand.u32 2147483648, %v4512_v58  ;;  %v4737_v30 = vand.u32 2147483647, %v4512_v58  ;;  %vm4733_vm4 = vweird.f32 %v4512_v58 }
 0x72a   :  { %9564 = vtanh.f32 %v12968_v39 }
 0x72b   :  { %9566 = vtanh.f32 %v12972_v12  ;;  %v4740_v39 = vor.u32 1.1754944e-38, %v4739_v46  ;;  %vm4738_vm6 = vcmp.eq.f32.partialorder %v4737_v30, 8.507059e+37 }
 0x72e   :  { %v9561_v5 = vpop.eup %9560 }
 0x72f   :  { %v9563_v52 = vpop.eup %9562  ;;  %v4513_v36 = vadd.f32 1.0, %v9561_v5 }
 0x730   :  { %v4729_v55 = vmul.f32 %v9563_v52, %v4512_v58  ;;  %vm4734_vm3 = vweird.f32 %v9563_v52  ;;  %v9565_v61 = vpop.eup %9564  ;;  %v4243_v58 = vpop.f32.mrf.mxu3 }
 0x731   :  { %9568 = vrcp.f32 %v4513_v36  ;;  %v9567_v43 = vpop.eup %9566  ;;  %vm4735_vm5 = vmor %vm4733_vm4, %vm4734_vm3  ;;  %v4754_v44 = vand.u32 2147483648, %v4513_v36  ;;  %v4752_v45 = vand.u32 2147483647, %v4513_v36  ;;  %vm4748_vm9 = vweird.f32 %v4513_v36 }
 0x732   :  { %v4730_v47 = vsub.f32 1.0, %v4729_v55  ;;  %v4905_v11 = vmul.f32 %v9567_v43, %v4853_v41  ;;  %9570 = vtanh.f32 %v12976_v28  ;;  %v4271_v5 = vadd.f32 %v13075_v4, %v4243_v58 }
 0x733   :  { %v4755_v33 = vor.u32 1.1754944e-38, %v4754_v44  ;;  %vm4753_vm11 = vcmp.eq.f32.partialorder %v4752_v45, 8.507059e+37  ;;  %9572 = vtanh.f32 %v12991_v6 }
 0x734   :  { %v4731_v20 = vmul.f32 %v9563_v52, %v4730_v47 }
 0x735   :  { %v4851_v1 = vpop.permute.xlu1 %4850 }
 0x736   :  { %v4732_v3 = vadd.f32 %v9563_v52, %v4731_v20  ;;  %v4904_v62 = vmul.f32 %v9565_v61, %v4851_v1 }
 0x737   :  { %v9569_v15 = vpop.eup %9568 }
 0x738   :  { %v4736_v51 = vsel %vm4735_vm5, %v9563_v52, %v4732_v3  ;;  %v4744_v12 = vmul.f32 %v9569_v15, %v4513_v36  ;;  %v4926_v59 = vpack.c.bf16 %v4905_v11, %v4904_v62  ;;  %vm4749_vm8 = vweird.f32 %v9569_v15  ;;  %v9571_v55 = vpop.eup %9570 }
 0x739   :  { %v4741_v63 = vsel %vm4738_vm6, %v4740_v39, %v4736_v51  ;;  %vm4750_vm10 = vmor %vm4748_vm9, %vm4749_vm8  ;;  %v9573_v46 = vpop.eup %9572 }
 0x73a   :  { %4866 = vrot.lane.b32.xlu0 %v4741_v63, %s9808_s30  ;;  %v4745_v14 = vsub.f32 1.0, %v4744_v12  ;;  %8421 = vmatmul.msk.bf16.gmra.mxu2 %vm278_vm2, %v4926_v59 }
 0x73c   :  { %v4746_v13 = vmul.f32 %v9569_v15, %v4745_v14 }
 0x73d   :  { %v4859_v39 = vpop.permute.xlu2 %4858 }
 0x73e   :  { %v4747_v57 = vadd.f32 %v9569_v15, %v4746_v13 }
 0x740   :  { %v4751_v9 = vsel %vm4750_vm10, %v9569_v15, %v4747_v57 }
 0x741   :  { %v4756_v40 = vsel %vm4753_vm11, %v4755_v33, %v4751_v9 }
 0x742   :  { %4868 = vrot.lane.b32.xlu1 %v4756_v40, %s9808_s30 }
 0x743   :  { %v4388_v26 = vpop.f32.mrf.mxu1 }
 0x744   :  { %v13079_v24 = vadd.f32 %v4388_v26, %v4270_v2 }
 0x745   :  { %v4855_v52 = vpop.permute.xlu0 %4854 }
 0x746   :  { %v8401_v0 = vmul.f32 -1.442695, %v13079_v24  ;;  %v4906_v30 = vmul.f32 %v9571_v55, %v4855_v52 }
 0x748   :  { %9574 = vpow2.f32 %v8401_v0 }
 0x74b   :  { %v4390_v36 = vpop.f32.mrf.mxu1 }
 0x74c   :  { %v13085_v47 = vadd.f32 %v4390_v36, %v4271_v5  ;;  %v4246_v5 = vpop.f32.mrf.mxu3 }
 0x74d   :  { %v4857_v41 = vpop.permute.xlu1 %4856 }
 0x74e   :  { %v9575_v20 = vpop.eup %9574  ;;  %v8402_v61 = vmul.f32 -1.442695, %v13085_v47  ;;  %v4907_v28 = vmul.f32 %v9573_v46, %v4857_v41 }
 0x74f   :  { %v4514_v43 = vadd.f32 1.0, %v9575_v20  ;;  %v4272_v20 = vadd.f32 %v13075_v4, %v4246_v5 }
 0x750   :  { %9576 = vpow2.f32 %v8402_v61  ;;  %v4927_v1 = vpack.c.bf16 %v4907_v28, %v4906_v30 }
 0x751   :  { %9578 = vrcp.f32 %v4514_v43  ;;  %v4769_v51 = vand.u32 2147483648, %v4514_v43  ;;  %v4767_v63 = vand.u32 2147483647, %v4514_v43  ;;  %vm4763_vm15 = vweird.f32 %v4514_v43 }
 0x752   :  { %8422 = vmatmul.msk.bf16.gmra.mxu2 %vm278_vm2, %v4927_v1  ;;  %9580 = vtanh.f32 %v13006_v16 }
 0x753   :  { %9582 = vtanh.f32 %v13019_v48  ;;  %v4770_v57 = vor.u32 1.1754944e-38, %v4769_v51  ;;  %vm4768_vm1 = vcmp.eq.f32.partialorder %v4767_v63, 8.507059e+37 }
 0x754   :  { %v4248_v1 = vpop.f32.mrf.mxu3 }
 0x756   :  { %v9577_v6 = vpop.eup %9576 }
 0x757   :  { %v9579_v3 = vpop.eup %9578  ;;  %v4515_v15 = vadd.f32 1.0, %v9577_v6  ;;  %v13104_v6 = vld [vmem:[%s14868_s10 + $0x1] ss:$0 sm:$0xff] }
 0x758   :  { %v4759_v11 = vmul.f32 %v9579_v3, %v4514_v43  ;;  %v9581_v12 = vpop.eup %9580  ;;  %vm4764_vm14 = vweird.f32 %v9579_v3  ;;  %v9246_v43 = vld [vmem:[%s14861_s5 + $0x2] ss:$0 sm:$0xff] }
 0x759   :  { %9584 = vrcp.f32 %v4515_v15  ;;  %v9583_v14 = vpop.eup %9582  ;;  %v4908_v13 = vmul.f32 %v9581_v12, %v4859_v39  ;;  %vm4765_vm0 = vmor %vm4763_vm15, %vm4764_vm14  ;;  %v4784_v26 = vand.u32 2147483648, %v4515_v15  ;;  %v4782_v58 = vand.u32 2147483647, %v4515_v15 }
 0x75a   :  { %v4760_v62 = vsub.f32 1.0, %v4759_v11  ;;  %vm4778_vm4 = vweird.f32 %v4515_v15 }
 0x75b   :  { %v4785_v55 = vor.u32 1.1754944e-38, %v4784_v26  ;;  %vm4783_vm6 = vcmp.eq.f32.partialorder %v4782_v58, 8.507059e+37 }
 0x75c   :  { %v4761_v59 = vmul.f32 %v9579_v3, %v4760_v62 }
 0x75d   :  { %v4861_v44 = vpop.permute.xlu0 %4860 }
 0x75e   :  { %v4909_v45 = vmul.f32 %v9583_v14, %v4861_v44  ;;  %v4762_v17 = vadd.f32 %v9579_v3, %v4761_v59 }
 0x75f   :  { %v9585_v16 = vpop.eup %9584  ;;  %v4989_v52 = vpop.f32.mrf.mxu2 }
 0x760   :  { %v4928_v48 = vpack.c.bf16 %v4909_v45, %v4908_v13  ;;  %v4766_v33 = vsel %vm4765_vm0, %v9579_v3, %v4762_v17  ;;  %v4774_v9 = vmul.f32 %v9585_v16, %v4515_v15  ;;  %vm4779_vm3 = vweird.f32 %v9585_v16 }
 0x761   :  { %v4771_v40 = vsel %vm4768_vm1, %v4770_v57, %v4766_v33  ;;  %vm4780_vm5 = vmor %vm4778_vm4, %vm4779_vm3  ;;  %v4273_v15 = vadd.f32 %v13075_v4, %v4248_v1  ;;  %v4990_v11 = vadd.f32 %v13104_v6, %v4989_v52 }
 0x762   :  { %8423 = vmatmul.msk.bf16.gmra.mxu2 %vm278_vm2, %v4928_v48  ;;  %4870 = vrot.lane.b32.xlu2 %v4771_v40, %s9808_s30  ;;  %v4775_v2 = vsub.f32 1.0, %v4774_v9 }
 0x763   :  { %v13113_v59 = vadd.f32 %v4990_v11, %v11914_v53 }
 0x764   :  { %v4776_v0 = vmul.f32 %v9585_v16, %v4775_v2 }
 0x765   :  { %v5067_v4 = vmul.f32 %v13113_v59, %v13113_v59  ;;  %v13125_v53 = vsel %vm2907_vm7, %v13113_v59, 0.0 }
 0x766   :  { %v4777_v36 = vadd.f32 %v9585_v16, %v4776_v0 }
 0x767   :  { %v4991_v3 = vpop.f32.mrf.mxu2 }
 0x768   :  { %v4781_v46 = vsel %vm4780_vm5, %v9585_v16, %v4777_v36  ;;  %v4992_v13 = vadd.f32 %v13104_v6, %v4991_v3 }
 0x769   :  { %v4786_v41 = vsel %vm4783_vm6, %v4785_v55, %v4781_v46 }
 0x76a   :  { %4872 = vrot.lane.b32.xlu0 %v4786_v41, %s9808_s30  ;;  %v13142_v33 = vadd.f32 %v4992_v13, %v11928_v19 }
 0x76b   :  { %v4393_v30 = vpop.f32.mrf.mxu1 }
 0x76c   :  { %v13095_v61 = vadd.f32 %v4393_v30, %v4272_v20  ;;  %v5068_v36 = vmul.f32 %v13142_v33, %v13142_v33  ;;  %v5106_v41 = vsel %vm2907_vm7, %v13142_v33, 0.0 }
 0x76e   :  { %v8403_v28 = vmul.f32 -1.442695, %v13095_v61 }
 0x770   :  { %9586 = vpow2.f32 %v8403_v28 }
 0x772   :  { %5537 = vrot.lane.b32.xlu0 %v9246_v43, %s9806_s20 }
 0x773   :  { %v4395_v62 = vpop.f32.mrf.mxu1 }
 0x774   :  { %v13109_v39 = vadd.f32 %v4395_v62, %v4273_v15  ;;  %v4865_v58 = vpop.permute.xlu2 %4864 }
 0x776   :  { %v9587_v51 = vpop.eup %9586  ;;  %v8404_v12 = vmul.f32 -1.442695, %v13109_v39 }
 0x777   :  { %v4516_v63 = vadd.f32 1.0, %v9587_v51  ;;  %v5146_v51 = vsel %vm2907_vm7, %v5068_v36, 0.0 }
 0x778   :  { %9588 = vpow2.f32 %v8404_v12  ;;  %v4994_v14 = vpop.f32.mrf.mxu2 }
 0x779   :  { %9590 = vrcp.f32 %v4516_v63  ;;  %v4995_v44 = vadd.f32 %v13104_v6, %v4994_v14  ;;  %v4799_v55 = vand.u32 2147483648, %v4516_v63  ;;  %v4797_v28 = vand.u32 2147483647, %v4516_v63 }
 0x77a   :  { %9592 = vtanh.f32 %v13047_v29  ;;  %v13139_v29 = vsel %vm2907_vm7, %v5067_v4, 0.0  ;;  %vm4793_vm9 = vweird.f32 %v4516_v63 }
 0x77b   :  { %v13120_v45 = vadd.f32 %v4995_v44, %v11989_v60  ;;  %9594 = vtanh.f32 %v13054_v42  ;;  %v4800_v44 = vor.u32 1.1754944e-38, %v4799_v55  ;;  %vm4798_vm11 = vcmp.eq.f32.partialorder %v4797_v28, 8.507059e+37 }
 0x77d   :  { %v5069_v17 = vmul.f32 %v13120_v45, %v13120_v45  ;;  %v13131_v16 = vsel %vm2907_vm7, %v13120_v45, 0.0 }
 0x77e   :  { %v9589_v57 = vpop.eup %9588  ;;  %v13136_v60 = vadd.f32 %v13131_v16, %v13125_v53 }
 0x77f   :  { %v9591_v48 = vpop.eup %9590  ;;  %v4517_v9 = vadd.f32 1.0, %v9589_v57  ;;  %v13145_v40 = vsel %vm2907_vm7, %v5069_v17, 0.0 }
 0x780   :  { %v5129_v2 = vadd.f32 %v13145_v40, %v13139_v29  ;;  %v4996_v26 = vpop.f32.mrf.mxu2  ;;  %v4789_v42 = vmul.f32 %v9591_v48, %v4516_v63  ;;  %v9593_v52 = vpop.eup %9592  ;;  %vm4794_vm8 = vweird.f32 %v9591_v48 }
 0x781   :  { %9596 = vrcp.f32 %v4517_v9  ;;  %v4997_v0 = vadd.f32 %v13104_v6, %v4996_v26  ;;  %v9595_v46 = vpop.eup %9594  ;;  %vm4795_vm10 = vmor %vm4793_vm9, %vm4794_vm8  ;;  %vm4808_vm15 = vweird.f32 %v4517_v9 }
 0x782   :  { %v4790_v5 = vsub.f32 1.0, %v4789_v42  ;;  %v4911_v43 = vmul.f32 %v9595_v46, %v4865_v58  ;;  %v4814_v58 = vand.u32 2147483648, %v4517_v9  ;;  %9598 = vtanh.f32 %v13061_v10 }
 0x783   :  { %v13153_v19 = vadd.f32 %v4997_v0, %v15234_v56  ;;  %9600 = vtanh.f32 %v13065_v25 }
 0x784   :  { %v4863_v20 = vpop.permute.xlu1 %4862  ;;  %v4791_v30 = vmul.f32 %v9591_v48, %v4790_v5  ;;  %v4815_v46 = vor.u32 1.1754944e-38, %v4814_v58 }
 0x785   :  { %v5070_v1 = vmul.f32 %v13153_v19, %v13153_v19  ;;  %v5107_v3 = vsel %vm2907_vm7, %v13153_v19, 0.0  ;;  %v4910_v15 = vmul.f32 %v9593_v52, %v4863_v20  ;;  %v4812_v52 = vand.u32 2147483647, %v4517_v9 }
 0x786   :  { %v5108_v11 = vadd.f32 %v5107_v3, %v5106_v41  ;;  %v4792_v56 = vadd.f32 %v9591_v48, %v4791_v30 }
 0x787   :  { %v9597_v62 = vpop.eup %9596  ;;  %v5147_v12 = vsel %vm2907_vm7, %v5070_v1, 0.0  ;;  %v4929_v14 = vpack.c.bf16 %v4911_v43, %v4910_v15  ;;  %vm4813_vm1 = vcmp.eq.f32.partialorder %v4812_v52, 8.507059e+37  ;;  %v5223_v1 = vadd.f32 %v5106_v41, %v13125_v53 }
 0x788   :  { %v5148_v4 = vadd.f32 %v5147_v12, %v5146_v51  ;;  %v4999_v13 = vpop.f32.mrf.mxu2  ;;  %v4796_v17 = vsel %vm4795_vm10, %v9591_v48, %v4792_v56  ;;  %v4804_v57 = vmul.f32 %v9597_v62, %v4517_v9  ;;  %vm4809_vm14 = vweird.f32 %v9597_v62 }
 0x789   :  { %v5000_v26 = vadd.f32 %v13104_v6, %v4999_v13  ;;  %v4801_v42 = vsel %vm4798_vm11, %v4800_v44, %v4796_v17  ;;  %8424 = vmatmul.msk.bf16.gmra.mxu2 %vm278_vm2, %v4929_v14  ;;  %vm4810_vm0 = vmor %vm4808_vm15, %vm4809_vm14  ;;  %v5230_v15 = vadd.f32 %v5107_v3, %v13131_v16  ;;  %v5224_v14 = vrot.slane %v5223_v1, 4 }
 0x78a   :  { %4874 = vrot.lane.b32.xlu1 %v4801_v42, %s9808_s30  ;;  %v4805_v63 = vsub.f32 1.0, %v4804_v57  ;;  %v5310_v44 = vadd.f32 %v5147_v12, %v13145_v40 }
 0x78b   :  { %v13167_v0 = vadd.f32 %v5000_v26, %v15239_v18  ;;  %v5231_v13 = vrot.slane %v5230_v15, 4  ;;  %v5225_v16 = vadd.f32 %v5224_v14, %v5223_v1 }
 0x78c   :  { %v4806_v5 = vmul.f32 %v9597_v62, %v4805_v63  ;;  %v5311_v3 = vrot.slane %v5310_v44, 4 }
 0x78d   :  { %v5071_v48 = vmul.f32 %v13167_v0, %v13167_v0  ;;  %v5090_v9 = vsel %vm2907_vm7, %v13167_v0, 0.0  ;;  %v5232_v17 = vadd.f32 %v5231_v13, %v5230_v15 }
 0x78e   :  { %v4807_v36 = vadd.f32 %v9597_v62, %v4806_v5  ;;  %v13181_v56 = vadd.f32 %v5090_v9, %v13136_v60  ;;  %v5312_v40 = vadd.f32 %v5311_v3, %v5310_v44 }
 0x78f   :  { %v5130_v55 = vsel %vm2907_vm7, %v5071_v48, 0.0  ;;  %v5233_v42 = vrot.slane %v5232_v17, 2 }
 0x790   :  { %v13172_v20 = vadd.f32 %v5130_v55, %v5129_v2  ;;  %v5001_v30 = vpop.f32.mrf.mxu2  ;;  %v4811_v28 = vsel %vm4810_vm0, %v9597_v62, %v4807_v36  ;;  %v5303_v2 = vadd.f32 %v5146_v51, %v13139_v29  ;;  %v5226_v29 = vrot.slane %v5225_v16, 2 }
 0x791   :  { %v5002_v18 = vadd.f32 %v13104_v6, %v5001_v30  ;;  %v4816_v43 = vsel %vm4813_vm1, %v4815_v46, %v4811_v28  ;;  %v5234_v46 = vadd.f32 %v5233_v42, %v5232_v17  ;;  %v5313_v30 = vrot.slane %v5312_v40, 2 }
 0x792   :  { %4876 = vrot.lane.b32.xlu2 %v4816_v43, %s9808_s30  ;;  %v5304_v53 = vrot.slane %v5303_v2, 4  ;;  %v5227_v52 = vadd.f32 %v5226_v29, %v5225_v16 }
 0x793   :  { %v13185_v62 = vadd.f32 %v5002_v18, %v15240_v38 }
 0x794   :  { %v5305_v51 = vadd.f32 %v5304_v53, %v5303_v2  ;;  %v5228_v43 = vrot.slane %v5227_v52, 1  ;;  %v5235_v2 = vrot.slane %v5234_v46, 1 }
 0x795   :  { %v5072_v41 = vmul.f32 %v13185_v62, %v13185_v62  ;;  %v5109_v60 = vsel %vm2907_vm7, %v13185_v62, 0.0 }
 0x796   :  { %v13192_v57 = vadd.f32 %v5109_v60, %v5108_v11  ;;  %v5237_v26 = vadd.f32 %v5109_v60, %v5090_v9  ;;  %v5306_v48 = vrot.slane %v5305_v51, 2  ;;  %v5314_v9 = vadd.f32 %v5313_v30, %v5312_v40 }
 0x797   :  { %v5149_v38 = vsel %vm2907_vm7, %v5072_v41, 0.0 }
 0x798   :  { %v13195_v12 = vadd.f32 %v5149_v38, %v5148_v4  ;;  %v5317_v63 = vadd.f32 %v5149_v38, %v5130_v55  ;;  %v5238_v58 = vrot.slane %v5237_v26, 4  ;;  %v5307_v1 = vadd.f32 %v5306_v48, %v5305_v51 }
 0x799   :  { %v5229_v4 = vadd.f32 %v5228_v43, %v5227_v52  ;;  %v5236_v55 = vadd.f32 %v5235_v2, %v5234_v46  ;;  %v5315_v53 = vrot.slane %v5314_v9, 1 }
 0x79a   :  { %v5318_v5 = vrot.slane %v5317_v63, 4  ;;  %v5239_v36 = vadd.f32 %v5238_v58, %v5237_v26  ;;  %v5308_v13 = vrot.slane %v5307_v1, 1  ;;  %v9599_v58 = vpop.eup %9598 }
 0x79b   :  { %v13198_v3 = vmul.f32 0.0625, %v5229_v4  ;;  %v13201_v60 = vmul.f32 0.0625, %v5236_v55  ;;  %v5316_v29 = vadd.f32 %v5315_v53, %v5314_v9  ;;  %v9601_v52 = vpop.eup %9600  ;;  %v8428_v4 = vld [vmem:[%s14863_s3 + $0x20] sm:$0xff] }
 0x79c   :  { %v5319_v28 = vadd.f32 %v5318_v5, %v5317_v63  ;;  %v5240_v11 = vrot.slane %v5239_v36, 2  ;;  %v5309_v17 = vadd.f32 %v5308_v13, %v5307_v1  ;;  %v8429_v13 = vld [vmem:[%s14863_s3 + $0x28] sm:$0xff]  ;;  %5200 = vrot.lane.b32.xlu1 %v8428_v4, %s9806_s20 }
 0x79d   :  { %v5383_v42 = vmul.f32 %v13198_v3, %v13198_v3  ;;  %v5374_v63 = vmul.f32 0.0625, %v5316_v29  ;;  %v5384_v10 = vmul.f32 %v13201_v60, %v13201_v60  ;;  %5202 = vrot.lane.b32.xlu2 %v8429_v13, %s9806_s20 }
 0x79e   :  { %v5320_v18 = vrot.slane %v5319_v28, 2  ;;  %v5241_v15 = vadd.f32 %v5240_v11, %v5239_v36  ;;  %v5373_v26 = vmul.f32 0.0625, %v5309_v17 }
 0x7a0   :  { %v5242_v14 = vrot.slane %v5241_v15, 1  ;;  %v5321_v44 = vadd.f32 %v5320_v18, %v5319_v28  ;;  %v5393_v30 = vsub.f32 %v5373_v26, %v5383_v42  ;;  %v5394_v28 = vsub.f32 %v5374_v63, %v5384_v10 }
 0x7a2   :  { %v5243_v41 = vadd.f32 %v5242_v14, %v5241_v15  ;;  %v5322_v16 = vrot.slane %v5321_v44, 1  ;;  %v5403_v43 = vmul.f32 1.0666667, %v5393_v30  ;;  %v5404_v1 = vmul.f32 1.0666667, %v5394_v28 }
 0x7a4   :  { %v13203_v51 = vmul.f32 0.0625, %v5243_v41  ;;  %v5323_v38 = vadd.f32 %v5322_v16, %v5321_v44  ;;  %v5413_v2 = vmax.f32 %v5403_v43, 0.0  ;;  %v5414_v9 = vmax.f32 %v5404_v1, 0.0 }
 0x7a6   :  { %v5375_v5 = vmul.f32 0.0625, %v5323_v38  ;;  %v5385_v25 = vmul.f32 %v13203_v51, %v13203_v51  ;;  %v5423_v44 = vadd.f32 1e-05, %v5413_v2  ;;  %v5424_v55 = vadd.f32 1e-05, %v5414_v9 }
 0x7a8   :  { %v5395_v18 = vsub.f32 %v5375_v5, %v5385_v25  ;;  %9602 = vrsqrt.f32 %v5423_v44  ;;  %vm5439_vm3 = vweird.f32 %v5423_v44  ;;  %vm5449_vm9 = vweird.f32 %v5424_v55 }
 0x7a9   :  { %9604 = vrsqrt.f32 %v5424_v55 }
 0x7aa   :  { %v5405_v15 = vmul.f32 1.0666667, %v5395_v18 }
 0x7ac   :  { %v4867_v40 = vpop.permute.xlu0 %4866  ;;  %v5415_v14 = vmax.f32 %v5405_v15, 0.0 }
 0x7ad   :  { %v4912_v36 = vmul.f32 %v9599_v58, %v4867_v40 }
 0x7ae   :  { %v5425_v41 = vadd.f32 1e-05, %v5415_v14  ;;  %v13220_v16 = vpop.eup %9602 }
 0x7af   :  { %v13222_v17 = vpop.eup %9604  ;;  %v5434_v42 = vmul.f32 %v13220_v16, %v5423_v44  ;;  %vm5440_vm4 = vweird.f32 %v13220_v16 }
 0x7b0   :  { %9606 = vrsqrt.f32 %v5425_v41  ;;  %v5444_v40 = vmul.f32 %v13222_v17, %v5424_v55  ;;  %vm5450_vm5 = vweird.f32 %v13222_v17  ;;  %vm5441_vm8 = vmor %vm5439_vm3, %vm5440_vm4  ;;  %vm5459_vm11 = vweird.f32 %v5425_v41 }
 0x7b1   :  { %v5435_v58 = vmul.f32 %v13220_v16, %v5434_v42  ;;  %9608 = vtanh.f32 %v13079_v24  ;;  %vm5451_vm10 = vmor %vm5449_vm9, %vm5450_vm5 }
 0x7b2   :  { %v5445_v5 = vmul.f32 %v13222_v17, %v5444_v40  ;;  %9610 = vtanh.f32 %v13085_v47 }
 0x7b3   :  { %9612 = vtanh.f32 %v13095_v61 }
 0x7b4   :  { %v4869_v48 = vpop.permute.xlu1 %4868  ;;  %9614 = vtanh.f32 %v13109_v39 }
 0x7b5   :  { %v4913_v46 = vmul.f32 %v9601_v52, %v4869_v48 }
 0x7b6   :  { %v13225_v38 = vpop.eup %9606 }
 0x7b7   :  { %v4930_v11 = vpack.c.bf16 %v4913_v46, %v4912_v36  ;;  %v5454_v10 = vmul.f32 %v13225_v38, %v5425_v41  ;;  %v5446_v46 = vmul.f32 0.5, %v5445_v5  ;;  %v9609_v1 = vpop.eup %9608  ;;  %vm5460_vm6 = vweird.f32 %v13225_v38 }
 0x7b8   :  { %v9611_v2 = vpop.eup %9610  ;;  %vm5461_vm14 = vmor %vm5459_vm11, %vm5460_vm6 }
 0x7b9   :  { %8425 = vmatmul.msk.bf16.gmra.mxu2 %vm278_vm2, %v4930_v11  ;;  %v5455_v52 = vmul.f32 %v13225_v38, %v5454_v10  ;;  %v5447_v15 = vsub.f32 1.5, %v5446_v46 }
 0x7bb   :  { %v5456_v11 = vmul.f32 0.5, %v5455_v52  ;;  %v5448_v10 = vmul.f32 %v13222_v17, %v5447_v15 }
 0x7bc   :  { %v4871_v18 = vpop.permute.xlu2 %4870 }
 0x7bd   :  { %v5004_v53 = vpop.f32.mrf.mxu2  ;;  %v4914_v13 = vmul.f32 %v9609_v1, %v4871_v18 }
 0x7be   :  { %v5005_v29 = vadd.f32 %v13104_v6, %v5004_v53 }
 0x7c0   :  { %v13230_v63 = vadd.f32 %v5005_v29, %v15243_v37  ;;  %v5436_v37 = vmul.f32 0.5, %v5435_v58 }
 0x7c2   :  { %v5073_v25 = vmul.f32 %v13230_v63, %v13230_v63  ;;  %v5437_v47 = vsub.f32 1.5, %v5436_v37  ;;  %v13260_v40 = vsel %vm2907_vm7, %v13230_v63, 0.0 }
 0x7c3   :  { %v5093_v44 = vadd.f32 %v13260_v40, %v13181_v56  ;;  %v5452_v56 = vsel %vm5451_vm10, %v13222_v17, %v5448_v10 }
 0x7c4   :  { %v13242_v30 = vsel %vm2907_vm7, %v5073_v25, 0.0 }
 0x7c5   :  { %v5006_v26 = vpop.f32.mrf.mxu2  ;;  %v5133_v24 = vadd.f32 %v13242_v30, %v13172_v20 }
 0x7c6   :  { %v5007_v9 = vadd.f32 %v13104_v6, %v5006_v26  ;;  %v5438_v26 = vmul.f32 %v13220_v16, %v5437_v47 }
 0x7c8   :  { %v13267_v58 = vadd.f32 %v5007_v9, %v15244_v23  ;;  %v5442_v23 = vsel %vm5441_vm8, %v13220_v16, %v5438_v26 }
 0x7ca   :  { %v5111_v18 = vsel %vm2907_vm7, %v13267_v58, 0.0 }
 0x7d5   :  { %v5009_v48 = vpop.f32.mrf.mxu2 }
 0x7d6   :  { %v5010_v36 = vadd.f32 %v13104_v6, %v5009_v48 }
 0x7d8   :  { %v13245_v28 = vadd.f32 %v5010_v36, %v15245_v8  ;;  %v5457_v8 = vsub.f32 1.5, %v5456_v11  ;;  %v5074_v36 = vmul.f32 %v13267_v58, %v13267_v58 }
 0x7da   :  { %v5075_v43 = vmul.f32 %v13245_v28, %v13245_v28  ;;  %v5458_v25 = vmul.f32 %v13225_v38, %v5457_v8  ;;  %v5094_v52 = vsel %vm2907_vm7, %v13245_v28, 0.0 }
 0x7db   :  { %v13278_v48 = vadd.f32 %v5094_v52, %v5093_v44 }
 0x7dc   :  { %v13253_v14 = vsel %vm2907_vm7, %v5075_v43, 0.0  ;;  %v4873_v4 = vpop.permute.xlu0 %4872  ;;  %v5462_v41 = vsel %vm5461_vm14, %v13225_v38, %v5458_v25  ;;  %v13307_v43 = vsel %vm2907_vm7, %v5074_v36, 0.0 }
 0x7dd   :  { %v13256_v53 = vadd.f32 %v13253_v14, %v5133_v24  ;;  %v4915_v29 = vmul.f32 %v9611_v2, %v4873_v4  ;;  %v5011_v42 = vpop.f32.mrf.mxu2  ;;  %v5112_v24 = vadd.f32 %v5111_v18, %v13192_v57  ;;  %v9613_v57 = vpop.eup %9612 }
 0x7de   :  { %v5012_v5 = vadd.f32 %v13104_v6, %v5011_v42  ;;  %v9615_v9 = vpop.eup %9614 }
 0x7df   :  { %v4931_v20 = vpack.c.bf16 %v4915_v29, %v4914_v13 }
 0x7e0   :  { %v13283_v37 = vadd.f32 %v5012_v5, %v15246_v21 }
 0x7e1   :  { %8426 = vmatmul.msk.bf16.gmra.mxu2 %vm278_vm2, %v4931_v20 }
 0x7e2   :  { %15254 = vst [vmem:[#allocation7_spill] sm:$0xff] %v13283_v37  ;;  %v5076_v1 = vmul.f32 %v13283_v37, %v13283_v37 }
 0x7e4   :  { %v13285_v55 = vpop.permute.xlu0 %5537  ;;  %v5153_v47 = vsel %vm2907_vm7, %v5076_v1, 0.0 }
 0x7e5   :  { %v13290_v46 = vmul.f32 %v13285_v55, %v5442_v23  ;;  %v13293_v16 = vmul.f32 %v13285_v55, %v5452_v56  ;;  %v13296_v11 = vmul.f32 %v13285_v55, %v5462_v41  ;;  %v5014_v5 = vpop.f32.mrf.mxu2 }
 0x7e7   :  { %v5552_v21 = vmul.f32 %v13290_v46, %v13198_v3  ;;  %v5553_v17 = vmul.f32 %v13293_v16, %v13201_v60  ;;  %v5554_v38 = vmul.f32 %v13296_v11, %v13203_v51  ;;  %v5113_v3 = vsel %vm2907_vm7, %v13283_v37, 0.0 }
 0x7e8   :  { %v13317_v60 = vadd.f32 %v5113_v3, %v5112_v24  ;;  %v5152_v51 = vadd.f32 %v13307_v43, %v13195_v12  ;;  %v5251_v42 = vadd.f32 %v5113_v3, %v5094_v52  ;;  %v5331_v12 = vadd.f32 %v5153_v47, %v13253_v14 }
 0x7e9   :  { %5572 = vrot.lane.b32.xlu0 %v5552_v21, %s9808_s30  ;;  %5574 = vrot.lane.b32.xlu1 %v5553_v17, %s9808_s30 }
 0x7ea   :  { %5576 = vrot.lane.b32.xlu2 %v5554_v38, %s9808_s30  ;;  %v13322_v15 = vadd.f32 %v5153_v47, %v5152_v51  ;;  %v5252_v20 = vrot.slane %v5251_v42, 4  ;;  %v5332_v10 = vrot.slane %v5331_v12, 4 }
 0x7ec   :  { %v4877_v2 = vpop.permute.xlu2 %4876  ;;  %v5253_v26 = vadd.f32 %v5252_v20, %v5251_v42  ;;  %v5333_v61 = vadd.f32 %v5332_v10, %v5331_v12 }
 0x7ed   :  { %v4917_v8 = vmul.f32 %v9615_v9, %v4877_v2  ;;  %v5016_v23 = vpop.f32.mrf.mxu2 }
 0x7ee   :  { %v5254_v25 = vrot.slane %v5253_v26, 2  ;;  %v5334_v39 = vrot.slane %v5333_v61, 2 }
 0x7f0   :  { %v5255_v44 = vadd.f32 %v5254_v25, %v5253_v26  ;;  %v5335_v56 = vadd.f32 %v5334_v39, %v5333_v61  ;;  %v5244_v25 = vadd.f32 %v5111_v18, %v13260_v40  ;;  %v5324_v40 = vadd.f32 %v13307_v43, %v13242_v30 }
 0x7f2   :  { %v5256_v36 = vrot.slane %v5255_v44, 1  ;;  %v5336_v21 = vrot.slane %v5335_v56, 1 }
 0x7f4   :  { %v5257_v41 = vadd.f32 %v5256_v36, %v5255_v44  ;;  %v5337_v52 = vadd.f32 %v5336_v21, %v5335_v56  ;;  %v5245_v56 = vrot.slane %v5244_v25, 4 }
 0x7f6   :  { %v13330_v38 = vmul.f32 0.0625, %v5257_v41  ;;  %v5377_v1 = vmul.f32 0.0625, %v5337_v52 }
 0x7f8   :  { %v5387_v14 = vmul.f32 %v13330_v38, %v13330_v38 }
 0x7fa   :  { %v5397_v24 = vsub.f32 %v5377_v1, %v5387_v14  ;;  %v5246_v14 = vadd.f32 %v5245_v56, %v5244_v25  ;;  %v5015_v56 = vadd.f32 %v13104_v6, %v5014_v5 }
 0x7fc   :  { %v4875_v4 = vpop.permute.xlu1 %4874  ;;  %v5407_v51 = vmul.f32 1.0666667, %v5397_v24  ;;  %v5325_v24 = vrot.slane %v5324_v40, 4 }
 0x7fd   :  { %v4916_v13 = vmul.f32 %v9613_v57, %v4875_v4 }
 0x7fe   :  { %v5417_v47 = vmax.f32 %v5407_v51, 0.0 }
 0x7ff   :  { %v4932_v29 = vpack.c.bf16 %v4917_v8, %v4916_v13 }
 0x800   :  { %v5427_v57 = vadd.f32 1e-05, %v5417_v47 }
 0x801   :  { %8427 = vmatmul.msk.bf16.gmra.mxu2 %vm278_vm2, %v4932_v29 }
 0x802   :  { %9616 = vrsqrt.f32 %v5427_v57  ;;  %vm5479_vm0 = vweird.f32 %v5427_v57 }
 0x808   :  { %v9617_v13 = vpop.eup %9616 }
 0x809   :  { %v5474_v20 = vmul.f32 %v9617_v13, %v5427_v57  ;;  %vm5480_vm15 = vweird.f32 %v9617_v13 }
 0x80a   :  { %vm5481_vm1 = vmor %vm5479_vm0, %vm5480_vm15 }
 0x80b   :  { %v5475_v10 = vmul.f32 %v9617_v13, %v5474_v20  ;;  %v5017_v20 = vadd.f32 %v13104_v6, %v5016_v23 }
 0x80c   :  { %v13328_v17 = vpop.f32.mrf.mxu2 }
 0x80d   :  { %v5476_v44 = vmul.f32 0.5, %v5475_v10 }
 0x80f   :  { %v5477_v1 = vsub.f32 1.5, %v5476_v44 }
 0x811   :  { %v5478_v43 = vmul.f32 %v9617_v13, %v5477_v1 }
 0x814   :  { %v13334_v3 = vpop.f32.mrf.mxu2 }
 0x83c   :  { %v5024_v2 = vpop.f32.mrf.mxu2 }
 0x83d   :  { %v13337_v4 = vadd.f32 %v13104_v6, %v5024_v2 }
 0x83f   :  { %15255 = vst [vmem:[#allocation6_spill] sm:$0xff] %v13337_v4  ;;  %v13344_v29 = vadd.f32 %v13337_v4, %v15251_v32 }
 0x841   :  { %15257 = vst [vmem:[#allocation2_spill] sm:$0xff] %v13344_v29  ;;  %v5081_v12 = vmul.f32 %v13344_v29, %v13344_v29  ;;  %v13357_v61 = vsel %vm2907_vm7, %v13344_v29, 0.0 }
 0x843   :  { %v13366_v39 = vsel %vm2907_vm7, %v5081_v12, 0.0  ;;  %v13379_v12 = vld [vmem:[%s14862_s6 + $0x2] sm:$0x1] }
 0x844   :  { %v5026_v9 = vpop.f32.mrf.mxu2 }
 0x845   :  { %v13340_v8 = vadd.f32 %v13104_v6, %v5026_v9 }
 0x847   :  { %15256 = vst [vmem:[#allocation3_spill] sm:$0xff] %v13340_v8  ;;  %v13348_v42 = vadd.f32 %v13340_v8, %v15252_v35 }
 0x849   :  { %15258 = vst [vmem:[#allocation5_spill] sm:$0xff] %v13348_v42  ;;  %v5082_v26 = vmul.f32 %v13348_v42, %v13348_v42  ;;  %v13361_v32 = vsel %vm2907_vm7, %v13348_v42, 0.0 }
 0x84a   :  { %v5272_v35 = vadd.f32 %v13361_v32, %v13357_v61 }
 0x84b   :  { %v13369_v36 = vsel %vm2907_vm7, %v5082_v26, 0.0  ;;  %v5247_v26 = vrot.slane %v5246_v14, 2 }
 0x84c   :  { %v5273_v18 = vrot.slane %v5272_v35, 4  ;;  %v5352_v41 = vadd.f32 %v13369_v36, %v13366_v39 }
 0x84d   :  { %v5248_v1 = vadd.f32 %v5247_v26, %v5246_v14 }
 0x84e   :  { %v5274_v21 = vadd.f32 %v5273_v18, %v5272_v35  ;;  %v5353_v52 = vrot.slane %v5352_v41, 4  ;;  %v5326_v35 = vadd.f32 %v5325_v24, %v5324_v40  ;;  %v13390_v24 = vadd.f32 %v5015_v56, %v15247_v49 }
 0x850   :  { %v5275_v51 = vrot.slane %v5274_v21, 2  ;;  %v5354_v47 = vadd.f32 %v5353_v52, %v5352_v41  ;;  %v5482_v52 = vsel %vm5481_vm1, %v9617_v13, %v5478_v43  ;;  %15260 = vst [vmem:[#allocation9_spill] sm:$0xff] %v13390_v24  ;;  %v5077_v49 = vmul.f32 %v13390_v24, %v13390_v24 }
 0x851   :  { %v13393_v5 = vmul.f32 %v13285_v55, %v5482_v52 }
 0x852   :  { %v5276_v2 = vadd.f32 %v5275_v51, %v5274_v21  ;;  %v5355_v9 = vrot.slane %v5354_v47, 2  ;;  %v13384_v21 = vadd.f32 %v5017_v20, %v15248_v34  ;;  %v5327_v51 = vrot.slane %v5326_v35, 2 }
 0x853   :  { %15261 = vst [vmem:[#allocation8_spill] sm:$0xff] %v13393_v5  ;;  %v5556_v43 = vmul.f32 %v13393_v5, %v13330_v38 }
 0x854   :  { %v5277_v25 = vrot.slane %v5276_v2, 1  ;;  %v5356_v44 = vadd.f32 %v5355_v9, %v5354_v47  ;;  %15259 = vst [vmem:[#allocation4_spill] sm:$0xff] %v13384_v21  ;;  %v5078_v34 = vmul.f32 %v13384_v21, %v13384_v21  ;;  %v13401_v13 = vsel %vm2907_vm7, %v13384_v21, 0.0 }
 0x855   :  { %v5328_v9 = vadd.f32 %v5327_v51, %v5326_v35 }
 0x856   :  { %v5278_v23 = vadd.f32 %v5277_v25, %v5276_v2  ;;  %v5357_v41 = vrot.slane %v5356_v44, 1  ;;  %v5249_v2 = vrot.slane %v5248_v1, 1  ;;  %v13414_v25 = vsel %vm2907_vm7, %v5078_v34, 0.0 }
 0x857   :  { %v13430_v34 = vadd.f32 %v13104_v6, %v13328_v17 }
 0x858   :  { %v13387_v8 = vmul.f32 0.0625, %v5278_v23  ;;  %v5358_v40 = vadd.f32 %v5357_v41, %v5356_v44  ;;  %v5250_v35 = vadd.f32 %v5249_v2, %v5248_v1  ;;  %v5329_v44 = vrot.slane %v5328_v9, 1 }
 0x859   :  { %15263 = vst [vmem:[#allocation10_spill] sm:$0xff] %v13430_v34  ;;  %v13446_v17 = vadd.f32 %v13430_v34, %v15249_v31 }
 0x85a   :  { %v5380_v57 = vmul.f32 0.0625, %v5358_v40  ;;  %v5390_v47 = vmul.f32 %v13387_v8, %v13387_v8  ;;  %v13422_v51 = vmul.f32 0.0625, %v5250_v35  ;;  %v5330_v40 = vadd.f32 %v5329_v44, %v5328_v9 }
 0x85b   :  { %v5573_v30 = vpop.permute.xlu0 %5572  ;;  %15267 = vst [vmem:[#allocation43_spill] sm:$0xff] %v13446_v17 }
 0x85c   :  { %v5602_v10 = vsub.f32 %v13379_v12, %v5573_v30  ;;  %v5400_v20 = vsub.f32 %v5380_v57, %v5390_v47  ;;  %v13407_v30 = vsel %vm2907_vm7, %v13390_v24, 0.0  ;;  %v13426_v57 = vadd.f32 %v13104_v6, %v13334_v3 }
 0x85d   :  { %v5258_v26 = vadd.f32 %v13401_v13, %v13407_v30  ;;  %v5386_v9 = vmul.f32 %v13422_v51, %v13422_v51 }
 0x85e   :  { %v5700_v18 = vperm.slane %v5602_v10, 0  ;;  %v5410_v10 = vmul.f32 1.0666667, %v5400_v20  ;;  %15262 = vst [vmem:[#allocation11_spill] sm:$0xff] %v13426_v57  ;;  %v13442_v3 = vadd.f32 %v13426_v57, %v15250_v7 }
 0x85f   :  { %v5259_v23 = vrot.slane %v5258_v26, 4 }
 0x860   :  { %5710 = vrot.lane.b32.xlu2 %v5700_v18, %s9806_s20  ;;  %v5420_v56 = vmax.f32 %v5410_v10, 0.0  ;;  %v13418_v18 = vsel %vm2907_vm7, %v5077_v49, 0.0  ;;  %v5376_v49 = vmul.f32 0.0625, %v5330_v40  ;;  %15266 = vst [vmem:[#allocation14_spill] sm:$0xff] %v13442_v3  ;;  %v13458_v7 = vsel %vm2907_vm7, %v13442_v3, 0.0 }
 0x861   :  { %v5338_v41 = vadd.f32 %v13414_v25, %v13418_v18  ;;  %v5260_v1 = vadd.f32 %v5259_v23, %v5258_v26 }
 0x862   :  { %v5430_v38 = vadd.f32 1e-05, %v5420_v56  ;;  %v5396_v56 = vsub.f32 %v5376_v49, %v5386_v9  ;;  %v5079_v49 = vmul.f32 %v13446_v17, %v13446_v17 }
 0x863   :  { %v5339_v47 = vrot.slane %v5338_v41, 4  ;;  %v5261_v26 = vrot.slane %v5260_v1, 2 }
 0x864   :  { %v5029_v14 = vpop.f32.mrf.mxu2  ;;  %9618 = vrsqrt.f32 %v5430_v38  ;;  %v5406_v9 = vmul.f32 1.0666667, %v5396_v56  ;;  %vm5509_vm4 = vweird.f32 %v5430_v38  ;;  %v5138_v42 = vsel %vm2907_vm7, %v5079_v49, 0.0 }
 0x865   :  { %v13433_v2 = vadd.f32 %v13104_v6, %v5029_v14  ;;  %v5340_v10 = vadd.f32 %v5339_v47, %v5338_v41  ;;  %v5080_v41 = vmul.f32 %v13442_v3, %v13442_v3  ;;  %v5262_v31 = vadd.f32 %v5261_v26, %v5260_v1 }
 0x866   :  { %v5416_v3 = vmax.f32 %v5406_v9, 0.0 }
 0x867   :  { %15264 = vst [vmem:[#allocation13_spill] sm:$0xff] %v13433_v2  ;;  %v13450_v14 = vadd.f32 %v13433_v2, %v12346_v27  ;;  %v13478_v2 = vsel %vm2907_vm7, %v5080_v41, 0.0  ;;  %v5263_v4 = vrot.slane %v5262_v31, 1 }
 0x868   :  { %5580 = vrot.lane.b32.xlu2 %v5556_v43, %s9808_s30  ;;  %v13495_v21 = vadd.f32 1e-05, %v5416_v3 }
 0x869   :  { %15268 = vst [vmem:[#allocation33_spill] sm:$0xff] %v13450_v14  ;;  %v5083_v27 = vmul.f32 %v13450_v14, %v13450_v14  ;;  %v5102_v1 = vsel %vm2907_vm7, %v13450_v14, 0.0  ;;  %v5345_v14 = vadd.f32 %v13478_v2, %v5138_v42 }
 0x86a   :  { %v9619_v43 = vpop.eup %9618  ;;  %9620 = vrsqrt.f32 %v13495_v21  ;;  %vm5469_vm0 = vweird.f32 %v13495_v21 }
 0x86b   :  { %v5504_v44 = vmul.f32 %v9619_v43, %v5430_v38  ;;  %vm5510_vm3 = vweird.f32 %v9619_v43  ;;  %v5142_v56 = vsel %vm2907_vm7, %v5083_v27, 0.0  ;;  %v5346_v24 = vrot.slane %v5345_v14, 4 }
 0x86c   :  { %v5031_v52 = vpop.f32.mrf.mxu2  ;;  %vm5511_vm5 = vmor %vm5509_vm4, %vm5510_vm3 }
 0x86d   :  { %v13436_v20 = vadd.f32 %v13104_v6, %v5031_v52  ;;  %v5505_v23 = vmul.f32 %v9619_v43, %v5504_v44  ;;  %v5341_v52 = vrot.slane %v5340_v10, 2 }
 0x86f   :  { %15265 = vst [vmem:[#allocation12_spill] sm:$0xff] %v13436_v20  ;;  %v13454_v35 = vadd.f32 %v13436_v20, %v12349_v22  ;;  %v5098_v22 = vsel %vm2907_vm7, %v13446_v17, 0.0  ;;  %v5506_v47 = vmul.f32 0.5, %v5505_v23  ;;  %v5342_v57 = vadd.f32 %v5341_v52, %v5340_v10 }
 0x870   :  { %v5265_v44 = vadd.f32 %v13458_v7, %v5098_v22 }
 0x871   :  { %15269 = vst [vmem:[#allocation15_spill] sm:$0xff] %v13454_v35  ;;  %v5084_v40 = vmul.f32 %v13454_v35, %v13454_v35  ;;  %v13475_v26 = vsel %vm2907_vm7, %v13454_v35, 0.0  ;;  %v5507_v20 = vsub.f32 1.5, %v5506_v47  ;;  %v5343_v17 = vrot.slane %v5342_v57, 1 }
 0x872   :  { %v5279_v23 = vadd.f32 %v13475_v26, %v5102_v1  ;;  %v5266_v41 = vrot.slane %v5265_v44, 4 }
 0x873   :  { %v13483_v34 = vsel %vm2907_vm7, %v5084_v40, 0.0  ;;  %v5508_v5 = vmul.f32 %v9619_v43, %v5507_v20  ;;  %v5264_v40 = vadd.f32 %v5263_v4, %v5262_v31  ;;  %v5137_v4 = vadd.f32 %v13418_v18, %v13256_v53 }
 0x874   :  { %v5359_v35 = vadd.f32 %v13483_v34, %v5142_v56  ;;  %v5280_v47 = vrot.slane %v5279_v23, 4  ;;  %v5267_v9 = vadd.f32 %v5266_v41, %v5265_v44  ;;  %v5347_v44 = vadd.f32 %v5346_v24, %v5345_v14 }
 0x875   :  { %v5512_v29 = vsel %vm5511_vm5, %v9619_v43, %v5508_v5  ;;  %v5097_v5 = vadd.f32 %v13407_v30, %v13278_v48  ;;  %v13499_v37 = vmul.f32 0.0625, %v5264_v40  ;;  %v5139_v30 = vadd.f32 %v5138_v42, %v5137_v4 }
 0x876   :  { %v13489_v10 = vmul.f32 %v13285_v55, %v5512_v29  ;;  %v5281_v52 = vadd.f32 %v5280_v47, %v5279_v23  ;;  %v5360_v27 = vrot.slane %v5359_v35, 4  ;;  %v5344_v23 = vadd.f32 %v5343_v17, %v5342_v57 }
 0x877   :  { %v5116_v53 = vadd.f32 %v13401_v13, %v13317_v60  ;;  %v5388_v17 = vmul.f32 %v13499_v37, %v13499_v37  ;;  %v5348_v40 = vrot.slane %v5347_v44, 2 }
 0x878   :  { %15270 = vst [vmem:[#allocation37_spill] sm:$0xff] %v13489_v10  ;;  %v13493_v38 = vmul.f32 %v13489_v10, %v13387_v8  ;;  %v5282_v20 = vrot.slane %v5281_v52, 2  ;;  %v5361_v49 = vadd.f32 %v5360_v27, %v5359_v35  ;;  %v5099_v8 = vadd.f32 %v5098_v22, %v5097_v5 }
 0x879   :  { %v5268_v35 = vrot.slane %v5267_v9, 2  ;;  %v5378_v18 = vmul.f32 0.0625, %v5344_v23  ;;  %v5141_v27 = vadd.f32 %v13366_v39, %v5139_v30 }
 0x87a   :  { %v5283_v43 = vadd.f32 %v5282_v20, %v5281_v52  ;;  %v5362_v29 = vrot.slane %v5361_v49, 2  ;;  %v5101_v48 = vadd.f32 %v13357_v61, %v5099_v8 }
 0x87b   :  { %v5269_v14 = vadd.f32 %v5268_v35, %v5267_v9  ;;  %v5143_v60 = vadd.f32 %v5142_v56, %v5141_v27  ;;  %v5398_v5 = vsub.f32 %v5378_v18, %v5388_v17  ;;  %v5118_v9 = vadd.f32 %v13458_v7, %v5116_v53 }
 0x87c   :  { %v5284_v47 = vrot.slane %v5283_v43, 1  ;;  %v5363_v10 = vadd.f32 %v5362_v29, %v5361_v49  ;;  %v5103_v22 = vadd.f32 %v5102_v1, %v5101_v48  ;;  %v13525_v1 = vpop.eup %9620 }
 0x87d   :  { %v5270_v8 = vrot.slane %v5269_v14, 1  ;;  %v5408_v7 = vmul.f32 1.0666667, %v5398_v5  ;;  %vm5470_vm9 = vweird.f32 %v13525_v1 }
 0x87e   :  { %v5285_v41 = vadd.f32 %v5284_v47, %v5283_v43  ;;  %v5364_v52 = vrot.slane %v5363_v10, 1  ;;  %v5349_v47 = vadd.f32 %v5348_v40, %v5347_v44  ;;  %vm13589_vm1 = vmor %vm5469_vm0, %vm5470_vm9 }
 0x87f   :  { %v5271_v18 = vadd.f32 %v5270_v8, %v5269_v14 }
 0x880   :  { %v13517_v24 = vmul.f32 0.0625, %v5285_v41  ;;  %v5365_v61 = vadd.f32 %v5364_v52, %v5363_v10  ;;  %v5156_v10 = vadd.f32 %v13414_v25, %v13322_v15  ;;  %v5120_v15 = vadd.f32 %v13361_v32, %v5118_v9 }
 0x881   :  { %v5350_v32 = vrot.slane %v5349_v47, 1 }
 0x882   :  { %v5381_v13 = vmul.f32 0.0625, %v5365_v61  ;;  %v5391_v49 = vmul.f32 %v13517_v24, %v13517_v24 }
 0x884   :  { %v5034_v31 = vpop.f32.mrf.mxu2  ;;  %v5401_v4 = vsub.f32 %v5381_v13, %v5391_v49  ;;  %v5418_v13 = vmax.f32 %v5408_v7, 0.0  ;;  %v13556_v49 = vmul.f32 0.0625, %v5271_v18 }
 0x885   :  { %v13504_v3 = vadd.f32 %v13104_v6, %v5034_v31  ;;  %v5158_v31 = vadd.f32 %v13478_v2, %v5156_v10  ;;  %v5351_v10 = vadd.f32 %v5350_v32, %v5349_v47 }
 0x886   :  { %v5411_v25 = vmul.f32 1.0666667, %v5401_v4  ;;  %v13561_v9 = vadd.f32 1e-05, %v5418_v13 }
 0x887   :  { %v13510_v57 = vadd.f32 %v13504_v3, %v12400_v54  ;;  %v5160_v52 = vadd.f32 %v13369_v36, %v5158_v31  ;;  %v5379_v31 = vmul.f32 0.0625, %v5351_v10 }
 0x888   :  { %v5421_v2 = vmax.f32 %v5411_v25, 0.0 }
 0x889   :  { %v5085_v42 = vmul.f32 %v13510_v57, %v13510_v57  ;;  %v5104_v54 = vsel %vm2907_vm7, %v13510_v57, 0.0 }
 0x88a   :  { %v5105_v20 = vadd.f32 %v5104_v54, %v5103_v22  ;;  %v5431_v27 = vadd.f32 1e-05, %v5421_v2 }
 0x88b   :  { %v5144_v39 = vsel %vm2907_vm7, %v5085_v42, 0.0 }
 0x88c   :  { %v5036_v43 = vpop.f32.mrf.mxu2  ;;  %v13530_v29 = vmul.f32 0.1, %v5105_v20  ;;  %v5145_v23 = vadd.f32 %v5144_v39, %v5143_v60  ;;  %9622 = vrsqrt.f32 %v5431_v27  ;;  %vm5519_vm10 = vweird.f32 %v5431_v27 }
 0x88d   :  { %v13534_v56 = vadd.f32 %v13104_v6, %v5036_v43  ;;  %v5122_v6 = vadd.f32 %v13475_v26, %v5120_v15  ;;  %v5464_v26 = vmul.f32 %v13525_v1, %v13495_v21 }
 0x88e   :  { %v5165_v35 = vmul.f32 0.1, %v5145_v23  ;;  %v5167_v48 = vmul.f32 %v13530_v29, %v13530_v29 }
 0x88f   :  { %v13542_v30 = vadd.f32 %v13534_v56, %v15253_v50  ;;  %v5162_v50 = vadd.f32 %v13483_v34, %v5160_v52  ;;  %v5465_v23 = vmul.f32 %v13525_v1, %v5464_v26 }
 0x890   :  { %v5169_v41 = vsub.f32 %v5165_v35, %v5167_v48 }
 0x891   :  { %v5086_v44 = vmul.f32 %v13542_v30, %v13542_v30  ;;  %v5123_v53 = vsel %vm2907_vm7, %v13542_v30, 0.0  ;;  %v5466_v15 = vmul.f32 0.5, %v5465_v23 }
 0x892   :  { %v5171_v17 = vmax.f32 %v5169_v41, 0.0  ;;  %v5124_v22 = vadd.f32 %v5123_v53, %v5122_v6  ;;  %v5286_v20 = vadd.f32 %v5123_v53, %v5104_v54  ;;  %v5389_v54 = vmul.f32 %v13556_v49, %v13556_v49 }
 0x893   :  { %v5163_v61 = vsel %vm2907_vm7, %v5086_v44, 0.0  ;;  %v5467_v53 = vsub.f32 1.5, %v5466_v15  ;;  %v5201_v15 = vpop.permute.xlu1 %5200 }
 0x894   :  { %v5173_v36 = vadd.f32 1e-05, %v5171_v17  ;;  %v13554_v42 = vmul.f32 0.1, %v5124_v22  ;;  %v5164_v40 = vadd.f32 %v5163_v61, %v5162_v50  ;;  %v5366_v60 = vadd.f32 %v5163_v61, %v5144_v39  ;;  %v9623_v39 = vpop.eup %9622 }
 0x895   :  { %v5287_v43 = vrot.slane %v5286_v20, 4  ;;  %v5514_v25 = vmul.f32 %v9623_v39, %v5431_v27  ;;  %v5399_v41 = vsub.f32 %v5379_v31, %v5389_v54  ;;  %vm5520_vm6 = vweird.f32 %v9623_v39 }
 0x896   :  { %9624 = vrsqrt.f32 %v5173_v36  ;;  %v5166_v14 = vmul.f32 0.1, %v5164_v40  ;;  %v5168_v34 = vmul.f32 %v13554_v42, %v13554_v42  ;;  %v5367_v8 = vrot.slane %v5366_v60, 4  ;;  %vm5521_vm14 = vmor %vm5519_vm10, %vm5520_vm6 }
 0x897   :  { %v5288_v7 = vadd.f32 %v5287_v43, %v5286_v20  ;;  %9626 = vrsqrt.f32 %v13561_v9  ;;  %v5515_v6 = vmul.f32 %v9623_v39, %v5514_v25  ;;  %v5409_v50 = vmul.f32 1.0666667, %v5399_v41 }
 0x898   :  { %v5170_v5 = vsub.f32 %v5166_v14, %v5168_v34  ;;  %v5368_v44 = vadd.f32 %v5367_v8, %v5366_v60  ;;  %v5468_v34 = vmul.f32 %v13525_v1, %v5467_v53  ;;  %vm5181_vm11 = vweird.f32 %v5173_v36 }
 0x899   :  { %v5289_v52 = vrot.slane %v5288_v7, 2  ;;  %v5516_v18 = vmul.f32 0.5, %v5515_v6  ;;  %v5419_v31 = vmax.f32 %v5409_v50, 0.0 }
 0x89a   :  { %v5172_v4 = vmax.f32 %v5170_v5, 0.0  ;;  %v5369_v22 = vrot.slane %v5368_v44, 2  ;;  %v5472_v21 = vsel %vm13589_vm1, %v13525_v1, %v5468_v34 }
 0x89b   :  { %v5290_v32 = vadd.f32 %v5289_v52, %v5288_v7  ;;  %v5517_v61 = vsub.f32 1.5, %v5516_v18  ;;  %v13602_v53 = vadd.f32 1e-05, %v5419_v31 }
 0x89c   :  { %v9625_v35 = vpop.eup %9624  ;;  %v13565_v48 = vadd.f32 1e-05, %v5172_v4  ;;  %v5370_v13 = vadd.f32 %v5369_v22, %v5368_v44 }
 0x89d   :  { %v5176_v47 = vmul.f32 %v9625_v35, %v5173_v36  ;;  %v5291_v26 = vrot.slane %v5290_v32, 1  ;;  %v13569_v40 = vpop.eup %9626  ;;  %vm5182_vm8 = vweird.f32 %v9625_v35  ;;  %v5518_v60 = vmul.f32 %v9623_v39, %v5517_v61 }
 0x89e   :  { %9628 = vrsqrt.f32 %v13565_v48  ;;  %v5371_v23 = vrot.slane %v5370_v13, 1  ;;  %vm5183_vm15 = vmor %vm5181_vm11, %vm5182_vm8  ;;  %v5484_v4 = vmul.f32 %v13569_v40, %v13561_v9  ;;  %vm5191_vm4 = vweird.f32 %v13565_v48 }
 0x89f   :  { %v5177_v2 = vmul.f32 %v9625_v35, %v5176_v47  ;;  %v5292_v10 = vadd.f32 %v5291_v26, %v5290_v32  ;;  %v5522_v54 = vsel %vm5521_vm14, %v9623_v39, %v5518_v60  ;;  %v5203_v47 = vpop.permute.xlu2 %5202  ;;  %9630 = vrsqrt.f32 %v13602_v53  ;;  %v5575_v60 = vpop.permute.xlu1 %5574 }
 0x8a0   :  { %v13580_v27 = vmul.f32 %v13285_v55, %v5522_v54  ;;  %v5372_v36 = vadd.f32 %v5371_v23, %v5370_v13  ;;  %v5485_v32 = vmul.f32 %v13569_v40, %v5484_v4  ;;  %v5603_v23 = vsub.f32 %v13379_v12, %v5575_v60 }
 0x8a1   :  { %v5178_v17 = vmul.f32 0.5, %v5177_v2  ;;  %v13577_v8 = vmul.f32 0.0625, %v5292_v10  ;;  %vm5490_vm6 = vweird.f32 %v13569_v40  ;;  %vm5489_vm8 = vweird.f32 %v13561_v9 }
 0x8a2   :  { %v5382_v2 = vmul.f32 0.0625, %v5372_v36  ;;  %v5486_v50 = vmul.f32 0.5, %v5485_v32  ;;  %vm5491_vm9 = vmor %vm5489_vm8, %vm5490_vm6  ;;  %vm5499_vm0 = vweird.f32 %v13602_v53 }
 0x8a3   :  { %v5179_v20 = vsub.f32 1.5, %v5178_v17  ;;  %v5392_v6 = vmul.f32 %v13577_v8, %v13577_v8 }
 0x8a4   :  { %v9629_v14 = vpop.eup %9628  ;;  %v5487_v10 = vsub.f32 1.5, %v5486_v50 }
 0x8a5   :  { %v5180_v5 = vmul.f32 %v9625_v35, %v5179_v20  ;;  %v5186_v43 = vmul.f32 %v9629_v14, %v13565_v48  ;;  %vm5192_vm3 = vweird.f32 %v9629_v14  ;;  %v5402_v17 = vsub.f32 %v5382_v2, %v5392_v6 }
 0x8a6   :  { %vm5193_vm5 = vmor %vm5191_vm4, %vm5192_vm3  ;;  %v5488_v4 = vmul.f32 %v13569_v40, %v5487_v10 }
 0x8a7   :  { %v5184_v25 = vsel %vm5183_vm15, %v9625_v35, %v5180_v5  ;;  %v5187_v7 = vmul.f32 %v9629_v14, %v5186_v43  ;;  %v13595_v35 = vmul.f32 %v13580_v27, %v13517_v24  ;;  %v5412_v24 = vmul.f32 1.0666667, %v5402_v17  ;;  %v5577_v13 = vpop.permute.xlu2 %5576  ;;  %v9631_v5 = vpop.eup %9630 }
 0x8a8   :  { %v13582_v41 = vmul.f32 %v5201_v15, %v5184_v25  ;;  %v5604_v43 = vsub.f32 %v13379_v12, %v5577_v13  ;;  %v5701_v25 = vperm.slane %v5603_v23, 0  ;;  %v5492_v6 = vsel %vm5491_vm9, %v13569_v40, %v5488_v4 }
 0x8a9   :  { %v5188_v52 = vmul.f32 0.5, %v5187_v7  ;;  %v5422_v61 = vmax.f32 %v5412_v24, 0.0  ;;  %vm5500_vm15 = vweird.f32 %v9631_v5  ;;  %v5662_v4 = vperm.slane %v13296_v11, 0 }
 0x8aa   :  { %v5211_v44 = vmul.f32 %v13582_v41, %v13530_v29  ;;  %v13608_v29 = vmul.f32 %v13285_v55, %v5472_v21  ;;  %v5702_v15 = vperm.slane %v5604_v43, 0  ;;  %vm5501_vm1 = vmor %vm5499_vm0, %vm5500_vm15 }
 0x8ab   :  { %v5189_v18 = vsub.f32 1.5, %v5188_v52  ;;  %v5432_v20 = vadd.f32 1e-05, %v5422_v61 }
 0x8ac   :  { %5215 = vrot.lane.b32.xlu0 %v5211_v44, %s9808_s30  ;;  %v5555_v48 = vmul.f32 %v13608_v29, %v13422_v51  ;;  %v5494_v51 = vmul.f32 %v9631_v5, %v13602_v53  ;;  %v13632_v44 = vmul.f32 %v13285_v55, %v5492_v6  ;;  %v8729_v53 = vld [vmem:[%s14865_s7 + $0xe8] sm:$0xff] }
 0x8ad   :  { %v5190_v22 = vmul.f32 %v9629_v14, %v5189_v18  ;;  %9632 = vrsqrt.f32 %v5432_v20  ;;  %vm5529_vm11 = vweird.f32 %v5432_v20  ;;  %6045 = vmatpush.bf16.msrb.mxu0 %v8729_v53  ;;  %v8726_v53 = vld [vmem:[%s14865_s7 + $0xd0] sm:$0xff] }
 0x8ae   :  { %v5495_v52 = vmul.f32 %v9631_v5, %v5494_v51  ;;  %v5557_v32 = vmul.f32 %v13632_v44, %v13499_v37  ;;  %v9060_v37 = vpack.i.bf16 %v13142_v33, %v13113_v59 }
 0x8af   :  { %v5194_v1 = vsel %vm5193_vm5, %v9629_v14, %v5190_v22  ;;  %v5660_v14 = vperm.slane %v13290_v46, 0 }
 0x8b0   :  { %v13611_v26 = vmul.f32 %v5203_v47, %v5194_v1  ;;  %v5496_v21 = vmul.f32 0.5, %v5495_v52 }
 0x8b1   :  { %v5670_v31 = vmul.f32 %v5660_v14, %v13113_v59  ;;  %v5671_v54 = vmul.f32 %v5660_v14, %v13142_v33 }
 0x8b2   :  { %v5212_v34 = vmul.f32 %v13611_v26, %v13554_v42  ;;  %v5497_v40 = vsub.f32 1.5, %v5496_v21  ;;  %v8727_v21 = vld [vmem:[%s14865_s7 + $0xd8] sm:$0xff] }
 0x8b3   :  { %v9633_v42 = vpop.eup %9632 }
 0x8b4   :  { %5217 = vrot.lane.b32.xlu1 %v5212_v34, %s9808_s30  ;;  %5578 = vrot.lane.b32.xlu0 %v5555_v48, %s9808_s30  ;;  %v5524_v7 = vmul.f32 %v9633_v42, %v5432_v20  ;;  %vm5530_vm10 = vweird.f32 %v9633_v42  ;;  %v5498_v1 = vmul.f32 %v9631_v5, %v5497_v40  ;;  %v9080_v40 = vpack.i.bf16 %v13185_v62, %v13167_v0 }
 0x8b5   :  { %vm5531_vm14 = vmor %vm5529_vm11, %vm5530_vm10 }
 0x8b6   :  { %v5525_v39 = vmul.f32 %v9633_v42, %v5524_v7  ;;  %v5502_v61 = vsel %vm5501_vm1, %v9631_v5, %v5498_v1  ;;  %v8431_v5 = vld [vmem:[%s14864_s4 + $0x28] sm:$0xff]  ;;  %v9090_v1 = vpack.i.bf16 %v13267_v58, %v13230_v63 }
 0x8b7   :  { %v13649_v20 = vmul.f32 %v13285_v55, %v5502_v61  ;;  %v15273_v61 = vld [vmem:[#allocation7_spill] sm:$0xff] }
 0x8b8   :  { %v5526_v9 = vmul.f32 0.5, %v5525_v39 }
 0x8b9   :  { %v5558_v13 = vmul.f32 %v13649_v20, %v13556_v49  ;;  %v8728_v49 = vld [vmem:[%s14865_s7 + $0xe0] sm:$0xff] }
 0x8ba   :  { %v5711_v46 = vpop.permute.xlu2 %5710  ;;  %v5527_v18 = vsub.f32 1.5, %v5526_v9  ;;  %6046 = vmatpush.bf16.msrb.mxu0 %v8728_v49 }
 0x8bb   :  { %v5740_v36 = vadd.f32 %v5711_v46, %v5670_v31  ;;  %v5741_v47 = vadd.f32 %v5711_v46, %v5671_v54  ;;  %v5674_v31 = vmul.f32 %v5662_v4, %v13167_v0  ;;  %v5675_v54 = vmul.f32 %v5662_v4, %v13185_v62 }
 0x8bc   :  { %5712 = vrot.lane.b32.xlu1 %v5701_v25, %s9806_s20  ;;  %5714 = vrot.lane.b32.xlu0 %v5702_v15, %s9806_s20  ;;  %v5528_v17 = vmul.f32 %v9633_v42, %v5527_v18  ;;  %v5618_v4 = vmul.f32 %v13582_v41, %v13230_v63 }
 0x8bd   :  { %v9065_v2 = vpack.i.bf16 %v5741_v47, %v5740_v36  ;;  %v9070_v47 = vpack.i.bf16 %v13153_v19, %v13120_v45 }
 0x8be   :  { %v5532_v22 = vsel %vm5531_vm14, %v9633_v42, %v5528_v17  ;;  %v5661_v42 = vperm.slane %v13293_v16, 0  ;;  %6047 = vmatpush.bf16.msrb.mxu0 %v8727_v21 }
 0x8bf   :  { %v13638_v24 = vmul.f32 %v13285_v55, %v5532_v22  ;;  %v8430_v55 = vld [vmem:[%s14864_s4 + $0x20] sm:$0xff] }
 0x8c0   :  { %v5672_v6 = vmul.f32 %v5661_v42, %v13120_v45  ;;  %v5673_v11 = vmul.f32 %v5661_v42, %v13153_v19  ;;  %v15276_v42 = vld [vmem:[#allocation43_spill] sm:$0xff] }
 0x8c1   :  { %v13642_v50 = vmul.f32 %v13638_v24, %v13577_v8 }
 0x8c2   :  { %v5581_v34 = vpop.permute.xlu2 %5580  ;;  %6048 = vmatpush.bf16.msrb.mxu0 %v8726_v53 }
 0x8c3   :  { %v5606_v8 = vsub.f32 %v13379_v12, %v5581_v34  ;;  %v15274_v34 = vld [vmem:[#allocation9_spill] sm:$0xff] }
 0x8c4   :  { %5582 = vrot.lane.b32.xlu1 %v5557_v32, %s9808_s30 }
 0x8c5   :  { %v5704_v48 = vperm.slane %v5606_v8, 0  ;;  %v15275_v8 = vld [vmem:[#allocation4_spill] sm:$0xff] }
 0x8cc   :  { %9061 = vrot.lane.b32.xlu1 %v9060_v37, %s9808_s30 }
 0x8d4   :  { %5584 = vrot.lane.b32.xlu1 %v5558_v13, %s9808_s30  ;;  %v9100_v13 = vpack.i.bf16 %v15273_v61, %v13245_v28 }
 0x8dc   :  { %5718 = vrot.lane.b32.xlu1 %v5704_v48, %s9806_s20  ;;  %v9110_v48 = vpack.i.bf16 %v15275_v8, %v15274_v34 }
 0x91e   :  { %v5216_v60 = vpop.permute.xlu0 %5215 }
 0x91f   :  { %v5221_v10 = vsub.f32 %v8430_v55, %v5216_v60  ;;  %v8725_v55 = vld [vmem:[%s14865_s7 + $0xc8] sm:$0xff]  ;;  %v5612_v60 = vmul.f32 %v13582_v41, %v13113_v59  ;;  %v5620_v59 = vmul.f32 %v13582_v41, %v13245_v28 }
 0x920   :  { %6049 = vmatpush.bf16.msrb.mxu0 %v8725_v55 }
 0x921   :  { %5634 = vrot.lane.b32.xlu2 %v5221_v10, %s9806_s20 }
 0x926   :  { %v5218_v14 = vpop.permute.xlu1 %5217  ;;  %v5579_v43 = vpop.permute.xlu0 %5578 }
 0x927   :  { %v5222_v23 = vsub.f32 %v8431_v5, %v5218_v14  ;;  %v5605_v51 = vsub.f32 %v13379_v12, %v5579_v43  ;;  %v8724_v43 = vld [vmem:[%s14865_s7 + $0xc0] sm:$0xff] }
 0x928   :  { %6050 = vmatpush.bf16.msrb.mxu0 %v8724_v43 }
 0x929   :  { %5636 = vrot.lane.b32.xlu0 %v5222_v23, %s9806_s20  ;;  %9066 = vrot.lane.b32.xlu2 %v9065_v2, %s9806_s20  ;;  %v5703_v46 = vperm.slane %v5605_v51, 0  ;;  %v5616_v23 = vmul.f32 %v13582_v41, %v13167_v0  ;;  %v5622_v51 = vmul.f32 %v13582_v41, %v15274_v34 }
 0x92e   :  { %v5713_v15 = vpop.permute.xlu1 %5712  ;;  %v5715_v25 = vpop.permute.xlu0 %5714 }
 0x92f   :  { %v5744_v7 = vadd.f32 %v5715_v25, %v5674_v31  ;;  %v5745_v36 = vadd.f32 %v5715_v25, %v5675_v54  ;;  %v5742_v16 = vadd.f32 %v5713_v15, %v5672_v6  ;;  %v5743_v39 = vadd.f32 %v5713_v15, %v5673_v11  ;;  %v15277_v54 = vld [vmem:[#allocation2_spill] sm:$0xff]  ;;  %v15278_v25 = vld [vmem:[#allocation33_spill] sm:$0xff] }
 0x930   :  { %v5624_v31 = vmul.f32 %v13582_v41, %v15276_v42  ;;  %v5626_v15 = vmul.f32 %v13582_v41, %v15277_v54 }
 0x931   :  { %v9085_v52 = vpack.i.bf16 %v5745_v36, %v5744_v7  ;;  %9071 = vrot.lane.b32.xlu2 %v9070_v47, %s9808_s30  ;;  %5716 = vrot.lane.b32.xlu0 %v5703_v46, %s9806_s20  ;;  %v9075_v9 = vpack.i.bf16 %v5743_v39, %v5742_v16  ;;  %v5628_v46 = vmul.f32 %v13582_v41, %v15278_v25 }
 0x932   :  { %v5630_v7 = vmul.f32 %v13582_v41, %v13510_v57 }
 0x933   :  { %9086 = vrot.lane.b32.xlu1 %v9085_v52, %s9806_s20 }
 0x936   :  { %v5583_v2 = vpop.permute.xlu1 %5582 }
 0x937   :  { %v5607_v18 = vsub.f32 %v13379_v12, %v5583_v2 }
 0x939   :  { %5586 = vrot.lane.b32.xlu2 %v13493_v38, %s9808_s30  ;;  %9076 = vrot.lane.b32.xlu0 %v9075_v9, %s9806_s20  ;;  %v5705_v17 = vperm.slane %v5607_v18, 0 }
 0x93e   :  { %v9062_v32 = vpop.permute.xlu1 %9061 }
 0x93f   :  { %v9063_v49 = vunpack.i.l.bf16 %v9062_v32 }
 0x941   :  { %5720 = vrot.lane.b32.xlu2 %v5705_v17, %s9806_s20  ;;  %9081 = vrot.lane.b32.xlu0 %v9080_v40, %s9808_s30 }
 0x946   :  { %v5585_v22 = vpop.permute.xlu1 %5584 }
 0x947   :  { %v5608_v38 = vsub.f32 %v13379_v12, %v5585_v22  ;;  %v5613_v22 = vmul.f32 %v13611_v26, %v13142_v33 }
 0x949   :  { %v5706_v37 = vperm.slane %v5608_v38, 0  ;;  %9091 = vrot.lane.b32.xlu0 %v9090_v1, %s9808_s30 }
 0x94b   :  { %5722 = vrot.lane.b32.xlu2 %v5706_v37, %s9806_s20  ;;  %v5619_v37 = vmul.f32 %v13611_v26, %v13267_v58 }
 0x951   :  { %9101 = vrot.lane.b32.xlu0 %v9100_v13, %s9808_s30  ;;  %v9064_v13 = vunpack.i.h.bf16 %v9062_v32  ;;  %v5666_v32 = vperm.slane %v13649_v20, 0  ;;  %v15281_v20 = vld [vmem:[#allocation15_spill] sm:$0xff] }
 0x959   :  { %9111 = vrot.lane.b32.xlu0 %v9110_v48, %s9808_s30 }
 0x97b   :  { %v13713_v10 = vpop.permute.xlu2 %5634 }
 0x97c   :  { %v5640_v5 = vadd.f32 %v13713_v10, %v5612_v60  ;;  %v13737_v36 = vadd.f32 %v13713_v10, %v5616_v23  ;;  %v13740_v47 = vadd.f32 %v13713_v10, %v5618_v4  ;;  %v13743_v6 = vadd.f32 %v13713_v10, %v5620_v59 }
 0x97d   :  { %v13746_v11 = vadd.f32 %v13713_v10, %v5622_v51  ;;  %v13749_v16 = vadd.f32 %v13713_v10, %v5624_v31  ;;  %v13752_v39 = vadd.f32 %v13713_v10, %v5626_v15  ;;  %v13755_v2 = vadd.f32 %v13713_v10, %v5628_v46  ;;  %v15280_v31 = vld [vmem:[#allocation5_spill] sm:$0xff] }
 0x97e   :  { %v5920_v14 = vsel %vm278_vm2, %v9063_v49, %v5640_v5  ;;  %v13758_v9 = vadd.f32 %v13713_v10, %v5630_v7  ;;  %v15279_v49 = vld [vmem:[#allocation14_spill] sm:$0xff]  ;;  %v5621_v4 = vmul.f32 %v13611_v26, %v15273_v61  ;;  %v5623_v59 = vmul.f32 %v13611_v26, %v15275_v8 }
 0x97f   :  { %v9120_v33 = vpack.i.bf16 %v15279_v49, %v15276_v42  ;;  %v5625_v51 = vmul.f32 %v13611_v26, %v15279_v49  ;;  %v5627_v15 = vmul.f32 %v13611_v26, %v15280_v31  ;;  %v5629_v7 = vmul.f32 %v13611_v26, %v15281_v20 }
 0x983   :  { %v9067_v52 = vpop.permute.xlu2 %9066 }
 0x984   :  { %v9068_v38 = vunpack.i.l.bf16 %v9067_v52  ;;  %v9069_v53 = vunpack.i.h.bf16 %v9067_v52  ;;  %v5631_v52 = vmul.f32 %v13611_v26, %v13542_v30 }
 0x986   :  { %v5940_v43 = vsel %vm1471_vm12, %v5920_v14, %v9068_v38  ;;  %v15282_v38 = vld [vmem:[#allocation8_spill] sm:$0xff] }
 0x98b   :  { %v13760_v21 = vpop.permute.xlu2 %9071 }
 0x993   :  { %v5587_v18 = vpop.permute.xlu2 %5586 }
 0x994   :  { %v5609_v17 = vsub.f32 %v13379_v12, %v5587_v18  ;;  %v5663_v12 = vperm.slane %v13608_v29, 0 }
 0x996   :  { %v5707_v40 = vperm.slane %v5609_v17, 0  ;;  %v5676_v14 = vmul.f32 %v5663_v12, %v13230_v63  ;;  %v5677_v46 = vmul.f32 %v5663_v12, %v13267_v58 }
 0x998   :  { %5724 = vrot.lane.b32.xlu2 %v5707_v40, %s9806_s20 }
 0x99b   :  { %v13766_v1 = vpop.permute.xlu0 %5636  ;;  %v13771_v55 = vpop.permute.xlu2 %5720 }
 0x99c   :  { %v5641_v48 = vadd.f32 %v13766_v1, %v5613_v22  ;;  %v13775_v60 = vadd.f32 %v13766_v1, %v5619_v37  ;;  %v13800_v18 = vadd.f32 %v13766_v1, %v5621_v4  ;;  %v13803_v17 = vadd.f32 %v13766_v1, %v5623_v59 }
 0x99d   :  { %v13806_v40 = vadd.f32 %v13766_v1, %v5625_v51  ;;  %v13809_v22 = vadd.f32 %v13766_v1, %v5627_v15  ;;  %v5664_v37 = vperm.slane %v15282_v38, 0  ;;  %v5719_v51 = vpop.permute.xlu1 %5718  ;;  %v5615_v15 = vmul.f32 %v13611_v26, %v13153_v19 }
 0x99e   :  { %v5921_v5 = vsel %vm278_vm2, %v9064_v13, %v5641_v48  ;;  %v13813_v48 = vadd.f32 %v13766_v1, %v5629_v7 }
 0x99f   :  { %v5941_v23 = vsel %vm1471_vm12, %v5921_v5, %v9069_v53  ;;  %v13816_v53 = vadd.f32 %v13766_v1, %v5631_v52  ;;  %v5682_v5 = vmul.f32 %v5666_v32, %v15276_v42  ;;  %v5678_v7 = vmul.f32 %v5664_v37, %v13245_v28 }
 0x9a0   :  { %9121 = vrot.lane.b32.xlu2 %v9120_v33, %s9808_s30  ;;  %v5975_v29 = vpack.c.bf16 %v5941_v23, %v5940_v43  ;;  %v5683_v43 = vmul.f32 %v5666_v32, %v15279_v49  ;;  %v5679_v38 = vmul.f32 %v5664_v37, %v15273_v61  ;;  %v9073_v32 = vunpack.i.l.bf16 %v13760_v21 }
 0x9a1   :  { %v5665_v37 = vperm.slane %v13632_v44, 0 }
 0x9a2   :  { %8471 = vmatmul.msk.bf16.vlgmr.msrb.gmra.mxu0 %vm1567_vm13, %v5975_v29 }
 0x9a3   :  { %v5717_v13 = vpop.permute.xlu0 %5716 }
 0x9a4   :  { %v5746_v12 = vadd.f32 %v5717_v13, %v5676_v14  ;;  %v5747_v33 = vadd.f32 %v5717_v13, %v5677_v46  ;;  %v5614_v14 = vmul.f32 %v13582_v41, %v13120_v45  ;;  %v5643_v46 = vadd.f32 %v13766_v1, %v5615_v15 }
 0x9a5   :  { %v5723_v23 = vpop.permute.xlu2 %5722  ;;  %v5748_v13 = vadd.f32 %v5719_v51, %v5678_v7  ;;  %v5680_v15 = vmul.f32 %v5665_v37, %v15274_v34  ;;  %v9087_v7 = vpop.permute.xlu1 %9086 }
 0x9a6   :  { %v9095_v4 = vpack.i.bf16 %v5747_v33, %v5746_v12  ;;  %v5752_v29 = vadd.f32 %v5723_v23, %v5682_v5  ;;  %v5753_v59 = vadd.f32 %v5723_v23, %v5683_v43  ;;  %v5749_v12 = vadd.f32 %v5719_v51, %v5679_v38 }
 0x9a7   :  { %v5642_v19 = vadd.f32 %v13713_v10, %v5614_v14  ;;  %v9074_v33 = vunpack.i.h.bf16 %v13760_v21  ;;  %v5681_v10 = vmul.f32 %v5665_v37, %v15275_v8  ;;  %v5750_v44 = vadd.f32 %v13771_v55, %v5680_v15  ;;  %v8735_v37 = vld [vmem:[%s14865_s7 + $0x118] sm:$0xff] }
 0x9a8   :  { %v9125_v52 = vpack.i.bf16 %v5753_v59, %v5752_v29  ;;  %9096 = vrot.lane.b32.xlu1 %v9095_v4, %s9806_s20  ;;  %v9105_v41 = vpack.i.bf16 %v5749_v12, %v5748_v13  ;;  %v5617_v38 = vmul.f32 %v13611_v26, %v13185_v62  ;;  %v9089_v13 = vunpack.i.h.bf16 %v9087_v7  ;;  %6170 = vmatpush.bf16.msra.mxu0 %v8735_v37  ;;  %v8732_v37 = vld [vmem:[%s14865_s7 + $0x100] sm:$0xff] }
 0x9a9   :  { %v5922_v4 = vsel %vm278_vm2, %v9073_v32, %v5642_v19  ;;  %v5923_v45 = vsel %vm278_vm2, %v9074_v33, %v5643_v46  ;;  %v5751_v21 = vadd.f32 %v13771_v55, %v5681_v10  ;;  %v9088_v12 = vunpack.i.l.bf16 %v9087_v7  ;;  %v8733_v10 = vld [vmem:[%s14865_s7 + $0x108] sm:$0xff] }
 0x9aa   :  { %9126 = vrot.lane.b32.xlu0 %v9125_v52, %s9806_s20  ;;  %v5645_v14 = vadd.f32 %v13766_v1, %v5617_v38  ;;  %v9130_v1 = vpack.i.bf16 %v15280_v31, %v15277_v54 }
 0x9ab   :  { %v9077_v5 = vpop.permute.xlu0 %9076  ;;  %v9115_v19 = vpack.i.bf16 %v5751_v21, %v5750_v44 }
 0x9ac   :  { %v9079_v43 = vunpack.i.h.bf16 %v9077_v5  ;;  %v9078_v23 = vunpack.i.l.bf16 %v9077_v5 }
 0x9ae   :  { %v5943_v29 = vsel %vm1471_vm12, %v5923_v45, %v9079_v43  ;;  %v5942_v59 = vsel %vm1471_vm12, %v5922_v4, %v9078_v23  ;;  %v8734_v43 = vld [vmem:[%s14865_s7 + $0x110] sm:$0xff]  ;;  %v15283_v23 = vld [vmem:[#allocation37_spill] sm:$0xff] }
 0x9af   :  { %v5976_v51 = vpack.c.bf16 %v5943_v29, %v5942_v59  ;;  %6171 = vmatpush.bf16.msra.mxu0 %v8734_v43  ;;  %v5667_v4 = vperm.slane %v15283_v23, 0 }
 0x9b0   :  { %9106 = vrot.lane.b32.xlu1 %v9105_v41, %s9806_s20 }
 0x9b1   :  { %v5684_v45 = vmul.f32 %v5667_v4, %v15277_v54 }
 0x9b2   :  { %5588 = vrot.lane.b32.xlu0 %v13595_v35, %s9808_s30  ;;  %8472 = vmatmul.msk.bf16.gmra.mxu0 %vm1567_vm13, %v5976_v51 }
 0x9b3   :  { %v9082_v52 = vpop.permute.xlu0 %9081  ;;  %6172 = vmatpush.bf16.msra.mxu0 %v8733_v10 }
 0x9b4   :  { %v9084_v32 = vunpack.i.h.bf16 %v9082_v52  ;;  %v9083_v46 = vunpack.i.l.bf16 %v9082_v52 }
 0x9b6   :  { %v5925_v33 = vsel %vm278_vm2, %v9084_v32, %v5645_v14  ;;  %v5924_v55 = vsel %vm278_vm2, %v9083_v46, %v13737_v36  ;;  %v9140_v36 = vpack.i.bf16 %v15281_v20, %v15278_v25 }
 0x9b7   :  { %v5944_v35 = vsel %vm1471_vm12, %v5924_v55, %v9088_v12  ;;  %v5945_v5 = vsel %vm1471_vm12, %v5925_v33, %v9089_v13  ;;  %6173 = vmatpush.bf16.msra.mxu0 %v8732_v37 }
 0x9b8   :  { %9116 = vrot.lane.b32.xlu1 %v9115_v19, %s9806_s20  ;;  %v13854_v26 = vpack.c.bf16 %v5945_v5, %v5944_v35 }
 0x9bb   :  { %v9092_v15 = vpop.permute.xlu0 %9091 }
 0x9bc   :  { %v9094_v38 = vunpack.i.h.bf16 %v9092_v15  ;;  %v9093_v52 = vunpack.i.l.bf16 %v9092_v15 }
 0x9be   :  { %v5927_v19 = vsel %vm278_vm2, %v9094_v38, %v13775_v60  ;;  %v5926_v33 = vsel %vm278_vm2, %v9093_v52, %v13740_v47 }
 0x9c0   :  { %9131 = vrot.lane.b32.xlu1 %v9130_v1, %s9808_s30 }
 0x9c2   :  { %8473 = vmatmul.msk.bf16.gmra.mxu0 %vm1567_vm13, %v13854_v26 }
 0x9c3   :  { %v9102_v44 = vpop.permute.xlu0 %9101 }
 0x9c8   :  { %5590 = vrot.lane.b32.xlu1 %v13642_v50, %s9808_s30  ;;  %v5685_v50 = vmul.f32 %v5667_v4, %v15280_v31 }
 0x9cb   :  { %v9112_v21 = vpop.permute.xlu0 %9111 }
 0x9d0   :  { %9141 = vrot.lane.b32.xlu1 %v9140_v36, %s9808_s30 }
 0x9f2   :  { %v5725_v41 = vpop.permute.xlu2 %5724 }
 0x9f3   :  { %v5754_v29 = vadd.f32 %v5725_v41, %v5684_v45  ;;  %v5755_v59 = vadd.f32 %v5725_v41, %v5685_v50  ;;  %v9104_v45 = vunpack.i.h.bf16 %v9102_v44  ;;  %v9103_v50 = vunpack.i.l.bf16 %v9102_v44  ;;  %v9805_v44 = vld [vmem:[%s14862_s6 + $0x2] sm:$0x1] }
 0x9f5   :  { %v9135_v51 = vpack.i.bf16 %v5755_v59, %v5754_v29 }
 0x9f7   :  { %9136 = vrot.lane.b32.xlu2 %v9135_v51, %s9806_s20 }
 0x9fa   :  { %v9122_v7 = vpop.permute.xlu2 %9121 }
 0x9fb   :  { %v9124_v14 = vunpack.i.h.bf16 %v9122_v7  ;;  %v9123_v32 = vunpack.i.l.bf16 %v9122_v7 }
 0x9fd   :  { %v5932_v43 = vsel %vm278_vm2, %v9123_v32, %v13749_v16  ;;  %v5933_v60 = vsel %vm278_vm2, %v9124_v14, %v13806_v40  ;;  %v5929_v16 = vsel %vm278_vm2, %v9104_v45, %v13800_v18  ;;  %v5928_v40 = vsel %vm278_vm2, %v9103_v50, %v13743_v6 }
 0x9fe   :  { %v9114_v32 = vunpack.i.h.bf16 %v9112_v21 }
 0xa00   :  { %v5931_v6 = vsel %vm278_vm2, %v9114_v32, %v13803_v17  ;;  %v9150_v17 = vpack.i.bf16 %v13542_v30, %v13510_v57 }
 0xa1a   :  { %v9097_v46 = vpop.permute.xlu1 %9096 }
 0xa1b   :  { %v9099_v13 = vunpack.i.h.bf16 %v9097_v46  ;;  %v9098_v12 = vunpack.i.l.bf16 %v9097_v46  ;;  %v9113_v46 = vunpack.i.l.bf16 %v9112_v21  ;;  %v8731_v21 = vld [vmem:[%s14865_s7 + $0xf8] sm:$0xff] }
 0xa1c   :  { %v9127_v55 = vpop.permute.xlu0 %9126  ;;  %6174 = vmatpush.bf16.msra.mxu0 %v8731_v21 }
 0xa1d   :  { %v5946_v35 = vsel %vm1471_vm12, %v5926_v33, %v9098_v12  ;;  %v5947_v5 = vsel %vm1471_vm12, %v5927_v19, %v9099_v13  ;;  %v9129_v1 = vunpack.i.h.bf16 %v9127_v55  ;;  %v9128_v36 = vunpack.i.l.bf16 %v9127_v55 }
 0xa1e   :  { %v5978_v23 = vpack.c.bf16 %v5947_v5, %v5946_v35  ;;  %v5930_v19 = vsel %vm278_vm2, %v9113_v46, %v13746_v11  ;;  %v8730_v11 = vld [vmem:[%s14865_s7 + $0xf0] sm:$0xff] }
 0xa1f   :  { %v5953_v47 = vsel %vm1471_vm12, %v5933_v60, %v9129_v1  ;;  %v5952_v4 = vsel %vm1471_vm12, %v5932_v43, %v9128_v36 }
 0xa20   :  { %v13894_v41 = vpack.c.bf16 %v5953_v47, %v5952_v4  ;;  %8474 = vmatmul.msk.bf16.gmra.mxu0 %vm1567_vm13, %v5978_v23 }
 0xa21   :  { %6175 = vmatpush.bf16.msra.mxu0 %v8730_v11 }
 0xa22   :  { %v9107_v29 = vpop.permute.xlu1 %9106 }
 0xa23   :  { %v9109_v59 = vunpack.i.h.bf16 %v9107_v29  ;;  %v9108_v51 = vunpack.i.l.bf16 %v9107_v29 }
 0xa24   :  { %v5589_v15 = vpop.permute.xlu0 %5588 }
 0xa25   :  { %v5948_v10 = vsel %vm1471_vm12, %v5928_v40, %v9108_v51  ;;  %v5949_v7 = vsel %vm1471_vm12, %v5929_v16, %v9109_v59  ;;  %v5610_v38 = vsub.f32 %v9805_v44, %v5589_v15  ;;  %v6052_v40 = vpop.f32.mrf.mxu0 }
 0xa26   :  { %v5979_v52 = vpack.c.bf16 %v5949_v7, %v5948_v10  ;;  %v5668_v7 = vperm.slane %v13580_v27, 0 }
 0xa27   :  { %v5708_v14 = vperm.slane %v5610_v38, 0 }
 0xa29   :  { %5726 = vrot.lane.b32.xlu2 %v5708_v14, %s9806_s20 }
 0xa2a   :  { %v9117_v18 = vpop.permute.xlu1 %9116 }
 0xa2b   :  { %v9119_v13 = vunpack.i.h.bf16 %v9117_v18  ;;  %v9118_v12 = vunpack.i.l.bf16 %v9117_v18 }
 0xa2d   :  { %v5950_v33 = vsel %vm1471_vm12, %v5930_v19, %v9118_v12  ;;  %v5951_v55 = vsel %vm1471_vm12, %v5931_v6, %v9119_v13  ;;  %v6054_v15 = vpop.f32.mrf.mxu0  ;;  %v5669_v13 = vperm.slane %v13638_v24, 0 }
 0xa2e   :  { %v5980_v35 = vpack.c.bf16 %v5951_v55, %v5950_v33 }
 0xa2f   :  { %v5688_v6 = vmul.f32 %v5669_v13, %v13510_v57  ;;  %v5689_v19 = vmul.f32 %v5669_v13, %v13542_v30 }
 0xa30   :  { %8475 = vmatmul.msk.bf16.gmra.mxu0 %vm1567_vm13, %v5979_v52 }
 0xa32   :  { %v9132_v5 = vpop.permute.xlu1 %9131 }
 0xa33   :  { %v9134_v43 = vunpack.i.h.bf16 %v9132_v5  ;;  %v9133_v60 = vunpack.i.l.bf16 %v9132_v5 }
 0xa35   :  { %v5935_v50 = vsel %vm278_vm2, %v9134_v43, %v13809_v22  ;;  %v5934_v29 = vsel %vm278_vm2, %v9133_v60, %v13752_v39  ;;  %v13936_v10 = vpop.f32.mrf.mxu0  ;;  %v5686_v39 = vmul.f32 %v5668_v7, %v15278_v25 }
 0xa3a   :  { %v5591_v1 = vpop.permute.xlu1 %5590 }
 0xa3b   :  { %v5611_v36 = vsub.f32 %v9805_v44, %v5591_v1  ;;  %v5687_v44 = vmul.f32 %v5668_v7, %v15281_v20  ;;  %v13990_v7 = vld [vmem:[%s14866_s8 + $0x2] ss:$0 sm:$0xff] }
 0xa3d   :  { %v5709_v37 = vperm.slane %v5611_v36, 0  ;;  %v13940_v22 = vpop.f32.mrf.mxu0 }
 0xa3f   :  { %5728 = vrot.lane.b32.xlu0 %v5709_v37, %s9806_s20 }
 0xa40   :  { %8476 = vmatmul.msk.bf16.gmra.mxu0 %vm1567_vm13, %v5980_v35 }
 0xa42   :  { %v9142_v36 = vpop.permute.xlu1 %9141 }
 0xa43   :  { %v9144_v11 = vunpack.i.h.bf16 %v9142_v36 }
 0xa45   :  { %v13945_v18 = vpop.f32.mrf.mxu0 }
 0xa47   :  { %9151 = vrot.lane.b32.xlu0 %v9150_v17, %s9808_s30  ;;  %v9143_v17 = vunpack.i.l.bf16 %v9142_v36 }
 0xa50   :  { %8477 = vmatmul.msk.bf16.gmra.mxu0 %vm1567_vm13, %v13894_v41 }
 0xa51   :  { %v9137_v47 = vpop.permute.xlu2 %9136 }
 0xa52   :  { %v9139_v4 = vunpack.i.h.bf16 %v9137_v47  ;;  %v9138_v45 = vunpack.i.l.bf16 %v9137_v47 }
 0xa54   :  { %v5954_v59 = vsel %vm1471_vm12, %v5934_v29, %v9138_v45  ;;  %v5955_v51 = vsel %vm1471_vm12, %v5935_v50, %v9139_v4  ;;  %v8737_v4 = vld [vmem:[%s14867_s9 + $0x28] sm:$0xff]  ;;  %v5937_v45 = vsel %vm278_vm2, %v9144_v11, %v13813_v48  ;;  %v5936_v50 = vsel %vm278_vm2, %v9143_v17, %v13755_v2 }
 0xa55   :  { %v5982_v16 = vpack.c.bf16 %v5955_v51, %v5954_v59  ;;  %6693 = vmatpush.bf16.msrb.mxu3 %v8737_v4  ;;  %v6095_v48 = vadd.f32 %v13990_v7, %v6052_v40  ;;  %v6097_v40 = vadd.f32 %v13990_v7, %v13936_v10  ;;  %v6098_v11 = vadd.f32 %v13990_v7, %v13940_v22 }
 0xa60   :  { %8478 = vmatmul.msk.bf16.gmra.mxu0 %vm1567_vm13, %v5982_v16 }
 0xa70   :  { %8515 = vmatmul.msk.bf16.vlgmr.msra.gmra.mxu0 %vm1567_vm13, %v13854_v26  ;;  %v13948_v26 = vpop.f32.mrf.mxu0 }
 0xa80   :  { %8516 = vmatmul.msk.bf16.gmra.mxu0 %vm1567_vm13, %v5978_v23 }
 0xa83   :  { %v5727_v38 = vpop.permute.xlu2 %5726 }
 0xa84   :  { %v5756_v14 = vadd.f32 %v5727_v38, %v5686_v39  ;;  %v5757_v32 = vadd.f32 %v5727_v38, %v5687_v44  ;;  %v6096_v38 = vadd.f32 %v13990_v7, %v6054_v15 }
 0xa86   :  { %v9145_v46 = vpack.i.bf16 %v5757_v32, %v5756_v14 }
 0xa88   :  { %9146 = vrot.lane.b32.xlu2 %v9145_v46, %s9806_s20 }
 0xa90   :  { %8517 = vmatmul.msk.bf16.gmra.mxu0 %vm1567_vm13, %v5979_v52 }
 0xa9d   :  { %v13950_v27 = vpop.f32.mrf.mxu0 }
 0xaa0   :  { %8518 = vmatmul.msk.bf16.gmra.mxu0 %vm1567_vm13, %v5980_v35 }
 0xaa5   :  { %v13953_v23 = vpop.f32.mrf.mxu0 }
 0xaad   :  { %v13956_v12 = vpop.f32.mrf.mxu0 }
 0xab0   :  { %8519 = vmatmul.msk.bf16.gmra.mxu0 %vm1567_vm13, %v13894_v41 }
 0xab1   :  { %v5729_v52 = vpop.permute.xlu0 %5728 }
 0xab2   :  { %v5758_v33 = vadd.f32 %v5729_v52, %v5688_v6  ;;  %v5759_v55 = vadd.f32 %v5729_v52, %v5689_v19 }
 0xab4   :  { %v9155_v5 = vpack.i.bf16 %v5759_v55, %v5758_v33 }
 0xab5   :  { %v13962_v21 = vpop.f32.mrf.mxu0 }
 0xab6   :  { %9156 = vrot.lane.b32.xlu1 %v9155_v5, %s9806_s20 }
 0xabd   :  { %v13965_v35 = vpop.f32.mrf.mxu0 }
 0xac0   :  { %8520 = vmatmul.msk.bf16.gmra.mxu0 %vm1567_vm13, %v5982_v16 }
 0xac5   :  { %v13968_v24 = vpop.f32.mrf.mxu0 }
 0xacd   :  { %v13970_v1 = vpop.f32.mrf.mxu0 }
 0xad5   :  { %v13972_v41 = vpop.f32.mrf.mxu0 }
 0xadd   :  { %v13974_v37 = vpop.f32.mrf.mxu0 }
 0xae2   :  { %v9147_v43 = vpop.permute.xlu2 %9146 }
 0xae3   :  { %v9149_v60 = vunpack.i.h.bf16 %v9147_v43  ;;  %v9148_v47 = vunpack.i.l.bf16 %v9147_v43 }
 0xae5   :  { %v5957_v29 = vsel %vm1471_vm12, %v5937_v45, %v9149_v60  ;;  %v5956_v59 = vsel %vm1471_vm12, %v5936_v50, %v9148_v47  ;;  %v13985_v51 = vpop.f32.mrf.mxu0 }
 0xae6   :  { %v6124_v16 = vpack.c.bf16 %v5957_v29, %v5956_v59 }
 0xae8   :  { %8521 = vmatmul.msk.bf16.gmra.mxu0 %vm1567_vm13, %v6124_v16 }
 0xaed   :  { %v6177_v39 = vpop.f32.mrf.mxu0 }
 0xaee   :  { %v13994_v44 = vadd.f32 %v6177_v39, %v6095_v48 }
 0xaf0   :  { %v8523_v2 = vmul.f32 -1.442695, %v13994_v44 }
 0xaf2   :  { %9634 = vpow2.f32 %v8523_v2 }
 0xaf5   :  { %v6179_v14 = vpop.f32.mrf.mxu0 }
 0xaf6   :  { %v13998_v32 = vadd.f32 %v6179_v14, %v6096_v38  ;;  %v6099_v38 = vadd.f32 %v13990_v7, %v13945_v18 }
 0xaf8   :  { %v9635_v46 = vpop.eup %9634  ;;  %v8524_v13 = vmul.f32 -1.442695, %v13998_v32 }
 0xaf9   :  { %v6297_v6 = vadd.f32 1.0, %v9635_v46 }
 0xafa   :  { %9636 = vpow2.f32 %v8524_v13 }
 0xafb   :  { %9638 = vrcp.f32 %v6297_v6  ;;  %v6324_v60 = vand.u32 2147483648, %v6297_v6  ;;  %v6322_v4 = vand.u32 2147483647, %v6297_v6  ;;  %vm6318_vm4 = vweird.f32 %v6297_v6 }
 0xafd   :  { %v6182_v19 = vpop.f32.mrf.mxu0  ;;  %v6325_v48 = vor.u32 1.1754944e-38, %v6324_v60  ;;  %vm6323_vm6 = vcmp.eq.f32.partialorder %v6322_v4, 8.507059e+37 }
 0xafe   :  { %v14003_v52 = vadd.f32 %v6182_v19, %v6097_v40 }
 0xb00   :  { %v9637_v33 = vpop.eup %9636  ;;  %v8525_v55 = vmul.f32 -1.442695, %v14003_v52 }
 0xb01   :  { %v9639_v5 = vpop.eup %9638  ;;  %v6298_v15 = vadd.f32 1.0, %v9637_v33 }
 0xb02   :  { %9640 = vpow2.f32 %v8525_v55  ;;  %v6314_v36 = vmul.f32 %v9639_v5, %v6297_v6  ;;  %vm6319_vm3 = vweird.f32 %v9639_v5 }
 0xb03   :  { %9642 = vrcp.f32 %v6298_v15  ;;  %vm6320_vm5 = vmor %vm6318_vm4, %vm6319_vm3  ;;  %v6339_v13 = vand.u32 2147483648, %v6298_v15  ;;  %v6337_v19 = vand.u32 2147483647, %v6298_v15  ;;  %vm6333_vm9 = vweird.f32 %v6298_v15 }
 0xb04   :  { %v6315_v17 = vsub.f32 1.0, %v6314_v36 }
 0xb05   :  { %v6184_v43 = vpop.f32.mrf.mxu0  ;;  %vm6338_vm11 = vcmp.eq.f32.partialorder %v6337_v19, 8.507059e+37 }
 0xb06   :  { %v14008_v47 = vadd.f32 %v6184_v43, %v6098_v11  ;;  %v6316_v10 = vmul.f32 %v9639_v5, %v6315_v17  ;;  %v6340_v17 = vor.u32 1.1754944e-38, %v6339_v13 }
 0xb08   :  { %v9641_v45 = vpop.eup %9640  ;;  %v8526_v50 = vmul.f32 -1.442695, %v14008_v47  ;;  %v6317_v29 = vadd.f32 %v9639_v5, %v6316_v10  ;;  %v6100_v10 = vadd.f32 %v13990_v7, %v13948_v26 }
 0xb09   :  { %v9643_v59 = vpop.eup %9642  ;;  %v6299_v16 = vadd.f32 1.0, %v9641_v45 }
 0xb0a   :  { %9644 = vpow2.f32 %v8526_v50  ;;  %v6321_v39 = vsel %vm6320_vm5, %v9639_v5, %v6317_v29  ;;  %v6329_v22 = vmul.f32 %v9643_v59, %v6298_v15  ;;  %vm6334_vm8 = vweird.f32 %v9643_v59 }
 0xb0b   :  { %9646 = vrcp.f32 %v6299_v16  ;;  %v6326_v2 = vsel %vm6323_vm6, %v6325_v48, %v6321_v39  ;;  %vm6335_vm10 = vmor %vm6333_vm9, %vm6334_vm8  ;;  %v6354_v50 = vand.u32 2147483648, %v6299_v16  ;;  %v6352_v48 = vand.u32 2147483647, %v6299_v16 }
 0xb0c   :  { %6569 = vrot.lane.b32.xlu2 %v6326_v2, %s9808_s30  ;;  %v6330_v14 = vsub.f32 1.0, %v6329_v22  ;;  %vm6348_vm15 = vweird.f32 %v6299_v16 }
 0xb0d   :  { %v6187_v46 = vpop.f32.mrf.mxu0  ;;  %vm6353_vm1 = vcmp.eq.f32.partialorder %v6352_v48, 8.507059e+37 }
 0xb0e   :  { %v14014_v40 = vadd.f32 %v6187_v46, %v6099_v38  ;;  %v6331_v6 = vmul.f32 %v9643_v59, %v6330_v14  ;;  %v6355_v14 = vor.u32 1.1754944e-38, %v6354_v50 }
 0xb10   :  { %v9645_v33 = vpop.eup %9644  ;;  %v8527_v55 = vmul.f32 -1.442695, %v14014_v40  ;;  %v6332_v5 = vadd.f32 %v9643_v59, %v6331_v6  ;;  %v6101_v6 = vadd.f32 %v13990_v7, %v13950_v27 }
 0xb11   :  { %v9647_v36 = vpop.eup %9646  ;;  %v6300_v11 = vadd.f32 1.0, %v9645_v33 }
 0xb12   :  { %9648 = vpow2.f32 %v8527_v55  ;;  %v6336_v18 = vsel %vm6335_vm10, %v9643_v59, %v6332_v5  ;;  %v6344_v43 = vmul.f32 %v9647_v36, %v6299_v16  ;;  %vm6349_vm14 = vweird.f32 %v9647_v36 }
 0xb13   :  { %9650 = vrcp.f32 %v6300_v11  ;;  %v6341_v60 = vsel %vm6338_vm11, %v6340_v17, %v6336_v18  ;;  %vm6350_vm0 = vmor %vm6348_vm15, %vm6349_vm14  ;;  %v6369_v55 = vand.u32 2147483648, %v6300_v11  ;;  %v6367_v17 = vand.u32 2147483647, %v6300_v11 }
 0xb14   :  { %6571 = vrot.lane.b32.xlu0 %v6341_v60, %s9808_s30  ;;  %v6345_v4 = vsub.f32 1.0, %v6344_v43  ;;  %v9152_v43 = vpop.permute.xlu0 %9151  ;;  %vm6363_vm4 = vweird.f32 %v6300_v11 }
 0xb15   :  { %v6189_v45 = vpop.f32.mrf.mxu0  ;;  %v6370_v27 = vor.u32 1.1754944e-38, %v6369_v55  ;;  %vm6368_vm6 = vcmp.eq.f32.partialorder %v6367_v17, 8.507059e+37 }
 0xb16   :  { %v14020_v29 = vadd.f32 %v6189_v45, %v6100_v10  ;;  %v6346_v15 = vmul.f32 %v9647_v36, %v6345_v4 }
 0xb18   :  { %v9649_v39 = vpop.eup %9648  ;;  %v8528_v59 = vmul.f32 -1.442695, %v14020_v29  ;;  %v6347_v22 = vadd.f32 %v9647_v36, %v6346_v15  ;;  %v9154_v15 = vunpack.i.h.bf16 %v9152_v43 }
 0xb19   :  { %v9651_v2 = vpop.eup %9650  ;;  %v6301_v38 = vadd.f32 1.0, %v9649_v39  ;;  %v6102_v39 = vadd.f32 %v13990_v7, %v13953_v23 }
 0xb1a   :  { %9652 = vpow2.f32 %v8528_v59  ;;  %v6351_v26 = vsel %vm6350_vm0, %v9647_v36, %v6347_v22  ;;  %v6359_v46 = vmul.f32 %v9651_v2, %v6300_v11  ;;  %vm6364_vm3 = vweird.f32 %v9651_v2 }
 0xb1b   :  { %9654 = vrcp.f32 %v6301_v38  ;;  %v6356_v13 = vsel %vm6353_vm1, %v6355_v14, %v6351_v26  ;;  %vm6365_vm5 = vmor %vm6363_vm4, %vm6364_vm3  ;;  %v9153_v59 = vunpack.i.l.bf16 %v9152_v43  ;;  %v6384_v14 = vand.u32 2147483648, %v6301_v38 }
 0xb1c   :  { %6573 = vrot.lane.b32.xlu1 %v6356_v13, %s9808_s30  ;;  %v6360_v19 = vsub.f32 1.0, %v6359_v46  ;;  %v5939_v13 = vsel %vm278_vm2, %v9154_v15, %v13816_v53  ;;  %vm6378_vm9 = vweird.f32 %v6301_v38 }
 0xb1d   :  { %v6192_v33 = vpop.f32.mrf.mxu0 }
 0xb1e   :  { %v14026_v5 = vadd.f32 %v6192_v33, %v6101_v6  ;;  %v6361_v16 = vmul.f32 %v9651_v2, %v6360_v19  ;;  %v5938_v19 = vsel %vm278_vm2, %v9153_v59, %v13758_v9 }
 0xb20   :  { %v9653_v18 = vpop.eup %9652  ;;  %v8529_v36 = vmul.f32 -1.442695, %v14026_v5  ;;  %v6362_v60 = vadd.f32 %v9651_v2, %v6361_v16 }
 0xb21   :  { %v9655_v10 = vpop.eup %9654  ;;  %v14029_v4 = vadd.f32 1.0, %v9653_v18 }
 0xb22   :  { %9656 = vpow2.f32 %v8529_v36  ;;  %v6366_v45 = vsel %vm6365_vm5, %v9651_v2, %v6362_v60  ;;  %v6374_v50 = vmul.f32 %v9655_v10, %v6301_v38  ;;  %vm6379_vm8 = vweird.f32 %v9655_v10 }
 0xb23   :  { %9658 = vrcp.f32 %v14029_v4  ;;  %v6371_v48 = vsel %vm6368_vm6, %v6370_v27, %v6366_v45  ;;  %v6382_v2 = vand.u32 2147483647, %v6301_v38  ;;  %vm6380_vm10 = vmor %vm6378_vm9, %vm6379_vm8  ;;  %v6385_v36 = vor.u32 1.1754944e-38, %v6384_v14 }
 0xb24   :  { %6575 = vrot.lane.b32.xlu2 %v6371_v48, %s9808_s30  ;;  %v6375_v11 = vsub.f32 1.0, %v6374_v50  ;;  %v6103_v38 = vadd.f32 %v13990_v7, %v13956_v12  ;;  %vm6393_vm15 = vweird.f32 %v14029_v4 }
 0xb25   :  { %v6194_v22 = vpop.f32.mrf.mxu0  ;;  %vm6383_vm11 = vcmp.eq.f32.partialorder %v6382_v2, 8.507059e+37 }
 0xb26   :  { %v14035_v26 = vadd.f32 %v6194_v22, %v6102_v39  ;;  %v6376_v46 = vmul.f32 %v9655_v10, %v6375_v11  ;;  %v6399_v39 = vand.u32 2147483648, %v14029_v4  ;;  %v6397_v11 = vand.u32 2147483647, %v14029_v4 }
 0xb28   :  { %v9657_v6 = vpop.eup %9656  ;;  %v8530_v23 = vmul.f32 -1.442695, %v14035_v26  ;;  %v9157_v33 = vpop.permute.xlu1 %9156  ;;  %v6377_v55 = vadd.f32 %v9655_v10, %v6376_v46  ;;  %vm6398_vm1 = vcmp.eq.f32.partialorder %v6397_v11, 8.507059e+37 }
 0xb29   :  { %v9659_v16 = vpop.eup %9658  ;;  %v6303_v17 = vadd.f32 1.0, %v9657_v6  ;;  %v9159_v18 = vunpack.i.h.bf16 %v9157_v33  ;;  %v9158_v43 = vunpack.i.l.bf16 %v9157_v33  ;;  %v8736_v33 = vld [vmem:[%s14867_s9 + $0x20] sm:$0xff] }
 0xb2a   :  { %9660 = vpow2.f32 %v8530_v23  ;;  %v6381_v60 = vsel %vm6380_vm10, %v9655_v10, %v6377_v55  ;;  %v6389_v53 = vmul.f32 %v9659_v16, %v14029_v4  ;;  %vm6394_vm14 = vweird.f32 %v9659_v16  ;;  %6694 = vmatpush.bf16.msrb.mxu3 %v8736_v33 }
 0xb2b   :  { %9662 = vrcp.f32 %v6303_v17  ;;  %v5958_v27 = vsel %vm1471_vm12, %v5938_v19, %v9158_v43  ;;  %v5959_v9 = vsel %vm1471_vm12, %v5939_v13, %v9159_v18  ;;  %v6386_v45 = vsel %vm6383_vm11, %v6385_v36, %v6381_v60  ;;  %vm6395_vm0 = vmor %vm6393_vm15, %vm6394_vm14 }
 0xb2c   :  { %v6125_v50 = vpack.c.bf16 %v5959_v9, %v5958_v27  ;;  %6577 = vrot.lane.b32.xlu0 %v6386_v45, %s9808_s30  ;;  %v6390_v15 = vsub.f32 1.0, %v6389_v53  ;;  %v6400_v13 = vor.u32 1.1754944e-38, %v6399_v39  ;;  %v6104_v55 = vadd.f32 %v13990_v7, %v13962_v21 }
 0xb2d   :  { %v6197_v48 = vpop.f32.mrf.mxu0  ;;  %v6414_v43 = vand.u32 2147483648, %v6303_v17  ;;  %v6412_v60 = vand.u32 2147483647, %v6303_v17  ;;  %vm6408_vm4 = vweird.f32 %v6303_v17  ;;  %v6105_v39 = vadd.f32 %v13990_v7, %v13965_v35 }
 0xb2e   :  { %v14049_v10 = vadd.f32 %v6197_v48, %v6103_v38  ;;  %8522 = vmatmul.msk.bf16.gmra.mxu0 %vm1567_vm13, %v6125_v50  ;;  %v6391_v59 = vmul.f32 %v9659_v16, %v6390_v15 }
 0xb2f   :  { %v6415_v21 = vor.u32 1.1754944e-38, %v6414_v43  ;;  %vm6413_vm6 = vcmp.eq.f32.partialorder %v6412_v60, 8.507059e+37 }
 0xb30   :  { %v9661_v22 = vpop.eup %9660  ;;  %v8531_v14 = vmul.f32 -1.442695, %v14049_v10  ;;  %v6392_v46 = vadd.f32 %v9659_v16, %v6391_v59 }
 0xb31   :  { %v9663_v12 = vpop.eup %9662  ;;  %v6304_v2 = vadd.f32 1.0, %v9661_v22 }
 0xb32   :  { %9664 = vpow2.f32 %v8531_v14  ;;  %v6396_v6 = vsel %vm6395_vm0, %v9659_v16, %v6392_v46  ;;  %v6404_v19 = vmul.f32 %v9663_v12, %v6303_v17  ;;  %vm6409_vm3 = vweird.f32 %v9663_v12 }
 0xb33   :  { %9666 = vrcp.f32 %v6304_v2  ;;  %v6401_v23 = vsel %vm6398_vm1, %v6400_v13, %v6396_v6  ;;  %vm6410_vm5 = vmor %vm6408_vm4, %vm6409_vm3  ;;  %v6429_v22 = vand.u32 2147483648, %v6304_v2  ;;  %v6427_v46 = vand.u32 2147483647, %v6304_v2 }
 0xb34   :  { %6579 = vrot.lane.b32.xlu1 %v6401_v23, %s9808_s30  ;;  %v6405_v4 = vsub.f32 1.0, %v6404_v19  ;;  %vm6423_vm9 = vweird.f32 %v6304_v2 }
 0xb35   :  { %v6199_v18 = vpop.f32.mrf.mxu0  ;;  %v6430_v33 = vor.u32 1.1754944e-38, %v6429_v22  ;;  %vm6428_vm11 = vcmp.eq.f32.partialorder %v6427_v46, 8.507059e+37 }
 0xb36   :  { %v14061_v36 = vadd.f32 %v6199_v18, %v6104_v55  ;;  %v6406_v16 = vmul.f32 %v9663_v12, %v6405_v4  ;;  %v6106_v18 = vadd.f32 %v13990_v7, %v13968_v24 }
 0xb38   :  { %v9665_v53 = vpop.eup %9664  ;;  %v8532_v27 = vmul.f32 -1.442695, %v14061_v36  ;;  %v6407_v9 = vadd.f32 %v9663_v12, %v6406_v16 }
 0xb39   :  { %v9667_v45 = vpop.eup %9666  ;;  %v6305_v38 = vadd.f32 1.0, %v9665_v53 }
 0xb3a   :  { %9668 = vpow2.f32 %v8532_v27  ;;  %v6411_v50 = vsel %vm6410_vm5, %v9663_v12, %v6407_v9  ;;  %v6419_v15 = vmul.f32 %v9667_v45, %v6304_v2  ;;  %vm6424_vm8 = vweird.f32 %v9667_v45 }
 0xb3b   :  { %9670 = vrcp.f32 %v6305_v38  ;;  %v6416_v48 = vsel %vm6413_vm6, %v6415_v21, %v6411_v50  ;;  %vm6425_vm10 = vmor %vm6423_vm9, %vm6424_vm8  ;;  %v6444_v60 = vand.u32 2147483648, %v6305_v38  ;;  %v6442_v27 = vand.u32 2147483647, %v6305_v38 }
 0xb3c   :  { %6581 = vrot.lane.b32.xlu2 %v6416_v48, %s9808_s30  ;;  %v6420_v59 = vsub.f32 1.0, %v6419_v15  ;;  %vm6438_vm15 = vweird.f32 %v6305_v38 }
 0xb3d   :  { %v6202_v11 = vpop.f32.mrf.mxu0  ;;  %v6445_v48 = vor.u32 1.1754944e-38, %v6444_v60  ;;  %vm6443_vm1 = vcmp.eq.f32.partialorder %v6442_v27, 8.507059e+37 }
 0xb3e   :  { %v14067_v14 = vadd.f32 %v6202_v11, %v6105_v39  ;;  %v6421_v17 = vmul.f32 %v9667_v45, %v6420_v59 }
 0xb40   :  { %v9669_v13 = vpop.eup %9668  ;;  %v8533_v12 = vmul.f32 -1.442695, %v14067_v14  ;;  %v6422_v6 = vadd.f32 %v9667_v45, %v6421_v17 }
 0xb41   :  { %v9671_v19 = vpop.eup %9670  ;;  %v6306_v23 = vadd.f32 1.0, %v9669_v13 }
 0xb42   :  { %9672 = vpow2.f32 %v8533_v12  ;;  %v6426_v35 = vsel %vm6425_vm10, %v9667_v45, %v6422_v6  ;;  %v6434_v55 = vmul.f32 %v9671_v19, %v6305_v38  ;;  %vm6439_vm14 = vweird.f32 %v9671_v19 }
 0xb43   :  { %9674 = vrcp.f32 %v6306_v23  ;;  %v6431_v4 = vsel %vm6428_vm11, %v6430_v33, %v6426_v35  ;;  %vm6440_vm0 = vmor %vm6438_vm15, %vm6439_vm14  ;;  %v6459_v22 = vand.u32 2147483648, %v6306_v23  ;;  %v6457_v46 = vand.u32 2147483647, %v6306_v23 }
 0xb44   :  { %6583 = vrot.lane.b32.xlu0 %v6431_v4, %s9808_s30  ;;  %v6435_v43 = vsub.f32 1.0, %v6434_v55  ;;  %vm6453_vm4 = vweird.f32 %v6306_v23 }
 0xb45   :  { %v6204_v16 = vpop.f32.mrf.mxu0  ;;  %v6460_v33 = vor.u32 1.1754944e-38, %v6459_v22  ;;  %vm6458_vm6 = vcmp.eq.f32.partialorder %v6457_v46, 8.507059e+37  ;;  %v6107_v22 = vadd.f32 %v13990_v7, %v13970_v1 }
 0xb46   :  { %v14073_v53 = vadd.f32 %v6204_v16, %v6106_v18  ;;  %v6436_v2 = vmul.f32 %v9671_v19, %v6435_v43 }
 0xb48   :  { %v9673_v9 = vpop.eup %9672  ;;  %v8534_v45 = vmul.f32 -1.442695, %v14073_v53  ;;  %v6437_v21 = vadd.f32 %v9671_v19, %v6436_v2 }
 0xb49   :  { %v9675_v50 = vpop.eup %9674  ;;  %v6307_v15 = vadd.f32 1.0, %v9673_v9 }
 0xb4a   :  { %9676 = vpow2.f32 %v8534_v45  ;;  %v6441_v24 = vsel %vm6440_vm0, %v9671_v19, %v6437_v21  ;;  %v6449_v39 = vmul.f32 %v9675_v50, %v6306_v23  ;;  %vm6454_vm3 = vweird.f32 %v9675_v50 }
 0xb4b   :  { %9678 = vrcp.f32 %v6307_v15  ;;  %v6446_v59 = vsel %vm6443_vm1, %v6445_v48, %v6441_v24  ;;  %vm6455_vm5 = vmor %vm6453_vm4, %vm6454_vm3  ;;  %v6474_v18 = vand.u32 2147483648, %v6307_v15  ;;  %v6472_v16 = vand.u32 2147483647, %v6307_v15 }
 0xb4c   :  { %6585 = vrot.lane.b32.xlu1 %v6446_v59, %s9808_s30  ;;  %v6450_v11 = vsub.f32 1.0, %v6449_v39  ;;  %vm6468_vm9 = vweird.f32 %v6307_v15 }
 0xb4d   :  { %v6475_v23 = vor.u32 1.1754944e-38, %v6474_v18  ;;  %vm6473_vm11 = vcmp.eq.f32.partialorder %v6472_v16, 8.507059e+37 }
 0xb4e   :  { %v6451_v17 = vmul.f32 %v9675_v50, %v6450_v11 }
 0xb50   :  { %v9677_v13 = vpop.eup %9676  ;;  %v6452_v12 = vadd.f32 %v9675_v50, %v6451_v17 }
 0xb51   :  { %v9679_v38 = vpop.eup %9678  ;;  %v6308_v6 = vadd.f32 1.0, %v9677_v13 }
 0xb52   :  { %v6456_v35 = vsel %vm6455_vm5, %v9675_v50, %v6452_v12  ;;  %v6464_v19 = vmul.f32 %v9679_v38, %v6307_v15  ;;  %vm6469_vm8 = vweird.f32 %v9679_v38  ;;  %v6108_v12 = vadd.f32 %v13990_v7, %v13972_v41 }
 0xb53   :  { %9680 = vrcp.f32 %v6308_v6  ;;  %v6461_v55 = vsel %vm6458_vm6, %v6460_v33, %v6456_v35  ;;  %vm6470_vm10 = vmor %vm6468_vm9, %vm6469_vm8  ;;  %v6489_v50 = vand.u32 2147483648, %v6308_v6  ;;  %v6487_v24 = vand.u32 2147483647, %v6308_v6 }
 0xb54   :  { %6587 = vrot.lane.b32.xlu2 %v6461_v55, %s9808_s30  ;;  %v6465_v4 = vsub.f32 1.0, %v6464_v19  ;;  %vm6483_vm15 = vweird.f32 %v6308_v6 }
 0xb55   :  { %v6490_v59 = vor.u32 1.1754944e-38, %v6489_v50  ;;  %vm6488_vm1 = vcmp.eq.f32.partialorder %v6487_v24, 8.507059e+37 }
 0xb56   :  { %v6466_v43 = vmul.f32 %v9679_v38, %v6465_v4 }
 0xb58   :  { %v6467_v60 = vadd.f32 %v9679_v38, %v6466_v43 }
 0xb59   :  { %v9681_v2 = vpop.eup %9680 }
 0xb5a   :  { %v6471_v27 = vsel %vm6470_vm10, %v9679_v38, %v6467_v60  ;;  %v6479_v9 = vmul.f32 %v9681_v2, %v6308_v6  ;;  %vm6484_vm14 = vweird.f32 %v9681_v2 }
 0xb5b   :  { %v6476_v45 = vsel %vm6473_vm11, %v6475_v23, %v6471_v27  ;;  %vm6485_vm0 = vmor %vm6483_vm15, %vm6484_vm14 }
 0xb5c   :  { %6589 = vrot.lane.b32.xlu0 %v6476_v45, %s9808_s30  ;;  %v6480_v21 = vsub.f32 1.0, %v6479_v9 }
 0xb5e   :  { %v6481_v48 = vmul.f32 %v9681_v2, %v6480_v21 }
 0xb60   :  { %v6482_v39 = vadd.f32 %v9681_v2, %v6481_v48 }
 0xb62   :  { %v6486_v11 = vsel %vm6485_vm0, %v9681_v2, %v6482_v39 }
 0xb63   :  { %v6491_v15 = vsel %vm6488_vm1, %v6490_v59, %v6486_v11 }
 0xb64   :  { %6591 = vrot.lane.b32.xlu1 %v6491_v15, %s9808_s30 }
 0xb65   :  { %v6207_v17 = vpop.f32.mrf.mxu0 }
 0xb66   :  { %v14082_v46 = vadd.f32 %v6207_v17, %v6107_v22  ;;  %v6570_v50 = vpop.permute.xlu2 %6569 }
 0xb68   :  { %v8535_v13 = vmul.f32 -1.442695, %v14082_v46 }
 0xb6a   :  { %9682 = vpow2.f32 %v8535_v13 }
 0xb6d   :  { %v6209_v38 = vpop.f32.mrf.mxu0 }
 0xb6e   :  { %v14087_v6 = vadd.f32 %v6209_v38, %v6108_v12 }
 0xb70   :  { %v9683_v33 = vpop.eup %9682  ;;  %v8536_v35 = vmul.f32 -1.442695, %v14087_v6 }
 0xb71   :  { %v6309_v19 = vadd.f32 1.0, %v9683_v33 }
 0xb72   :  { %9684 = vpow2.f32 %v8536_v35 }
 0xb73   :  { %9686 = vrcp.f32 %v6309_v19  ;;  %v6504_v16 = vand.u32 2147483648, %v6309_v19  ;;  %v6502_v2 = vand.u32 2147483647, %v6309_v19  ;;  %vm6498_vm4 = vweird.f32 %v6309_v19 }
 0xb75   :  { %v6505_v27 = vor.u32 1.1754944e-38, %v6504_v16  ;;  %vm6503_vm6 = vcmp.eq.f32.partialorder %v6502_v2, 8.507059e+37 }
 0xb78   :  { %v9685_v1 = vpop.eup %9684 }
 0xb79   :  { %v9687_v55 = vpop.eup %9686  ;;  %v6310_v4 = vadd.f32 1.0, %v9685_v1 }
 0xb7a   :  { %v6494_v18 = vmul.f32 %v9687_v55, %v6309_v19  ;;  %vm6499_vm3 = vweird.f32 %v9687_v55 }
 0xb7b   :  { %9688 = vrcp.f32 %v6310_v4  ;;  %vm6500_vm5 = vmor %vm6498_vm4, %vm6499_vm3  ;;  %v6519_v39 = vand.u32 2147483648, %v6310_v4  ;;  %vm6513_vm9 = vweird.f32 %v6310_v4 }
 0xb7c   :  { %v6495_v43 = vsub.f32 1.0, %v6494_v18  ;;  %9690 = vtanh.f32 %v13994_v44 }
 0xb7d   :  { %9692 = vtanh.f32 %v13998_v32  ;;  %v6517_v32 = vand.u32 2147483647, %v6310_v4  ;;  %v6520_v12 = vor.u32 1.1754944e-38, %v6519_v39 }
 0xb7e   :  { %v6496_v60 = vmul.f32 %v9687_v55, %v6495_v43  ;;  %9694 = vtanh.f32 %v14003_v52  ;;  %v6576_v35 = vpop.permute.xlu2 %6575 }
 0xb7f   :  { %9696 = vtanh.f32 %v14008_v47  ;;  %vm6518_vm11 = vcmp.eq.f32.partialorder %v6517_v32, 8.507059e+37 }
 0xb80   :  { %v6497_v41 = vadd.f32 %v9687_v55, %v6496_v60  ;;  %9698 = vtanh.f32 %v14014_v40 }
 0xb81   :  { %v9689_v23 = vpop.eup %9688  ;;  %9700 = vtanh.f32 %v14020_v29  ;;  %v6110_v29 = vadd.f32 %v13990_v7, %v13985_v51 }
 0xb82   :  { %v6501_v9 = vsel %vm6500_vm5, %v9687_v55, %v6497_v41  ;;  %v6509_v45 = vmul.f32 %v9689_v23, %v6310_v4  ;;  %v9691_v24 = vpop.eup %9690  ;;  %vm6514_vm8 = vweird.f32 %v9689_v23  ;;  %9702 = vtanh.f32 %v14026_v5 }
 0xb83   :  { %v6506_v21 = vsel %vm6503_vm6, %v6505_v27, %v6501_v9  ;;  %v9693_v59 = vpop.eup %9692  ;;  %v6617_v15 = vmul.f32 %v9691_v24, %v6570_v50  ;;  %vm6515_vm10 = vmor %vm6513_vm9, %vm6514_vm8  ;;  %v6109_v27 = vadd.f32 %v13990_v7, %v13974_v37  ;;  %9704 = vtanh.f32 %v14035_v26 }
 0xb84   :  { %6593 = vrot.lane.b32.xlu2 %v6506_v21, %s9808_s30  ;;  %v6510_v48 = vsub.f32 1.0, %v6509_v45  ;;  %v9695_v19 = vpop.eup %9694  ;;  %v9248_v21 = vld [vmem:[%s14861_s5 + $0x3] ss:$0 sm:$0xff] }
 0xb85   :  { %v9697_v1 = vpop.eup %9696 }
 0xb86   :  { %v6572_v11 = vpop.permute.xlu0 %6571  ;;  %v6511_v44 = vmul.f32 %v9689_v23, %v6510_v48  ;;  %v6620_v55 = vmul.f32 %v9697_v1, %v6576_v35  ;;  %v9699_v4 = vpop.eup %9698 }
 0xb87   :  { %v6618_v22 = vmul.f32 %v9693_v59, %v6572_v11  ;;  %v9701_v16 = vpop.eup %9700 }
 0xb88   :  { %v6512_v17 = vadd.f32 %v9689_v23, %v6511_v44  ;;  %v9703_v50 = vpop.eup %9702 }
 0xb89   :  { %v6638_v13 = vpack.c.bf16 %v6618_v22, %v6617_v15  ;;  %v9705_v5 = vpop.eup %9704 }
 0xb8a   :  { %v6516_v38 = vsel %vm6515_vm10, %v9689_v23, %v6512_v17 }
 0xb8b   :  { %8552 = vmatmul.msk.bf16.vlgmr.msrb.gmra.mxu3 %vm278_vm2, %v6638_v13  ;;  %v6521_v33 = vsel %vm6518_vm11, %v6520_v12, %v6516_v38 }
 0xb8c   :  { %6595 = vrot.lane.b32.xlu0 %v6521_v33, %s9808_s30 }
 0xb8e   :  { %v6574_v52 = vpop.permute.xlu1 %6573 }
 0xb8f   :  { %v6619_v18 = vmul.f32 %v9695_v19, %v6574_v52 }
 0xb91   :  { %v6639_v43 = vpack.c.bf16 %v6620_v55, %v6619_v18 }
 0xb94   :  { %7148 = vrot.lane.b32.xlu0 %v9248_v21, %s9806_s20 }
 0xb96   :  { %v6582_v48 = vpop.permute.xlu2 %6581 }
 0xb97   :  { %v6623_v51 = vmul.f32 %v9703_v50, %v6582_v48 }
 0xb9b   :  { %8553 = vmatmul.msk.bf16.gmra.mxu3 %vm278_vm2, %v6639_v43 }
 0xb9e   :  { %v6578_v47 = vpop.permute.xlu0 %6577 }
 0xb9f   :  { %v6621_v2 = vmul.f32 %v9699_v4, %v6578_v47 }
 0xba6   :  { %v6580_v60 = vpop.permute.xlu1 %6579 }
 0xba7   :  { %v6622_v41 = vmul.f32 %v9701_v16, %v6580_v60 }
 0xba9   :  { %v6640_v23 = vpack.c.bf16 %v6622_v41, %v6621_v2 }
 0xbab   :  { %v6212_v9 = vpop.f32.mrf.mxu0  ;;  %8554 = vmatmul.msk.bf16.gmra.mxu3 %vm278_vm2, %v6640_v23 }
 0xbac   :  { %v14103_v45 = vadd.f32 %v6212_v9, %v6109_v27 }
 0xbae   :  { %v8537_v40 = vmul.f32 -1.442695, %v14103_v45  ;;  %v6588_v15 = vpop.permute.xlu2 %6587 }
 0xbb0   :  { %9706 = vpow2.f32 %v8537_v40 }
 0xbb1   :  { %9708 = vtanh.f32 %v14049_v10 }
 0xbb2   :  { %9710 = vtanh.f32 %v14061_v36 }
 0xbb3   :  { %v6214_v37 = vpop.f32.mrf.mxu0 }
 0xbb4   :  { %v14113_v24 = vadd.f32 %v6214_v37, %v6110_v29 }
 0xbb6   :  { %v9707_v39 = vpop.eup %9706  ;;  %v8538_v26 = vmul.f32 -1.442695, %v14113_v24  ;;  %v6584_v59 = vpop.permute.xlu0 %6583 }
 0xbb7   :  { %v6311_v7 = vadd.f32 1.0, %v9707_v39  ;;  %v6624_v11 = vmul.f32 %v9705_v5, %v6584_v59  ;;  %v9709_v32 = vpop.eup %9708 }
 0xbb8   :  { %9712 = vpow2.f32 %v8538_v26  ;;  %v9711_v22 = vpop.eup %9710 }
 0xbb9   :  { %9714 = vrcp.f32 %v6311_v7  ;;  %v6641_v44 = vpack.c.bf16 %v6624_v11, %v6623_v51  ;;  %v6626_v10 = vmul.f32 %v9711_v22, %v6588_v15  ;;  %v6534_v1 = vand.u32 2147483648, %v6311_v7  ;;  %v14132_v22 = vld [vmem:[%s14868_s10 + $0x2] ss:$0 sm:$0xff] }
 0xbba   :  { %v6532_v55 = vand.u32 2147483647, %v6311_v7  ;;  %vm6528_vm15 = vweird.f32 %v6311_v7 }
 0xbbb   :  { %8555 = vmatmul.msk.bf16.gmra.mxu3 %vm278_vm2, %v6641_v44  ;;  %v6535_v47 = vor.u32 1.1754944e-38, %v6534_v1 }
 0xbbc   :  { %vm6533_vm1 = vcmp.eq.f32.partialorder %v6532_v55, 8.507059e+37 }
 0xbbe   :  { %v9713_v17 = vpop.eup %9712  ;;  %v6586_v13 = vpop.permute.xlu1 %6585 }
 0xbbf   :  { %v9715_v12 = vpop.eup %9714  ;;  %v6312_v38 = vadd.f32 1.0, %v9713_v17  ;;  %v6625_v33 = vmul.f32 %v9709_v32, %v6586_v13 }
 0xbc0   :  { %v6524_v35 = vmul.f32 %v9715_v12, %v6311_v7  ;;  %vm6529_vm14 = vweird.f32 %v9715_v12 }
 0xbc1   :  { %9716 = vrcp.f32 %v6312_v38  ;;  %v6642_v36 = vpack.c.bf16 %v6626_v10, %v6625_v33  ;;  %vm6530_vm0 = vmor %vm6528_vm15, %vm6529_vm14  ;;  %v6549_v41 = vand.u32 2147483648, %v6312_v38  ;;  %v6547_v27 = vand.u32 2147483647, %v6312_v38 }
 0xbc2   :  { %v6525_v19 = vsub.f32 1.0, %v6524_v35  ;;  %vm6543_vm4 = vweird.f32 %v6312_v38  ;;  %9718 = vtanh.f32 %v14067_v14 }
 0xbc3   :  { %v6550_v40 = vor.u32 1.1754944e-38, %v6549_v41  ;;  %9720 = vtanh.f32 %v14073_v53  ;;  %vm6548_vm6 = vcmp.eq.f32.partialorder %v6547_v27, 8.507059e+37 }
 0xbc4   :  { %v6526_v52 = vmul.f32 %v9715_v12, %v6525_v19  ;;  %9722 = vtanh.f32 %v14082_v46 }
 0xbc5   :  { %9724 = vtanh.f32 %v14087_v6 }
 0xbc6   :  { %v6527_v18 = vadd.f32 %v9715_v12, %v6526_v52  ;;  %9726 = vtanh.f32 %v14103_v45 }
 0xbc7   :  { %v9717_v43 = vpop.eup %9716  ;;  %9728 = vtanh.f32 %v14113_v24 }
 0xbc8   :  { %v6531_v4 = vsel %vm6530_vm0, %v9715_v12, %v6527_v18  ;;  %v6539_v16 = vmul.f32 %v9717_v43, %v6312_v38  ;;  %vm6544_vm3 = vweird.f32 %v9717_v43  ;;  %v9719_v50 = vpop.eup %9718 }
 0xbc9   :  { %v6536_v60 = vsel %vm6533_vm1, %v6535_v47, %v6531_v4  ;;  %vm6545_vm5 = vmor %vm6543_vm4, %vm6544_vm3  ;;  %v9721_v48 = vpop.eup %9720 }
 0xbca   :  { %6597 = vrot.lane.b32.xlu1 %v6536_v60, %s9808_s30  ;;  %v6540_v2 = vsub.f32 1.0, %v6539_v16  ;;  %v9723_v53 = vpop.eup %9722 }
 0xbcb   :  { %8556 = vmatmul.msk.bf16.gmra.mxu3 %vm278_vm2, %v6642_v36  ;;  %v9725_v51 = vpop.eup %9724 }
 0xbcc   :  { %v6541_v23 = vmul.f32 %v9717_v43, %v6540_v2 }
 0xbce   :  { %v6542_v9 = vadd.f32 %v9717_v43, %v6541_v23  ;;  %v6590_v37 = vpop.permute.xlu0 %6589  ;;  %v8560_v23 = vld [vmem:[%s14863_s3 + $0x30] sm:$0xff] }
 0xbcf   :  { %v6627_v39 = vmul.f32 %v9719_v50, %v6590_v37 }
 0xbd0   :  { %v6546_v29 = vsel %vm6545_vm5, %v9717_v43, %v6542_v9 }
 0xbd1   :  { %v6551_v21 = vsel %vm6548_vm6, %v6550_v40, %v6546_v29 }
 0xbd2   :  { %6599 = vrot.lane.b32.xlu2 %v6551_v21, %s9808_s30  ;;  %6873 = vrot.lane.b32.xlu1 %v8560_v23, %s9806_s20 }
 0xbd6   :  { %v6592_v5 = vpop.permute.xlu1 %6591 }
 0xbd7   :  { %v6628_v26 = vmul.f32 %v9721_v48, %v6592_v5 }
 0xbd9   :  { %v6643_v59 = vpack.c.bf16 %v6628_v26, %v6627_v39 }
 0xbdb   :  { %8557 = vmatmul.msk.bf16.gmra.mxu3 %vm278_vm2, %v6643_v59 }
 0xbde   :  { %v6594_v14 = vpop.permute.xlu2 %6593 }
 0xbdf   :  { %v6629_v11 = vmul.f32 %v9723_v53, %v6594_v14 }
 0xbfe   :  { %v6596_v7 = vpop.permute.xlu0 %6595 }
 0xbff   :  { %v6630_v44 = vmul.f32 %v9725_v51, %v6596_v7 }
 0xc01   :  { %v6644_v32 = vpack.c.bf16 %v6630_v44, %v6629_v11 }
 0xc03   :  { %8558 = vmatmul.msk.bf16.gmra.mxu3 %vm278_vm2, %v6644_v32 }
 0xc0e   :  { %v6696_v15 = vpop.f32.mrf.mxu3 }
 0xc0f   :  { %v6697_v17 = vadd.f32 %v14132_v22, %v6696_v15 }
 0xc11   :  { %v14136_v6 = vadd.f32 %v6697_v17, %v13167_v0 }
 0xc13   :  { %v6760_v10 = vmul.f32 %v14136_v6, %v14136_v6 }
 0xc15   :  { %v6808_v36 = vsel %vm2907_vm7, %v6760_v10, 0.0 }
 0xc16   :  { %v6698_v46 = vpop.f32.mrf.mxu3 }
 0xc17   :  { %v6699_v13 = vadd.f32 %v14132_v22, %v6698_v46 }
 0xc19   :  { %v14140_v12 = vadd.f32 %v6699_v13, %v13185_v62  ;;  %v6776_v62 = vsel %vm2907_vm7, %v14136_v6, 0.0 }
 0xc1b   :  { %v6761_v38 = vmul.f32 %v14140_v12, %v14140_v12  ;;  %v6791_v0 = vsel %vm2907_vm7, %v14140_v12, 0.0 }
 0xc1c   :  { %v6896_v55 = vadd.f32 %v6791_v0, %v6776_v62 }
 0xc1d   :  { %v6823_v33 = vsel %vm2907_vm7, %v6761_v38, 0.0 }
 0xc1e   :  { %v6701_v35 = vpop.f32.mrf.mxu3  ;;  %v6960_v1 = vadd.f32 %v6823_v33, %v6808_v36  ;;  %v6897_v16 = vrot.slane %v6896_v55, 4 }
 0xc1f   :  { %v6702_v19 = vadd.f32 %v14132_v22, %v6701_v35 }
 0xc20   :  { %v6961_v47 = vrot.slane %v6960_v1, 4 }
 0xc21   :  { %v14154_v52 = vadd.f32 %v6702_v19, %v13230_v63  ;;  %v6898_v63 = vadd.f32 %v6897_v16, %v6896_v55 }
 0xc22   :  { %v6962_v40 = vadd.f32 %v6961_v47, %v6960_v1 }
 0xc23   :  { %v6762_v18 = vmul.f32 %v14154_v52, %v14154_v52  ;;  %v6777_v43 = vsel %vm2907_vm7, %v14154_v52, 0.0  ;;  %v6899_v9 = vrot.slane %v6898_v63, 2 }
 0xc24   :  { %v6778_v4 = vadd.f32 %v6777_v43, %v6776_v62  ;;  %v6963_v37 = vrot.slane %v6962_v40, 2 }
 0xc25   :  { %v6809_v60 = vsel %vm2907_vm7, %v6762_v18, 0.0  ;;  %v6900_v21 = vadd.f32 %v6899_v9, %v6898_v63  ;;  %v9727_v18 = vpop.eup %9726 }
 0xc26   :  { %v6810_v2 = vadd.f32 %v6809_v60, %v6808_v36  ;;  %v6703_v41 = vpop.f32.mrf.mxu3  ;;  %v6964_v26 = vadd.f32 %v6963_v37, %v6962_v40  ;;  %v9729_v24 = vpop.eup %9728 }
 0xc27   :  { %v6704_v27 = vadd.f32 %v14132_v22, %v6703_v41  ;;  %v6901_v39 = vrot.slane %v6900_v21, 1 }
 0xc28   :  { %v6965_v7 = vrot.slane %v6964_v26, 1 }
 0xc29   :  { %v14167_v29 = vadd.f32 %v6704_v27, %v13267_v58  ;;  %v6902_v51 = vadd.f32 %v6901_v39, %v6900_v21 }
 0xc2a   :  { %v6966_v44 = vadd.f32 %v6965_v7, %v6964_v26 }
 0xc2b   :  { %v6763_v50 = vmul.f32 %v14167_v29, %v14167_v29  ;;  %v6792_v48 = vsel %vm2907_vm7, %v14167_v29, 0.0  ;;  %v14175_v11 = vmul.f32 0.0625, %v6902_v51 }
 0xc2c   :  { %v6793_v5 = vadd.f32 %v6792_v48, %v6791_v0  ;;  %v7016_v15 = vmul.f32 0.0625, %v6966_v44  ;;  %v6600_v62 = vpop.permute.xlu2 %6599  ;;  %v6903_v27 = vadd.f32 %v6792_v48, %v6777_v43  ;;  %v14211_v44 = vpop.permute.xlu0 %7148 }
 0xc2d   :  { %v6824_v59 = vsel %vm2907_vm7, %v6763_v50, 0.0  ;;  %v7024_v17 = vmul.f32 %v14175_v11, %v14175_v11 }
 0xc2e   :  { %v6825_v14 = vadd.f32 %v6824_v59, %v6823_v33  ;;  %v6706_v53 = vpop.f32.mrf.mxu3  ;;  %v6967_v21 = vadd.f32 %v6824_v59, %v6809_v60  ;;  %v6904_v37 = vrot.slane %v6903_v27, 4 }
 0xc2f   :  { %v6707_v58 = vadd.f32 %v14132_v22, %v6706_v53  ;;  %v7032_v38 = vsub.f32 %v7016_v15, %v7024_v17 }
 0xc30   :  { %v6968_v26 = vrot.slane %v6967_v21, 4  ;;  %v6905_v51 = vadd.f32 %v6904_v37, %v6903_v27 }
 0xc31   :  { %v14178_v32 = vadd.f32 %v6707_v58, %v13245_v28  ;;  %v7040_v36 = vmul.f32 1.0666667, %v7032_v38 }
 0xc32   :  { %v6906_v43 = vrot.slane %v6905_v51, 2  ;;  %v6969_v48 = vadd.f32 %v6968_v26, %v6967_v21 }
 0xc33   :  { %v6764_v46 = vmul.f32 %v14178_v32, %v14178_v32  ;;  %v6779_v13 = vsel %vm2907_vm7, %v14178_v32, 0.0  ;;  %v7048_v19 = vmax.f32 %v7040_v36, 0.0  ;;  %v15284_v36 = vld [vmem:[#allocation34_spill] sm:$0xff] }
 0xc34   :  { %v14186_v10 = vadd.f32 %v6779_v13, %v6778_v4  ;;  %v6907_v38 = vadd.f32 %v6906_v43, %v6905_v51 }
 0xc35   :  { %v6811_v33 = vsel %vm2907_vm7, %v6764_v46, 0.0  ;;  %v7056_v55 = vadd.f32 1e-05, %v7048_v19 }
 0xc36   :  { %v14191_v28 = vadd.f32 %v6811_v33, %v6810_v2  ;;  %v6708_v35 = vpop.f32.mrf.mxu3  ;;  %v6632_v2 = vmul.f32 %v9729_v24, %v6600_v62 }
 0xc37   :  { %v6709_v0 = vadd.f32 %v14132_v22, %v6708_v35  ;;  %9730 = vrsqrt.f32 %v7056_v55  ;;  %vm7070_vm9 = vweird.f32 %v7056_v55  ;;  %v6970_v35 = vrot.slane %v6969_v48, 2 }
 0xc39   :  { %v14195_v1 = vadd.f32 %v6709_v0, %v15273_v61  ;;  %v15285_v0 = vld [vmem:[#allocation10_spill] sm:$0xff]  ;;  %v6971_v27 = vadd.f32 %v6970_v35, %v6969_v48 }
 0xc3a   :  { %v5059_v19 = vadd.f32 %v15285_v0, %v15284_v36 }
 0xc3b   :  { %v6765_v45 = vmul.f32 %v14195_v1, %v14195_v1  ;;  %v6794_v47 = vsel %vm2907_vm7, %v14195_v1, 0.0 }
 0xc3c   :  { %v14201_v4 = vadd.f32 %v6794_v47, %v6793_v5  ;;  %v6598_v16 = vpop.permute.xlu1 %6597 }
 0xc3d   :  { %v6826_v41 = vsel %vm2907_vm7, %v6765_v45, 0.0  ;;  %v6631_v23 = vmul.f32 %v9727_v18, %v6598_v16  ;;  %v9731_v40 = vpop.eup %9730  ;;  %v6910_v18 = vadd.f32 %v6794_v47, %v6779_v13 }
 0xc3e   :  { %v14204_v61 = vadd.f32 %v6826_v41, %v6825_v14  ;;  %v6711_v63 = vpop.f32.mrf.mxu3  ;;  %v7065_v50 = vmul.f32 %v9731_v40, %v7056_v55  ;;  %vm7071_vm8 = vweird.f32 %v9731_v40 }
 0xc3f   :  { %v6645_v9 = vpack.c.bf16 %v6632_v2, %v6631_v23  ;;  %v6712_v5 = vadd.f32 %v14132_v22, %v6711_v63  ;;  %vm7072_vm10 = vmor %vm7070_vm9, %vm7071_vm8  ;;  %v6974_v23 = vadd.f32 %v6826_v41, %v6811_v33  ;;  %v6908_v63 = vrot.slane %v6907_v38, 1 }
 0xc40   :  { %v7066_v39 = vmul.f32 %v9731_v40, %v7065_v50 }
 0xc41   :  { %8559 = vmatmul.msk.bf16.gmra.mxu3 %vm278_vm2, %v6645_v9  ;;  %v14209_v58 = vadd.f32 %v6712_v5, %v15274_v34  ;;  %v15286_v9 = vld [vmem:[#allocation25_spill] sm:$0xff]  ;;  %v6975_v21 = vrot.slane %v6974_v23, 4  ;;  %v6909_v5 = vadd.f32 %v6908_v63, %v6907_v38  ;;  %v15289_v63 = vld [vmem:[#allocation6_spill] sm:$0xff] }
 0xc42   :  { %v7067_v7 = vmul.f32 0.5, %v7066_v39  ;;  %v6972_v39 = vrot.slane %v6971_v27, 1 }
 0xc43   :  { %v6766_v60 = vmul.f32 %v14209_v58, %v14209_v58  ;;  %v6976_v35 = vadd.f32 %v6975_v21, %v6974_v23 }
 0xc44   :  { %v7068_v14 = vsub.f32 1.5, %v7067_v7 }
 0xc45   :  { %v14225_v45 = vsel %vm2907_vm7, %v6766_v60, 0.0  ;;  %v14268_v60 = vmul.f32 0.0625, %v6909_v5 }
 0xc46   :  { %v6713_v53 = vpop.f32.mrf.mxu3  ;;  %v7069_v15 = vmul.f32 %v9731_v40, %v7068_v14  ;;  %v6814_v47 = vadd.f32 %v14225_v45, %v14191_v28 }
 0xc47   :  { %v6714_v59 = vadd.f32 %v14132_v22, %v6713_v53 }
 0xc48   :  { %v7073_v17 = vsel %vm7072_vm10, %v9731_v40, %v7069_v15 }
 0xc49   :  { %v14217_v46 = vmul.f32 %v14211_v44, %v7073_v17  ;;  %v14228_v24 = vadd.f32 %v6714_v59, %v15275_v8  ;;  %v15287_v8 = vld [vmem:[#allocation11_spill] sm:$0xff]  ;;  %v6973_v59 = vadd.f32 %v6972_v39, %v6971_v27 }
 0xc4a   :  { %v5060_v40 = vadd.f32 %v15287_v8, %v15286_v9 }
 0xc4b   :  { %v7161_v55 = vmul.f32 %v14217_v46, %v14175_v11  ;;  %v6911_v11 = vrot.slane %v6910_v18, 4  ;;  %v6767_v33 = vmul.f32 %v14228_v24, %v14228_v24  ;;  %v14251_v28 = vsel %vm2907_vm7, %v14228_v24, 0.0 }
 0xc4c   :  { %v6797_v15 = vadd.f32 %v14251_v28, %v14201_v4 }
 0xc4d   :  { %7177 = vrot.lane.b32.xlu1 %v7161_v55, %s9808_s30  ;;  %v6912_v51 = vadd.f32 %v6911_v11, %v6910_v18  ;;  %v14259_v14 = vsel %vm2907_vm7, %v6767_v33, 0.0  ;;  %v7025_v18 = vmul.f32 %v14268_v60, %v14268_v60  ;;  %v15288_v55 = vld [vmem:[#allocation19_spill] sm:$0xff] }
 0xc4e   :  { %v6716_v34 = vpop.f32.mrf.mxu3  ;;  %v5061_v27 = vadd.f32 %v15289_v63, %v15288_v55 }
 0xc4f   :  { %v6717_v62 = vadd.f32 %v14132_v22, %v6716_v34  ;;  %v6913_v38 = vrot.slane %v6912_v51, 2 }
 0xc51   :  { %v14231_v16 = vadd.f32 %v6717_v62, %v15276_v42  ;;  %v14233_v2 = vadd.f32 %v6717_v62, %v5059_v19  ;;  %v14244_v42 = vsel %vm2907_vm7, %v14209_v58, 0.0  ;;  %v7017_v62 = vmul.f32 0.0625, %v6973_v59 }
 0xc52   :  { %v6782_v7 = vadd.f32 %v14244_v42, %v14186_v10  ;;  %v6914_v11 = vadd.f32 %v6913_v38, %v6912_v51  ;;  %v15291_v51 = vld [vmem:[#allocation3_spill] sm:$0xff] }
 0xc53   :  { %v6768_v13 = vmul.f32 %v14231_v16, %v14231_v16  ;;  %v6783_v26 = vsel %vm2907_vm7, %v14231_v16, 0.0 }
 0xc54   :  { %v6784_v17 = vadd.f32 %v6783_v26, %v6782_v7  ;;  %v6915_v21 = vrot.slane %v6914_v11, 1  ;;  %v15290_v7 = vld [vmem:[#allocation40_spill] sm:$0xff] }
 0xc55   :  { %v6815_v41 = vsel %vm2907_vm7, %v6768_v13, 0.0 }
 0xc56   :  { %v6816_v37 = vadd.f32 %v6815_v41, %v6814_v47  ;;  %v6718_v50 = vpop.f32.mrf.mxu3  ;;  %v6977_v47 = vrot.slane %v6976_v35, 2  ;;  %v6916_v38 = vadd.f32 %v6915_v21, %v6914_v11 }
 0xc57   :  { %v6719_v53 = vadd.f32 %v14132_v22, %v6718_v50 }
 0xc58   :  { %v6978_v50 = vadd.f32 %v6977_v47, %v6976_v35  ;;  %v14308_v11 = vmul.f32 0.0625, %v6916_v38 }
 0xc59   :  { %v14262_v43 = vadd.f32 %v6719_v53, %v15279_v49  ;;  %v14264_v48 = vadd.f32 %v6719_v53, %v5060_v40  ;;  %v6829_v49 = vadd.f32 %v14259_v14, %v14204_v61  ;;  %v7033_v40 = vsub.f32 %v7017_v62, %v7025_v18 }
 0xc5b   :  { %v6769_v34 = vmul.f32 %v14262_v43, %v14262_v43  ;;  %v6798_v10 = vsel %vm2907_vm7, %v14262_v43, 0.0 }
 0xc5c   :  { %v6799_v36 = vadd.f32 %v6798_v10, %v6797_v15  ;;  %v6924_v8 = vadd.f32 %v6798_v10, %v6783_v26  ;;  %v5062_v15 = vadd.f32 %v15291_v51, %v15290_v7 }
 0xc5d   :  { %v6830_v0 = vsel %vm2907_vm7, %v6769_v34, 0.0  ;;  %v7041_v34 = vmul.f32 1.0666667, %v7033_v40 }
 0xc5e   :  { %v6831_v19 = vadd.f32 %v6830_v0, %v6829_v49  ;;  %v6721_v4 = vpop.f32.mrf.mxu3  ;;  %v6988_v23 = vadd.f32 %v6830_v0, %v6815_v41  ;;  %v6925_v39 = vrot.slane %v6924_v8, 4  ;;  %v6979_v49 = vrot.slane %v6978_v50, 1 }
 0xc5f   :  { %v6722_v13 = vadd.f32 %v14132_v22, %v6721_v4  ;;  %v7049_v55 = vmax.f32 %v7041_v34, 0.0 }
 0xc60   :  { %v6989_v5 = vrot.slane %v6988_v23, 4  ;;  %v6926_v59 = vadd.f32 %v6925_v39, %v6924_v8  ;;  %v6980_v47 = vadd.f32 %v6979_v49, %v6978_v50  ;;  %v7026_v39 = vmul.f32 %v14308_v11, %v14308_v11 }
 0xc61   :  { %v14283_v9 = vadd.f32 %v6722_v13, %v15277_v54  ;;  %v14285_v61 = vadd.f32 %v6722_v13, %v5061_v27 }
 0xc62   :  { %v6927_v35 = vrot.slane %v6926_v59, 2  ;;  %v6990_v0 = vadd.f32 %v6989_v5, %v6988_v23  ;;  %v14313_v5 = vadd.f32 1e-05, %v7049_v55 }
 0xc63   :  { %v6770_v33 = vmul.f32 %v14283_v9, %v14283_v9  ;;  %v6785_v26 = vsel %vm2907_vm7, %v14283_v9, 0.0 }
 0xc64   :  { %v6928_v18 = vadd.f32 %v6927_v35, %v6926_v59  ;;  %v14302_v63 = vadd.f32 %v6785_v26, %v6784_v17  ;;  %v7018_v17 = vmul.f32 0.0625, %v6980_v47  ;;  %9732 = vrsqrt.f32 %v14313_v5 }
 0xc65   :  { %v6817_v53 = vsel %vm2907_vm7, %v6770_v33, 0.0  ;;  %vm7080_vm1 = vweird.f32 %v14313_v5 }
 0xc66   :  { %v14292_v41 = vadd.f32 %v6817_v53, %v6816_v37  ;;  %v6723_v54 = vpop.f32.mrf.mxu3  ;;  %v6991_v37 = vrot.slane %v6990_v0, 2  ;;  %v7034_v59 = vsub.f32 %v7018_v17, %v7026_v39 }
 0xc67   :  { %v6724_v10 = vadd.f32 %v14132_v22, %v6723_v54 }
 0xc68   :  { %v6992_v8 = vadd.f32 %v6991_v37, %v6990_v0  ;;  %v7042_v55 = vmul.f32 1.0666667, %v7034_v59 }
 0xc69   :  { %v14298_v4 = vadd.f32 %v6724_v10, %v15280_v31  ;;  %v14300_v62 = vadd.f32 %v6724_v10, %v5062_v15  ;;  %v6929_v31 = vrot.slane %v6928_v18, 1 }
 0xc6a   :  { %v6993_v21 = vrot.slane %v6992_v8, 1 }
 0xc6b   :  { %v6771_v27 = vmul.f32 %v14298_v4, %v14298_v4  ;;  %v6800_v13 = vsel %vm2907_vm7, %v14298_v4, 0.0  ;;  %v6930_v33 = vadd.f32 %v6929_v31, %v6928_v18 }
 0xc6c   :  { %v14310_v23 = vadd.f32 %v6800_v13, %v6799_v36  ;;  %v6994_v15 = vadd.f32 %v6993_v21, %v6992_v8  ;;  %v6931_v50 = vadd.f32 %v6800_v13, %v6785_v26  ;;  %v8561_v26 = vld [vmem:[%s14863_s3 + $0x38] sm:$0xff] }
 0xc6d   :  { %v6832_v40 = vsel %vm2907_vm7, %v6771_v27, 0.0  ;;  %v14317_v51 = vmul.f32 0.0625, %v6930_v33  ;;  %v14324_v27 = vpop.eup %9732  ;;  %6875 = vrot.lane.b32.xlu2 %v8561_v26, %s9806_s20 }
 0xc6e   :  { %v6995_v7 = vadd.f32 %v6832_v40, %v6817_v53  ;;  %v7020_v54 = vmul.f32 0.0625, %v6994_v15  ;;  %v6932_v38 = vrot.slane %v6931_v50, 4  ;;  %v14322_v49 = vadd.f32 %v6832_v40, %v6831_v19 }
 0xc6f   :  { %v7028_v36 = vmul.f32 %v14317_v51, %v14317_v51  ;;  %v7050_v40 = vmax.f32 %v7042_v55, 0.0  ;;  %v7075_v33 = vmul.f32 %v14324_v27, %v14313_v5  ;;  %vm7081_vm0 = vweird.f32 %v14324_v27 }
 0xc70   :  { %v6996_v34 = vrot.slane %v6995_v7, 4  ;;  %v6933_v0 = vadd.f32 %v6932_v38, %v6931_v50  ;;  %vm7082_vm3 = vmor %vm7080_vm1, %vm7081_vm0 }
 0xc71   :  { %v7036_v10 = vsub.f32 %v7020_v54, %v7028_v36  ;;  %v14334_v15 = vadd.f32 1e-05, %v7050_v40  ;;  %v7076_v54 = vmul.f32 %v14324_v27, %v7075_v33 }
 0xc72   :  { %v6934_v53 = vrot.slane %v6933_v0, 2  ;;  %v6997_v37 = vadd.f32 %v6996_v34, %v6995_v7 }
 0xc73   :  { %v7044_v35 = vmul.f32 1.0666667, %v7036_v10  ;;  %vm7090_vm9 = vweird.f32 %v14334_v15 }
 0xc74   :  { %v6935_v13 = vadd.f32 %v6934_v53, %v6933_v0  ;;  %v6998_v31 = vrot.slane %v6997_v37, 2  ;;  %v15292_v53 = vld [vmem:[#allocation32_spill] sm:$0xff] }
 0xc75   :  { %v7052_v18 = vmax.f32 %v7044_v35, 0.0  ;;  %v7077_v35 = vmul.f32 0.5, %v7076_v54 }
 0xc76   :  { %v6936_v19 = vrot.slane %v6935_v13, 1  ;;  %v6999_v8 = vadd.f32 %v6998_v31, %v6997_v37  ;;  %v15293_v37 = vld [vmem:[#allocation13_spill] sm:$0xff] }
 0xc77   :  { %v7060_v47 = vadd.f32 1e-05, %v7052_v18  ;;  %v5063_v55 = vadd.f32 %v15293_v37, %v15292_v53  ;;  %v7078_v40 = vsub.f32 1.5, %v7077_v35 }
 0xc78   :  { %v6937_v21 = vadd.f32 %v6936_v19, %v6935_v13  ;;  %v7000_v17 = vrot.slane %v6999_v8, 1 }
 0xc79   :  { %9734 = vrsqrt.f32 %v7060_v47  ;;  %vm7110_vm14 = vweird.f32 %v7060_v47  ;;  %v7079_v54 = vmul.f32 %v14324_v27, %v7078_v40 }
 0xc7a   :  { %v14332_v39 = vmul.f32 0.0625, %v6937_v21  ;;  %v7001_v7 = vadd.f32 %v7000_v17, %v6999_v8  ;;  %9736 = vrsqrt.f32 %v14334_v15 }
 0xc7b   :  { %v7083_v37 = vsel %vm7082_vm3, %v14324_v27, %v7079_v54 }
 0xc7c   :  { %v7021_v50 = vmul.f32 0.0625, %v7001_v7  ;;  %v7029_v59 = vmul.f32 %v14332_v39, %v14332_v39 }
 0xc7e   :  { %v7037_v10 = vsub.f32 %v7021_v50, %v7029_v59 }
 0xc7f   :  { %v9735_v36 = vpop.eup %9734 }
 0xc80   :  { %v7105_v34 = vmul.f32 %v9735_v36, %v7060_v47  ;;  %v7045_v18 = vmul.f32 1.0666667, %v7037_v10  ;;  %vm7111_vm11 = vweird.f32 %v9735_v36  ;;  %v9737_v33 = vpop.eup %9736  ;;  %v15294_v10 = vld [vmem:[#allocation24_spill] sm:$0xff] }
 0xc81   :  { %vm7112_vm15 = vmor %vm7110_vm14, %vm7111_vm11  ;;  %v7085_v50 = vmul.f32 %v9737_v33, %v14334_v15  ;;  %vm7091_vm8 = vweird.f32 %v9737_v33 }
 0xc82   :  { %v7106_v38 = vmul.f32 %v9735_v36, %v7105_v34  ;;  %v7053_v31 = vmax.f32 %v7045_v18, 0.0  ;;  %vm7092_vm10 = vmor %vm7090_vm9, %vm7091_vm8 }
 0xc84   :  { %v7107_v13 = vmul.f32 0.5, %v7106_v38  ;;  %v7061_v21 = vadd.f32 1e-05, %v7053_v31  ;;  %v15295_v38 = vld [vmem:[#allocation12_spill] sm:$0xff] }
 0xc85   :  { %v5064_v35 = vadd.f32 %v15295_v38, %v15294_v10 }
 0xc86   :  { %v6726_v0 = vpop.f32.mrf.mxu3  ;;  %v7108_v8 = vsub.f32 1.5, %v7107_v13  ;;  %9738 = vrsqrt.f32 %v7061_v21  ;;  %vm7120_vm5 = vweird.f32 %v7061_v21 }
 0xc87   :  { %v6727_v26 = vadd.f32 %v14132_v22, %v6726_v0 }
 0xc88   :  { %v7109_v17 = vmul.f32 %v9735_v36, %v7108_v8 }
 0xc89   :  { %v14343_v19 = vadd.f32 %v6727_v26, %v5063_v55  ;;  %v14354_v0 = vadd.f32 %v6727_v26, %v15278_v25  ;;  %v7086_v55 = vmul.f32 %v9737_v33, %v7085_v50 }
 0xc8a   :  { %v7113_v7 = vsel %vm7112_vm15, %v9735_v36, %v7109_v17 }
 0xc8b   :  { %v14349_v59 = vmul.f32 %v14211_v44, %v7113_v7  ;;  %v6772_v25 = vmul.f32 %v14354_v0, %v14354_v0  ;;  %v7087_v8 = vmul.f32 0.5, %v7086_v55  ;;  %v14390_v50 = vsel %vm2907_vm7, %v14354_v0, 0.0 }
 0xc8c   :  { %v9739_v13 = vpop.eup %9738 }
 0xc8d   :  { %v7165_v36 = vmul.f32 %v14349_v59, %v14317_v51  ;;  %v7115_v26 = vmul.f32 %v9739_v13, %v7061_v21  ;;  %v14372_v51 = vmul.f32 %v14211_v44, %v7083_v37  ;;  %v14378_v27 = vsel %vm2907_vm7, %v6772_v25, 0.0 }
 0xc8e   :  { %v6728_v34 = vpop.f32.mrf.mxu3  ;;  %vm7121_vm4 = vweird.f32 %v9739_v13  ;;  %v7088_v10 = vsub.f32 1.5, %v7087_v8 }
 0xc8f   :  { %v6729_v47 = vadd.f32 %v14132_v22, %v6728_v34  ;;  %7185 = vrot.lane.b32.xlu0 %v7165_v36, %s9808_s30  ;;  %v7116_v31 = vmul.f32 %v9739_v13, %v7115_v26  ;;  %v7162_v54 = vmul.f32 %v14372_v51, %v14268_v60  ;;  %vm7122_vm6 = vmor %vm7120_vm5, %vm7121_vm4 }
 0xc90   :  { %v7089_v55 = vmul.f32 %v9737_v33, %v7088_v10 }
 0xc91   :  { %v14361_v18 = vadd.f32 %v6729_v47, %v15281_v20  ;;  %v14363_v53 = vadd.f32 %v6729_v47, %v5064_v35  ;;  %v7117_v17 = vmul.f32 0.5, %v7116_v31 }
 0xc92   :  { %v7093_v8 = vsel %vm7092_vm10, %v9737_v33, %v7089_v55 }
 0xc93   :  { %v6773_v5 = vmul.f32 %v14361_v18, %v14361_v18  ;;  %v14382_v40 = vsel %vm2907_vm7, %v14361_v18, 0.0  ;;  %v7118_v34 = vsub.f32 1.5, %v7117_v17 }
 0xc94   :  { %v6938_v38 = vadd.f32 %v14382_v40, %v14390_v50 }
 0xc95   :  { %v14375_v20 = vsel %vm2907_vm7, %v6773_v5, 0.0  ;;  %v7119_v35 = vmul.f32 %v9739_v13, %v7118_v34 }
 0xc96   :  { %v7002_v7 = vadd.f32 %v14375_v20, %v14378_v27  ;;  %v6939_v36 = vrot.slane %v6938_v38, 4 }
 0xc97   :  { %7179 = vrot.lane.b32.xlu0 %v7162_v54, %s9808_s30  ;;  %v7123_v37 = vsel %vm7122_vm6, %v9739_v13, %v7119_v35  ;;  %v14403_v13 = vmul.f32 %v14211_v44, %v7093_v8 }
 0xc98   :  { %v7003_v47 = vrot.slane %v7002_v7, 4  ;;  %v14396_v60 = vmul.f32 %v14211_v44, %v7123_v37  ;;  %v6940_v25 = vadd.f32 %v6939_v36, %v6938_v38 }
 0xc99   :  { %v7163_v15 = vmul.f32 %v14403_v13, %v14308_v11 }
 0xc9a   :  { %v7166_v5 = vmul.f32 %v14396_v60, %v14332_v39  ;;  %v6941_v26 = vrot.slane %v6940_v25, 2  ;;  %v7004_v31 = vadd.f32 %v7003_v47, %v7002_v7 }
 0xc9c   :  { %7187 = vrot.lane.b32.xlu2 %v7166_v5, %s9808_s30  ;;  %v6942_v21 = vadd.f32 %v6941_v26, %v6940_v25  ;;  %v7005_v17 = vrot.slane %v7004_v31, 2  ;;  %v6917_v25 = vadd.f32 %v14251_v28, %v14244_v42  ;;  %v6981_v26 = vadd.f32 %v14259_v14, %v14225_v45 }
 0xc9e   :  { %v6943_v54 = vrot.slane %v6942_v21, 1  ;;  %v7006_v34 = vadd.f32 %v7005_v17, %v7004_v31  ;;  %v6918_v11 = vrot.slane %v6917_v25, 4 }
 0xca0   :  { %v6944_v10 = vadd.f32 %v6943_v54, %v6942_v21  ;;  %v7007_v38 = vrot.slane %v7006_v34, 1  ;;  %v6982_v21 = vrot.slane %v6981_v26, 4  ;;  %v6919_v54 = vadd.f32 %v6918_v11, %v6917_v25 }
 0xca1   :  { %v6788_v25 = vadd.f32 %v14390_v50, %v14302_v63  ;;  %v15297_v50 = vld [vmem:[#allocation42_spill] sm:$0xff] }
 0xca2   :  { %v6958_v35 = vmul.f32 0.0625, %v6944_v10  ;;  %v7008_v39 = vadd.f32 %v7007_v38, %v7006_v34  ;;  %v6920_v38 = vrot.slane %v6919_v54, 2 }
 0xca4   :  { %7181 = vrot.lane.b32.xlu2 %v7163_v15, %s9808_s30  ;;  %v7022_v7 = vmul.f32 0.0625, %v7008_v39  ;;  %v7030_v33 = vmul.f32 %v6958_v35, %v6958_v35  ;;  %v6983_v15 = vadd.f32 %v6982_v21, %v6981_v26 }
 0xca6   :  { %v7038_v47 = vsub.f32 %v7022_v7, %v7030_v33  ;;  %v15296_v7 = vld [vmem:[#allocation45_spill] sm:$0xff] }
 0xca7   :  { %v5065_v42 = vadd.f32 %v13504_v3, %v15296_v7 }
 0xca8   :  { %v7046_v36 = vmul.f32 1.0666667, %v7038_v47 }
 0xcaa   :  { %v7054_v37 = vmax.f32 %v7046_v36, 0.0  ;;  %v6921_v36 = vadd.f32 %v6920_v38, %v6919_v54 }
 0xcac   :  { %v7062_v55 = vadd.f32 1e-05, %v7054_v37  ;;  %v6984_v37 = vrot.slane %v6983_v15, 2  ;;  %v6922_v11 = vrot.slane %v6921_v36, 1 }
 0xcae   :  { %9740 = vrsqrt.f32 %v7062_v55  ;;  %vm7130_vm14 = vweird.f32 %v7062_v55 }
 0xcb4   :  { %v9741_v5 = vpop.eup %9740 }
 0xcb5   :  { %v7125_v31 = vmul.f32 %v9741_v5, %v7062_v55  ;;  %vm7131_vm11 = vweird.f32 %v9741_v5 }
 0xcb6   :  { %vm7132_vm15 = vmor %vm7130_vm14, %vm7131_vm11 }
 0xcb7   :  { %v7126_v8 = vmul.f32 %v9741_v5, %v7125_v31 }
 0xcb9   :  { %v7127_v17 = vmul.f32 0.5, %v7126_v8  ;;  %v6985_v8 = vadd.f32 %v6984_v37, %v6983_v15 }
 0xcbb   :  { %v7128_v34 = vsub.f32 1.5, %v7127_v17  ;;  %v5066_v17 = vadd.f32 %v13534_v56, %v15297_v50  ;;  %v6986_v15 = vrot.slane %v6985_v8, 1 }
 0xcbd   :  { %v7129_v10 = vmul.f32 %v9741_v5, %v7128_v34 }
 0xcbf   :  { %v7133_v28 = vsel %vm7132_vm15, %v9741_v5, %v7129_v10 }
 0xcc0   :  { %v14416_v14 = vmul.f32 %v14211_v44, %v7133_v28  ;;  %v6835_v28 = vadd.f32 %v14375_v20, %v14322_v49 }
 0xcc2   :  { %v7167_v55 = vmul.f32 %v14416_v14, %v6958_v35 }
 0xcc4   :  { %v6731_v39 = vpop.f32.mrf.mxu3  ;;  %7189 = vrot.lane.b32.xlu1 %v7167_v55, %s9808_s30 }
 0xcc5   :  { %v6732_v45 = vadd.f32 %v14132_v22, %v6731_v39  ;;  %v6803_v39 = vadd.f32 %v14382_v40, %v14310_v23 }
 0xcc7   :  { %v14419_v33 = vadd.f32 %v6732_v45, %v13510_v57  ;;  %v14421_v47 = vadd.f32 %v6732_v45, %v5065_v42  ;;  %v6820_v57 = vadd.f32 %v14378_v27, %v14292_v41  ;;  %v6923_v27 = vadd.f32 %v6922_v11, %v6921_v36 }
 0xcc8   :  { %v6987_v36 = vadd.f32 %v6986_v15, %v6985_v8 }
 0xcc9   :  { %v6774_v3 = vmul.f32 %v14419_v33, %v14419_v33  ;;  %v6789_v5 = vsel %vm2907_vm7, %v14419_v33, 0.0  ;;  %v14455_v37 = vmul.f32 0.0625, %v6923_v27 }
 0xcca   :  { %v6790_v26 = vadd.f32 %v6789_v5, %v6788_v25 }
 0xccb   :  { %v6821_v31 = vsel %vm2907_vm7, %v6774_v3, 0.0  ;;  %v7027_v49 = vmul.f32 %v14455_v37, %v14455_v37 }
 0xccc   :  { %v6733_v35 = vpop.f32.mrf.mxu3  ;;  %v14434_v21 = vmul.f32 0.125, %v6790_v26  ;;  %v6822_v63 = vadd.f32 %v6821_v31, %v6820_v57 }
 0xccd   :  { %v6734_v54 = vadd.f32 %v14132_v22, %v6733_v35  ;;  %v7019_v35 = vmul.f32 0.0625, %v6987_v36 }
 0xcce   :  { %v6838_v34 = vmul.f32 0.125, %v6822_v63  ;;  %v6840_v10 = vmul.f32 %v14434_v21, %v14434_v21 }
 0xccf   :  { %v14442_v38 = vadd.f32 %v6734_v54, %v13542_v30  ;;  %v14444_v41 = vadd.f32 %v6734_v54, %v5066_v17  ;;  %v7035_v17 = vsub.f32 %v7019_v35, %v7027_v49 }
 0xcd0   :  { %v6842_v7 = vsub.f32 %v6838_v34, %v6840_v10 }
 0xcd1   :  { %v6775_v56 = vmul.f32 %v14442_v38, %v14442_v38  ;;  %v6804_v22 = vsel %vm2907_vm7, %v14442_v38, 0.0  ;;  %v9220_v20 = vpack.i.bf16 %v14442_v38, %v14419_v33 }
 0xcd2   :  { %v6844_v42 = vmax.f32 %v6842_v7, 0.0  ;;  %v6805_v30 = vadd.f32 %v6804_v22, %v6803_v39  ;;  %v6945_v25 = vadd.f32 %v6804_v22, %v6789_v5  ;;  %v7043_v7 = vmul.f32 1.0666667, %v7035_v17  ;;  %v6874_v22 = vpop.permute.xlu1 %6873 }
 0xcd3   :  { %v6836_v45 = vsel %vm2907_vm7, %v6775_v56, 0.0 }
 0xcd4   :  { %v6846_v55 = vadd.f32 1e-05, %v6844_v42  ;;  %v14457_v23 = vmul.f32 0.125, %v6805_v30  ;;  %v6837_v40 = vadd.f32 %v6836_v45, %v6835_v28  ;;  %v7009_v3 = vadd.f32 %v6836_v45, %v6821_v31 }
 0xcd5   :  { %v6946_v8 = vrot.slane %v6945_v25, 4  ;;  %v7051_v36 = vmax.f32 %v7043_v7, 0.0  ;;  %v6876_v7 = vpop.permute.xlu2 %6875 }
 0xcd6   :  { %9742 = vrsqrt.f32 %v6846_v55  ;;  %v6839_v26 = vmul.f32 0.125, %v6837_v40  ;;  %v6841_v57 = vmul.f32 %v14457_v23, %v14457_v23  ;;  %v7010_v11 = vrot.slane %v7009_v3, 4 }
 0xcd7   :  { %v6947_v34 = vadd.f32 %v6946_v8, %v6945_v25  ;;  %vm6854_vm0 = vweird.f32 %v6846_v55 }
 0xcd8   :  { %v6843_v63 = vsub.f32 %v6839_v26, %v6841_v57  ;;  %v7011_v50 = vadd.f32 %v7010_v11, %v7009_v3 }
 0xcd9   :  { %v6948_v15 = vrot.slane %v6947_v34, 2 }
 0xcda   :  { %v6845_v5 = vmax.f32 %v6843_v63, 0.0  ;;  %v7012_v27 = vrot.slane %v7011_v50, 2  ;;  %v7059_v63 = vadd.f32 1e-05, %v7051_v36 }
 0xcdb   :  { %v6949_v56 = vadd.f32 %v6948_v15, %v6947_v34  ;;  %v7178_v15 = vpop.permute.xlu1 %7177 }
 0xcdc   :  { %v9743_v54 = vpop.eup %9742  ;;  %v6847_v31 = vadd.f32 1e-05, %v6845_v5  ;;  %v7013_v30 = vadd.f32 %v7012_v27, %v7011_v50  ;;  %vm7100_vm11 = vweird.f32 %v7059_v63 }
 0xcdd   :  { %v6849_v10 = vmul.f32 %v9743_v54, %v6846_v55  ;;  %v6950_v28 = vrot.slane %v6949_v56, 1  ;;  %vm6855_vm7 = vweird.f32 %v9743_v54  ;;  %v14472_v55 = vld [vmem:[%s14862_s6 + $0x3] sm:$0x1] }
 0xcde   :  { %9744 = vrsqrt.f32 %v6847_v31  ;;  %v7014_v26 = vrot.slane %v7013_v30, 1  ;;  %vm6856_vm1 = vmor %vm6854_vm0, %vm6855_vm7  ;;  %vm6864_vm4 = vweird.f32 %v6847_v31 }
 0xcdf   :  { %v6850_v39 = vmul.f32 %v9743_v54, %v6849_v10  ;;  %v6951_v3 = vadd.f32 %v6950_v28, %v6949_v56  ;;  %9746 = vrsqrt.f32 %v7059_v63 }
 0xce0   :  { %v7015_v35 = vadd.f32 %v7014_v26, %v7013_v30 }
 0xce1   :  { %v6851_v42 = vmul.f32 0.5, %v6850_v39  ;;  %v6959_v11 = vmul.f32 0.0625, %v6951_v3 }
 0xce2   :  { %v7023_v17 = vmul.f32 0.0625, %v7015_v35 }
 0xce3   :  { %v6852_v45 = vsub.f32 1.5, %v6851_v42  ;;  %v7031_v34 = vmul.f32 %v6959_v11, %v6959_v11 }
 0xce4   :  { %v9745_v40 = vpop.eup %9744 }
 0xce5   :  { %v6853_v57 = vmul.f32 %v9743_v54, %v6852_v45  ;;  %v6859_v25 = vmul.f32 %v9745_v40, %v6847_v31  ;;  %v7039_v27 = vsub.f32 %v7023_v17, %v7031_v34  ;;  %vm6865_vm3 = vweird.f32 %v9745_v40  ;;  %v9747_v45 = vpop.eup %9746 }
 0xce6   :  { %vm6866_vm5 = vmor %vm6864_vm4, %vm6865_vm3  ;;  %v7095_v31 = vmul.f32 %v9747_v45, %v7059_v63  ;;  %vm7101_vm10 = vweird.f32 %v9747_v45 }
 0xce7   :  { %v6857_v49 = vsel %vm6856_vm1, %v9743_v54, %v6853_v57  ;;  %v6860_v8 = vmul.f32 %v9745_v40, %v6859_v25  ;;  %v7047_v54 = vmul.f32 1.0666667, %v7039_v27  ;;  %vm7102_vm14 = vmor %vm7100_vm11, %vm7101_vm10 }
 0xce8   :  { %v14465_v5 = vmul.f32 %v6874_v22, %v6857_v49  ;;  %v7201_v22 = vsub.f32 %v14472_v55, %v7178_v15 }
 0xce9   :  { %v6861_v50 = vmul.f32 0.5, %v6860_v8 }
 0xcea   :  { %v6884_v10 = vmul.f32 %v14465_v5, %v14434_v21  ;;  %v7055_v21 = vmax.f32 %v7047_v54, 0.0  ;;  %v14480_v36 = vmul.f32 %v14465_v5, %v14419_v33  ;;  %v7281_v3 = vperm.slane %v7201_v22, 0 }
 0xceb   :  { %v6862_v39 = vsub.f32 1.5, %v6861_v50 }
 0xcec   :  { %6888 = vrot.lane.b32.xlu0 %v6884_v10, %s9808_s30  ;;  %v7063_v30 = vadd.f32 1e-05, %v7055_v21 }
 0xced   :  { %v6863_v56 = vmul.f32 %v9745_v40, %v6862_v39 }
 0xcee   :  { %9748 = vrsqrt.f32 %v7063_v30  ;;  %vm7140_vm8 = vweird.f32 %v7063_v30 }
 0xcef   :  { %v6867_v42 = vsel %vm6866_vm5, %v9745_v40, %v6863_v56  ;;  %v7096_v40 = vmul.f32 %v9747_v45, %v7095_v31 }
 0xcf0   :  { %v14476_v28 = vmul.f32 %v6876_v7, %v6867_v42 }
 0xcf1   :  { %v7097_v17 = vmul.f32 0.5, %v7096_v40 }
 0xcf2   :  { %v6885_v26 = vmul.f32 %v14476_v28, %v14457_v23  ;;  %v14488_v35 = vmul.f32 %v14476_v28, %v14442_v38 }
 0xcf3   :  { %v7098_v27 = vsub.f32 1.5, %v7097_v17  ;;  %v9160_v17 = vpack.i.bf16 %v14262_v43, %v14231_v16 }
 0xcf4   :  { %6890 = vrot.lane.b32.xlu1 %v6885_v26, %s9808_s30  ;;  %7289 = vrot.lane.b32.xlu0 %v7281_v3, %s9806_s20  ;;  %v9749_v57 = vpop.eup %9748 }
 0xcf5   :  { %v7135_v25 = vmul.f32 %v9749_v57, %v7063_v30  ;;  %vm7141_vm6 = vweird.f32 %v9749_v57  ;;  %v7099_v22 = vmul.f32 %v9747_v45, %v7098_v27 }
 0xcf6   :  { %v7188_v8 = vpop.permute.xlu2 %7187  ;;  %vm7142_vm9 = vmor %vm7140_vm8, %vm7141_vm6 }
 0xcf7   :  { %v7136_v49 = vmul.f32 %v9749_v57, %v7135_v25  ;;  %v7206_v34 = vsub.f32 %v14472_v55, %v7188_v8  ;;  %v7103_v30 = vsel %vm7102_vm14, %v9747_v45, %v7099_v22 }
 0xcf9   :  { %v7137_v50 = vmul.f32 0.5, %v7136_v49  ;;  %v7286_v23 = vperm.slane %v7206_v34, 0 }
 0xcfb   :  { %v7138_v10 = vsub.f32 1.5, %v7137_v50 }
 0xcfc   :  { %7299 = vrot.lane.b32.xlu0 %v7286_v23, %s9806_s20  ;;  %v8562_v23 = vld [vmem:[%s14864_s4 + $0x30] sm:$0xff] }
 0xcfd   :  { %v7139_v15 = vmul.f32 %v9749_v57, %v7138_v10 }
 0xcfe   :  { %v7182_v7 = vpop.permute.xlu2 %7181 }
 0xcff   :  { %v7143_v39 = vsel %vm7142_vm9, %v9749_v57, %v7139_v15  ;;  %v7203_v42 = vsub.f32 %v14472_v55, %v7182_v7  ;;  %v7249_v15 = vperm.slane %v14217_v46, 0 }
 0xd00   :  { %v7158_v56 = vmul.f32 %v14211_v44, %v7143_v39 }
 0xd01   :  { %v7186_v54 = vpop.permute.xlu0 %7185  ;;  %v7283_v40 = vperm.slane %v7203_v42, 0  ;;  %v7257_v42 = vmul.f32 %v7249_v15, %v14136_v6 }
 0xd02   :  { %v7205_v21 = vsub.f32 %v14472_v55, %v7186_v54  ;;  %v7168_v3 = vmul.f32 %v7158_v56, %v6959_v11  ;;  %v7256_v26 = vperm.slane %v7158_v56, 0  ;;  %v14505_v11 = vmul.f32 %v14211_v44, %v7103_v30 }
 0xd04   :  { %v7285_v31 = vperm.slane %v7205_v21, 0  ;;  %7191 = vrot.lane.b32.xlu1 %v7168_v3, %s9808_s30  ;;  %v14497_v57 = vmul.f32 %v7256_v26, %v14419_v33  ;;  %v14500_v25 = vmul.f32 %v7256_v26, %v14442_v38  ;;  %7293 = vrot.lane.b32.xlu0 %v7283_v40, %s9806_s20  ;;  %v7164_v45 = vmul.f32 %v14505_v11, %v14455_v37  ;;  %v8563_v21 = vld [vmem:[%s14864_s4 + $0x38] sm:$0xff]  ;;  %v8739_v38 = vld [vmem:[%s14865_s7 + $0x128] sm:$0xff] }
 0xd05   :  { %v7253_v37 = vperm.slane %v14349_v59, 0  ;;  %v7258_v59 = vmul.f32 %v7249_v15, %v14140_v12  ;;  %v8749_v15 = vld [vmem:[%s14865_s7 + $0x178] sm:$0xff] }
 0xd06   :  { %7297 = vrot.lane.b32.xlu2 %v7285_v31, %s9806_s20  ;;  %7663 = vmatpush.bf16.msra.mxu2 %v8749_v15  ;;  %v9230_v15 = vpack.i.bf16 %v14228_v24, %v14209_v58  ;;  %v8745_v33 = vld [vmem:[%s14865_s7 + $0x158] sm:$0xff] }
 0xd07   :  { %v7265_v39 = vmul.f32 %v7253_v37, %v14231_v16  ;;  %v7266_v54 = vmul.f32 %v7253_v37, %v14262_v43 }
 0xd09   :  { %v7180_v63 = vpop.permute.xlu0 %7179 }
 0xd0a   :  { %v7202_v49 = vsub.f32 %v14472_v55, %v7180_v63 }
 0xd0c   :  { %v7282_v8 = vperm.slane %v7202_v49, 0  ;;  %9161 = vrot.lane.b32.xlu0 %v9160_v17, %s9808_s30  ;;  %v9165_v49 = vpack.i.bf16 %v14140_v12, %v14136_v6 }
 0xd0e   :  { %7183 = vrot.lane.b32.xlu2 %v7164_v45, %s9808_s30  ;;  %7291 = vrot.lane.b32.xlu1 %v7282_v8, %s9806_s20  ;;  %v9180_v45 = vpack.i.bf16 %v14298_v4, %v14283_v9 }
 0xd36   :  { %v7190_v34 = vpop.permute.xlu1 %7189 }
 0xd37   :  { %v7207_v44 = vsub.f32 %v14472_v55, %v7190_v34 }
 0xd39   :  { %v7287_v50 = vperm.slane %v7207_v44, 0 }
 0xd3b   :  { %7301 = vrot.lane.b32.xlu2 %v7287_v50, %s9806_s20  ;;  %v7254_v50 = vperm.slane %v14396_v60, 0  ;;  %v8743_v60 = vld [vmem:[%s14865_s7 + $0x148] sm:$0xff] }
 0xd3c   :  { %7558 = vmatpush.bf16.msra.mxu1 %v8743_v60  ;;  %v8740_v60 = vld [vmem:[%s14865_s7 + $0x130] sm:$0xff] }
 0xd5e   :  { %v6889_v10 = vpop.permute.xlu0 %6888 }
 0xd5f   :  { %v6894_v27 = vsub.f32 %v8562_v23, %v6889_v10 }
 0xd60   :  { %v7298_v7 = vpop.permute.xlu2 %7297 }
 0xd61   :  { %7227 = vrot.lane.b32.xlu1 %v6894_v27, %s9806_s20  ;;  %v7321_v56 = vadd.f32 %v7298_v7, %v7265_v39  ;;  %v7322_v22 = vadd.f32 %v7298_v7, %v7266_v54  ;;  %v7250_v27 = vperm.slane %v14372_v51, 0  ;;  %v7267_v39 = vmul.f32 %v7254_v50, %v14283_v9 }
 0xd62   :  { %v7268_v54 = vmul.f32 %v7254_v50, %v14298_v4  ;;  %v9190_v7 = vpack.i.bf16 %v14167_v29, %v14154_v52 }
 0xd63   :  { %v9175_v31 = vpack.i.bf16 %v7322_v22, %v7321_v56  ;;  %v7259_v56 = vmul.f32 %v7250_v27, %v14154_v52  ;;  %v7260_v22 = vmul.f32 %v7250_v27, %v14167_v29 }
 0xd66   :  { %v6891_v3 = vpop.permute.xlu1 %6890  ;;  %v7290_v26 = vpop.permute.xlu0 %7289 }
 0xd67   :  { %v6895_v40 = vsub.f32 %v8563_v21, %v6891_v3  ;;  %v7313_v46 = vadd.f32 %v7290_v26, %v7257_v42  ;;  %v7314_v30 = vadd.f32 %v7290_v26, %v7258_v59 }
 0xd68   :  { %v7184_v8 = vpop.permute.xlu2 %7183 }
 0xd69   :  { %v9170_v63 = vpack.i.bf16 %v7314_v30, %v7313_v46  ;;  %7229 = vrot.lane.b32.xlu2 %v6895_v40, %s9806_s20  ;;  %9176 = vrot.lane.b32.xlu1 %v9175_v31, %s9806_s20  ;;  %v7204_v17 = vsub.f32 %v14472_v55, %v7184_v8  ;;  %v8748_v31 = vld [vmem:[%s14865_s7 + $0x170] sm:$0xff]  ;;  %v8742_v40 = vld [vmem:[%s14865_s7 + $0x140] sm:$0xff]  ;;  %v7251_v46 = vperm.slane %v14403_v13, 0  ;;  %v9200_v30 = vpack.i.bf16 %v14361_v18, %v14354_v0 }
 0xd6a   :  { %7664 = vmatpush.bf16.msra.mxu2 %v8748_v31  ;;  %7559 = vmatpush.bf16.msra.mxu1 %v8742_v40  ;;  %v7255_v13 = vperm.slane %v14416_v14, 0  ;;  %v8747_v14 = vld [vmem:[%s14865_s7 + $0x168] sm:$0xff]  ;;  %v7252_v31 = vperm.slane %v14505_v11, 0  ;;  %v7215_v11 = vmul.f32 %v14465_v5, %v14209_v58 }
 0xd6b   :  { %9171 = vrot.lane.b32.xlu0 %v9170_v63, %s9806_s20  ;;  %v7284_v34 = vperm.slane %v7204_v17, 0  ;;  %v7261_v8 = vmul.f32 %v7251_v46, %v14178_v32 }
 0xd6c   :  { %v7269_v50 = vmul.f32 %v7255_v13, %v14354_v0  ;;  %v7264_v40 = vmul.f32 %v7252_v31, %v14228_v24 }
 0xd6e   :  { %v7300_v10 = vpop.permute.xlu0 %7299  ;;  %7665 = vmatpush.bf16.msra.mxu2 %v8747_v14 }
 0xd6f   :  { %v7324_v51 = vadd.f32 %v7300_v10, %v7268_v54  ;;  %v8741_v54 = vld [vmem:[%s14865_s7 + $0x138] sm:$0xff] }
 0xd70   :  { %7560 = vmatpush.bf16.msra.mxu1 %v8741_v54 }
 0xd71   :  { %9166 = vrot.lane.b32.xlu2 %v9165_v49, %s9808_s30  ;;  %v9210_v49 = vpack.i.bf16 %v14195_v1, %v14178_v32 }
 0xd73   :  { %9181 = vrot.lane.b32.xlu0 %v9180_v45, %s9808_s30  ;;  %v7262_v45 = vmul.f32 %v7251_v46, %v14195_v1 }
 0xd74   :  { %7561 = vmatpush.bf16.msra.mxu1 %v8740_v60 }
 0xd76   :  { %v7192_v44 = vpop.permute.xlu1 %7191  ;;  %v7294_v63 = vpop.permute.xlu0 %7293 }
 0xd77   :  { %v7208_v23 = vsub.f32 %v14472_v55, %v7192_v44  ;;  %v7323_v55 = vadd.f32 %v7300_v10, %v7267_v39  ;;  %v7317_v17 = vadd.f32 %v7294_v63, %v7261_v8 }
 0xd78   :  { %7562 = vmatpush.bf16.msra.mxu1 %v8739_v38 }
 0xd79   :  { %7295 = vrot.lane.b32.xlu2 %v7284_v34, %s9806_s20  ;;  %v7288_v37 = vperm.slane %v7208_v23, 0  ;;  %v9185_v3 = vpack.i.bf16 %v7324_v51, %v7323_v55  ;;  %v7318_v34 = vadd.f32 %v7294_v63, %v7262_v45  ;;  %v7270_v23 = vmul.f32 %v7255_v13, %v14361_v18  ;;  %v8738_v55 = vld [vmem:[%s14865_s7 + $0x120] sm:$0xff] }
 0xd7a   :  { %v7217_v45 = vmul.f32 %v14465_v5, %v14231_v16 }
 0xd7b   :  { %7303 = vrot.lane.b32.xlu1 %v7288_v37, %s9806_s20  ;;  %v9215_v44 = vpack.i.bf16 %v7318_v34, %v7317_v17  ;;  %v7218_v17 = vmul.f32 %v14476_v28, %v14262_v43 }
 0xd7c   :  { %7563 = vmatpush.bf16.msra.mxu1 %v8738_v55 }
 0xd80   :  { %v7292_v21 = vpop.permute.xlu1 %7291 }
 0xd81   :  { %9191 = vrot.lane.b32.xlu2 %v9190_v7, %s9808_s30  ;;  %v7315_v42 = vadd.f32 %v7292_v21, %v7259_v56  ;;  %v7316_v59 = vadd.f32 %v7292_v21, %v7260_v22  ;;  %v8746_v7 = vld [vmem:[%s14865_s7 + $0x160] sm:$0xff]  ;;  %v7222_v56 = vmul.f32 %v14476_v28, %v14361_v18  ;;  %v7214_v22 = vmul.f32 %v14476_v28, %v14195_v1 }
 0xd82   :  { %7666 = vmatpush.bf16.msra.mxu2 %v8746_v7  ;;  %v7216_v21 = vmul.f32 %v14476_v28, %v14228_v24  ;;  %v7263_v1 = vmul.f32 %v7252_v31, %v14209_v58 }
 0xd83   :  { %v9195_v26 = vpack.i.bf16 %v7316_v59, %v7315_v42  ;;  %9186 = vrot.lane.b32.xlu1 %v9185_v3, %s9806_s20 }
 0xd85   :  { %9196 = vrot.lane.b32.xlu0 %v9195_v26, %s9806_s20 }
 0xd86   :  { %7667 = vmatpush.bf16.msra.mxu2 %v8745_v33 }
 0xd8b   :  { %9201 = vrot.lane.b32.xlu1 %v9200_v30, %s9808_s30 }
 0xd8d   :  { %9211 = vrot.lane.b32.xlu0 %v9210_v49, %s9808_s30 }
 0xd93   :  { %9216 = vrot.lane.b32.xlu1 %v9215_v44, %s9806_s20  ;;  %v7209_v44 = vmul.f32 %v14465_v5, %v14136_v6 }
 0xd95   :  { %v7302_v37 = vpop.permute.xlu2 %7301 }
 0xd96   :  { %v7325_v10 = vadd.f32 %v7302_v37, %v7269_v50  ;;  %v7326_v27 = vadd.f32 %v7302_v37, %v7270_v23  ;;  %v7210_v23 = vmul.f32 %v14476_v28, %v14140_v12 }
 0xd98   :  { %v9205_v39 = vpack.i.bf16 %v7326_v27, %v7325_v10 }
 0xd9a   :  { %9206 = vrot.lane.b32.xlu2 %v9205_v39, %s9806_s20 }
 0xd9b   :  { %9231 = vrot.lane.b32.xlu1 %v9230_v15, %s9808_s30 }
 0xda2   :  { %9221 = vrot.lane.b32.xlu2 %v9220_v20, %s9808_s30  ;;  %v8744_v20 = vld [vmem:[%s14865_s7 + $0x150] sm:$0xff] }
 0xda3   :  { %7668 = vmatpush.bf16.msra.mxu2 %v8744_v20 }
 0xdc3   :  { %v14611_v51 = vpop.permute.xlu2 %7229 }
 0xdc4   :  { %v14620_v42 = vadd.f32 %v14611_v51, %v7222_v56  ;;  %v14624_v59 = vadd.f32 %v14611_v51, %v14488_v35  ;;  %v14627_v3 = vadd.f32 %v14611_v51, %v7214_v22  ;;  %v14630_v26 = vadd.f32 %v14611_v51, %v7216_v21  ;;  %v9162_v35 = vpop.permute.xlu0 %9161 }
 0xdc5   :  { %v7242_v34 = vadd.f32 %v14611_v51, %v7218_v17  ;;  %v9164_v43 = vunpack.i.h.bf16 %v9162_v35  ;;  %v9163_v50 = vunpack.i.l.bf16 %v9162_v35  ;;  %v7234_v14 = vadd.f32 %v14611_v51, %v7210_v23 }
 0xdc6   :  { %v7220_v35 = vmul.f32 %v14476_v28, %v14298_v4  ;;  %v7212_v17 = vmul.f32 %v14476_v28, %v14167_v29 }
 0xdc7   :  { %v7466_v39 = vsel %vm278_vm2, %v9164_v43, %v7242_v34 }
 0xdc8   :  { %v7244_v34 = vadd.f32 %v14611_v51, %v7220_v35 }
 0xdcb   :  { %v9167_v18 = vpop.permute.xlu2 %9166 }
 0xdcc   :  { %v9169_v37 = vunpack.i.h.bf16 %v9167_v18  ;;  %v9168_v54 = vunpack.i.l.bf16 %v9167_v18 }
 0xdce   :  { %v7458_v20 = vsel %vm278_vm2, %v9169_v37, %v7234_v14  ;;  %v7221_v14 = vmul.f32 %v14465_v5, %v14354_v0  ;;  %v7213_v0 = vmul.f32 %v14465_v5, %v14178_v32 }
 0xdd3   :  { %v7296_v46 = vpop.permute.xlu2 %7295  ;;  %v14635_v30 = vpop.permute.xlu1 %7227 }
 0xdd4   :  { %v7319_v63 = vadd.f32 %v7296_v46, %v7263_v1  ;;  %v7320_v49 = vadd.f32 %v7296_v46, %v7264_v40  ;;  %v7241_v24 = vadd.f32 %v14635_v30, %v7217_v45  ;;  %v14650_v13 = vadd.f32 %v14635_v30, %v14480_v36 }
 0xdd5   :  { %v14653_v16 = vadd.f32 %v14635_v30, %v7215_v11  ;;  %v7233_v15 = vadd.f32 %v14635_v30, %v7209_v44 }
 0xdd6   :  { %v9235_v8 = vpack.i.bf16 %v7320_v49, %v7319_v63  ;;  %v7465_v6 = vsel %vm278_vm2, %v9163_v50, %v7241_v24  ;;  %v7219_v49 = vmul.f32 %v14465_v5, %v14283_v9  ;;  %v7236_v9 = vadd.f32 %v14611_v51, %v7212_v17 }
 0xdd7   :  { %v7457_v55 = vsel %vm278_vm2, %v9168_v54, %v7233_v15 }
 0xdd8   :  { %9236 = vrot.lane.b32.xlu2 %v9235_v8, %s9806_s20 }
 0xddb   :  { %v9177_v58 = vpop.permute.xlu1 %9176  ;;  %v9192_v63 = vpop.permute.xlu2 %9191 }
 0xddc   :  { %v9179_v10 = vunpack.i.h.bf16 %v9177_v58  ;;  %v9178_v27 = vunpack.i.l.bf16 %v9177_v58  ;;  %v9194_v11 = vunpack.i.h.bf16 %v9192_v63  ;;  %v9193_v24 = vunpack.i.l.bf16 %v9192_v63 }
 0xddd   :  { %v9172_v36 = vpop.permute.xlu0 %9171 }
 0xdde   :  { %v7481_v7 = vsel %vm1471_vm12, %v7465_v6, %v9178_v27  ;;  %v7482_v60 = vsel %vm1471_vm12, %v7466_v39, %v9179_v10  ;;  %v9174_v12 = vunpack.i.h.bf16 %v9172_v36  ;;  %v9173_v38 = vunpack.i.l.bf16 %v9172_v36 }
 0xddf   :  { %v7609_v33 = vpack.c.bf16 %v7482_v60, %v7481_v7  ;;  %v7245_v60 = vadd.f32 %v14635_v30, %v7221_v14 }
 0xde0   :  { %v7474_v56 = vsel %vm1471_vm12, %v7458_v20, %v9174_v12  ;;  %v7473_v22 = vsel %vm1471_vm12, %v7457_v55, %v9173_v38 }
 0xde1   :  { %8643 = vmatmul.msk.bf16.vlgmr.msra.gmra.mxu2 %vm1567_vm13, %v7609_v33  ;;  %v7504_v21 = vpack.c.bf16 %v7474_v56, %v7473_v22 }
 0xde3   :  { %8603 = vmatmul.msk.bf16.vlgmr.msra.gmra.mxu1 %vm1567_vm13, %v7504_v21 }
 0xde5   :  { %v9182_v31 = vpop.permute.xlu0 %9181 }
 0xde6   :  { %v9184_v8 = vunpack.i.h.bf16 %v9182_v31  ;;  %v9183_v45 = vunpack.i.l.bf16 %v9182_v31 }
 0xde8   :  { %v7468_v58 = vsel %vm278_vm2, %v9184_v8, %v7244_v34 }
 0xded   :  { %v7304_v18 = vpop.permute.xlu1 %7303 }
 0xdee   :  { %v7327_v1 = vadd.f32 %v7304_v18, %v14497_v57  ;;  %v7328_v40 = vadd.f32 %v7304_v18, %v14500_v25  ;;  %v7211_v57 = vmul.f32 %v14465_v5, %v14154_v52  ;;  %v7243_v25 = vadd.f32 %v14635_v30, %v7219_v49 }
 0xdef   :  { %v7460_v52 = vsel %vm278_vm2, %v9194_v11, %v7236_v9 }
 0xdf0   :  { %v9225_v46 = vpack.i.bf16 %v7328_v40, %v7327_v1  ;;  %v7235_v43 = vadd.f32 %v14635_v30, %v7211_v57  ;;  %v7467_v29 = vsel %vm278_vm2, %v9183_v45, %v7243_v25 }
 0xdf2   :  { %9226 = vrot.lane.b32.xlu0 %v9225_v46, %s9806_s20  ;;  %v7459_v10 = vsel %vm278_vm2, %v9193_v24, %v7235_v43  ;;  %v7237_v46 = vadd.f32 %v14635_v30, %v7213_v0 }
 0xdf4   :  { %v9207_v54 = vpop.permute.xlu2 %9206 }
 0xdf5   :  { %v9187_v44 = vpop.permute.xlu1 %9186  ;;  %v9209_v38 = vunpack.i.h.bf16 %v9207_v54  ;;  %v9208_v20 = vunpack.i.l.bf16 %v9207_v54 }
 0xdf6   :  { %v9189_v4 = vunpack.i.h.bf16 %v9187_v44  ;;  %v9188_v50 = vunpack.i.l.bf16 %v9187_v44 }
 0xdf7   :  { %v9197_v23 = vpop.permute.xlu0 %9196 }
 0xdf8   :  { %v9199_v28 = vunpack.i.h.bf16 %v9197_v23  ;;  %v9198_v37 = vunpack.i.l.bf16 %v9197_v23  ;;  %v7483_v27 = vsel %vm1471_vm12, %v7467_v29, %v9188_v50  ;;  %v7484_v15 = vsel %vm1471_vm12, %v7468_v58, %v9189_v4  ;;  %v14722_v50 = vld [vmem:[%s14866_s8 + $0x3] ss:$0 sm:$0xff] }
 0xdf9   :  { %v7610_v51 = vpack.c.bf16 %v7484_v15, %v7483_v27 }
 0xdfa   :  { %v7476_v6 = vsel %vm1471_vm12, %v7460_v52, %v9199_v28  ;;  %v7475_v39 = vsel %vm1471_vm12, %v7459_v10, %v9198_v37 }
 0xdfb   :  { %v7505_v36 = vpack.c.bf16 %v7476_v6, %v7475_v39  ;;  %8644 = vmatmul.msk.bf16.gmra.mxu2 %vm1567_vm13, %v7610_v51 }
 0xdfc   :  { %v9222_v32 = vpop.permute.xlu2 %9221 }
 0xdfd   :  { %8604 = vmatmul.msk.bf16.gmra.mxu1 %vm1567_vm13, %v7505_v36  ;;  %v9202_v7 = vpop.permute.xlu1 %9201  ;;  %v9224_v28 = vunpack.i.h.bf16 %v9222_v32 }
 0xdfe   :  { %v9204_v33 = vunpack.i.h.bf16 %v9202_v7  ;;  %v9203_v12 = vunpack.i.l.bf16 %v9202_v7 }
 0xdff   :  { %v9212_v22 = vpop.permute.xlu0 %9211  ;;  %v7472_v51 = vsel %vm278_vm2, %v9224_v28, %v14624_v59 }
 0xe00   :  { %v7470_v55 = vsel %vm278_vm2, %v9204_v33, %v14620_v42  ;;  %v7469_v56 = vsel %vm278_vm2, %v9203_v12, %v7245_v60  ;;  %v9214_v31 = vunpack.i.h.bf16 %v9212_v22  ;;  %v9213_v1 = vunpack.i.l.bf16 %v9212_v22 }
 0xe01   :  { %v7485_v21 = vsel %vm1471_vm12, %v7469_v56, %v9208_v20  ;;  %v7486_v18 = vsel %vm1471_vm12, %v7470_v55, %v9209_v38 }
 0xe02   :  { %v7611_v40 = vpack.c.bf16 %v7486_v18, %v7485_v21  ;;  %v7462_v42 = vsel %vm278_vm2, %v9214_v31, %v14627_v3  ;;  %v7461_v8 = vsel %vm278_vm2, %v9213_v1, %v7237_v46 }
 0xe05   :  { %v9217_v63 = vpop.permute.xlu1 %9216 }
 0xe06   :  { %v9219_v49 = vunpack.i.h.bf16 %v9217_v63  ;;  %v9218_v35 = vunpack.i.l.bf16 %v9217_v63 }
 0xe08   :  { %v7477_v45 = vsel %vm1471_vm12, %v7461_v8, %v9218_v35  ;;  %v7478_v17 = vsel %vm1471_vm12, %v7462_v42, %v9219_v49 }
 0xe09   :  { %v7506_v11 = vpack.c.bf16 %v7478_v17, %v7477_v45 }
 0xe0b   :  { %8645 = vmatmul.msk.bf16.gmra.mxu2 %vm1567_vm13, %v7611_v40 }
 0xe0d   :  { %8605 = vmatmul.msk.bf16.gmra.mxu1 %vm1567_vm13, %v7506_v11  ;;  %v9232_v5 = vpop.permute.xlu1 %9231 }
 0xe0e   :  { %v9234_v30 = vunpack.i.h.bf16 %v9232_v5  ;;  %v9233_v24 = vunpack.i.l.bf16 %v9232_v5 }
 0xe10   :  { %v7464_v3 = vsel %vm278_vm2, %v9234_v30, %v14630_v26  ;;  %v7463_v44 = vsel %vm278_vm2, %v9233_v24, %v14653_v16  ;;  %v9223_v16 = vunpack.i.l.bf16 %v9222_v32 }
 0xe12   :  { %v7471_v6 = vsel %vm278_vm2, %v9223_v16, %v14650_v13 }
 0xe32   :  { %v9237_v57 = vpop.permute.xlu2 %9236 }
 0xe33   :  { %v9239_v25 = vunpack.i.h.bf16 %v9237_v57  ;;  %v9238_v34 = vunpack.i.l.bf16 %v9237_v57 }
 0xe35   :  { %v7479_v9 = vsel %vm1471_vm12, %v7463_v44, %v9238_v34  ;;  %v7480_v43 = vsel %vm1471_vm12, %v7464_v3, %v9239_v25 }
 0xe36   :  { %v7507_v4 = vpack.c.bf16 %v7480_v43, %v7479_v9 }
 0xe38   :  { %8606 = vmatmul.msk.bf16.gmra.mxu1 %vm1567_vm13, %v7507_v4 }
 0xe60   :  { %v7565_v23 = vpop.f32.mrf.mxu1 }
 0xe61   :  { %v7588_v58 = vadd.f32 %v14722_v50, %v7565_v23 }
 0xe64   :  { %v7670_v29 = vpop.f32.mrf.mxu2  ;;  %v9227_v52 = vpop.permute.xlu0 %9226 }
 0xe65   :  { %v14725_v26 = vadd.f32 %v7670_v29, %v7588_v58  ;;  %v9229_v10 = vunpack.i.h.bf16 %v9227_v52  ;;  %v9228_v27 = vunpack.i.l.bf16 %v9227_v52 }
 0xe67   :  { %v8647_v37 = vmul.f32 -1.442695, %v14725_v26  ;;  %v7488_v39 = vsel %vm1471_vm12, %v7472_v51, %v9229_v10  ;;  %v7487_v36 = vsel %vm1471_vm12, %v7471_v6, %v9228_v27 }
 0xe68   :  { %v7567_v15 = vpop.f32.mrf.mxu1  ;;  %v7612_v54 = vpack.c.bf16 %v7488_v39, %v7487_v36 }
 0xe69   :  { %9750 = vpow2.f32 %v8647_v37  ;;  %v7589_v14 = vadd.f32 %v14722_v50, %v7567_v15 }
 0xe6a   :  { %8646 = vmatmul.msk.bf16.gmra.mxu2 %vm1567_vm13, %v7612_v54 }
 0xe6c   :  { %v7672_v7 = vpop.f32.mrf.mxu2 }
 0xe6d   :  { %v14735_v60 = vadd.f32 %v7672_v7, %v7589_v14 }
 0xe6f   :  { %v9751_v33 = vpop.eup %9750  ;;  %v8648_v12 = vmul.f32 -1.442695, %v14735_v60 }
 0xe70   :  { %v7730_v38 = vadd.f32 1.0, %v9751_v33 }
 0xe71   :  { %9752 = vpow2.f32 %v8648_v12 }
 0xe72   :  { %9754 = vrcp.f32 %v7730_v38  ;;  %v7749_v22 = vand.u32 2147483648, %v7730_v38  ;;  %v7747_v0 = vand.u32 2147483647, %v7730_v38  ;;  %vm7743_vm15 = vweird.f32 %v7730_v38 }
 0xe74   :  { %v7750_v40 = vor.u32 1.1754944e-38, %v7749_v22  ;;  %vm7748_vm7 = vcmp.eq.f32.partialorder %v7747_v0, 8.507059e+37 }
 0xe77   :  { %v9753_v59 = vpop.eup %9752 }
 0xe78   :  { %v9755_v13 = vpop.eup %9754  ;;  %v7731_v20 = vadd.f32 1.0, %v9753_v59 }
 0xe79   :  { %v7739_v55 = vmul.f32 %v9755_v13, %v7730_v38  ;;  %vm7744_vm12 = vweird.f32 %v9755_v13 }
 0xe7a   :  { %9756 = vrcp.f32 %v7731_v20  ;;  %v7570_v21 = vpop.f32.mrf.mxu1  ;;  %vm7745_vm13 = vmor %vm7743_vm15, %vm7744_vm12  ;;  %v7764_v17 = vand.u32 2147483648, %v7731_v20  ;;  %v7762_v30 = vand.u32 2147483647, %v7731_v20  ;;  %vm7758_vm1 = vweird.f32 %v7731_v20 }
 0xe7b   :  { %v7740_v56 = vsub.f32 1.0, %v7739_v55  ;;  %v7590_v46 = vadd.f32 %v14722_v50, %v7570_v21 }
 0xe7c   :  { %v7765_v57 = vor.u32 1.1754944e-38, %v7764_v17  ;;  %vm7763_vm4 = vcmp.eq.f32.partialorder %v7762_v30, 8.507059e+37 }
 0xe7d   :  { %v7741_v18 = vmul.f32 %v9755_v13, %v7740_v56 }
 0xe7e   :  { %v7675_v35 = vpop.f32.mrf.mxu2 }
 0xe7f   :  { %v7742_v31 = vadd.f32 %v9755_v13, %v7741_v18  ;;  %v14740_v8 = vadd.f32 %v7675_v35, %v7590_v46 }
 0xe80   :  { %v9757_v1 = vpop.eup %9756 }
 0xe81   :  { %v7746_v63 = vsel %vm7745_vm13, %v9755_v13, %v7742_v31  ;;  %v7754_v49 = vmul.f32 %v9757_v1, %v7731_v20  ;;  %v8649_v11 = vmul.f32 -1.442695, %v14740_v8  ;;  %vm7759_vm0 = vweird.f32 %v9757_v1 }
 0xe82   :  { %v7751_v42 = vsel %vm7748_vm7, %v7750_v40, %v7746_v63  ;;  %v7572_v32 = vpop.f32.mrf.mxu1  ;;  %vm7760_vm3 = vmor %vm7758_vm1, %vm7759_vm0 }
 0xe83   :  { %7866 = vrot.lane.b32.xlu0 %v7751_v42, %s9808_s30  ;;  %v7755_v45 = vsub.f32 1.0, %v7754_v49  ;;  %9758 = vpow2.f32 %v8649_v11  ;;  %v7591_v25 = vadd.f32 %v14722_v50, %v7572_v32 }
 0xe85   :  { %v7756_v5 = vmul.f32 %v9757_v1, %v7755_v45 }
 0xe86   :  { %v7677_v3 = vpop.f32.mrf.mxu2 }
 0xe87   :  { %v7757_v24 = vadd.f32 %v9757_v1, %v7756_v5  ;;  %v14745_v9 = vadd.f32 %v7677_v3, %v7591_v25 }
 0xe89   :  { %v7761_v34 = vsel %vm7760_vm3, %v9757_v1, %v7757_v24  ;;  %v9759_v43 = vpop.eup %9758  ;;  %v8650_v4 = vmul.f32 -1.442695, %v14745_v9 }
 0xe8a   :  { %v7766_v44 = vsel %vm7763_vm4, %v7765_v57, %v7761_v34  ;;  %v7575_v23 = vpop.f32.mrf.mxu1  ;;  %v7732_v58 = vadd.f32 1.0, %v9759_v43 }
 0xe8b   :  { %7868 = vrot.lane.b32.xlu1 %v7766_v44, %s9808_s30  ;;  %9760 = vpow2.f32 %v8650_v4  ;;  %v7592_v29 = vadd.f32 %v14722_v50, %v7575_v23 }
 0xe8c   :  { %9762 = vrcp.f32 %v7732_v58  ;;  %v7779_v14 = vand.u32 2147483648, %v7732_v58  ;;  %v7777_v33 = vand.u32 2147483647, %v7732_v58  ;;  %vm7773_vm6 = vweird.f32 %v7732_v58 }
 0xe8e   :  { %v7680_v28 = vpop.f32.mrf.mxu2  ;;  %v7780_v55 = vor.u32 1.1754944e-38, %v7779_v14  ;;  %vm7778_vm9 = vcmp.eq.f32.partialorder %v7777_v33, 8.507059e+37 }
 0xe8f   :  { %v14750_v16 = vadd.f32 %v7680_v28, %v7592_v29 }
 0xe91   :  { %v9761_v37 = vpop.eup %9760  ;;  %v8651_v52 = vmul.f32 -1.442695, %v14750_v16 }
 0xe92   :  { %v9763_v10 = vpop.eup %9762  ;;  %v7733_v27 = vadd.f32 1.0, %v9761_v37  ;;  %v7577_v15 = vpop.f32.mrf.mxu1 }
 0xe93   :  { %9764 = vpow2.f32 %v8651_v52  ;;  %v7769_v51 = vmul.f32 %v9763_v10, %v7732_v58  ;;  %v7593_v6 = vadd.f32 %v14722_v50, %v7577_v15  ;;  %vm7774_vm5 = vweird.f32 %v9763_v10 }
 0xe94   :  { %9766 = vrcp.f32 %v7733_v27  ;;  %vm7775_vm8 = vmor %vm7773_vm6, %vm7774_vm5  ;;  %v7794_v0 = vand.u32 2147483648, %v7733_v27  ;;  %v7792_v1 = vand.u32 2147483647, %v7733_v27  ;;  %vm7788_vm11 = vweird.f32 %v7733_v27 }
 0xe95   :  { %v7770_v39 = vsub.f32 1.0, %v7769_v51 }
 0xe96   :  { %v7682_v36 = vpop.f32.mrf.mxu2  ;;  %v7795_v35 = vor.u32 1.1754944e-38, %v7794_v0  ;;  %vm7793_vm12 = vcmp.eq.f32.partialorder %v7792_v1, 8.507059e+37 }
 0xe97   :  { %v14754_v54 = vadd.f32 %v7682_v36, %v7593_v6  ;;  %v7771_v7 = vmul.f32 %v9763_v10, %v7770_v39 }
 0xe99   :  { %v9765_v12 = vpop.eup %9764  ;;  %v8652_v38 = vmul.f32 -1.442695, %v14754_v54  ;;  %v7772_v59 = vadd.f32 %v9763_v10, %v7771_v7 }
 0xe9a   :  { %v9767_v13 = vpop.eup %9766  ;;  %v7734_v20 = vadd.f32 1.0, %v9765_v12 }
 0xe9b   :  { %9768 = vpow2.f32 %v8652_v38  ;;  %v7776_v56 = vsel %vm7775_vm8, %v9763_v10, %v7772_v59  ;;  %v7784_v22 = vmul.f32 %v9767_v13, %v7733_v27  ;;  %vm7789_vm10 = vweird.f32 %v9767_v13  ;;  %v8751_v10 = vld [vmem:[%s14867_s9 + $0x38] sm:$0xff]  ;;  %v8750_v27 = vld [vmem:[%s14867_s9 + $0x30] sm:$0xff] }
 0xe9c   :  { %9770 = vrcp.f32 %v7734_v20  ;;  %v7781_v21 = vsel %vm7778_vm9, %v7780_v55, %v7776_v56  ;;  %vm7790_vm14 = vmor %vm7788_vm11, %vm7789_vm10  ;;  %v7809_v32 = vand.u32 2147483648, %v7734_v20  ;;  %v7807_v30 = vand.u32 2147483647, %v7734_v20  ;;  %7942 = vmatpush.bf16.msrb.mxu1 %v8751_v10 }
 0xe9d   :  { %7870 = vrot.lane.b32.xlu2 %v7781_v21, %s9808_s30  ;;  %v7785_v18 = vsub.f32 1.0, %v7784_v22  ;;  %vm7803_vm13 = vweird.f32 %v7734_v20 }
 0xe9e   :  { %v7810_v25 = vor.u32 1.1754944e-38, %v7809_v32  ;;  %vm7808_vm0 = vcmp.eq.f32.partialorder %v7807_v30, 8.507059e+37 }
 0xe9f   :  { %v7786_v31 = vmul.f32 %v9767_v13, %v7785_v18 }
 0xea0   :  { %7943 = vmatpush.bf16.msrb.mxu1 %v8750_v27 }
 0xea1   :  { %v9769_v40 = vpop.eup %9768  ;;  %v7787_v46 = vadd.f32 %v9767_v13, %v7786_v31 }
 0xea2   :  { %v9771_v63 = vpop.eup %9770  ;;  %v7735_v49 = vadd.f32 1.0, %v9769_v40 }
 0xea3   :  { %v7791_v42 = vsel %vm7790_vm14, %v9767_v13, %v7787_v46  ;;  %v7799_v45 = vmul.f32 %v9771_v63, %v7734_v20  ;;  %vm7804_vm15 = vweird.f32 %v9771_v63 }
 0xea4   :  { %9772 = vrcp.f32 %v7735_v49  ;;  %v7796_v17 = vsel %vm7793_vm12, %v7795_v35, %v7791_v42  ;;  %vm7805_vm7 = vmor %vm7803_vm13, %vm7804_vm15  ;;  %v7824_v4 = vand.u32 2147483648, %v7735_v49  ;;  %v7822_v58 = vand.u32 2147483647, %v7735_v49 }
 0xea5   :  { %7872 = vrot.lane.b32.xlu0 %v7796_v17, %s9808_s30  ;;  %v7800_v11 = vsub.f32 1.0, %v7799_v45  ;;  %vm7818_vm3 = vweird.f32 %v7735_v49  ;;  %9774 = vtanh.f32 %v14725_v26  ;;  %vm8119_vm13 = vcmask 31744  }
 0xea6   :  { %v7825_v28 = vor.u32 1.1754944e-38, %v7824_v4  ;;  %vm7823_vm5 = vcmp.eq.f32.partialorder %v7822_v58, 8.507059e+37 }
 0xea7   :  { %v7801_v5 = vmul.f32 %v9771_v63, %v7800_v11 }
 0xea9   :  { %v7802_v24 = vadd.f32 %v9771_v63, %v7801_v5 }
 0xeaa   :  { %v9773_v57 = vpop.eup %9772 }
 0xeab   :  { %v7806_v34 = vsel %vm7805_vm7, %v9771_v63, %v7802_v24  ;;  %v7814_v3 = vmul.f32 %v9773_v57, %v7735_v49  ;;  %vm7819_vm1 = vweird.f32 %v9773_v57  ;;  %v9775_v38 = vpop.eup %9774 }
 0xeac   :  { %v7811_v44 = vsel %vm7808_vm0, %v7810_v25, %v7806_v34  ;;  %vm7820_vm4 = vmor %vm7818_vm3, %vm7819_vm1 }
 0xead   :  { %7874 = vrot.lane.b32.xlu1 %v7811_v44, %s9808_s30  ;;  %v7815_v43 = vsub.f32 1.0, %v7814_v3 }
 0xeaf   :  { %v7816_v23 = vmul.f32 %v9773_v57, %v7815_v43 }
 0xeb1   :  { %v7817_v29 = vadd.f32 %v9773_v57, %v7816_v23 }
 0xeb3   :  { %v7821_v37 = vsel %vm7820_vm4, %v9773_v57, %v7817_v29 }
 0xeb4   :  { %v7826_v52 = vsel %vm7823_vm5, %v7825_v28, %v7821_v37 }
 0xeb5   :  { %7876 = vrot.lane.b32.xlu2 %v7826_v52, %s9808_s30  ;;  %v7580_v15 = vpop.f32.mrf.mxu1 }
 0xeb6   :  { %v7594_v51 = vadd.f32 %v14722_v50, %v7580_v15 }
 0xebd   :  { %v7582_v14 = vpop.f32.mrf.mxu1 }
 0xebe   :  { %v7595_v7 = vadd.f32 %v14722_v50, %v7582_v14 }
 0xeed   :  { %v7685_v6 = vpop.f32.mrf.mxu2 }
 0xeee   :  { %v14768_v39 = vadd.f32 %v7685_v6, %v7594_v51  ;;  %v9251_v6 = vld [vmem:[%s14868_s10 + $0x3] ss:$0 sm:$0xff] }
 0xef0   :  { %v8653_v36 = vmul.f32 -1.442695, %v14768_v39 }
 0xef2   :  { %9776 = vpow2.f32 %v8653_v36 }
 0xef3   :  { %9778 = vtanh.f32 %v14735_v60 }
 0xef5   :  { %v7687_v33 = vpop.f32.mrf.mxu2  ;;  %v7867_v59 = vpop.permute.xlu0 %7866 }
 0xef6   :  { %v14774_v12 = vadd.f32 %v7687_v33, %v7595_v7  ;;  %v7890_v21 = vmul.f32 %v9775_v38, %v7867_v59 }
 0xef7   :  { %v7871_v44 = vpop.permute.xlu2 %7870 }
 0xef8   :  { %v9777_v13 = vpop.eup %9776  ;;  %v8654_v20 = vmul.f32 -1.442695, %v14774_v12 }
 0xef9   :  { %v9779_v55 = vpop.eup %9778  ;;  %v7736_v56 = vadd.f32 1.0, %v9777_v13 }
 0xefa   :  { %9780 = vpow2.f32 %v8654_v20 }
 0xefb   :  { %9782 = vrcp.f32 %v7736_v56  ;;  %v7839_v40 = vand.u32 2147483648, %v7736_v56  ;;  %v7837_v63 = vand.u32 2147483647, %v7736_v56  ;;  %vm7833_vm8 = vweird.f32 %v7736_v56 }
 0xefd   :  { %v7869_v22 = vpop.permute.xlu1 %7868  ;;  %v7840_v42 = vor.u32 1.1754944e-38, %v7839_v40  ;;  %vm7838_vm10 = vcmp.eq.f32.partialorder %v7837_v63, 8.507059e+37 }
 0xefe   :  { %v7891_v26 = vmul.f32 %v9779_v55, %v7869_v22 }
 0xf00   :  { %v7903_v18 = vpack.c.bf16 %v7891_v26, %v7890_v21  ;;  %v9781_v60 = vpop.eup %9780 }
 0xf01   :  { %v9783_v50 = vpop.eup %9782  ;;  %v7737_v0 = vadd.f32 1.0, %v9781_v60 }
 0xf02   :  { %8668 = vmatmul.msk.bf16.vlgmr.msrb.gmra.mxu1 %vm278_vm2, %v7903_v18  ;;  %v7829_v31 = vmul.f32 %v9783_v50, %v7736_v56  ;;  %vm7834_vm6 = vweird.f32 %v9783_v50 }
 0xf03   :  { %9784 = vrcp.f32 %v7737_v0  ;;  %vm7835_vm9 = vmor %vm7833_vm8, %vm7834_vm6  ;;  %v7854_v5 = vand.u32 2147483648, %v7737_v0  ;;  %v7852_v24 = vand.u32 2147483647, %v7737_v0  ;;  %vm7848_vm14 = vweird.f32 %v7737_v0 }
 0xf04   :  { %v7830_v1 = vsub.f32 1.0, %v7829_v31  ;;  %9786 = vtanh.f32 %v14740_v8 }
 0xf05   :  { %9788 = vtanh.f32 %v14745_v9  ;;  %v7855_v25 = vor.u32 1.1754944e-38, %v7854_v5  ;;  %vm7853_vm15 = vcmp.eq.f32.partialorder %v7852_v24, 8.507059e+37 }
 0xf06   :  { %v7831_v46 = vmul.f32 %v9783_v50, %v7830_v1  ;;  %9790 = vtanh.f32 %v14750_v16  ;;  %v8753_v16 = vld [vmem:[%s14869_s11 + $0x8] sm:$0xff] }
 0xf07   :  { %9792 = vtanh.f32 %v14754_v54  ;;  %8023 = vmatpush.bf16.msrb.mxu2 %v8753_v16  ;;  %v8752_v54 = vld [vmem:[%s14869_s11] sm:$0xff] }
 0xf08   :  { %v7832_v49 = vadd.f32 %v9783_v50, %v7831_v46  ;;  %9794 = vtanh.f32 %v14768_v39 }
 0xf09   :  { %v9785_v35 = vpop.eup %9784  ;;  %9796 = vtanh.f32 %v14774_v12 }
 0xf0a   :  { %v7836_v45 = vsel %vm7835_vm9, %v9783_v50, %v7832_v49  ;;  %v7844_v17 = vmul.f32 %v9785_v35, %v7737_v0  ;;  %vm7849_vm11 = vweird.f32 %v9785_v35  ;;  %v9787_v43 = vpop.eup %9786 }
 0xf0b   :  { %v7841_v11 = vsel %vm7838_vm10, %v7840_v42, %v7836_v45  ;;  %vm7850_vm12 = vmor %vm7848_vm14, %vm7849_vm11  ;;  %v9789_v4 = vpop.eup %9788  ;;  %v7892_v58 = vmul.f32 %v9787_v43, %v7871_v44  ;;  %8024 = vmatpush.bf16.msrb.mxu2 %v8752_v54 }
 0xf0c   :  { %7878 = vrot.lane.b32.xlu0 %v7841_v11, %s9808_s30  ;;  %v7845_v32 = vsub.f32 1.0, %v7844_v17  ;;  %v9791_v28 = vpop.eup %9790 }
 0xf0d   :  { %v9793_v37 = vpop.eup %9792 }
 0xf0e   :  { %v7846_v30 = vmul.f32 %v9785_v35, %v7845_v32  ;;  %v9795_v59 = vpop.eup %9794 }
 0xf0f   :  { %v7877_v9 = vpop.permute.xlu2 %7876  ;;  %v9797_v13 = vpop.eup %9796 }
 0xf10   :  { %v7847_v57 = vadd.f32 %v9785_v35, %v7846_v30  ;;  %v7895_v10 = vmul.f32 %v9793_v37, %v7877_v9 }
 0xf12   :  { %v7851_v34 = vsel %vm7850_vm12, %v9785_v35, %v7847_v57 }
 0xf13   :  { %v7856_v3 = vsel %vm7853_vm15, %v7855_v25, %v7851_v34 }
 0xf14   :  { %7880 = vrot.lane.b32.xlu1 %v7856_v3, %s9808_s30 }
 0xf17   :  { %v7873_v23 = vpop.permute.xlu0 %7872 }
 0xf18   :  { %v7893_v29 = vmul.f32 %v9789_v4, %v7873_v23 }
 0xf1a   :  { %v7904_v8 = vpack.c.bf16 %v7893_v29, %v7892_v58 }
 0xf1c   :  { %8669 = vmatmul.msk.bf16.gmra.mxu1 %vm278_vm2, %v7904_v8 }
 0xf1f   :  { %v7875_v52 = vpop.permute.xlu1 %7874 }
 0xf20   :  { %v7894_v27 = vmul.f32 %v9791_v28, %v7875_v52 }
 0xf22   :  { %v7905_v15 = vpack.c.bf16 %v7895_v10, %v7894_v27 }
 0xf2c   :  { %8670 = vmatmul.msk.bf16.gmra.mxu1 %vm278_vm2, %v7905_v15 }
 0xf7e   :  { %v7879_v7 = vpop.permute.xlu0 %7878 }
 0xf7f   :  { %v7945_v51 = vpop.f32.mrf.mxu1  ;;  %v7896_v56 = vmul.f32 %v9795_v59, %v7879_v7  ;;  %v9253_v7 = vld [vmem:[%s14872_s14] ss:$0 sm:$0xff] }
 0xf80   :  { %v7946_v36 = vadd.f32 %v9251_v6, %v7945_v51 }
 0xf82   :  { %v7965_v33 = vadd.f32 %v7946_v36, %v14233_v2  ;;  %v8755_v2 = vld [vmem:[%s14870_s13 + $0x8] sm:$0xff] }
 0xf83   :  { %8096 = vmatpush.bf16.msrb.mxu0 %v8755_v2 }
 0xf84   :  { %v7973_v21 = vmax.f32 %v7965_v33, 0.0 }
 0xf86   :  { %v7881_v20 = vpop.permute.xlu1 %7880 }
 0xf87   :  { %v7947_v14 = vpop.f32.mrf.mxu1  ;;  %v7897_v22 = vmul.f32 %v9797_v13, %v7881_v20 }
 0xf88   :  { %v7948_v38 = vadd.f32 %v9251_v6, %v7947_v14 }
 0xf89   :  { %v7906_v18 = vpack.c.bf16 %v7897_v22, %v7896_v56 }
 0xf8a   :  { %v7966_v55 = vadd.f32 %v7948_v38, %v14264_v48 }
 0xf8b   :  { %8671 = vmatmul.msk.bf16.gmra.mxu1 %vm278_vm2, %v7906_v18 }
 0xf8c   :  { %v7974_v26 = vmax.f32 %v7966_v55, 0.0 }
 0xf8e   :  { %v7985_v60 = vpack.c.bf16 %v7974_v26, %v7973_v21 }
 0xf90   :  { %8680 = vmatmul.msk.bf16.vlgmr.msrb.gmra.mxu2 %vm278_vm2, %v7985_v60 }
 0xf99   :  { %v7950_v39 = vpop.f32.mrf.mxu1 }
 0xf9a   :  { %v7951_v12 = vadd.f32 %v9251_v6, %v7950_v39 }
 0xf9c   :  { %v7967_v48 = vadd.f32 %v7951_v12, %v14285_v61  ;;  %v8754_v61 = vld [vmem:[%s14870_s13] sm:$0xff] }
 0xf9d   :  { %8097 = vmatpush.bf16.msrb.mxu0 %v8754_v61 }
 0xf9e   :  { %v7975_v1 = vmax.f32 %v7967_v48, 0.0 }
 0xfa1   :  { %v7952_v50 = vpop.f32.mrf.mxu1 }
 0xfa2   :  { %v7953_v0 = vadd.f32 %v9251_v6, %v7952_v50 }
 0xfa4   :  { %v7968_v31 = vadd.f32 %v7953_v0, %v14300_v62 }
 0xfa6   :  { %v7976_v40 = vmax.f32 %v7968_v31, 0.0 }
 0xfa8   :  { %v7986_v46 = vpack.c.bf16 %v7976_v40, %v7975_v1 }
 0xfa9   :  { %v7955_v63 = vpop.f32.mrf.mxu1 }
 0xfaa   :  { %8681 = vmatmul.msk.bf16.gmra.mxu2 %vm278_vm2, %v7986_v46  ;;  %v7956_v49 = vadd.f32 %v9251_v6, %v7955_v63 }
 0xfac   :  { %v7969_v42 = vadd.f32 %v7956_v49, %v14343_v19 }
 0xfae   :  { %v7977_v11 = vmax.f32 %v7969_v42, 0.0 }
 0xfb1   :  { %v7957_v35 = vpop.f32.mrf.mxu1 }
 0xfb2   :  { %v7958_v45 = vadd.f32 %v9251_v6, %v7957_v35 }
 0xfb4   :  { %v7970_v17 = vadd.f32 %v7958_v45, %v14363_v53  ;;  %v9252_v53 = vld [vmem:[%s14871_s12] ss:$0 sm:$0xff] }
 0xfb6   :  { %v7978_v32 = vmax.f32 %v7970_v17, 0.0 }
 0xfb8   :  { %v7987_v5 = vpack.c.bf16 %v7978_v32, %v7977_v11 }
 0xfba   :  { %8682 = vmatmul.msk.bf16.gmra.mxu2 %vm278_vm2, %v7987_v5 }
0x1008   :  { %v7960_v62 = vpop.f32.mrf.mxu1 }
0x1009   :  { %v7961_v30 = vadd.f32 %v9251_v6, %v7960_v62 }
0x100b   :  { %v7971_v25 = vadd.f32 %v7961_v30, %v14421_v47 }
0x100d   :  { %v7979_v3 = vmax.f32 %v7971_v25, 0.0 }
0x1010   :  { %v7962_v57 = vpop.f32.mrf.mxu1 }
0x1011   :  { %v7963_v19 = vadd.f32 %v9251_v6, %v7962_v57 }
0x1013   :  { %v8026_v24 = vpop.f32.mrf.mxu2  ;;  %v7972_v34 = vadd.f32 %v7963_v19, %v14444_v41 }
0x1014   :  { %v8027_v43 = vadd.f32 %v9252_v53, %v8026_v24 }
0x1015   :  { %v7980_v44 = vmax.f32 %v7972_v34, 0.0 }
0x1016   :  { %v8046_v29 = vmax.f32 %v8027_v43, 0.0 }
0x1017   :  { %v7988_v4 = vpack.c.bf16 %v7980_v44, %v7979_v3 }
0x1019   :  { %8683 = vmatmul.msk.bf16.gmra.mxu2 %vm278_vm2, %v7988_v4 }
0x101b   :  { %v8028_v23 = vpop.f32.mrf.mxu2 }
0x101c   :  { %v8029_v58 = vadd.f32 %v9252_v53, %v8028_v23 }
0x101e   :  { %v8047_v8 = vmax.f32 %v8029_v58, 0.0 }
0x1020   :  { %v8058_v9 = vpack.c.bf16 %v8047_v8, %v8046_v29 }
0x1022   :  { %8692 = vmatmul.msk.bf16.vlgmr.msrb.gmra.mxu0 %vm278_vm2, %v8058_v9 }
0x102d   :  { %v8031_v47 = vpop.f32.mrf.mxu2 }
0x102e   :  { %v8032_v28 = vadd.f32 %v9252_v53, %v8031_v47 }
0x1030   :  { %v8048_v10 = vmax.f32 %v8032_v28, 0.0 }
0x1035   :  { %v8033_v37 = vpop.f32.mrf.mxu2 }
0x1036   :  { %v8034_v52 = vadd.f32 %v9252_v53, %v8033_v37 }
0x1038   :  { %v8049_v27 = vmax.f32 %v8034_v52, 0.0 }
0x103a   :  { %v8059_v41 = vpack.c.bf16 %v8049_v27, %v8048_v10 }
0x103c   :  { %8693 = vmatmul.msk.bf16.gmra.mxu0 %vm278_vm2, %v8059_v41 }
0x103d   :  { %v8036_v15 = vpop.f32.mrf.mxu2 }
0x103e   :  { %v8037_v16 = vadd.f32 %v9252_v53, %v8036_v15 }
0x1040   :  { %v8050_v6 = vmax.f32 %v8037_v16, 0.0 }
0x1045   :  { %v8038_v54 = vpop.f32.mrf.mxu2 }
0x1046   :  { %v8039_v51 = vadd.f32 %v9252_v53, %v8038_v54 }
0x1048   :  { %v8051_v36 = vmax.f32 %v8039_v51, 0.0 }
0x104a   :  { %v8060_v14 = vpack.c.bf16 %v8051_v36, %v8050_v6 }
0x104c   :  { %8694 = vmatmul.msk.bf16.gmra.mxu0 %vm278_vm2, %v8060_v14 }
0x109c   :  { %v8041_v38 = vpop.f32.mrf.mxu2 }
0x109d   :  { %v8042_v13 = vadd.f32 %v9252_v53, %v8041_v38 }
0x109f   :  { %v8099_v33 = vpop.f32.mrf.mxu0  ;;  %v8052_v21 = vmax.f32 %v8042_v13, 0.0 }
0x10a0   :  { %v8100_v59 = vadd.f32 %v9253_v7, %v8099_v33 }
0x10a2   :  { %8120 = vst.msk [vmem:[%s14873_s15] sm:$0xff] %vm8119_vm13, %v8100_v59 }
0x10a4   :  { %v8043_v55 = vpop.f32.mrf.mxu2 }
0x10a5   :  { %v8044_v22 = vadd.f32 %v9252_v53, %v8043_v55 }
0x10a7   :  { %v8101_v20 = vpop.f32.mrf.mxu0  ;;  %v8053_v26 = vmax.f32 %v8044_v22, 0.0 }
0x10a8   :  { %v8102_v56 = vadd.f32 %v9253_v7, %v8101_v20 }
0x10a9   :  { %v8061_v18 = vpack.c.bf16 %v8053_v26, %v8052_v21 }
0x10aa   :  { %8121 = vst.msk [vmem:[%s14873_s15 + $0x8] sm:$0xff] %vm8119_vm13, %v8102_v56 }
0x10ab   :  { %8695 = vmatmul.msk.bf16.gmra.mxu0 %vm278_vm2, %v8061_v18 }
0x10b9   :  { %v8104_v60 = vpop.f32.mrf.mxu0 }
0x10ba   :  { %v8105_v39 = vadd.f32 %v9253_v7, %v8104_v60 }
0x10bc   :  { %8122 = vst.msk [vmem:[%s14873_s15 + $0x10] sm:$0xff] %vm8119_vm13, %v8105_v39 }
0x10c1   :  { %v8106_v2 = vpop.f32.mrf.mxu0 }
0x10c2   :  { %v8107_v12 = vadd.f32 %v9253_v7, %v8106_v2 }
0x10c4   :  { %8123 = vst.msk [vmem:[%s14873_s15 + $0x18] sm:$0xff] %vm8119_vm13, %v8107_v12 }
0x10c9   :  { %v8109_v50 = vpop.f32.mrf.mxu0 }
0x10ca   :  { %v8110_v48 = vadd.f32 %v9253_v7, %v8109_v50 }
0x10cc   :  { %8124 = vst.msk [vmem:[%s14873_s15 + $0x20] sm:$0xff] %vm8119_vm13, %v8110_v48 }
0x10d1   :  { %v8111_v0 = vpop.f32.mrf.mxu0 }
0x10d2   :  { %v8112_v31 = vadd.f32 %v9253_v7, %v8111_v0 }
0x10d4   :  { %8125 = vst.msk [vmem:[%s14873_s15 + $0x28] sm:$0xff] %vm8119_vm13, %v8112_v31 }
0x1128   :  { %v8114_v1 = vpop.f32.mrf.mxu0 }
0x1129   :  { %v8115_v40 = vadd.f32 %v9253_v7, %v8114_v1 }
0x112b   :  { %8126 = vst.msk [vmem:[%s14873_s15 + $0x30] sm:$0xff] %vm8119_vm13, %v8115_v40 }
0x1130   :  { %v8116_v46 = vpop.f32.mrf.mxu0 }
0x1131   :  { %v8117_v63 = vadd.f32 %v9253_v7, %v8116_v46 }
0x1133   :  { %8127 = vst.msk [vmem:[%s14873_s15 + $0x38] sm:$0xff] %vm8119_vm13, %v8117_v63 }

</bundles_post_ra>
